<compile_context>
chip_gen: v6e
topology: v6e:2x2x1
jax: 0.10.0
libtpu: 0.0.40
codegen_flags: <defaults>
</compile_context>

<pallas_src>
import functools

import jax
import jax.numpy as jnp
from jax.experimental import pallas as pl
from jax.experimental.pallas import tpu as pltpu

_ON_TPU = jax.default_backend() == "tpu"
# bf16 MXU operands on real TPUs; the CPU interpreter cannot execute bf16 dots.
_MXU_DTYPE = jnp.bfloat16 if _ON_TPU else jnp.float32
_NEG = -1e30  # additive mask value (representable in bf16)


def _vmem_limit_bytes():
    """Generation-aware scoped-VMEM limit: ~75% of physical (96 MiB v5e/v6e, 48 MiB v7x)."""
    if not _ON_TPU:
        return 64 * 1024 * 1024
    try:
        cap = int(pltpu.get_tpu_info().vmem_capacity_bytes)
        if cap <= 0:
            raise ValueError
    except Exception:
        cap = 64 * 1024 * 1024
    return cap * 3 // 4


def _compiler_params(vmem_bytes):
    return pltpu.CompilerParams(
        dimension_semantics=("parallel",),
        vmem_limit_bytes=vmem_bytes,
    )


def _recip(x):
    # EUP approx reciprocal on TPU; plain divide under the CPU interpreter.
    return pl.reciprocal(x, approx=True) if _ON_TPU else 1.0 / x


def _full_spec(shape):
    nd = len(shape)
    return pl.BlockSpec(shape, lambda i, _nd=nd: (0,) * _nd)


def _pick_tile(total, target, align=128):
    """Largest lane-aligned tile <= target dividing `total` (else the full extent).
    TODO(synk): pad N/E to a tile multiple instead of full-residency fallback."""
    if total <= target:
        return total
    t = (min(target, total) // align) * align
    while t >= align:
        if total % t == 0:
            return t
        t -= align
    return total


def _default_row_tile(n, heads, vmem_bytes):
    # Sized from the in-kernel [H, N, TN] f32 softmax temporaries (~4 live copies)
    # plus the double-buffered bf16 adjacency-bias column stream.
    per_col = 4 * heads * n * 4 + 2 * n * 2
    tgt = max(128, min(512, (vmem_bytes // 2) // max(per_col, 1)))
    return _pick_tile(n, tgt)


def _default_edge_tile(e, n, vmem_bytes):
    # One-hot gather temporaries are [N, TE]: two one-hots + an int32 iota per tile.
    itemsize = jnp.dtype(_MXU_DTYPE).itemsize
    per_col = n * (2 * itemsize + 4) + 3 * 128 * 4
    tgt = max(128, min(1024, (vmem_bytes // 2) // max(per_col, 1)))
    return _pick_tile(e, tgt)


# ----------------------------- GAT layer kernel -----------------------------
def gat_attn_kernel(ht_ref, asrc_ref, adst_ref, adjb_ref, bias_ref, o_ref, *,
                    heads, c_out, concat):
    # Transposed layout: sources on sublanes, destination tile (TN) on lanes.
    a_src = asrc_ref[...]                                   # [H, N]
    a_dst = adst_ref[...]                                   # [H, TN]
    e = a_src[:, :, None] + a_dst[:, None, :]               # [H, N, TN]
    e = jnp.maximum(e, 0.2 * e)                             # leaky_relu(0.2)
    e = e + adjb_ref[...].astype(jnp.float32)[None, :, :]   # additive mask (0 / -1e30)
    e = e - jnp.max(e, axis=1, keepdims=True)               # softmax over sources
    p = jnp.exp(e)                                          # masked entries underflow to 0
    denom = jnp.sum(p, axis=1, keepdims=True)               # [H, 1, TN]; self-loops => > 0
    p_c = p.astype(ht_ref.dtype)
    h_t = ht_ref[...]                                       # [H*C, N]

    outs = []
    for hd in range(heads):
        # Lane-dense MXU shape: [C, N] @ [N, TN] -> [C, TN]; normalization is folded
        # in afterwards (f32), so alpha is never materialized.
        acc = jnp.dot(h_t[hd * c_out:(hd + 1) * c_out, :], p_c[hd],
                      preferred_element_type=jnp.float32)
        outs.append(acc * _recip(denom[hd]))
    if concat:
        out = jnp.concatenate(outs, axis=0)                 # [H*C, TN]
    else:
        out = outs[0]
        for t in outs[1:]:
            out = out + t
        out = out * (1.0 / float(heads))                    # mean over heads
    out = out + bias_ref[...]                               # [out_dim, 1] broadcast
    # ELU with overflow-safe untaken branch.
    o_ref[...] = jnp.where(out > 0, out, jnp.exp(jnp.minimum(out, 0.0)) - 1.0)


def gat_layer_t(h_t, att_src_mat, att_dst_mat, bias, adj_bias_t, *,
                heads, c_out, concat, row_tile=None):
    """h_t: [H*C, N] f32 pre-projected node features (transposed).
    Returns elu(GATConv(h)) transposed: [out_dim, N] f32."""
    hc, n = h_t.shape
    assert hc == heads * c_out
    out_dim = heads * c_out if concat else c_out
    vmem = _vmem_limit_bytes()
    tn = _default_row_tile(n, heads, vmem) if row_tile is None else row_tile
    assert n % tn == 0

    # Hoisted once per layer (tiny XLA matmuls): attention-logit tables.
    a_src_t = att_src_mat.T @ h_t                            # [H, N]
    a_dst_t = att_dst_mat.T @ h_t                            # [H, N]
    bias_t = bias.T                                          # [out_dim, 1]

    kern = functools.partial(gat_attn_kernel, heads=heads, c_out=c_out, concat=concat)
    return pl.pallas_call(
        kern,
        out_shape=jax.ShapeDtypeStruct((out_dim, n), jnp.float32),
        grid=(n // tn,),
        in_specs=[
            _full_spec((hc, n)),                              # h_t (resident)
            _full_spec((heads, n)),                           # a_src_t (resident)
            pl.BlockSpec((heads, tn), lambda i: (0, i)),      # a_dst_t column tile
            pl.BlockSpec((n, tn), lambda i: (0, i)),          # adjacency-bias column tile
            _full_spec((out_dim, 1)),                         # bias_t
        ],
        out_specs=pl.BlockSpec((out_dim, tn), lambda i: (0, i)),
        compiler_params=_compiler_params(vmem),
    )(h_t.astype(_MXU_DTYPE), a_src_t, a_dst_t, adj_bias_t, bias_t)


# --------------------- edge-MLP + log_softmax kernel -------------------------
def edge_head_kernel(ts_ref, td_ref, w1e_ref, b1_ref, w2_ref, b2_ref,
                     src_ref, dst_ref, ea_ref, o_ref):
    n_nodes = ts_ref.shape[1]
    te = src_ref.shape[1]
    cdt = ts_ref.dtype
    # In-VMEM one-hot gather (no [E, N] HBM traffic); edges on lanes.
    row = jax.lax.broadcasted_iota(jnp.int32, (n_nodes, te), 0)
    soh = (row == src_ref[...]).astype(cdt)                  # [N, TE]
    doh = (row == dst_ref[...]).astype(cdt)                  # [N, TE]
    h1 = (jnp.dot(ts_ref[...], soh, preferred_element_type=jnp.float32)
          + jnp.dot(td_ref[...], doh, preferred_element_type=jnp.float32)
          + jnp.dot(w1e_ref[...], ea_ref[...].astype(cdt),
                    preferred_element_type=jnp.float32)
          + b1_ref[...])                                     # [128, TE]
    h1 = jnp.maximum(h1, 0.0)                                # ReLU
    logits = jnp.dot(w2_ref[...], h1.astype(cdt),
                     preferred_element_type=jnp.float32) + b2_ref[...]   # [2, TE]
    # exact log-sum-exp over the class axis (sublanes)
    m = jnp.max(logits, axis=0, keepdims=True)
    lse = m + jnp.log(jnp.sum(jnp.exp(logits - m), axis=0, keepdims=True))
    o_ref[...] = logits - lse                                # log_softmax, lane-dense store


def edge_head(ts_t, td_t, w1_e, b1, w2, b2, src, dst, edge_attr, *, edge_tile=None):
    """ts_t/td_t: [128, N] node tables (already lin+W1-projected). Returns [E, 2]."""
    e, edge_ch = edge_attr.shape
    n = ts_t.shape[1]
    vmem = _vmem_limit_bytes()
    te = _default_edge_tile(e, n, vmem) if edge_tile is None else edge_tile
    assert e % te == 0

    out_t = pl.pallas_call(
        edge_head_kernel,
        out_shape=jax.ShapeDtypeStruct((2, e), jnp.float32),
        grid=(e // te,),
        in_specs=[
            _full_spec(ts_t.shape),                           # [128, N]
            _full_spec(td_t.shape),                           # [128, N]
            _full_spec((128, edge_ch)),                       # W1_edge^T
            _full_spec((128, 1)),                             # b1^T
            _full_spec((2, 128)),                             # W2^T
            _full_spec((2, 1)),                               # b2^T
            pl.BlockSpec((1, te), lambda i: (0, i)),          # src ids (row)
            pl.BlockSpec((1, te), lambda i: (0, i)),          # dst ids (row)
            pl.BlockSpec((edge_ch, te), lambda i: (0, i)),    # edge_attr^T column tile
        ],
        out_specs=pl.BlockSpec((2, te), lambda i: (0, i)),
        compiler_params=_compiler_params(vmem),
    )(ts_t.astype(_MXU_DTYPE), td_t.astype(_MXU_DTYPE),
      w1_e.T.astype(_MXU_DTYPE), b1.T, w2.T.astype(_MXU_DTYPE), b2.T,
      src.reshape(1, e).astype(jnp.int32), dst.reshape(1, e).astype(jnp.int32),
      edge_attr.T)
    return out_t.T


# --------------------------------- glue --------------------------------------
def att_to_mat(att):
    """[H, C] attention vector -> block-diagonal [H*C, H] so a = h @ mat."""
    h, c = att.shape
    m = jnp.zeros((h * c, h), jnp.float32)
    for i in range(h):
        m = m.at[i * c:(i + 1) * c, i].set(att[i])
    return m


def init_params(key, in_ch, edge_ch, out_ch):
    ks = jax.random.split(key, 14)
    s = 0.1
    return {
        "gat1_w": jax.random.normal(ks[0], (in_ch, 8 * 8), jnp.float32) * s,
        "gat1_att_src": jax.random.normal(ks[1], (8, 8), jnp.float32) * s,
        "gat1_att_dst": jax.random.normal(ks[2], (8, 8), jnp.float32) * s,
        "gat1_b": jax.random.normal(ks[3], (1, 64), jnp.float32) * s,
        "gat2_w": jax.random.normal(ks[4], (64, out_ch), jnp.float32) * s,
        "gat2_att_src": jax.random.normal(ks[5], (1, out_ch), jnp.float32) * s,
        "gat2_att_dst": jax.random.normal(ks[6], (1, out_ch), jnp.float32) * s,
        "gat2_b": jax.random.normal(ks[7], (1, out_ch), jnp.float32) * s,
        "lin_w": jax.random.normal(ks[8], (out_ch, out_ch), jnp.float32) * s,
        "lin_b": jax.random.normal(ks[9], (1, out_ch), jnp.float32) * s,
        "mlp_w1": jax.random.normal(ks[10], (2 * out_ch + edge_ch, 128), jnp.float32) * s,
        "mlp_b1": jax.random.normal(ks[11], (1, 128), jnp.float32) * s,
        "mlp_w2": jax.random.normal(ks[12], (128, 2), jnp.float32) * s,
        "mlp_b2": jax.random.normal(ks[13], (1, 2), jnp.float32) * s,
    }


def edge_gat_forward(params, x, edge_index, edge_attr, out_ch, *,
                     row_tile=None, edge_tile=None):
    n = x.shape[0]
    src, dst = edge_index[0], edge_index[1]

    # Additive attention-mask bias: 0 where edge src->dst or self-loop exists
    # (PyG add_self_loops=True), -1e30 elsewhere; transposed [N_src, N_dst], bf16.
    # NOTE: duplicate edges collapse to a single entry (differs from PyG only if
    # the edge list contains multi-edges).
    adj_t = jnp.zeros((n, n), jnp.float32).at[src, dst].set(1.0)
    adj_t = adj_t.at[jnp.arange(n), jnp.arange(n)].set(1.0)
    adj_bias_t = jnp.where(adj_t > 0, 0.0, _NEG).astype(jnp.bfloat16)

    a1s, a1d = att_to_mat(params["gat1_att_src"]), att_to_mat(params["gat1_att_dst"])
    a2s, a2d = att_to_mat(params["gat2_att_src"]), att_to_mat(params["gat2_att_dst"])

    # Hoisted projections: one tiny XLA matmul per layer, everything kept transposed
    # ([features, N]) so kernel inputs/outputs stay lane-dense.
    h1_t = params["gat1_w"].T @ x.T                            # [64, N]
    x1_t = gat_layer_t(h1_t, a1s, a1d, params["gat1_b"], adj_bias_t,
                       heads=8, c_out=8, concat=True, row_tile=row_tile)
    h2_t = params["gat2_w"].T @ x1_t                           # [out_ch, N]
    x2_t = gat_layer_t(h2_t, a2s, a2d, params["gat2_b"], adj_bias_t,
                       heads=1, c_out=out_ch, concat=False, row_tile=row_tile)

    # lin(x) and the reassociated per-node 128-wide MLP tables, hoisted out of the
    # per-tile edge kernel.
    x3_t = params["lin_w"].T @ x2_t + params["lin_b"].T        # [out_ch, N]
    w1 = params["mlp_w1"]
    w1_src, w1_dst, w1_e = w1[:out_ch], w1[out_ch:2 * out_ch], w1[2 * out_ch:]
    ts_t = w1_src.T @ x3_t                                     # [128, N]
    td_t = w1_dst.T @ x3_t                                     # [128, N]

    return edge_head(ts_t, td_t, w1_e, params["mlp_b1"], params["mlp_w2"],
                     params["mlp_b2"], src, dst, edge_attr, edge_tile=edge_tile)


# ------------------------- pure-JAX reference (PyG math) ---------------------
def reference_forward(params, x, edge_index, edge_attr, out_ch):
    n = x.shape[0]
    src, dst = edge_index[0], edge_index[1]
    loop = jnp.arange(n, dtype=src.dtype)
    s_all = jnp.concatenate([src, loop])
    d_all = jnp.concatenate([dst, loop])

    def gat(xin, w, att_s, att_d, b, heads, c, concat):
        h = xin @ w
        hh = h.reshape(n, heads, c)
        a_s = (hh * att_s[None]).sum(-1)
        a_d = (hh * att_d[None]).sum(-1)
        e = a_s[s_all] + a_d[d_all]
        e = jnp.where(e > 0, e, 0.2 * e)
        e_max = jax.ops.segment_max(e, d_all, num_segments=n)
        p = jnp.exp(e - e_max[d_all])
        denom = jax.ops.segment_sum(p, d_all, num_segments=n)
        alpha = p / denom[d_all]
        msg = hh[s_all] * alpha[:, :, None]
        out = jax.ops.segment_sum(msg, d_all, num_segments=n)
        out = out.reshape(n, heads * c) if concat else out.mean(axis=1)
        out = out + b[0]
        return jnp.where(out > 0, out, jnp.exp(jnp.minimum(out, 0.0)) - 1.0)

    x1 = gat(x, params["gat1_w"], params["gat1_att_src"], params["gat1_att_dst"],
             params["gat1_b"], 8, 8, True)
    x2 = gat(x1, params["gat2_w"], params["gat2_att_src"], params["gat2_att_dst"],
             params["gat2_b"], 1, out_ch, False)
    x3 = x2 @ params["lin_w"] + params["lin_b"][0]
    ef = jnp.concatenate([x3[src], x3[dst], edge_attr], axis=1)
    h1 = jnp.maximum(ef @ params["mlp_w1"] + params["mlp_b1"][0], 0.0)
    logits = h1 @ params["mlp_w2"] + params["mlp_b2"][0]
    return jax.nn.log_softmax(logits, axis=1)


if __name__ == "__main__":
    N, E = 256, 512            # lane-aligned so the demo exercises 2-step grids
    in_ch, edge_ch, out_ch = 4, 4, 8

    key = jax.random.PRNGKey(0)
    kx, ke, kp, kidx = jax.random.split(key, 4)
    x = jax.random.normal(kx, (N, in_ch), jnp.float32)
    edge_attr = jax.random.normal(ke, (E, edge_ch), jnp.float32)

    # unique off-diagonal (src, dst) pairs -> no multi-edges / pre-existing self loops
    perm = jax.random.permutation(kidx, N * (N - 1))[:E]
    src = (perm // (N - 1)).astype(jnp.int32)
    jr = (perm % (N - 1)).astype(jnp.int32)
    dst = (jr + (jr >= src).astype(jnp.int32)).astype(jnp.int32)
    edge_index = jnp.stack([src, dst])                     # [2, E]

    params = init_params(kp, in_ch, edge_ch, out_ch)

    # explicit tiles -> 2 destination tiles and 2 edge tiles (both 128-lane aligned)
    out = edge_gat_forward(params, x, edge_index, edge_attr, out_ch,
                           row_tile=128, edge_tile=256)
    out = jax.block_until_ready(out)

    assert out.shape == (E, 2)
    assert bool(jnp.all(jnp.isfinite(out)))
    # rows of a log_softmax must exponentiate-sum to 1 (lse is exact fp32 in-kernel)
    assert bool(jnp.allclose(jnp.sum(jnp.exp(out), axis=1), 1.0, atol=1e-4))
    # check against a pure-JAX fp32 reference of the same (PyG) semantics.
    # Tolerance accounts for bf16 MXU inputs + approx reciprocal on real TPUs.
    ref = jax.block_until_ready(reference_forward(params, x, edge_index, edge_attr, out_ch))
    assert bool(jnp.allclose(out, ref, atol=3e-2, rtol=3e-2)), "mismatch vs reference"

    print("KERNEL_OK")
</pallas_src>

<mosaic_0001>
module attributes {stable_mosaic.version = 11 : i64} {
  func.func @gat_attn_kernel(%arg0: i32, %arg1: memref<64x256xf32, #tpu.memory_space<vmem>>, %arg2: memref<8x256xf32, #tpu.memory_space<vmem>>, %arg3: memref<8x128xf32, #tpu.memory_space<vmem>>, %arg4: memref<256x128xbf16, #tpu.memory_space<vmem>>, %arg5: memref<64x1xf32, #tpu.memory_space<vmem>>, %arg6: memref<64x128xf32, #tpu.memory_space<vmem>>) attributes {dimension_semantics = [#tpu.dimension_semantics<parallel>], iteration_bounds = array<i64: 2>, scalar_prefetch = 0 : i64, scratch_operands = 0 : i64, tpu.core_type = #tpu.core_type<tc>, window_params = [{pipeline_mode = #tpu.pipeline_mode<synchronous>, transform_indices = @transform_0, window_bounds = array<i64: 64, 256>}, {pipeline_mode = #tpu.pipeline_mode<synchronous>, transform_indices = @transform_1, window_bounds = array<i64: 8, 256>}, {transform_indices = @transform_2, window_bounds = array<i64: 8, 128>}, {transform_indices = @transform_3, window_bounds = array<i64: 256, 128>}, {pipeline_mode = #tpu.pipeline_mode<synchronous>, transform_indices = @transform_4, window_bounds = array<i64: 64, 1>}, {transform_indices = @transform_5, window_bounds = array<i64: 64, 128>}]} {
    %c0 = arith.constant 0 : index
    %c0_0 = arith.constant 0 : index
    %0 = vector.load %arg2[%c0, %c0_0] : memref<8x256xf32, #tpu.memory_space<vmem>>, vector<8x256xf32>
    %c0_1 = arith.constant 0 : index
    %c0_2 = arith.constant 0 : index
    %1 = vector.load %arg3[%c0_1, %c0_2] : memref<8x128xf32, #tpu.memory_space<vmem>>, vector<8x128xf32>
    %2 = vector.shape_cast %0 : vector<8x256xf32> to vector<8x256x1xf32>
    %3 = vector.shape_cast %1 : vector<8x128xf32> to vector<8x1x128xf32>
    %4 = vector.broadcast %2 : vector<8x256x1xf32> to vector<8x256x128xf32>
    %5 = vector.broadcast %3 : vector<8x1x128xf32> to vector<8x256x128xf32>
    %6 = arith.addf %4, %5 : vector<8x256x128xf32>
    %cst = arith.constant 2.000000e-01 : f32
    %7 = vector.broadcast %cst : f32 to vector<8x256x128xf32>
    %8 = arith.mulf %7, %6 : vector<8x256x128xf32>
    %9 = arith.maximumf %6, %8 : vector<8x256x128xf32>
    %c0_3 = arith.constant 0 : index
    %c0_4 = arith.constant 0 : index
    %10 = vector.load %arg4[%c0_3, %c0_4] : memref<256x128xbf16, #tpu.memory_space<vmem>>, vector<256x128xbf16>
    %11 = arith.extf %10 : vector<256x128xbf16> to vector<256x128xf32>
    %12 = vector.shape_cast %11 : vector<256x128xf32> to vector<1x256x128xf32>
    %13 = vector.broadcast %12 : vector<1x256x128xf32> to vector<8x256x128xf32>
    %14 = arith.addf %9, %13 : vector<8x256x128xf32>
    %cst_5 = arith.constant dense<0xFF800000> : vector<8x128xf32>
    %15 = vector.multi_reduction <maximumf>, %14, %cst_5 [1] : vector<8x256x128xf32> to vector<8x128xf32>
    %16 = vector.shape_cast %15 : vector<8x128xf32> to vector<8x1x128xf32>
    %17 = vector.broadcast %16 : vector<8x1x128xf32> to vector<8x256x128xf32>
    %18 = arith.subf %14, %17 : vector<8x256x128xf32>
    %19 = math.exp %18 : vector<8x256x128xf32>
    %cst_6 = arith.constant dense<0.000000e+00> : vector<8x128xf32>
    %20 = vector.multi_reduction <add>, %19, %cst_6 [1] : vector<8x256x128xf32> to vector<8x128xf32>
    %21 = vector.shape_cast %20 : vector<8x128xf32> to vector<8x1x128xf32>
    %c0_7 = arith.constant 0 : index
    %c0_8 = arith.constant 0 : index
    %22 = vector.load %arg1[%c0_7, %c0_8] : memref<64x256xf32, #tpu.memory_space<vmem>>, vector<64x256xf32>
    %23 = vector.extract_strided_slice %22 {offsets = [0, 0], sizes = [8, 256], strides = [1, 1]} : vector<64x256xf32> to vector<8x256xf32>
    %24 = vector.extract_strided_slice %19 {offsets = [0, 0, 0], sizes = [1, 256, 128], strides = [1, 1, 1]} : vector<8x256x128xf32> to vector<1x256x128xf32>
    %25 = vector.shape_cast %24 : vector<1x256x128xf32> to vector<256x128xf32>
    %cst_9 = arith.constant dense<0.000000e+00> : vector<8x128xf32>
    %26 = tpu.matmul %23, %25, %cst_9 {dimension_numbers = #tpu.dot_dimension_numbers<[1], [0], [0], [1], [0, 0, 1, 1], [], []>} : vector<8x256xf32>, vector<256x128xf32>, vector<8x128xf32> -> vector<8x128xf32>
    %27 = vector.extract_strided_slice %21 {offsets = [0, 0, 0], sizes = [1, 1, 128], strides = [1, 1, 1]} : vector<8x1x128xf32> to vector<1x1x128xf32>
    %28 = vector.shape_cast %27 : vector<1x1x128xf32> to vector<1x128xf32>
    %cst_10 = arith.constant 1.000000e+00 : f32
    %29 = vector.broadcast %cst_10 : f32 to vector<1x128xf32>
    %30 = arith.divf %29, %28 : vector<1x128xf32>
    %31 = vector.broadcast %30 : vector<1x128xf32> to vector<8x128xf32>
    %32 = arith.mulf %26, %31 : vector<8x128xf32>
    %33 = vector.extract_strided_slice %22 {offsets = [8, 0], sizes = [8, 256], strides = [1, 1]} : vector<64x256xf32> to vector<8x256xf32>
    %34 = vector.extract_strided_slice %19 {offsets = [1, 0, 0], sizes = [1, 256, 128], strides = [1, 1, 1]} : vector<8x256x128xf32> to vector<1x256x128xf32>
    %35 = vector.shape_cast %34 : vector<1x256x128xf32> to vector<256x128xf32>
    %cst_11 = arith.constant dense<0.000000e+00> : vector<8x128xf32>
    %36 = tpu.matmul %33, %35, %cst_11 {dimension_numbers = #tpu.dot_dimension_numbers<[1], [0], [0], [1], [0, 0, 1, 1], [], []>} : vector<8x256xf32>, vector<256x128xf32>, vector<8x128xf32> -> vector<8x128xf32>
    %37 = vector.extract_strided_slice %21 {offsets = [1, 0, 0], sizes = [1, 1, 128], strides = [1, 1, 1]} : vector<8x1x128xf32> to vector<1x1x128xf32>
    %38 = vector.shape_cast %37 : vector<1x1x128xf32> to vector<1x128xf32>
    %cst_12 = arith.constant 1.000000e+00 : f32
    %39 = vector.broadcast %cst_12 : f32 to vector<1x128xf32>
    %40 = arith.divf %39, %38 : vector<1x128xf32>
    %41 = vector.broadcast %40 : vector<1x128xf32> to vector<8x128xf32>
    %42 = arith.mulf %36, %41 : vector<8x128xf32>
    %43 = vector.extract_strided_slice %22 {offsets = [16, 0], sizes = [8, 256], strides = [1, 1]} : vector<64x256xf32> to vector<8x256xf32>
    %44 = vector.extract_strided_slice %19 {offsets = [2, 0, 0], sizes = [1, 256, 128], strides = [1, 1, 1]} : vector<8x256x128xf32> to vector<1x256x128xf32>
    %45 = vector.shape_cast %44 : vector<1x256x128xf32> to vector<256x128xf32>
    %cst_13 = arith.constant dense<0.000000e+00> : vector<8x128xf32>
    %46 = tpu.matmul %43, %45, %cst_13 {dimension_numbers = #tpu.dot_dimension_numbers<[1], [0], [0], [1], [0, 0, 1, 1], [], []>} : vector<8x256xf32>, vector<256x128xf32>, vector<8x128xf32> -> vector<8x128xf32>
    %47 = vector.extract_strided_slice %21 {offsets = [2, 0, 0], sizes = [1, 1, 128], strides = [1, 1, 1]} : vector<8x1x128xf32> to vector<1x1x128xf32>
    %48 = vector.shape_cast %47 : vector<1x1x128xf32> to vector<1x128xf32>
    %cst_14 = arith.constant 1.000000e+00 : f32
    %49 = vector.broadcast %cst_14 : f32 to vector<1x128xf32>
    %50 = arith.divf %49, %48 : vector<1x128xf32>
    %51 = vector.broadcast %50 : vector<1x128xf32> to vector<8x128xf32>
    %52 = arith.mulf %46, %51 : vector<8x128xf32>
    %53 = vector.extract_strided_slice %22 {offsets = [24, 0], sizes = [8, 256], strides = [1, 1]} : vector<64x256xf32> to vector<8x256xf32>
    %54 = vector.extract_strided_slice %19 {offsets = [3, 0, 0], sizes = [1, 256, 128], strides = [1, 1, 1]} : vector<8x256x128xf32> to vector<1x256x128xf32>
    %55 = vector.shape_cast %54 : vector<1x256x128xf32> to vector<256x128xf32>
    %cst_15 = arith.constant dense<0.000000e+00> : vector<8x128xf32>
    %56 = tpu.matmul %53, %55, %cst_15 {dimension_numbers = #tpu.dot_dimension_numbers<[1], [0], [0], [1], [0, 0, 1, 1], [], []>} : vector<8x256xf32>, vector<256x128xf32>, vector<8x128xf32> -> vector<8x128xf32>
    %57 = vector.extract_strided_slice %21 {offsets = [3, 0, 0], sizes = [1, 1, 128], strides = [1, 1, 1]} : vector<8x1x128xf32> to vector<1x1x128xf32>
    %58 = vector.shape_cast %57 : vector<1x1x128xf32> to vector<1x128xf32>
    %cst_16 = arith.constant 1.000000e+00 : f32
    %59 = vector.broadcast %cst_16 : f32 to vector<1x128xf32>
    %60 = arith.divf %59, %58 : vector<1x128xf32>
    %61 = vector.broadcast %60 : vector<1x128xf32> to vector<8x128xf32>
    %62 = arith.mulf %56, %61 : vector<8x128xf32>
    %63 = vector.extract_strided_slice %22 {offsets = [32, 0], sizes = [8, 256], strides = [1, 1]} : vector<64x256xf32> to vector<8x256xf32>
    %64 = vector.extract_strided_slice %19 {offsets = [4, 0, 0], sizes = [1, 256, 128], strides = [1, 1, 1]} : vector<8x256x128xf32> to vector<1x256x128xf32>
    %65 = vector.shape_cast %64 : vector<1x256x128xf32> to vector<256x128xf32>
    %cst_17 = arith.constant dense<0.000000e+00> : vector<8x128xf32>
    %66 = tpu.matmul %63, %65, %cst_17 {dimension_numbers = #tpu.dot_dimension_numbers<[1], [0], [0], [1], [0, 0, 1, 1], [], []>} : vector<8x256xf32>, vector<256x128xf32>, vector<8x128xf32> -> vector<8x128xf32>
    %67 = vector.extract_strided_slice %21 {offsets = [4, 0, 0], sizes = [1, 1, 128], strides = [1, 1, 1]} : vector<8x1x128xf32> to vector<1x1x128xf32>
    %68 = vector.shape_cast %67 : vector<1x1x128xf32> to vector<1x128xf32>
    %cst_18 = arith.constant 1.000000e+00 : f32
    %69 = vector.broadcast %cst_18 : f32 to vector<1x128xf32>
    %70 = arith.divf %69, %68 : vector<1x128xf32>
    %71 = vector.broadcast %70 : vector<1x128xf32> to vector<8x128xf32>
    %72 = arith.mulf %66, %71 : vector<8x128xf32>
    %73 = vector.extract_strided_slice %22 {offsets = [40, 0], sizes = [8, 256], strides = [1, 1]} : vector<64x256xf32> to vector<8x256xf32>
    %74 = vector.extract_strided_slice %19 {offsets = [5, 0, 0], sizes = [1, 256, 128], strides = [1, 1, 1]} : vector<8x256x128xf32> to vector<1x256x128xf32>
    %75 = vector.shape_cast %74 : vector<1x256x128xf32> to vector<256x128xf32>
    %cst_19 = arith.constant dense<0.000000e+00> : vector<8x128xf32>
    %76 = tpu.matmul %73, %75, %cst_19 {dimension_numbers = #tpu.dot_dimension_numbers<[1], [0], [0], [1], [0, 0, 1, 1], [], []>} : vector<8x256xf32>, vector<256x128xf32>, vector<8x128xf32> -> vector<8x128xf32>
    %77 = vector.extract_strided_slice %21 {offsets = [5, 0, 0], sizes = [1, 1, 128], strides = [1, 1, 1]} : vector<8x1x128xf32> to vector<1x1x128xf32>
    %78 = vector.shape_cast %77 : vector<1x1x128xf32> to vector<1x128xf32>
    %cst_20 = arith.constant 1.000000e+00 : f32
    %79 = vector.broadcast %cst_20 : f32 to vector<1x128xf32>
    %80 = arith.divf %79, %78 : vector<1x128xf32>
    %81 = vector.broadcast %80 : vector<1x128xf32> to vector<8x128xf32>
    %82 = arith.mulf %76, %81 : vector<8x128xf32>
    %83 = vector.extract_strided_slice %22 {offsets = [48, 0], sizes = [8, 256], strides = [1, 1]} : vector<64x256xf32> to vector<8x256xf32>
    %84 = vector.extract_strided_slice %19 {offsets = [6, 0, 0], sizes = [1, 256, 128], strides = [1, 1, 1]} : vector<8x256x128xf32> to vector<1x256x128xf32>
    %85 = vector.shape_cast %84 : vector<1x256x128xf32> to vector<256x128xf32>
    %cst_21 = arith.constant dense<0.000000e+00> : vector<8x128xf32>
    %86 = tpu.matmul %83, %85, %cst_21 {dimension_numbers = #tpu.dot_dimension_numbers<[1], [0], [0], [1], [0, 0, 1, 1], [], []>} : vector<8x256xf32>, vector<256x128xf32>, vector<8x128xf32> -> vector<8x128xf32>
    %87 = vector.extract_strided_slice %21 {offsets = [6, 0, 0], sizes = [1, 1, 128], strides = [1, 1, 1]} : vector<8x1x128xf32> to vector<1x1x128xf32>
    %88 = vector.shape_cast %87 : vector<1x1x128xf32> to vector<1x128xf32>
    %cst_22 = arith.constant 1.000000e+00 : f32
    %89 = vector.broadcast %cst_22 : f32 to vector<1x128xf32>
    %90 = arith.divf %89, %88 : vector<1x128xf32>
    %91 = vector.broadcast %90 : vector<1x128xf32> to vector<8x128xf32>
    %92 = arith.mulf %86, %91 : vector<8x128xf32>
    %93 = vector.extract_strided_slice %22 {offsets = [56, 0], sizes = [8, 256], strides = [1, 1]} : vector<64x256xf32> to vector<8x256xf32>
    %94 = vector.extract_strided_slice %19 {offsets = [7, 0, 0], sizes = [1, 256, 128], strides = [1, 1, 1]} : vector<8x256x128xf32> to vector<1x256x128xf32>
    %95 = vector.shape_cast %94 : vector<1x256x128xf32> to vector<256x128xf32>
    %cst_23 = arith.constant dense<0.000000e+00> : vector<8x128xf32>
    %96 = tpu.matmul %93, %95, %cst_23 {dimension_numbers = #tpu.dot_dimension_numbers<[1], [0], [0], [1], [0, 0, 1, 1], [], []>} : vector<8x256xf32>, vector<256x128xf32>, vector<8x128xf32> -> vector<8x128xf32>
    %97 = vector.extract_strided_slice %21 {offsets = [7, 0, 0], sizes = [1, 1, 128], strides = [1, 1, 1]} : vector<8x1x128xf32> to vector<1x1x128xf32>
    %98 = vector.shape_cast %97 : vector<1x1x128xf32> to vector<1x128xf32>
    %cst_24 = arith.constant 1.000000e+00 : f32
    %99 = vector.broadcast %cst_24 : f32 to vector<1x128xf32>
    %100 = arith.divf %99, %98 : vector<1x128xf32>
    %101 = vector.broadcast %100 : vector<1x128xf32> to vector<8x128xf32>
    %102 = arith.mulf %96, %101 : vector<8x128xf32>
    %103 = tpu.concatenate %32, %42, %52, %62, %72, %82, %92, %102 in 0 : vector<8x128xf32>, vector<8x128xf32>, vector<8x128xf32>, vector<8x128xf32>, vector<8x128xf32>, vector<8x128xf32>, vector<8x128xf32>, vector<8x128xf32> -> vector<64x128xf32>
    %c0_25 = arith.constant 0 : index
    %c0_26 = arith.constant 0 : index
    %104 = vector.load %arg5[%c0_25, %c0_26] : memref<64x1xf32, #tpu.memory_space<vmem>>, vector<64x1xf32>
    %105 = vector.broadcast %104 : vector<64x1xf32> to vector<64x128xf32>
    %106 = arith.addf %103, %105 : vector<64x128xf32>
    %cst_27 = arith.constant 0.000000e+00 : f32
    %107 = vector.broadcast %cst_27 : f32 to vector<64x128xf32>
    %108 = arith.cmpf ogt, %106, %107 : vector<64x128xf32>
    %cst_28 = arith.constant 0.000000e+00 : f32
    %109 = vector.broadcast %cst_28 : f32 to vector<64x128xf32>
    %110 = arith.minimumf %106, %109 : vector<64x128xf32>
    %111 = math.exp %110 : vector<64x128xf32>
    %cst_29 = arith.constant 1.000000e+00 : f32
    %112 = vector.broadcast %cst_29 : f32 to vector<64x128xf32>
    %113 = arith.subf %111, %112 : vector<64x128xf32>
    %114 = arith.select %108, %106, %113 : vector<64x128xi1>, vector<64x128xf32>
    %c0_30 = arith.constant 0 : index
    %c0_31 = arith.constant 0 : index
    %115 = vector.load %arg6[%c0_30, %c0_31] : memref<64x128xf32, #tpu.memory_space<vmem>>, vector<64x128xf32>
    tpu.vector_store %arg6[%c0_30, %c0_31], %114 {strides = array<i32>} : memref<64x128xf32, #tpu.memory_space<vmem>>, vector<64x128xf32>,
    return
  }
  func.func @transform_0(%arg0: i32) -> (i32, i32) {
    %c0_i32 = arith.constant 0 : i32
    %c0_i32_0 = arith.constant 0 : i32
    %c0_i32_1 = arith.constant 0 : i32
    return %c0_i32, %c0_i32_0 : i32, i32
  }
  func.func @transform_1(%arg0: i32) -> (i32, i32) {
    %c0_i32 = arith.constant 0 : i32
    %c0_i32_0 = arith.constant 0 : i32
    %c0_i32_1 = arith.constant 0 : i32
    return %c0_i32, %c0_i32_0 : i32, i32
  }
  func.func @transform_2(%arg0: i32) -> (i32, i32) {
    %c0_i32 = arith.constant 0 : i32
    %c0_i32_0 = arith.constant 0 : i32
    return %c0_i32, %arg0 : i32, i32
  }
  func.func @transform_3(%arg0: i32) -> (i32, i32) {
    %c0_i32 = arith.constant 0 : i32
    %c0_i32_0 = arith.constant 0 : i32
    return %c0_i32, %arg0 : i32, i32
  }
  func.func @transform_4(%arg0: i32) -> (i32, i32) {
    %c0_i32 = arith.constant 0 : i32
    %c0_i32_0 = arith.constant 0 : i32
    %c0_i32_1 = arith.constant 0 : i32
    return %c0_i32, %c0_i32_0 : i32, i32
  }
  func.func @transform_5(%arg0: i32) -> (i32, i32) {
    %c0_i32 = arith.constant 0 : i32
    %c0_i32_0 = arith.constant 0 : i32
    return %c0_i32, %arg0 : i32, i32
  }
}

</mosaic_0001>

<bundles_post_ra>
// kernel: tpu_custom_call.1
= control target key start
LH: loop header
LB: loop body
LE: loop exit
PB: predicated region body
PF: predicated region fallthrough
CT: control target
= control target key end

     0   :  { %10 = vsyncpa [#allocation3], 0  ;;  %s10921_s0 = inlined_call_operand.hbm [shape: f32[64,256], index: 0, kind: input, shape index: {}]   ;;  %s10922_s1 = inlined_call_operand.vmem [shape: f32[8,256], index: 1, kind: input, shape index: {}]   ;;  %s10923_s2 = inlined_call_operand.vmem [shape: f32[8,256], index: 2, kind: input, shape index: {}]   ;;  %s10924_s3 = inlined_call_operand.hbm [shape: bf16[256,256], index: 3, kind: input, shape index: {}]   ;;  %s10925_s4 = inlined_call_operand.vmem [shape: f32[64,1], index: 4, kind: input, shape index: {}]   ;;  %s10926_s5 = inlined_call_operand.hbm [shape: f32[64,256], index: 5, kind: output, shape index: {}]  }
   0x1   :  { %11 = vsyncpa [#allocation6], 0 }
   0x2   :  { %13 = vsyncpa [#allocation6 + $0x1], 0 }
   0x3   :  { %14 = vsyncpa [#allocation4], 0 }
   0x4   :  { %16 = vsyncpa [#allocation4 + $0x1], 0  ;;  %s5875_s18 = smov 0   ;;  %s5877_s19 = smov 0  }
   0x5   :  { %s5879_s20 = smov 0   ;;  %s5881_s21 = smov 0  }
   0x6 LB: > { %s5896_s22 = sadd.s32 4294967295, %s5830_s21   ;;  %s4709_s23 = sadd.s32 4294967294, %s5830_s21   ;;  %s5830_s21 = sphi %s5881_s21, %s12457_s21   ;;  %s5826_s20 = sphi %s5879_s20, %s12456_s20   ;;  %s5822_s19 = sphi %s5877_s19, %s12455_s19   ;;  %s5818_s18 = sphi %s5875_s18, %s12454_s18  }
   0x7   : > { %s5900_s24 = sadd.s32 1, %s5830_s21   ;;  %s97_s25 = sadd.s32 1, %s5826_s20 }
   0x8   : > { %s94_s26 = ssub.s32 %s5830_s21, %s5900_s24  ;;  %p104_p0 = scmp.ne.s32.totalorder %s5826_s20, %s5822_s19 }
   0x9   : > { %p95_p1 = scmp.eq.s32.totalorder %s94_s26, 0  ;;  %p105_p2 = scmp.eq.s32.totalorder %s5830_s21, 0 }
   0xa   : > { %p110_p3 = scmp.ne.s32.totalorder %s5822_s19, %s5818_s18  ;;  %p10930_p4 = scmp.eq.s32.totalorder %s5896_s22, 0 }
   0xb   : > { %s5912_s27 = scalar_select %p95_p1, %s5826_s20, %s97_s25  }
   0xc   : > { %p5914_p5 = por %p105_p2, %p104_p0  ;;  %p5920_p6 = por %p10930_p4, %p110_p3 }
   0xd   : > { %p155_p7 = scmp.eq.s32.totalorder %s5896_s22, 1  ;;  %p161_p8 = scmp.eq.s32.totalorder %s4709_s23, 1 }
   0xe   : > { %s11429_s29 = scalar_select %p5920_p6, 1, 0 }
   0xf   : > { %p4710_p9 = scmp.ge.s32.totalorder %s5830_s21, 1  ;;  %p168_p10 = scmp.lt.s32.totalorder %s5830_s21, 3 }
  0x10   : > { %p5927_p11 = por %p155_p7, %p104_p0  ;;  %p5931_p12 = por %p161_p8, %p110_p3 }
  0x11   : > { %p5935_p13 = pnand %p4710_p9, %p168_p10  ;;  %s5832_s8 = smov [#allocation2]  }
  0x12   : > { %s11430_s30 = scalar_select %p5927_p11, 1, 0 }
  0x13   : > { %s11431_s6 = scalar_select %p5931_p12, 1, 0 }
  0x14   : > { %s11432_s7 = scalar_select %p5935_p13, 1, 0 }
  0x15   : > { %p5099_p1 = pneg %p5935_p13  ;;  %s180_s9 = sshll.u32 %s5832_s8, 4  ;;  %s181_s9 = int_to_ptr.vmem [resolvable:$true] %s180_s9 }
  0x16   : > { %p5112_p3 = scmp.lt.s32.totalorder %s5830_s21, 2  ;;  %s207_s11 = sand.u32 1, %s5826_s20  }
  0x17   : > { %p5943_p2 = pnand %p5099_p1, %p10930_p4  ;;  %s5719_s12 = scalar_lea.vmem %s181_s9, 2048 }
  0x18   : > { %p5720_p8 = scmp.ne.s32.totalorder %s181_s9, %s5719_s12  ;;  %p5727_p12 = scmp.lt.s32.totalorder %s181_s9, %s181_s9 }
  0x19   : > { %p5710_p7 = pneg %p5943_p2  ;;  %p5728_p11 = scmp.lt.s32.totalorder %s5719_s12, %s5719_s12 }
  0x1b   : > { %p5722_p9 = pnand %p5720_p8, %p5710_p7  ;;  %p5729_p6 = por %p5728_p11, %p5727_p12 }
  0x1d   : > { %p5723_p10 = pneg %p5722_p9 }
  0x1f   : > { %p5730_p13 = pnand %p5729_p6, %p5723_p10 }
  0x21   : > { %5733 = shalt.err (!%p5730_p13)
}
  0x22   : > { %s5833_s13 = smov 256   ;;  %s5834_s14 = smov 16  }
  0x23   : > { %5102 = dma.hbm_to_vmem [thread:$0]  (!%p5943_p2), %s10921_s0, 2048, %s181_s9, [#allocation3], %s5833_s13, %s5833_s13, %s5834_s14  }
  0x24   : > { %p5961_p1 = pnand %p5112_p3, %p5914_p5  ;;  %s4713_s23 = sshll.u32 %s207_s11, 7 }
  0x25   : > { %s4714_s25 = sshll.u32 %s5830_s21, 6  ;;  %s211_s10 = scalar_lea.vmem [#allocation5], %s4713_s23 }
  0x26   : > { %s5969_s12 = scalar_lea.hbm %s10924_s3, %s4714_s25  ;;  %s217_s15 = sshll.u32 %s211_s10, 4  ;;  %s5971_s15 = int_to_ptr.vmem [resolvable:$true] %s217_s15 }
  0x27   : > { %s5973_s28 = scalar_lea.sflag [#allocation6], %s207_s11  ;;  %s5734_s9 = scalar_lea.hbm %s5969_s12, 2048 }
  0x28   : > { %p5735_p5 = scmp.ne.s32.totalorder %s5969_s12, %s5734_s9  ;;  %p5736_p6 = pneg %p5961_p1 }
  0x29   : > { %s5739_s16 = scalar_lea.hbm %s10924_s3, 4096  ;;  %p5740_p13 = scmp.lt.s32.totalorder %s5969_s12, %s10924_s3 }
  0x2a   : > { %p5737_p11 = pnand %p5736_p6, %p5735_p5  ;;  %p5741_p2 = scmp.lt.s32.totalorder %s5739_s16, %s5734_s9 }
  0x2c   : > { %p5738_p12 = pneg %p5737_p11  ;;  %p5742_p3 = por %p5741_p2, %p5740_p13 }
  0x2e   : > { %p5743_p7 = pnand %p5742_p3, %p5738_p12 }
  0x30   : > { %5746 = shalt.err (!%p5743_p7)
}
  0x31   : > { %s5747_s11 = scalar_lea.vmem %s5971_s15, 2048  ;;  %s5835_s23 = smov [#allocation5]  }
  0x32   : > { %p5748_p8 = scmp.ne.s32.totalorder %s5971_s15, %s5747_s11  ;;  %s5752_s8 = sshll.u32 %s5835_s23, 4  ;;  %s5753_s8 = int_to_ptr.vmem [resolvable:$false] %s5752_s8 }
  0x33   : > { %s5754_s10 = scalar_lea.vmem %s5753_s8, 4096  ;;  %p5755_p5 = scmp.lt.s32.totalorder %s5971_s15, %s5753_s8 }
  0x34   : > { %p5750_p9 = pnand %p5748_p8, %p5736_p6  ;;  %p5756_p11 = scmp.lt.s32.totalorder %s5754_s10, %s5747_s11 }
  0x36   : > { %p5751_p10 = pneg %p5750_p9  ;;  %p5757_p0 = por %p5756_p11, %p5755_p5 }
  0x38   : > { %p5758_p4 = pnand %p5757_p0, %p5751_p10 }
  0x3a   : > { %5761 = shalt.err (!%p5758_p4)
}
  0x3b   : > { %s5836_s9 = smov 128   ;;  %s5837_s13 = smov 64  }
  0x3c   : > { %s5838_s14 = smov 4   ;;  %p11435_p6 = scmp.ne.s32.totalorder %s11432_s7, 0 }
  0x3d   : > { %5106 = dma.hbm_to_vmem [thread:$0]  (!%p5961_p1), %s5969_s12, 2048, %s5971_s15, %s5973_s28, %s5836_s9, %s5837_s13, %s5838_s14  }
  0x3e   : > { %229 = sbr.rel (%p11435_p6) target bundleno = 1194 (0x4aa), region = 40 }
  0x43   : > { %p11436_p12 = scmp.eq.s32.totalorder %s5896_s22, 0 }
  0x45   : > { %5805 = dma.done.wait (%p11436_p12), [#allocation3], 2048   ;;  %p11437_p13 = pmov %p11436_p12 }
  0x46   : > { %s6001_s16 = sand.u32 1, %s5822_s19   ;;  %p11438_p4 = scmp.ne.s32.totalorder %s11429_s29, 0 }
  0x47   : > { %5807 = vsyncadd (%p11437_p13), [#allocation3], 4294965248  ;;  %s4717_s25 = sshll.u32 %s6001_s16, 7  ;;  %s236_s26 = scalar_lea.sflag [#allocation6], %s6001_s16 }
  0x48   : > { %s6005_s11 = scalar_lea.vmem [#allocation5], %s4717_s25 }
  0x49   : > { %5809 = dma.done.wait (%p11438_p4), %s236_s26, 2048  }
  0x4a   : > { %5811 = vsyncadd (%p11438_p4), %s236_s26, 4294965248  ;;  %p270_p0 = scmp.lt.s32.totalorder %s5896_s22, 1  ;;  %v277_v0 = vlaneseq  ;;  %v5839_v1 = vmov 1966171168   ;;  %v6025_v7 = vld [vmem:[%s10922_s1] sm:$0xff]  ;;  %v6058_v29 = vld [vmem:[%s10922_s1 + $0x8] sm:$0xff] }
  0x4b   : > { %v1352_v2 = vunpack.c.l.s4 %v5839_v1  ;;  %v4733_v58 = vld [vmem:[%s6005_s11] sm:$0xff]   ;;  %v4796_v63 = vld [vmem:[%s6005_s11 + $0x8] sm:$0xff]   ;;  %s4600_s10 = scalar_lea.sflag [#allocation4], %s6001_s16  ;;  %p12451_p2 = scmp.ne.s32.totalorder %s11430_s30, 0 }
  0x4c   : > { %s271_s7 = scalar_select %p270_p0, %s5896_s22, 1  ;;  %v6013_v3 = vshrl.u32 %v277_v0, 7  ;;  %v6145_v59 = vunpack.c.h.bf16 %v4733_v58  ;;  %v6152_v1 = vunpack.c.l.bf16 %v4733_v58 }
  0x4d   : > { %v1353_v4 = vunpack.c.0.s8 %v1352_v2 }
  0x4e   : > { %11439 = vst [vmem:[#allocation11_spill] sm:$0xff] %v6013_v3  ;;  %s4719_s17 = sshll.u32 %s271_s7, 3  ;;  %v6016_v5 = vsub.s32 0, %v6013_v3  ;;  %v413_v31 = vsub.s32 1, %v6013_v3  ;;  %v10931_v34 = vsub.s32 2, %v6013_v3  ;;  %v10932_v36 = vsub.s32 3, %v6013_v3 }
  0x4f   : > { %s273_s28 = scalar_lea.vmem %s10923_s2, %s4719_s17  ;;  %v1356_v6 = vsub.s32 %v1353_v4, %v6013_v3  ;;  %11446 = vst [vmem:[#allocation18_spill] sm:$0xff] %v6145_v59  ;;  %11447 = vst [vmem:[#allocation19_spill] sm:$0xff] %v6152_v1  ;;  %s4718_s17 = sshll.u32 %s6001_s16, 6 }
  0x50   : > { %v276_v8 = vld [vmem:[%s273_s28] sm:$0xff]  ;;  %v280_v9 = vrot.slane %v6025_v7, %v6016_v5  ;;  %v6062_v30 = vrot.slane %v6058_v29, %v6016_v5  ;;  %v414_v32 = vrot.slane %v6025_v7, %v413_v31  ;;  %v6069_v33 = vrot.slane %v6058_v29, %v413_v31  ;;  %v4797_v31 = vld [vmem:[%s6005_s11 + $0x10] sm:$0xff]   ;;  %s10618_s12 = scalar_lea.vmem [#allocation7], %s4718_s17  ;;  %s4729_s28 = sshll.u32 %s5896_s22, 7 }
  0x51   : > { %v1350_v10 = vcombine.high %v276_v8, %v276_v8  ;;  %v1357_v11 = vrot.slane %v276_v8, %v1356_v6  ;;  %v6076_v35 = vrot.slane %v6025_v7, %v10931_v34  ;;  %v6084_v37 = vrot.slane %v6025_v7, %v10932_v36  ;;  %s4612_s15 = sshll.u32 %s10618_s12, 4  ;;  %s10877_s8 = scalar_lea.hbm %s10926_s5, %s4729_s28  ;;  %s10872_s15 = int_to_ptr.vmem [resolvable:$true] %s4612_s15 }
  0x52   : > { %290 = vbcast.lane.b32.xlu1 %v280_v9, 272  ;;  %282 = vbcast.lane.b32.xlu0 %v280_v9, 256  ;;  %s5762_s9 = scalar_lea.vmem %s10872_s15, 1024  ;;  %s5841_s22 = smov [#allocation7]  }
  0x53   : > { %v1364_v12 = vrot.slane %v1350_v10, %v1356_v6  ;;  %v1365_v13 = vcombine.high %v1357_v11, %v1357_v11  ;;  %v6029_v14 = vrot.slane %v1357_v11, %v1356_v6  ;;  %v6166_v10 = vunpack.c.l.bf16 %v4796_v63  ;;  %p5763_p1 = scmp.ne.s32.totalorder %s10872_s15, %s5762_s9  ;;  %s5766_s13 = sshll.u32 %s5841_s22, 4  ;;  %s5767_s13 = int_to_ptr.vmem [resolvable:$false] %s5766_s13 }
  0x54   : > { %s5768_s14 = scalar_lea.vmem %s5767_s13, 2048  ;;  %p5769_p8 = scmp.lt.s32.totalorder %s10872_s15, %s5767_s13 }
  0x55   : > { %v1366_v15 = vcombine.high %v1364_v12, %v1364_v12  ;;  %v1380_v16 = vrot.slane %v1364_v12, %v1356_v6  ;;  %v6031_v17 = vrot.slane %v1365_v13, %v1356_v6  ;;  %v1395_v18 = vcombine.high %v6029_v14, %v6029_v14  ;;  %11449 = vst [vmem:[#allocation21_spill] sm:$0xff] %v6166_v10  ;;  %p5764_p3 = pnand %p5763_p1, %p12451_p2  ;;  %p5770_p9 = scmp.lt.s32.totalorder %s5768_s14, %s5762_s9 }
  0x56   : > { %294 = vbcast.lane.b32.xlu1 %v280_v9, 280  ;;  %286 = vbcast.lane.b32.xlu0 %v280_v9, 264  ;;  %v6125_v48 = vrot.slane %v6029_v14, %v6016_v5 }
  0x57   : > { %v1394_v19 = vrot.slane %v1366_v15, %v1356_v6  ;;  %v1396_v20 = vcombine.high %v1380_v16, %v1380_v16  ;;  %v1397_v21 = vcombine.high %v6031_v17, %v6031_v17  ;;  %v6038_v22 = vrot.slane %v1395_v18, %v6016_v5  ;;  %p5765_p7 = pneg %p5764_p3  ;;  %p5771_p10 = por %p5770_p9, %p5769_p8 }
  0x58   : > { %v6041_v23 = vrot.slane %v1380_v16, %v6016_v5  ;;  %v6179_v18 = vunpack.c.h.bf16 %v4796_v63 }
  0x59   : > { %11440 = vst [vmem:[#allocation12_spill] sm:$0xff] %v6038_v22  ;;  %v1398_v24 = vcombine.high %v1394_v19, %v1394_v19  ;;  %v6044_v25 = vrot.slane %v1397_v21, %v6016_v5  ;;  %v6047_v26 = vrot.slane %v1394_v19, %v6016_v5  ;;  %v6050_v27 = vrot.slane %v1396_v20, %v6016_v5  ;;  %p5772_p5 = pnand %p5771_p10, %p5765_p7 }
  0x5a   : > { %11441 = vst [vmem:[#allocation13_spill] sm:$0xff] %v6041_v23  ;;  %302 = vbcast.lane.b32.xlu1 %v280_v9, 296  ;;  %298 = vbcast.lane.b32.xlu0 %v280_v9, 288  ;;  %11451 = vst [vmem:[#allocation23_spill] sm:$0xff] %v6179_v18 }
  0x5b   : > { %11442 = vst [vmem:[#allocation14_spill] sm:$0xff] %v6044_v25  ;;  %11443 = vst [vmem:[#allocation15_spill] sm:$0xff] %v6047_v26  ;;  %v6053_v28 = vrot.slane %v1398_v24, %v6016_v5 }
  0x5c   : > { %11444 = vst [vmem:[#allocation16_spill] sm:$0xff] %v6050_v27 }
  0x5d   : > { %11445 = vst [vmem:[#allocation17_spill] sm:$0xff] %v6053_v28 }
  0x5e   : > { %310 = vbcast.lane.b32.xlu1 %v280_v9, 312  ;;  %306 = vbcast.lane.b32.xlu0 %v280_v9, 304 }
  0x62   : > { %318 = vbcast.lane.b32.xlu1 %v280_v9, 328  ;;  %314 = vbcast.lane.b32.xlu0 %v280_v9, 320 }
  0x66   : > { %326 = vbcast.lane.b32.xlu1 %v280_v9, 344  ;;  %322 = vbcast.lane.b32.xlu0 %v280_v9, 336 }
  0x6a   : > { %334 = vbcast.lane.b32.xlu1 %v280_v9, 360  ;;  %330 = vbcast.lane.b32.xlu0 %v280_v9, 352 }
  0x6e   : > { %342 = vbcast.lane.b32.xlu1 %v280_v9, 376  ;;  %338 = vbcast.lane.b32.xlu0 %v280_v9, 368  ;;  %v6164_v9 = vrot.slane %v6031_v17, %v6016_v5 }
  0x72   : > { %353 = vbcast.lane.b32.xlu1 %v6062_v30, 264  ;;  %349 = vbcast.lane.b32.xlu0 %v6062_v30, 256 }
  0x76   : > { %420 = vbcast.lane.b32.xlu1 %v414_v32, 264  ;;  %416 = vbcast.lane.b32.xlu0 %v414_v32, 256 }
  0x7a   : > { %428 = vbcast.lane.b32.xlu1 %v414_v32, 280  ;;  %424 = vbcast.lane.b32.xlu0 %v414_v32, 272 }
  0x7e   : > { %436 = vbcast.lane.b32.xlu1 %v414_v32, 296  ;;  %432 = vbcast.lane.b32.xlu0 %v414_v32, 288 }
  0x82   : > { %444 = vbcast.lane.b32.xlu1 %v414_v32, 312  ;;  %440 = vbcast.lane.b32.xlu0 %v414_v32, 304 }
  0x86   : > { %452 = vbcast.lane.b32.xlu1 %v414_v32, 328  ;;  %448 = vbcast.lane.b32.xlu0 %v414_v32, 320 }
  0x8a   : > { %460 = vbcast.lane.b32.xlu1 %v414_v32, 344  ;;  %456 = vbcast.lane.b32.xlu0 %v414_v32, 336 }
  0x8e   : > { %468 = vbcast.lane.b32.xlu1 %v414_v32, 360  ;;  %464 = vbcast.lane.b32.xlu0 %v414_v32, 352 }
  0x92   : > { %476 = vbcast.lane.b32.xlu1 %v414_v32, 376  ;;  %472 = vbcast.lane.b32.xlu0 %v414_v32, 368 }
  0x96   : > { %487 = vbcast.lane.b32.xlu1 %v6069_v33, 264  ;;  %483 = vbcast.lane.b32.xlu0 %v6069_v33, 256 }
  0x9a   : > { %554 = vbcast.lane.b32.xlu1 %v6076_v35, 264  ;;  %550 = vbcast.lane.b32.xlu0 %v6076_v35, 256 }
  0x9e   : > { %688 = vbcast.lane.b32.xlu1 %v6084_v37, 264  ;;  %684 = vbcast.lane.b32.xlu0 %v6084_v37, 256 }
  0xa2   : > { %491 = vbcast.lane.b32.xlu1 %v6069_v33, 272  ;;  %357 = vbcast.lane.b32.xlu0 %v6062_v30, 272 }
  0xa6   : > { %692 = vbcast.lane.b32.xlu1 %v6084_v37, 272  ;;  %558 = vbcast.lane.b32.xlu0 %v6076_v35, 272 }
  0xaa   : > { %495 = vbcast.lane.b32.xlu1 %v6069_v33, 280  ;;  %361 = vbcast.lane.b32.xlu0 %v6062_v30, 280 }
  0xae   : > { %696 = vbcast.lane.b32.xlu1 %v6084_v37, 280  ;;  %562 = vbcast.lane.b32.xlu0 %v6076_v35, 280 }
  0xb2   : > { %499 = vbcast.lane.b32.xlu1 %v6069_v33, 288  ;;  %365 = vbcast.lane.b32.xlu0 %v6062_v30, 288 }
  0xb6   : > { %700 = vbcast.lane.b32.xlu1 %v6084_v37, 288  ;;  %566 = vbcast.lane.b32.xlu0 %v6076_v35, 288 }
  0xba   : > { %503 = vbcast.lane.b32.xlu1 %v6069_v33, 296  ;;  %369 = vbcast.lane.b32.xlu0 %v6062_v30, 296 }
  0xbe   : > { %704 = vbcast.lane.b32.xlu1 %v6084_v37, 296  ;;  %570 = vbcast.lane.b32.xlu0 %v6076_v35, 296 }
  0xc2   : > { %507 = vbcast.lane.b32.xlu1 %v6069_v33, 304  ;;  %373 = vbcast.lane.b32.xlu0 %v6062_v30, 304 }
  0xc4   : > { %v291_v38 = vpop.permute.xlu1 %290  ;;  %v283_v39 = vpop.permute.xlu0 %282 }
  0xc5   : > { %v1439_v52 = vadd.f32 %v6125_v48, %v283_v39  ;;  %v1441_v56 = vadd.f32 %v6125_v48, %v291_v38 }
  0xc6   : > { %708 = vbcast.lane.b32.xlu1 %v6084_v37, 304  ;;  %574 = vbcast.lane.b32.xlu0 %v6076_v35, 304 }
  0xc7   : > { %v1695_v57 = vmul.f32 0.2, %v1439_v52  ;;  %v1697_v0 = vmul.f32 0.2, %v1441_v56 }
  0xc8   : > { %v295_v40 = vpop.permute.xlu1 %294  ;;  %v287_v41 = vpop.permute.xlu0 %286 }
  0xc9   : > { %v1440_v49 = vadd.f32 %v6125_v48, %v287_v41  ;;  %v1951_v2 = vmax.f32 %v1439_v52, %v1695_v57  ;;  %v1442_v4 = vadd.f32 %v6125_v48, %v295_v40  ;;  %v1953_v12 = vmax.f32 %v1441_v56, %v1697_v0 }
  0xca   : > { %511 = vbcast.lane.b32.xlu1 %v6069_v33, 312  ;;  %377 = vbcast.lane.b32.xlu0 %v6062_v30, 312 }
  0xcb   : > { %v1696_v53 = vmul.f32 0.2, %v1440_v49  ;;  %v6171_v13 = vadd.f32 %v6152_v1, %v1951_v2  ;;  %v1698_v14 = vmul.f32 0.2, %v1442_v4  ;;  %v6183_v21 = vadd.f32 %v6166_v10, %v1953_v12 }
  0xcc   : > { %v303_v42 = vpop.permute.xlu1 %302  ;;  %v299_v43 = vpop.permute.xlu0 %298  ;;  %v6200_v2 = vunpack.c.h.bf16 %v4797_v31 }
  0xcd   : > { %v1952_v60 = vmax.f32 %v1440_v49, %v1696_v53  ;;  %11450 = vst [vmem:[#allocation22_spill] sm:$0xff] %v6171_v13  ;;  %v1443_v15 = vadd.f32 %v6125_v48, %v299_v43  ;;  %v1444_v16 = vadd.f32 %v6125_v48, %v303_v42  ;;  %11452 = vst [vmem:[#allocation24_spill] sm:$0xff] %v6183_v21  ;;  %v6190_v49 = vunpack.c.l.bf16 %v4797_v31 }
  0xce   : > { %712 = vbcast.lane.b32.xlu1 %v6084_v37, 312  ;;  %578 = vbcast.lane.b32.xlu0 %v6076_v35, 312  ;;  %v1954_v24 = vmax.f32 %v1442_v4, %v1698_v14  ;;  %11455 = vst [vmem:[#allocation27_spill] sm:$0xff] %v6200_v2 }
  0xcf   : > { %v6158_v6 = vadd.f32 %v6145_v59, %v1952_v60  ;;  %v1699_v32 = vmul.f32 0.2, %v1443_v15  ;;  %v1700_v39 = vmul.f32 0.2, %v1444_v16  ;;  %11453 = vst [vmem:[#allocation25_spill] sm:$0xff] %v6190_v49 }
  0xd0   : > { %v6113_v44 = vpop.permute.xlu1 %310  ;;  %v6115_v45 = vpop.permute.xlu0 %306  ;;  %v6196_v58 = vadd.f32 %v6179_v18, %v1954_v24 }
  0xd1   : > { %11448 = vst [vmem:[#allocation20_spill] sm:$0xff] %v6158_v6  ;;  %v2527_v5 = vmax.f32 %v6171_v13, %v6158_v6  ;;  %v1445_v52 = vadd.f32 %v6125_v48, %v6115_v45  ;;  %v1955_v60 = vmax.f32 %v1443_v15, %v1699_v32  ;;  %v1956_v4 = vmax.f32 %v1444_v16, %v1700_v39 }
  0xd2   : > { %515 = vbcast.lane.b32.xlu1 %v6069_v33, 320  ;;  %381 = vbcast.lane.b32.xlu0 %v6062_v30, 320  ;;  %11454 = vst [vmem:[#allocation26_spill] sm:$0xff] %v6196_v58  ;;  %v1446_v12 = vadd.f32 %v6125_v48, %v6113_v44 }
  0xd3   : > { %v2528_v41 = vmax.f32 %v2527_v5, %v6183_v21  ;;  %v4798_v5 = vld [vmem:[%s6005_s11 + $0x18] sm:$0xff]   ;;  %v1701_v24 = vmul.f32 0.2, %v1445_v52  ;;  %v6215_v44 = vadd.f32 %v6190_v49, %v1955_v60  ;;  %v4800_v21 = vld [vmem:[%s6005_s11 + $0x28] sm:$0xff]  }
  0xd4   : > { %v6119_v46 = vpop.permute.xlu1 %318  ;;  %v6121_v47 = vpop.permute.xlu0 %314  ;;  %v6240_v36 = vunpack.c.h.bf16 %v4798_v5 }
  0xd5   : > { %v2529_v14 = vmax.f32 %v2528_v41, %v6196_v58  ;;  %11458 = vst [vmem:[#allocation30_spill] sm:$0xff] %v6215_v44  ;;  %v1702_v41 = vmul.f32 0.2, %v1446_v12 }
  0xd6   : > { %716 = vbcast.lane.b32.xlu1 %v6084_v37, 320  ;;  %582 = vbcast.lane.b32.xlu0 %v6076_v35, 320  ;;  %11463 = vst [vmem:[#allocation35_spill] sm:$0xff] %v6240_v36 }
  0xd8   : > { %v6130_v50 = vpop.permute.xlu1 %326  ;;  %v6132_v51 = vpop.permute.xlu0 %322 }
  0xda   : > { %519 = vbcast.lane.b32.xlu1 %v6069_v33, 328  ;;  %385 = vbcast.lane.b32.xlu0 %v6062_v30, 328 }
  0xdc   : > { %v6137_v54 = vpop.permute.xlu1 %334  ;;  %v6139_v55 = vpop.permute.xlu0 %330 }
  0xde   : > { %720 = vbcast.lane.b32.xlu1 %v6084_v37, 328  ;;  %586 = vbcast.lane.b32.xlu0 %v6076_v35, 328 }
  0xe0   : > { %v6147_v61 = vpop.permute.xlu1 %342  ;;  %v6149_v62 = vpop.permute.xlu0 %338 }
  0xe2   : > { %523 = vbcast.lane.b32.xlu1 %v6069_v33, 336  ;;  %389 = vbcast.lane.b32.xlu0 %v6062_v30, 336 }
  0xe4   : > { %v6160_v8 = vpop.permute.xlu1 %353  ;;  %v6168_v11 = vpop.permute.xlu0 %349 }
  0xe6   : > { %724 = vbcast.lane.b32.xlu1 %v6084_v37, 336  ;;  %590 = vbcast.lane.b32.xlu0 %v6076_v35, 336 }
  0xe8   : > { %v421_v17 = vpop.permute.xlu1 %420  ;;  %v417_v20 = vpop.permute.xlu0 %416 }
  0xe9   : > { %v1472_v19 = vadd.f32 %v6164_v9, %v421_v17  ;;  %v1471_v38 = vadd.f32 %v6164_v9, %v417_v20 }
  0xea   : > { %527 = vbcast.lane.b32.xlu1 %v6069_v33, 344  ;;  %393 = vbcast.lane.b32.xlu0 %v6062_v30, 344 }
  0xeb   : > { %v1728_v40 = vmul.f32 0.2, %v1472_v19  ;;  %v1727_v42 = vmul.f32 0.2, %v1471_v38 }
  0xec   : > { %v429_v43 = vpop.permute.xlu1 %428  ;;  %v425_v57 = vpop.permute.xlu0 %424 }
  0xed   : > { %v1984_v53 = vmax.f32 %v1472_v19, %v1728_v40  ;;  %v1474_v56 = vadd.f32 %v6164_v9, %v429_v43  ;;  %v1983_v63 = vmax.f32 %v1471_v38, %v1727_v42  ;;  %v1473_v0 = vadd.f32 %v6164_v9, %v425_v57 }
  0xee   : > { %728 = vbcast.lane.b32.xlu1 %v6084_v37, 344  ;;  %594 = vbcast.lane.b32.xlu0 %v6076_v35, 344  ;;  %v6220_v40 = vadd.f32 %v6200_v2, %v1956_v4  ;;  %v6222_v42 = vunpack.c.l.bf16 %v4798_v5  ;;  %v1447_v4 = vadd.f32 %v6125_v48, %v6121_v47  ;;  %v6244_v47 = vadd.f32 %v6125_v48, %v6119_v46 }
  0xef   : > { %v1730_v45 = vmul.f32 0.2, %v1474_v56  ;;  %v6208_v17 = vadd.f32 %v6145_v59, %v1984_v53  ;;  %v6211_v15 = vadd.f32 %v6152_v1, %v1983_v63  ;;  %v1729_v19 = vmul.f32 0.2, %v1473_v0 }
  0xf0   : > { %v437_v20 = vpop.permute.xlu1 %436  ;;  %v433_v31 = vpop.permute.xlu0 %432  ;;  %11459 = vst [vmem:[#allocation31_spill] sm:$0xff] %v6220_v40  ;;  %11460 = vst [vmem:[#allocation32_spill] sm:$0xff] %v6222_v42  ;;  %v2530_v53 = vmax.f32 %v2529_v14, %v6215_v44 }
  0xf1   : > { %11456 = vst [vmem:[#allocation28_spill] sm:$0xff] %v6208_v17  ;;  %11457 = vst [vmem:[#allocation29_spill] sm:$0xff] %v6211_v15  ;;  %v1476_v16 = vadd.f32 %v6164_v9, %v437_v20  ;;  %v1986_v32 = vmax.f32 %v1474_v56, %v1730_v45  ;;  %v1985_v38 = vmax.f32 %v1473_v0, %v1729_v19 }
  0xf2   : > { %v1475_v39 = vadd.f32 %v6164_v9, %v433_v31  ;;  %531 = vbcast.lane.b32.xlu1 %v6069_v33, 352  ;;  %397 = vbcast.lane.b32.xlu0 %v6062_v30, 352  ;;  %v2564_v57 = vmax.f32 %v6211_v15, %v6208_v17  ;;  %v1957_v0 = vmax.f32 %v1445_v52, %v1701_v24 }
  0xf3   : > { %v1732_v43 = vmul.f32 0.2, %v1476_v16  ;;  %v6229_v56 = vadd.f32 %v6166_v10, %v1985_v38  ;;  %v6235_v31 = vadd.f32 %v6179_v18, %v1986_v32  ;;  %v1958_v52 = vmax.f32 %v1446_v12, %v1702_v41  ;;  %v4799_v32 = vld [vmem:[%s6005_s11 + $0x20] sm:$0xff]  }
  0xf4   : > { %v1731_v60 = vmul.f32 0.2, %v1475_v39  ;;  %v445_v63 = vpop.permute.xlu1 %444  ;;  %v441_v20 = vpop.permute.xlu0 %440  ;;  %v6254_v5 = vadd.f32 %v6222_v42, %v1957_v0  ;;  %v1703_v12 = vmul.f32 0.2, %v1447_v4  ;;  %v6266_v0 = vunpack.c.l.bf16 %v4799_v32 }
  0xf5   : > { %11461 = vst [vmem:[#allocation33_spill] sm:$0xff] %v6229_v56  ;;  %v1988_v45 = vmax.f32 %v1476_v16, %v1732_v43  ;;  %v1478_v19 = vadd.f32 %v6164_v9, %v445_v63  ;;  %11462 = vst [vmem:[#allocation34_spill] sm:$0xff] %v6235_v31  ;;  %v2565_v14 = vmax.f32 %v2564_v57, %v6229_v56  ;;  %v6289_v44 = vunpack.c.h.bf16 %v4799_v32 }
  0xf6   : > { %v1987_v34 = vmax.f32 %v1475_v39, %v1731_v60  ;;  %v1477_v38 = vadd.f32 %v6164_v9, %v441_v20  ;;  %732 = vbcast.lane.b32.xlu1 %v6084_v37, 352  ;;  %598 = vbcast.lane.b32.xlu0 %v6076_v35, 352  ;;  %v2531_v16 = vmax.f32 %v2530_v53, %v6220_v40 }
  0xf7   : > { %v1734_v24 = vmul.f32 0.2, %v1478_v19  ;;  %v2566_v43 = vmax.f32 %v2565_v14, %v6235_v31  ;;  %11465 = vst [vmem:[#allocation37_spill] sm:$0xff] %v6254_v5  ;;  %v6257_v46 = vadd.f32 %v6200_v2, %v1988_v45  ;;  %11468 = vst [vmem:[#allocation40_spill] sm:$0xff] %v6266_v0 }
  0xf8   : > { %v6251_v39 = vadd.f32 %v6190_v49, %v1987_v34  ;;  %v1733_v57 = vmul.f32 0.2, %v1477_v38  ;;  %v453_v60 = vpop.permute.xlu1 %452  ;;  %v449_v63 = vpop.permute.xlu0 %448  ;;  %v6264_v34 = vadd.f32 %v6240_v36, %v1958_v52  ;;  %v2532_v45 = vmax.f32 %v2531_v16, %v6254_v5  ;;  %11472 = vst [vmem:[#allocation44_spill] sm:$0xff] %v6289_v44 }
  0xf9   : > { %11466 = vst [vmem:[#allocation38_spill] sm:$0xff] %v6257_v46  ;;  %v1480_v41 = vadd.f32 %v6164_v9, %v453_v60  ;;  %v1990_v20 = vmax.f32 %v1478_v19, %v1734_v24  ;;  %v1479_v14 = vadd.f32 %v6164_v9, %v449_v63  ;;  %v1704_v24 = vmul.f32 0.2, %v6244_v47 }
  0xfa   : > { %11464 = vst [vmem:[#allocation36_spill] sm:$0xff] %v6251_v39  ;;  %v2567_v53 = vmax.f32 %v2566_v43, %v6251_v39  ;;  %v1989_v28 = vmax.f32 %v1477_v38, %v1733_v57  ;;  %535 = vbcast.lane.b32.xlu1 %v6069_v33, 360  ;;  %11467 = vst [vmem:[#allocation39_spill] sm:$0xff] %v6264_v34  ;;  %401 = vbcast.lane.b32.xlu0 %v6062_v30, 360 }
  0xfb   : > { %v1735_v19 = vmul.f32 0.2, %v1479_v14  ;;  %v1959_v43 = vmax.f32 %v1447_v4, %v1703_v12  ;;  %v1449_v52 = vadd.f32 %v6125_v48, %v6132_v51  ;;  %v1736_v57 = vmul.f32 0.2, %v1480_v41 }
  0xfc   : > { %v2568_v60 = vmax.f32 %v2567_v53, %v6257_v46  ;;  %v6272_v27 = vadd.f32 %v6222_v42, %v1989_v28  ;;  %v461_v38 = vpop.permute.xlu1 %460  ;;  %v457_v63 = vpop.permute.xlu0 %456  ;;  %v6278_v40 = vadd.f32 %v6240_v36, %v1990_v20  ;;  %v2533_v4 = vmax.f32 %v2532_v45, %v6264_v34 }
  0xfd   : > { %v1991_v53 = vmax.f32 %v1479_v14, %v1735_v19  ;;  %v1481_v28 = vadd.f32 %v6164_v9, %v457_v63  ;;  %v1482_v14 = vadd.f32 %v6164_v9, %v461_v38  ;;  %v1960_v63 = vmax.f32 %v6244_v47, %v1704_v24 }
  0xfe   : > { %11469 = vst [vmem:[#allocation41_spill] sm:$0xff] %v6272_v27  ;;  %11470 = vst [vmem:[#allocation42_spill] sm:$0xff] %v6278_v40  ;;  %v2569_v16 = vmax.f32 %v2568_v60, %v6272_v27  ;;  %736 = vbcast.lane.b32.xlu1 %v6084_v37, 360  ;;  %602 = vbcast.lane.b32.xlu0 %v6076_v35, 360  ;;  %v1992_v60 = vmax.f32 %v1480_v41, %v1736_v57  ;;  %v6304_v24 = vunpack.c.l.bf16 %v4800_v21 }
  0xff   : > { %v6287_v51 = vadd.f32 %v6266_v0, %v1991_v53  ;;  %v1737_v5 = vmul.f32 0.2, %v1481_v28  ;;  %v6294_v58 = vadd.f32 %v6266_v0, %v1959_v43  ;;  %v1450_v45 = vadd.f32 %v6125_v48, %v6130_v50 }
 0x100   : > { %v2570_v12 = vmax.f32 %v2569_v16, %v6278_v40  ;;  %v469_v20 = vpop.permute.xlu1 %468  ;;  %v465_v19 = vpop.permute.xlu0 %464  ;;  %v1705_v16 = vmul.f32 0.2, %v1449_v52  ;;  %11474 = vst [vmem:[#allocation46_spill] sm:$0xff] %v6304_v24  ;;  %v6307_v43 = vadd.f32 %v6289_v44, %v1992_v60  ;;  %v1738_v57 = vmul.f32 0.2, %v1482_v14 }
 0x101   : > { %11471 = vst [vmem:[#allocation43_spill] sm:$0xff] %v6287_v51  ;;  %11473 = vst [vmem:[#allocation45_spill] sm:$0xff] %v6294_v58  ;;  %v1993_v32 = vmax.f32 %v1481_v28, %v1737_v5  ;;  %v1483_v41 = vadd.f32 %v6164_v9, %v465_v19  ;;  %v2534_v38 = vmax.f32 %v2533_v4, %v6294_v58  ;;  %v1706_v6 = vmul.f32 0.2, %v1450_v45 }
 0x102   : > { %539 = vbcast.lane.b32.xlu1 %v6069_v33, 368  ;;  %v2571_v53 = vmax.f32 %v2570_v12, %v6287_v51  ;;  %405 = vbcast.lane.b32.xlu0 %v6062_v30, 368  ;;  %11475 = vst [vmem:[#allocation47_spill] sm:$0xff] %v6307_v43  ;;  %v6310_v34 = vadd.f32 %v6289_v44, %v1960_v63  ;;  %v6323_v58 = vunpack.c.h.bf16 %v4800_v21 }
 0x103   : > { %v1961_v5 = vmax.f32 %v1449_v52, %v1705_v16  ;;  %v1451_v28 = vadd.f32 %v6125_v48, %v6139_v55  ;;  %v6317_v12 = vadd.f32 %v6304_v24, %v1993_v32  ;;  %v1739_v60 = vmul.f32 0.2, %v1483_v41 }
 0x104   : > { %v477_v47 = vpop.permute.xlu1 %476  ;;  %v473_v50 = vpop.permute.xlu0 %472  ;;  %11476 = vst [vmem:[#allocation48_spill] sm:$0xff] %v6310_v34  ;;  %v2572_v4 = vmax.f32 %v2571_v53, %v6307_v43  ;;  %v2535_v19 = vmax.f32 %v2534_v38, %v6310_v34  ;;  %11478 = vst [vmem:[#allocation50_spill] sm:$0xff] %v6323_v58  ;;  %v1994_v52 = vmax.f32 %v1482_v14, %v1738_v57  ;;  %v4801_v53 = vld [vmem:[%s6005_s11 + $0x30] sm:$0xff]  }
 0x105   : > { %11477 = vst [vmem:[#allocation49_spill] sm:$0xff] %v6317_v12  ;;  %v1484_v16 = vadd.f32 %v6164_v9, %v469_v20  ;;  %v1962_v13 = vmax.f32 %v1450_v45, %v1706_v6  ;;  %v6327_v51 = vadd.f32 %v6304_v24, %v1961_v5  ;;  %v1452_v32 = vadd.f32 %v6125_v48, %v6137_v54 }
 0x106   : > { %740 = vbcast.lane.b32.xlu1 %v6084_v37, 368  ;;  %606 = vbcast.lane.b32.xlu0 %v6076_v35, 368  ;;  %v1707_v43 = vmul.f32 0.2, %v1451_v28  ;;  %v2573_v38 = vmax.f32 %v2572_v4, %v6317_v12  ;;  %v1995_v34 = vmax.f32 %v1483_v41, %v1739_v60  ;;  %v1485_v21 = vadd.f32 %v6164_v9, %v473_v50 }
 0x107   : > { %11479 = vst [vmem:[#allocation51_spill] sm:$0xff] %v6327_v51  ;;  %v2536_v20 = vmax.f32 %v2535_v19, %v6327_v51  ;;  %v6339_v14 = vunpack.c.l.bf16 %v4801_v53  ;;  %v6342_v45 = vadd.f32 %v6323_v58, %v1994_v52  ;;  %v1740_v54 = vmul.f32 0.2, %v1484_v16 }
 0x108   : > { %v6321_v63 = vpop.permute.xlu1 %487  ;;  %v484_v55 = vpop.permute.xlu0 %483  ;;  %v6352_v50 = vadd.f32 %v6323_v58, %v1962_v13  ;;  %v1963_v5 = vmax.f32 %v1451_v28, %v1707_v43  ;;  %v1453_v4 = vadd.f32 %v6125_v48, %v6149_v62  ;;  %v1741_v52 = vmul.f32 0.2, %v1485_v21 }
 0x109   : > { %11480 = vst [vmem:[#allocation52_spill] sm:$0xff] %v6339_v14  ;;  %11481 = vst [vmem:[#allocation53_spill] sm:$0xff] %v6342_v45  ;;  %v2574_v60 = vmax.f32 %v2573_v38, %v6342_v45  ;;  %v6359_v19 = vadd.f32 %v6339_v14, %v1995_v34  ;;  %v1454_v62 = vadd.f32 %v6125_v48, %v6147_v61 }
 0x10a   : > { %543 = vbcast.lane.b32.xlu1 %v6069_v33, 376  ;;  %409 = vbcast.lane.b32.xlu0 %v6062_v30, 376  ;;  %v11482_v33 = vsub.s32 3, %v6013_v3  ;;  %11483 = vst [vmem:[#allocation54_spill] sm:$0xff] %v6352_v50  ;;  %v1708_v30 = vmul.f32 0.2, %v1452_v32  ;;  %v2537_v43 = vmax.f32 %v2536_v20, %v6352_v50  ;;  %v1996_v38 = vmax.f32 %v1484_v16, %v1740_v54 }
 0x10b   : > { %11484 = vst [vmem:[#allocation55_spill] sm:$0xff] %v6359_v19  ;;  %v1486_v34 = vadd.f32 %v6164_v9, %v477_v47  ;;  %v6378_v45 = vadd.f32 %v6339_v14, %v1963_v5  ;;  %v2575_v61 = vmax.f32 %v2574_v60, %v6359_v19  ;;  %v1997_v50 = vmax.f32 %v1485_v21, %v1741_v52  ;;  %v4803_v19 = vld [vmem:[%s6005_s11 + $0x40] sm:$0xff]  }
 0x10c   : > { %v6337_v6 = vpop.permute.xlu1 %554  ;;  %v6344_v57 = vpop.permute.xlu0 %550  ;;  %v6349_v41 = vrot.slane %v6058_v29, %v11482_v33  ;;  %v11485_v33 = vsub.s32 2, %v6013_v3  ;;  %v1710_v16 = vmul.f32 0.2, %v1454_v62  ;;  %v1455_v60 = vadd.f32 %v6125_v48, %v6168_v11 }
 0x10d   : > { %11487 = vst [vmem:[#allocation57_spill] sm:$0xff] %v6378_v45  ;;  %v2538_v47 = vmax.f32 %v2537_v43, %v6378_v45  ;;  %v1742_v5 = vmul.f32 0.2, %v1486_v34  ;;  %v11491_v52 = vsub.s32 4, %v6013_v3  ;;  %v6459_v17 = vunpack.c.h.bf16 %v4803_v19 }
 0x10e   : > { %744 = vbcast.lane.b32.xlu1 %v6084_v37, 376  ;;  %610 = vbcast.lane.b32.xlu0 %v6076_v35, 376  ;;  %v6365_v13 = vrot.slane %v6058_v29, %v11485_v33  ;;  %v6372_v37 = vunpack.c.h.bf16 %v4801_v53  ;;  %v1964_v35 = vmax.f32 %v1452_v32, %v1708_v30  ;;  %v4802_v29 = vld [vmem:[%s6005_s11 + $0x38] sm:$0xff]   ;;  %v1709_v33 = vmul.f32 0.2, %v1453_v4 }
 0x10f   : > { %v1487_v53 = vadd.f32 %v6164_v9, %v484_v55  ;;  %v6387_v54 = vunpack.c.l.bf16 %v4802_v29  ;;  %v6402_v43 = vrot.slane %v6025_v7, %v11491_v52  ;;  %v1998_v40 = vmax.f32 %v1486_v34, %v1742_v5  ;;  %11501 = vst [vmem:[#allocation69_spill] sm:$0xff] %v6459_v17 }
 0x110   : > { %v6370_v28 = vpop.permute.xlu1 %688  ;;  %11486 = vst [vmem:[#allocation56_spill] sm:$0xff] %v6372_v37  ;;  %v6375_v51 = vpop.permute.xlu0 %684  ;;  %v6390_v30 = vadd.f32 %v6372_v37, %v1996_v38  ;;  %v6394_v21 = vadd.f32 %v6372_v37, %v1964_v35  ;;  %v1965_v55 = vmax.f32 %v1453_v4, %v1709_v33  ;;  %v6409_v35 = vunpack.c.h.bf16 %v4802_v29 }
 0x111   : > { %11488 = vst [vmem:[#allocation58_spill] sm:$0xff] %v6387_v54  ;;  %v6406_v45 = vadd.f32 %v6387_v54, %v1997_v50  ;;  %v1743_v20 = vmul.f32 0.2, %v1487_v53  ;;  %v1966_v4 = vmax.f32 %v1454_v62, %v1710_v16  ;;  %v1488_v52 = vadd.f32 %v6164_v9, %v6321_v63 }
 0x112   : > { %751 = vbcast.lane.b32.xlu1 %v6349_v41, 256  ;;  %617 = vbcast.lane.b32.xlu0 %v6365_v13, 256  ;;  %11489 = vst [vmem:[#allocation59_spill] sm:$0xff] %v6390_v30  ;;  %11490 = vst [vmem:[#allocation60_spill] sm:$0xff] %v6394_v21  ;;  %v2576_v38 = vmax.f32 %v2575_v61, %v6390_v30  ;;  %v2539_v11 = vmax.f32 %v2538_v47, %v6394_v21  ;;  %v11494_v50 = vsub.s32 5, %v6013_v3 }
 0x113   : > { %11492 = vst [vmem:[#allocation61_spill] sm:$0xff] %v6406_v45  ;;  %11493 = vst [vmem:[#allocation62_spill] sm:$0xff] %v6409_v35  ;;  %v6426_v62 = vadd.f32 %v6387_v54, %v1965_v55  ;;  %v1456_v29 = vadd.f32 %v6125_v48, %v6160_v8  ;;  %v1711_v47 = vmul.f32 0.2, %v1455_v60  ;;  %v1999_v16 = vmax.f32 %v1487_v53, %v1743_v20  ;;  %v4804_v53 = vld [vmem:[%s6005_s11 + $0x48] sm:$0xff]  }
 0x114   : > { %v492_v32 = vpop.permute.xlu1 %491  ;;  %v358_v12 = vpop.permute.xlu0 %357  ;;  %v6423_v27 = vrot.slane %v6025_v7, %v11494_v50  ;;  %v2577_v63 = vmax.f32 %v2576_v38, %v6406_v45  ;;  %v6435_v7 = vadd.f32 %v6409_v35, %v1966_v4  ;;  %v6438_v5 = vunpack.c.l.bf16 %v4803_v19 }
 0x115   : > { %v1489_v61 = vadd.f32 %v6164_v9, %v492_v32  ;;  %11495 = vst [vmem:[#allocation63_spill] sm:$0xff] %v6426_v62  ;;  %v1457_v34 = vadd.f32 %v6125_v48, %v358_v12  ;;  %v2540_v32 = vmax.f32 %v2539_v11, %v6426_v62  ;;  %v6441_v8 = vadd.f32 %v6409_v35, %v1998_v40 }
 0x116   : > { %755 = vbcast.lane.b32.xlu1 %v6349_v41, 264  ;;  %621 = vbcast.lane.b32.xlu0 %v6365_v13, 264  ;;  %11496 = vst [vmem:[#allocation64_spill] sm:$0xff] %v6435_v7  ;;  %11497 = vst [vmem:[#allocation65_spill] sm:$0xff] %v6438_v5  ;;  %v1744_v12 = vmul.f32 0.2, %v1488_v52  ;;  %v1967_v20 = vmax.f32 %v1455_v60, %v1711_v47  ;;  %v6449_v62 = vadd.f32 %v6438_v5, %v1999_v16 }
 0x117   : > { %11498 = vst [vmem:[#allocation66_spill] sm:$0xff] %v6441_v8  ;;  %v1745_v50 = vmul.f32 0.2, %v1489_v61  ;;  %v1712_v38 = vmul.f32 0.2, %v1456_v29  ;;  %v2578_v11 = vmax.f32 %v2577_v63, %v6441_v8  ;;  %v2541_v39 = vmax.f32 %v2540_v32, %v6435_v7 }
 0x118   : > { %v6412_v33 = vpop.permute.xlu1 %692  ;;  %v6418_v30 = vpop.permute.xlu0 %558  ;;  %v1713_v45 = vmul.f32 0.2, %v1457_v34  ;;  %11499 = vst [vmem:[#allocation67_spill] sm:$0xff] %v6449_v62  ;;  %v2000_v60 = vmax.f32 %v1488_v52, %v1744_v12  ;;  %v6455_v47 = vunpack.c.l.bf16 %v4804_v53  ;;  %v6462_v16 = vadd.f32 %v6438_v5, %v1967_v20  ;;  %v4805_v12 = vld [vmem:[%s6005_s11 + $0x50] sm:$0xff]   ;;  %v4808_v5 = vld [vmem:[%s6005_s11 + $0x68] sm:$0xff]  }
 0x119   : > { %v1968_v63 = vmax.f32 %v1456_v29, %v1712_v38  ;;  %v2579_v32 = vmax.f32 %v2578_v11, %v6449_v62  ;;  %v6466_v7 = vunpack.c.h.bf16 %v4804_v53 }
 0x11a   : > { %822 = vbcast.lane.b32.xlu1 %v6402_v43, 264  ;;  %818 = vbcast.lane.b32.xlu0 %v6402_v43, 256  ;;  %11500 = vst [vmem:[#allocation68_spill] sm:$0xff] %v6455_v47  ;;  %11502 = vst [vmem:[#allocation70_spill] sm:$0xff] %v6462_v16  ;;  %v1969_v8 = vmax.f32 %v1457_v34, %v1713_v45  ;;  %v2542_v52 = vmax.f32 %v2541_v39, %v6462_v16 }
 0x11b   : > { %11503 = vst [vmem:[#allocation71_spill] sm:$0xff] %v6466_v7  ;;  %v6472_v29 = vadd.f32 %v6459_v17, %v2000_v60  ;;  %v6479_v38 = vadd.f32 %v6459_v17, %v1968_v63 }
 0x11c   : > { %v496_v55 = vpop.permute.xlu1 %495  ;;  %v362_v46 = vpop.permute.xlu0 %361 }
 0x11d   : > { %v1490_v21 = vadd.f32 %v6164_v9, %v496_v55  ;;  %v1458_v4 = vadd.f32 %v6125_v48, %v362_v46  ;;  %v2001_v46 = vmax.f32 %v1489_v61, %v1745_v50  ;;  %11504 = vst [vmem:[#allocation72_spill] sm:$0xff] %v6472_v29  ;;  %11506 = vst [vmem:[#allocation74_spill] sm:$0xff] %v6479_v38 }
 0x11e   : > { %956 = vbcast.lane.b32.xlu1 %v6423_v27, 264  ;;  %952 = vbcast.lane.b32.xlu0 %v6423_v27, 256  ;;  %v2580_v20 = vmax.f32 %v2579_v32, %v6472_v29 }
 0x11f   : > { %v1746_v40 = vmul.f32 0.2, %v1490_v21  ;;  %v1714_v55 = vmul.f32 0.2, %v1458_v4  ;;  %v6475_v50 = vadd.f32 %v6455_v47, %v2001_v46 }
 0x120   : > { %v6453_v31 = vpop.permute.xlu1 %696  ;;  %v6457_v56 = vpop.permute.xlu0 %562 }
 0x121   : > { %v2002_v15 = vmax.f32 %v1490_v21, %v1746_v40  ;;  %v1970_v61 = vmax.f32 %v1458_v4, %v1714_v55  ;;  %11505 = vst [vmem:[#allocation73_spill] sm:$0xff] %v6475_v50  ;;  %v6482_v21 = vadd.f32 %v6455_v47, %v1969_v8  ;;  %v6490_v4 = vunpack.c.l.bf16 %v4805_v12 }
 0x122   : > { %759 = vbcast.lane.b32.xlu1 %v6349_v41, 272  ;;  %625 = vbcast.lane.b32.xlu0 %v6365_v13, 272  ;;  %v2543_v40 = vmax.f32 %v2542_v52, %v6479_v38  ;;  %v2581_v46 = vmax.f32 %v2580_v20, %v6475_v50  ;;  %v1506_v54 = vadd.f32 %v6038_v22, %v6457_v56 }
 0x123   : > { %11507 = vst [vmem:[#allocation75_spill] sm:$0xff] %v6482_v21  ;;  %v6488_v53 = vadd.f32 %v6466_v7, %v2002_v15  ;;  %11509 = vst [vmem:[#allocation77_spill] sm:$0xff] %v6490_v4  ;;  %v6495_v55 = vadd.f32 %v6466_v7, %v1970_v61 }
 0x124   : > { %v500_v19 = vpop.permute.xlu1 %499  ;;  %v366_v34 = vpop.permute.xlu0 %365  ;;  %v2544_v15 = vmax.f32 %v2543_v40, %v6482_v21 }
 0x125   : > { %v1491_v45 = vadd.f32 %v6164_v9, %v500_v19  ;;  %v1459_v39 = vadd.f32 %v6125_v48, %v366_v34  ;;  %11508 = vst [vmem:[#allocation76_spill] sm:$0xff] %v6488_v53  ;;  %11510 = vst [vmem:[#allocation78_spill] sm:$0xff] %v6495_v55  ;;  %v2582_v34 = vmax.f32 %v2581_v46, %v6488_v53  ;;  %v6518_v46 = vunpack.c.h.bf16 %v4805_v12 }
 0x126   : > { %960 = vbcast.lane.b32.xlu1 %v6423_v27, 272  ;;  %826 = vbcast.lane.b32.xlu0 %v6402_v43, 272  ;;  %v2545_v61 = vmax.f32 %v2544_v15, %v6495_v55 }
 0x127   : > { %v1747_v11 = vmul.f32 0.2, %v1491_v45  ;;  %v1715_v8 = vmul.f32 0.2, %v1459_v39  ;;  %11513 = vst [vmem:[#allocation81_spill] sm:$0xff] %v6518_v46 }
 0x128   : > { %v6497_v60 = vpop.permute.xlu1 %700  ;;  %v6500_v32 = vpop.permute.xlu0 %566 }
 0x129   : > { %v2003_v63 = vmax.f32 %v1491_v45, %v1747_v11  ;;  %v1971_v19 = vmax.f32 %v1459_v39, %v1715_v8 }
 0x12a   : > { %763 = vbcast.lane.b32.xlu1 %v6349_v41, 280  ;;  %629 = vbcast.lane.b32.xlu0 %v6365_v13, 280 }
 0x12b   : > { %v6506_v52 = vadd.f32 %v6490_v4, %v2003_v63  ;;  %v6511_v7 = vadd.f32 %v6490_v4, %v1971_v19 }
 0x12c   : > { %v504_v45 = vpop.permute.xlu1 %503  ;;  %v370_v39 = vpop.permute.xlu0 %369 }
 0x12d   : > { %11511 = vst [vmem:[#allocation79_spill] sm:$0xff] %v6506_v52  ;;  %11512 = vst [vmem:[#allocation80_spill] sm:$0xff] %v6511_v7  ;;  %v2583_v20 = vmax.f32 %v2582_v34, %v6506_v52  ;;  %v1492_v11 = vadd.f32 %v6164_v9, %v504_v45  ;;  %v2546_v40 = vmax.f32 %v2545_v61, %v6511_v7 }
 0x12e   : > { %v1460_v8 = vadd.f32 %v6125_v48, %v370_v39  ;;  %964 = vbcast.lane.b32.xlu1 %v6423_v27, 280  ;;  %830 = vbcast.lane.b32.xlu0 %v6402_v43, 280  ;;  %v4806_v39 = vld [vmem:[%s6005_s11 + $0x58] sm:$0xff]  }
 0x12f   : > { %v1748_v63 = vmul.f32 0.2, %v1492_v11 }
 0x130   : > { %v1716_v15 = vmul.f32 0.2, %v1460_v8  ;;  %v6521_v19 = vpop.permute.xlu1 %704  ;;  %v6523_v34 = vpop.permute.xlu0 %570 }
 0x131   : > { %v2004_v4 = vmax.f32 %v1492_v11, %v1748_v63 }
 0x132   : > { %v1972_v45 = vmax.f32 %v1460_v8, %v1716_v15  ;;  %767 = vbcast.lane.b32.xlu1 %v6349_v41, 288  ;;  %633 = vbcast.lane.b32.xlu0 %v6365_v13, 288 }
 0x133   : > { %v6527_v61 = vadd.f32 %v6518_v46, %v2004_v4  ;;  %v6539_v4 = vunpack.c.l.bf16 %v4806_v39 }
 0x134   : > { %v6531_v12 = vadd.f32 %v6518_v46, %v1972_v45  ;;  %v508_v47 = vpop.permute.xlu1 %507  ;;  %v374_v11 = vpop.permute.xlu0 %373 }
 0x135   : > { %11514 = vst [vmem:[#allocation82_spill] sm:$0xff] %v6527_v61  ;;  %v2584_v7 = vmax.f32 %v2583_v20, %v6527_v61  ;;  %v1493_v55 = vadd.f32 %v6164_v9, %v508_v47  ;;  %v1461_v8 = vadd.f32 %v6125_v48, %v374_v11  ;;  %11516 = vst [vmem:[#allocation84_spill] sm:$0xff] %v6539_v4 }
 0x136   : > { %11515 = vst [vmem:[#allocation83_spill] sm:$0xff] %v6531_v12  ;;  %v2547_v63 = vmax.f32 %v2546_v40, %v6531_v12  ;;  %968 = vbcast.lane.b32.xlu1 %v6423_v27, 288  ;;  %834 = vbcast.lane.b32.xlu0 %v6402_v43, 288 }
 0x137   : > { %v1749_v15 = vmul.f32 0.2, %v1493_v55  ;;  %v1717_v45 = vmul.f32 0.2, %v1461_v8 }
 0x138   : > { %v6542_v46 = vpop.permute.xlu1 %708  ;;  %v6544_v38 = vpop.permute.xlu0 %574 }
 0x139   : > { %v2005_v21 = vmax.f32 %v1493_v55, %v1749_v15  ;;  %v1973_v20 = vmax.f32 %v1461_v8, %v1717_v45 }
 0x13a   : > { %771 = vbcast.lane.b32.xlu1 %v6349_v41, 296  ;;  %637 = vbcast.lane.b32.xlu0 %v6365_v13, 296 }
 0x13b   : > { %v6548_v47 = vadd.f32 %v6539_v4, %v2005_v21  ;;  %v6552_v40 = vadd.f32 %v6539_v4, %v1973_v20  ;;  %v6559_v21 = vunpack.c.h.bf16 %v4806_v39  ;;  %v4807_v39 = vld [vmem:[%s6005_s11 + $0x60] sm:$0xff]  }
 0x13c   : > { %v512_v11 = vpop.permute.xlu1 %511  ;;  %v378_v61 = vpop.permute.xlu0 %377 }
 0x13d   : > { %11517 = vst [vmem:[#allocation85_spill] sm:$0xff] %v6548_v47  ;;  %11518 = vst [vmem:[#allocation86_spill] sm:$0xff] %v6552_v40  ;;  %v2585_v12 = vmax.f32 %v2584_v7, %v6548_v47  ;;  %v1494_v16 = vadd.f32 %v6164_v9, %v512_v11  ;;  %v2548_v55 = vmax.f32 %v2547_v63, %v6552_v40 }
 0x13e   : > { %v1462_v8 = vadd.f32 %v6125_v48, %v378_v61  ;;  %972 = vbcast.lane.b32.xlu1 %v6423_v27, 296  ;;  %11519 = vst [vmem:[#allocation87_spill] sm:$0xff] %v6559_v21  ;;  %838 = vbcast.lane.b32.xlu0 %v6402_v43, 296 }
 0x13f   : > { %v1750_v15 = vmul.f32 0.2, %v1494_v16 }
 0x140   : > { %v1718_v45 = vmul.f32 0.2, %v1462_v8  ;;  %v6562_v20 = vpop.permute.xlu1 %712  ;;  %v6564_v7 = vpop.permute.xlu0 %578 }
 0x141   : > { %v2006_v4 = vmax.f32 %v1494_v16, %v1750_v15 }
 0x142   : > { %v1974_v11 = vmax.f32 %v1462_v8, %v1718_v45  ;;  %775 = vbcast.lane.b32.xlu1 %v6349_v41, 304  ;;  %641 = vbcast.lane.b32.xlu0 %v6365_v13, 304 }
 0x143   : > { %v6568_v63 = vadd.f32 %v6559_v21, %v2006_v4  ;;  %v6580_v4 = vunpack.c.l.bf16 %v4807_v39 }
 0x144   : > { %v6572_v61 = vadd.f32 %v6559_v21, %v1974_v11  ;;  %v516_v40 = vpop.permute.xlu1 %515  ;;  %v382_v16 = vpop.permute.xlu0 %381  ;;  %v1504_v11 = vadd.f32 %v6038_v22, %v6337_v6  ;;  %v1537_v6 = vadd.f32 %v6044_v25, %v6412_v33 }
 0x145   : > { %11520 = vst [vmem:[#allocation88_spill] sm:$0xff] %v6568_v63  ;;  %v2586_v47 = vmax.f32 %v2585_v12, %v6568_v63  ;;  %v1495_v52 = vadd.f32 %v6164_v9, %v516_v40  ;;  %v1463_v8 = vadd.f32 %v6125_v48, %v382_v16  ;;  %11522 = vst [vmem:[#allocation90_spill] sm:$0xff] %v6580_v4 }
 0x146   : > { %11521 = vst [vmem:[#allocation89_spill] sm:$0xff] %v6572_v61  ;;  %v2549_v15 = vmax.f32 %v2548_v55, %v6572_v61  ;;  %976 = vbcast.lane.b32.xlu1 %v6423_v27, 304  ;;  %842 = vbcast.lane.b32.xlu0 %v6402_v43, 304  ;;  %v1536_v12 = vadd.f32 %v6044_v25, %v6370_v28  ;;  %v1760_v50 = vmul.f32 0.2, %v1504_v11 }
 0x147   : > { %v1751_v45 = vmul.f32 0.2, %v1495_v52  ;;  %v1719_v21 = vmul.f32 0.2, %v1463_v8  ;;  %v1535_v55 = vadd.f32 %v6044_v25, %v6375_v51  ;;  %v1503_v63 = vadd.f32 %v6038_v22, %v6344_v57 }
 0x148   : > { %v6587_v40 = vpop.permute.xlu1 %716  ;;  %v6591_v61 = vpop.permute.xlu0 %582  ;;  %v1792_v29 = vmul.f32 0.2, %v1536_v12  ;;  %v1505_v51 = vadd.f32 %v6038_v22, %v6418_v30  ;;  %v1793_v30 = vmul.f32 0.2, %v1537_v6 }
 0x149   : > { %v2007_v16 = vmax.f32 %v1495_v52, %v1751_v45  ;;  %v1975_v53 = vmax.f32 %v1463_v8, %v1719_v21  ;;  %v1791_v21 = vmul.f32 0.2, %v1535_v55 }
 0x14a   : > { %779 = vbcast.lane.b32.xlu1 %v6349_v41, 312  ;;  %645 = vbcast.lane.b32.xlu0 %v6365_v13, 312  ;;  %v1761_v17 = vmul.f32 0.2, %v1505_v51 }
 0x14b   : > { %v6599_v28 = vadd.f32 %v6580_v4, %v2007_v16  ;;  %v6605_v52 = vadd.f32 %v6580_v4, %v1975_v53  ;;  %v1759_v16 = vmul.f32 0.2, %v1503_v63  ;;  %v6616_v53 = vunpack.c.h.bf16 %v4807_v39 }
 0x14c   : > { %v520_v57 = vpop.permute.xlu1 %519  ;;  %v386_v45 = vpop.permute.xlu0 %385  ;;  %v2047_v35 = vmax.f32 %v1535_v55, %v1791_v21  ;;  %v2017_v56 = vmax.f32 %v1505_v51, %v1761_v17  ;;  %v1762_v17 = vmul.f32 0.2, %v1506_v54 }
 0x14d   : > { %11523 = vst [vmem:[#allocation91_spill] sm:$0xff] %v6599_v28  ;;  %11524 = vst [vmem:[#allocation92_spill] sm:$0xff] %v6605_v52  ;;  %v6608_v8 = vmax.f32 %v2586_v47, %v6599_v28  ;;  %v1496_v33 = vadd.f32 %v6164_v9, %v520_v57  ;;  %v6612_v62 = vmax.f32 %v2549_v15, %v6605_v52 }
 0x14e   : > { %v1464_v26 = vadd.f32 %v6125_v48, %v386_v45  ;;  %980 = vbcast.lane.b32.xlu1 %v6423_v27, 312  ;;  %11525 = vst [vmem:[#allocation93_spill] sm:$0xff] %v6616_v53  ;;  %846 = vbcast.lane.b32.xlu0 %v6402_v43, 312  ;;  %v2016_v47 = vmax.f32 %v1504_v11, %v1760_v50  ;;  %v6633_v11 = vunpack.c.l.bf16 %v4808_v5 }
 0x14f   : > { %v1752_v4 = vmul.f32 0.2, %v1496_v33  ;;  %v2048_v28 = vmax.f32 %v1536_v12, %v1792_v29  ;;  %v1538_v15 = vadd.f32 %v6044_v25, %v6453_v31  ;;  %v2015_v39 = vmax.f32 %v1503_v63, %v1759_v16  ;;  %v4809_v12 = vld [vmem:[%s6005_s11 + $0x70] sm:$0xff]  }
 0x150   : > { %v1720_v23 = vmul.f32 0.2, %v1464_v26  ;;  %v6619_v57 = vpop.permute.xlu1 %720  ;;  %v6624_v52 = vpop.permute.xlu0 %586  ;;  %v2049_v29 = vmax.f32 %v1537_v6, %v1793_v30  ;;  %11526 = vst [vmem:[#allocation94_spill] sm:$0xff] %v6633_v11  ;;  %v6635_v31 = vunpack.c.h.bf16 %v4808_v5  ;;  %v6648_v55 = vadd.f32 %v6152_v1, %v2047_v35 }
 0x151   : > { %v2008_v45 = vmax.f32 %v1496_v33, %v1752_v4  ;;  %v6638_v4 = vadd.f32 %v6145_v59, %v2016_v47  ;;  %v6641_v63 = vadd.f32 %v6145_v59, %v2048_v28  ;;  %v1794_v6 = vmul.f32 0.2, %v1538_v15  ;;  %v6669_v47 = vld [vmem:[%s6005_s11 + $0x78] sm:$0xff]  }
 0x152   : > { %v1976_v37 = vmax.f32 %v1464_v26, %v1720_v23  ;;  %783 = vbcast.lane.b32.xlu1 %v6349_v41, 320  ;;  %649 = vbcast.lane.b32.xlu0 %v6365_v13, 320  ;;  %11527 = vst [vmem:[#allocation95_spill] sm:$0xff] %v6635_v31  ;;  %11531 = vst [vmem:[#allocation99_spill] sm:$0xff] %v6648_v55  ;;  %v6654_v28 = vadd.f32 %v6152_v1, %v2015_v39  ;;  %v6666_v30 = vunpack.c.l.bf16 %v4809_v12 }
 0x153   : > { %v6630_v50 = vadd.f32 %v6616_v53, %v2008_v45  ;;  %11528 = vst [vmem:[#allocation96_spill] sm:$0xff] %v6638_v4  ;;  %11529 = vst [vmem:[#allocation97_spill] sm:$0xff] %v6641_v63  ;;  %v6661_v35 = vadd.f32 %v6166_v10, %v2049_v29  ;;  %v6672_v45 = vadd.f32 %v6166_v10, %v2017_v56  ;;  %v6684_v59 = vunpack.c.h.bf16 %v4809_v12 }
 0x154   : > { %v6644_v23 = vadd.f32 %v6616_v53, %v1976_v37  ;;  %v524_v26 = vpop.permute.xlu1 %523  ;;  %v390_v33 = vpop.permute.xlu0 %389  ;;  %11532 = vst [vmem:[#allocation100_spill] sm:$0xff] %v6654_v28  ;;  %11534 = vst [vmem:[#allocation102_spill] sm:$0xff] %v6666_v30  ;;  %v1540_v39 = vadd.f32 %v6044_v25, %v6521_v19  ;;  %v2601_v56 = vmax.f32 %v6654_v28, %v6638_v4  ;;  %v6690_v19 = vunpack.c.l.bf16 %v6669_v47 }
 0x155   : > { %v2588_v5 = vmax.f32 %v6608_v8, %v6630_v50  ;;  %v1497_v21 = vadd.f32 %v6164_v9, %v524_v26  ;;  %v1465_v51 = vadd.f32 %v6125_v48, %v390_v33  ;;  %11533 = vst [vmem:[#allocation101_spill] sm:$0xff] %v6661_v35  ;;  %v1539_v8 = vadd.f32 %v6044_v25, %v6497_v60 }
 0x156   : > { %11530 = vst [vmem:[#allocation98_spill] sm:$0xff] %v6644_v23  ;;  %v2551_v37 = vmax.f32 %v6612_v62, %v6644_v23  ;;  %984 = vbcast.lane.b32.xlu1 %v6423_v27, 320  ;;  %850 = vbcast.lane.b32.xlu0 %v6402_v43, 320  ;;  %11535 = vst [vmem:[#allocation103_spill] sm:$0xff] %v6672_v45  ;;  %v1507_v62 = vadd.f32 %v6038_v22, %v6500_v32 }
 0x157   : > { %v1753_v16 = vmul.f32 0.2, %v1497_v21  ;;  %v1721_v29 = vmul.f32 0.2, %v1465_v51  ;;  %v2638_v60 = vmax.f32 %v6648_v55, %v6641_v63  ;;  %v2050_v33 = vmax.f32 %v1538_v15, %v1794_v6  ;;  %11536 = vst [vmem:[#allocation104_spill] sm:$0xff] %v6684_v59  ;;  %11537 = vst [vmem:[#allocation105_spill] sm:$0xff] %v6690_v19 }
 0x158   : > { %v6678_v26 = vpop.permute.xlu1 %724  ;;  %v6682_v1 = vpop.permute.xlu0 %590  ;;  %v2018_v10 = vmax.f32 %v1506_v54, %v1762_v17  ;;  %v1795_v63 = vmul.f32 0.2, %v1539_v8  ;;  %v1508_v15 = vadd.f32 %v6038_v22, %v6523_v34  ;;  %v6702_v54 = vmax.f32 %v2601_v56, %v6672_v45 }
 0x159   : > { %v2009_v53 = vmax.f32 %v1497_v21, %v1753_v16  ;;  %v1977_v32 = vmax.f32 %v1465_v51, %v1721_v29  ;;  %v6693_v23 = vmax.f32 %v2638_v60, %v6661_v35  ;;  %v1763_v6 = vmul.f32 0.2, %v1507_v62 }
 0x15a   : > { %787 = vbcast.lane.b32.xlu1 %v6349_v41, 328  ;;  %653 = vbcast.lane.b32.xlu0 %v6365_v13, 328  ;;  %v1796_v21 = vmul.f32 0.2, %v1540_v39  ;;  %v6708_v16 = vadd.f32 %v6179_v18, %v2050_v33  ;;  %v1541_v34 = vadd.f32 %v6044_v25, %v6542_v46  ;;  %v6717_v56 = vadd.f32 %v6179_v18, %v2018_v10  ;;  %v11610_v18 = vld [vmem:[#allocation85_spill] sm:$0xff] }
 0x15b   : > { %v6698_v12 = vadd.f32 %v6633_v11, %v2009_v53  ;;  %v6705_v17 = vadd.f32 %v6633_v11, %v1977_v32  ;;  %v1509_v32 = vadd.f32 %v6038_v22, %v6544_v38  ;;  %v2051_v46 = vmax.f32 %v1539_v8, %v1795_v63 }
 0x15c   : > { %v528_v51 = vpop.permute.xlu1 %527  ;;  %11538 = vst [vmem:[#allocation106_spill] sm:$0xff] %v6708_v16  ;;  %v394_v60 = vpop.permute.xlu0 %393  ;;  %11539 = vst [vmem:[#allocation107_spill] sm:$0xff] %v6717_v56  ;;  %v1764_v4 = vmul.f32 0.2, %v1508_v15  ;;  %v2019_v10 = vmax.f32 %v1507_v62, %v1763_v6  ;;  %v2052_v28 = vmax.f32 %v1540_v39, %v1796_v21  ;;  %v1510_v38 = vadd.f32 %v6038_v22, %v6564_v7 }
 0x15d   : > { %v6713_v53 = vmax.f32 %v2588_v5, %v6698_v12  ;;  %v1498_v29 = vadd.f32 %v6164_v9, %v528_v51  ;;  %v6722_v45 = vmax.f32 %v2551_v37, %v6705_v17  ;;  %v1466_v33 = vadd.f32 %v6125_v48, %v394_v60 }
 0x15e   : > { %988 = vbcast.lane.b32.xlu1 %v6423_v27, 328  ;;  %v1542_v5 = vadd.f32 %v6044_v25, %v6562_v20  ;;  %854 = vbcast.lane.b32.xlu0 %v6402_v43, 328  ;;  %v2640_v60 = vmax.f32 %v6693_v23, %v6708_v16  ;;  %v1797_v55 = vmul.f32 0.2, %v1541_v34  ;;  %v1543_v63 = vadd.f32 %v6044_v25, %v6587_v40 }
 0x15f   : > { %v1754_v51 = vmul.f32 0.2, %v1498_v29  ;;  %v1722_v35 = vmul.f32 0.2, %v1466_v33  ;;  %v2603_v62 = vmax.f32 %v6702_v54, %v6717_v56  ;;  %v1765_v39 = vmul.f32 0.2, %v1509_v32 }
 0x160   : > { %v6731_v37 = vpop.permute.xlu1 %728  ;;  %v6737_v20 = vpop.permute.xlu0 %594  ;;  %v1511_v7 = vadd.f32 %v6038_v22, %v6591_v61  ;;  %v6745_v21 = vadd.f32 %v6190_v49, %v2051_v46  ;;  %v2020_v23 = vmax.f32 %v1508_v15, %v1764_v4  ;;  %v1798_v16 = vmul.f32 0.2, %v1542_v5 }
 0x161   : > { %v2010_v8 = vmax.f32 %v1498_v29, %v1754_v51  ;;  %v1978_v6 = vmax.f32 %v1466_v33, %v1722_v35  ;;  %v6752_v29 = vadd.f32 %v6190_v49, %v2019_v10  ;;  %v6755_v54 = vadd.f32 %v6200_v2, %v2052_v28 }
 0x162   : > { %791 = vbcast.lane.b32.xlu1 %v6349_v41, 336  ;;  %11540 = vst [vmem:[#allocation108_spill] sm:$0xff] %v6745_v21  ;;  %657 = vbcast.lane.b32.xlu0 %v6365_v13, 336  ;;  %v1766_v61 = vmul.f32 0.2, %v1510_v38  ;;  %v2053_v46 = vmax.f32 %v1541_v34, %v1797_v55  ;;  %v2021_v56 = vmax.f32 %v1509_v32, %v1765_v39 }
 0x163   : > { %v6748_v40 = vadd.f32 %v6635_v31, %v2010_v8  ;;  %11541 = vst [vmem:[#allocation109_spill] sm:$0xff] %v6752_v29  ;;  %11542 = vst [vmem:[#allocation110_spill] sm:$0xff] %v6755_v54  ;;  %v6758_v35 = vadd.f32 %v6635_v31, %v1978_v6  ;;  %v1799_v51 = vmul.f32 0.2, %v1543_v63  ;;  %v1767_v11 = vmul.f32 0.2, %v1511_v7 }
 0x164   : > { %v532_v33 = vpop.permute.xlu1 %531  ;;  %v398_v8 = vpop.permute.xlu0 %397  ;;  %v6768_v6 = vadd.f32 %v6200_v2, %v2020_v23  ;;  %v2054_v55 = vmax.f32 %v1542_v5, %v1798_v16  ;;  %v1544_v34 = vadd.f32 %v6044_v25, %v6619_v57  ;;  %v2641_v32 = vmax.f32 %v2640_v60, %v6745_v21 }
 0x165   : > { %v2590_v4 = vmax.f32 %v6713_v53, %v6748_v40  ;;  %v1499_v15 = vadd.f32 %v6164_v9, %v532_v33  ;;  %v2553_v10 = vmax.f32 %v6722_v45, %v6758_v35  ;;  %v1467_v28 = vadd.f32 %v6125_v48, %v398_v8 }
 0x166   : > { %992 = vbcast.lane.b32.xlu1 %v6423_v27, 336  ;;  %11543 = vst [vmem:[#allocation111_spill] sm:$0xff] %v6768_v6  ;;  %858 = vbcast.lane.b32.xlu0 %v6402_v43, 336  ;;  %v2022_v39 = vmax.f32 %v1510_v38, %v1766_v61  ;;  %v1512_v45 = vadd.f32 %v6038_v22, %v6624_v52 }
 0x167   : > { %v1755_v53 = vmul.f32 0.2, %v1499_v15  ;;  %v1723_v33 = vmul.f32 0.2, %v1467_v28  ;;  %v2604_v31 = vmax.f32 %v2603_v62, %v6752_v29  ;;  %v6780_v23 = vadd.f32 %v6222_v42, %v2053_v46 }
 0x168   : > { %v6776_v8 = vpop.permute.xlu1 %732  ;;  %v2055_v16 = vmax.f32 %v1543_v63, %v1799_v51  ;;  %v6782_v57 = vpop.permute.xlu0 %598  ;;  %v2642_v2 = vmax.f32 %v2641_v32, %v6755_v54  ;;  %v6786_v60 = vadd.f32 %v6222_v42, %v2021_v56  ;;  %v2023_v38 = vmax.f32 %v1511_v7, %v1767_v11 }
 0x169   : > { %11544 = vst [vmem:[#allocation112_spill] sm:$0xff] %v6780_v23  ;;  %v2011_v5 = vmax.f32 %v1499_v15, %v1755_v53  ;;  %v1979_v61 = vmax.f32 %v1467_v28, %v1723_v33  ;;  %v2605_v52 = vmax.f32 %v2604_v31, %v6768_v6  ;;  %v6791_v62 = vadd.f32 %v6240_v36, %v2054_v55 }
 0x16a   : > { %11545 = vst [vmem:[#allocation113_spill] sm:$0xff] %v6786_v60  ;;  %795 = vbcast.lane.b32.xlu1 %v6349_v41, 344  ;;  %v1800_v46 = vmul.f32 0.2, %v1544_v34  ;;  %661 = vbcast.lane.b32.xlu0 %v6365_v13, 344  ;;  %v6798_v51 = vadd.f32 %v6240_v36, %v2022_v39  ;;  %v1545_v11 = vadd.f32 %v6044_v25, %v6678_v26  ;;  %v11607_v36 = vld [vmem:[#allocation76_spill] sm:$0xff] }
 0x16b   : > { %11546 = vst [vmem:[#allocation114_spill] sm:$0xff] %v6791_v62  ;;  %v6794_v63 = vadd.f32 %v6666_v30, %v2011_v5  ;;  %v1768_v56 = vmul.f32 0.2, %v1512_v45  ;;  %v6803_v7 = vadd.f32 %v6666_v30, %v1979_v61  ;;  %v2643_v15 = vmax.f32 %v2642_v2, %v6780_v23  ;;  %v11602_v30 = vld [vmem:[#allocation61_spill] sm:$0xff] }
 0x16c   : > { %11547 = vst [vmem:[#allocation115_spill] sm:$0xff] %v6798_v51  ;;  %v536_v31 = vpop.permute.xlu1 %535  ;;  %v6807_v28 = vadd.f32 %v6266_v0, %v2055_v16  ;;  %v402_v32 = vpop.permute.xlu0 %401  ;;  %v2606_v39 = vmax.f32 %v2605_v52, %v6786_v60  ;;  %v6815_v33 = vadd.f32 %v6266_v0, %v2023_v38  ;;  %v2056_v16 = vmax.f32 %v1544_v34, %v1800_v46  ;;  %v11606_v0 = vld [vmem:[#allocation73_spill] sm:$0xff] }
 0x16d   : > { %v6810_v55 = vmax.f32 %v2590_v4, %v6794_v63  ;;  %v1500_v53 = vadd.f32 %v6164_v9, %v536_v31  ;;  %v6818_v26 = vmax.f32 %v2553_v10, %v6803_v7  ;;  %v1468_v5 = vadd.f32 %v6125_v48, %v402_v32 }
 0x16e   : > { %11548 = vst [vmem:[#allocation116_spill] sm:$0xff] %v6807_v28  ;;  %11549 = vst [vmem:[#allocation117_spill] sm:$0xff] %v6815_v33  ;;  %996 = vbcast.lane.b32.xlu1 %v6423_v27, 344  ;;  %v2644_v2 = vmax.f32 %v2643_v15, %v6791_v62  ;;  %v1513_v4 = vadd.f32 %v6038_v22, %v6682_v1  ;;  %862 = vbcast.lane.b32.xlu0 %v6402_v43, 344  ;;  %v1801_v31 = vmul.f32 0.2, %v1545_v11 }
 0x16f   : > { %v1756_v61 = vmul.f32 0.2, %v1500_v53  ;;  %v2607_v52 = vmax.f32 %v2606_v39, %v6798_v51  ;;  %v2024_v38 = vmax.f32 %v1512_v45, %v1768_v56  ;;  %v1724_v60 = vmul.f32 0.2, %v1468_v5  ;;  %v5705_v56 = vld [vmem:[%s10922_s1 + $0x8] sm:$0xff] }
 0x170   : > { %v737_v10 = vpop.permute.xlu1 %736  ;;  %v2645_v6 = vmax.f32 %v2644_v2, %v6807_v28  ;;  %v1546_v32 = vadd.f32 %v6044_v25, %v6731_v37  ;;  %v603_v15 = vpop.permute.xlu0 %602  ;;  %v6831_v34 = vunpack.c.h.bf16 %v6669_v47  ;;  %v1514_v46 = vadd.f32 %v6038_v22, %v6737_v20 }
 0x171   : > { %v2012_v29 = vmax.f32 %v1500_v53, %v1756_v61  ;;  %v6834_v1 = vmax.f32 %v2607_v52, %v6815_v33  ;;  %v1980_v45 = vmax.f32 %v1468_v5, %v1724_v60  ;;  %v11551_v37 = vsub.s32 5, %v6013_v3 }
 0x172   : > { %11550 = vst [vmem:[#allocation118_spill] sm:$0xff] %v6831_v34  ;;  %799 = vbcast.lane.b32.xlu1 %v6349_v41, 352  ;;  %v6847_v47 = vadd.f32 %v6289_v44, %v2056_v16  ;;  %v1769_v39 = vmul.f32 0.2, %v1513_v4  ;;  %665 = vbcast.lane.b32.xlu0 %v6365_v13, 352  ;;  %v11553_v20 = vsub.s32 4, %v6013_v3  ;;  %v6858_v5 = vadd.f32 %v6289_v44, %v2024_v38 }
 0x173   : > { %v6844_v53 = vrot.slane %v5705_v56, %v11551_v37  ;;  %v6850_v2 = vadd.f32 %v6684_v59, %v2012_v29  ;;  %v2057_v61 = vmax.f32 %v1545_v11, %v1801_v31  ;;  %v6861_v52 = vadd.f32 %v6684_v59, %v1980_v45 }
 0x174   : > { %11552 = vst [vmem:[#allocation119_spill] sm:$0xff] %v6847_v47  ;;  %v6855_v60 = vrot.slane %v5705_v56, %v11553_v20  ;;  %11554 = vst [vmem:[#allocation120_spill] sm:$0xff] %v6858_v5  ;;  %v540_v37 = vpop.permute.xlu1 %539  ;;  %v1802_v33 = vmul.f32 0.2, %v1546_v32  ;;  %v1547_v29 = vadd.f32 %v6044_v25, %v6776_v8  ;;  %v406_v20 = vpop.permute.xlu0 %405  ;;  %v1770_v28 = vmul.f32 0.2, %v1514_v46 }
 0x175   : > { %v2592_v51 = vmax.f32 %v6810_v55, %v6850_v2  ;;  %v1501_v56 = vadd.f32 %v6164_v9, %v540_v37  ;;  %v1515_v11 = vadd.f32 %v6038_v22, %v6782_v57  ;;  %v2555_v38 = vmax.f32 %v6818_v26, %v6861_v52 }
 0x176   : > { %v1469_v31 = vadd.f32 %v6125_v48, %v406_v20  ;;  %1000 = vbcast.lane.b32.xlu1 %v6423_v27, 352  ;;  %v2646_v45 = vmax.f32 %v2645_v6, %v6847_v47  ;;  %v2025_v8 = vmax.f32 %v1513_v4, %v1769_v39  ;;  %v1548_v16 = vadd.f32 %v6044_v25, %v737_v10  ;;  %v5706_v4 = vld [vmem:[%s10922_s1] sm:$0xff] }
 0x177   : > { %v1757_v55 = vmul.f32 0.2, %v1501_v56  ;;  %866 = vbcast.lane.b32.xlu0 %v6402_v43, 352  ;;  %v2609_v37 = vmax.f32 %v6834_v1, %v6858_v5  ;;  %v6881_v57 = vadd.f32 %v6304_v24, %v2057_v61  ;;  %v1516_v26 = vadd.f32 %v6038_v22, %v603_v15 }
 0x178   : > { %v1725_v62 = vmul.f32 0.2, %v1469_v31  ;;  %v741_v20 = vpop.permute.xlu1 %740  ;;  %v2058_v23 = vmax.f32 %v1546_v32, %v1802_v33  ;;  %v1803_v54 = vmul.f32 0.2, %v1547_v29  ;;  %v607_v6 = vpop.permute.xlu0 %606  ;;  %v11556_v10 = vsub.s32 6, %v6013_v3 }
 0x179   : > { %11555 = vst [vmem:[#allocation121_spill] sm:$0xff] %v6881_v57  ;;  %v2013_v21 = vmax.f32 %v1501_v56, %v1757_v55  ;;  %v2026_v1 = vmax.f32 %v1514_v46, %v1770_v28  ;;  %v1771_v5 = vmul.f32 0.2, %v1515_v11  ;;  %v6894_v33 = vadd.f32 %v6304_v24, %v2025_v8 }
 0x17a   : > { %v6889_v39 = vrot.slane %v5706_v4, %v11556_v10  ;;  %v1981_v61 = vmax.f32 %v1469_v31, %v1725_v62  ;;  %803 = vbcast.lane.b32.xlu1 %v6349_v41, 360  ;;  %v1804_v32 = vmul.f32 0.2, %v1548_v16  ;;  %v1549_v55 = vadd.f32 %v6044_v25, %v741_v20 }
 0x17b   : > { %11557 = vst [vmem:[#allocation122_spill] sm:$0xff] %v6894_v33  ;;  %v6897_v56 = vadd.f32 %v6690_v19, %v2013_v21  ;;  %669 = vbcast.lane.b32.xlu0 %v6365_v13, 360  ;;  %v2647_v10 = vmax.f32 %v2646_v45, %v6881_v57  ;;  %v1772_v28 = vmul.f32 0.2, %v1516_v26  ;;  %v1517_v46 = vadd.f32 %v6038_v22, %v607_v6 }
 0x17c   : > { %v6903_v62 = vadd.f32 %v6690_v19, %v1981_v61  ;;  %v544_v31 = vpop.permute.xlu1 %543  ;;  %v6907_v8 = vadd.f32 %v6323_v58, %v2058_v23  ;;  %v2059_v15 = vmax.f32 %v1547_v29, %v1803_v54  ;;  %v410_v20 = vpop.permute.xlu0 %409  ;;  %v6912_v59 = vadd.f32 %v6323_v58, %v2026_v1  ;;  %v11603_v58 = vld [vmem:[#allocation66_spill] sm:$0xff] }
 0x17d   : > { %v2593_v21 = vmax.f32 %v2592_v51, %v6897_v56  ;;  %v1502_v47 = vadd.f32 %v6164_v9, %v544_v31  ;;  %v2027_v45 = vmax.f32 %v1515_v11, %v1771_v5  ;;  %v1470_v61 = vadd.f32 %v6125_v48, %v410_v20 }
 0x17e   : > { %11558 = vst [vmem:[#allocation123_spill] sm:$0xff] %v6907_v8  ;;  %11559 = vst [vmem:[#allocation124_spill] sm:$0xff] %v6912_v59  ;;  %v2556_v57 = vmax.f32 %v2555_v38, %v6903_v62  ;;  %1004 = vbcast.lane.b32.xlu1 %v6423_v27, 360  ;;  %v2060_v6 = vmax.f32 %v1548_v16, %v1804_v32  ;;  %v1805_v19 = vmul.f32 0.2, %v1549_v55  ;;  %v11560_v54 = vsub.s32 7, %v6013_v3 }
 0x17f   : > { %v1758_v23 = vmul.f32 0.2, %v1502_v47  ;;  %870 = vbcast.lane.b32.xlu0 %v6402_v43, 360  ;;  %v2610_v9 = vmax.f32 %v2609_v37, %v6894_v33  ;;  %v2028_v29 = vmax.f32 %v1516_v26, %v1772_v28  ;;  %v1773_v1 = vmul.f32 0.2, %v1517_v46  ;;  %v11563_v26 = vld [vmem:[#allocation56_spill] sm:$0xff] }
 0x180   : > { %v6920_v51 = vrot.slane %v5706_v4, %v11560_v54  ;;  %v1726_v5 = vmul.f32 0.2, %v1470_v61  ;;  %v745_v11 = vpop.permute.xlu1 %744  ;;  %v2648_v38 = vmax.f32 %v2647_v10, %v6907_v8  ;;  %v6925_v48 = vadd.f32 %v6339_v14, %v2059_v15  ;;  %v611_v31 = vpop.permute.xlu0 %610 }
 0x181   : > { %v2014_v16 = vmax.f32 %v1502_v47, %v1758_v23  ;;  %v1550_v32 = vadd.f32 %v6044_v25, %v745_v11  ;;  %v2611_v20 = vmax.f32 %v2610_v9, %v6912_v59  ;;  %v6930_v4 = vadd.f32 %v6339_v14, %v2027_v45 }
 0x182   : > { %11561 = vst [vmem:[#allocation125_spill] sm:$0xff] %v6925_v48  ;;  %v1982_v54 = vmax.f32 %v1470_v61, %v1726_v5  ;;  %v1518_v37 = vadd.f32 %v6038_v22, %v611_v31  ;;  %807 = vbcast.lane.b32.xlu1 %v6349_v41, 368  ;;  %v6935_v28 = vadd.f32 %v11563_v26, %v2060_v6 }
 0x183   : > { %11562 = vst [vmem:[#allocation126_spill] sm:$0xff] %v6930_v4  ;;  %v2061_v10 = vmax.f32 %v1549_v55, %v1805_v19  ;;  %v6938_v15 = vadd.f32 %v6831_v34, %v2014_v16  ;;  %v1806_v47 = vmul.f32 0.2, %v1550_v32  ;;  %673 = vbcast.lane.b32.xlu0 %v6365_v13, 368  ;;  %v6942_v23 = vadd.f32 %v11563_v26, %v2028_v29 }
 0x184   : > { %11564 = vst [vmem:[#allocation127_spill] sm:$0xff] %v6935_v28  ;;  %v2029_v45 = vmax.f32 %v1517_v46, %v1773_v1  ;;  %v6945_v61 = vadd.f32 %v6831_v34, %v1982_v54  ;;  %v1774_v9 = vmul.f32 0.2, %v1518_v37  ;;  %v752_v5 = vpop.permute.xlu1 %751  ;;  %v2649_v11 = vmax.f32 %v2648_v38, %v6925_v48  ;;  %v618_v16 = vpop.permute.xlu0 %617  ;;  %v11566_v54 = vld [vmem:[#allocation58_spill] sm:$0xff]  ;;  %v11598_v34 = vld [vmem:[#allocation53_spill] sm:$0xff] }
 0x185   : > { %11565 = vst [vmem:[#allocation128_spill] sm:$0xff] %v6942_v23  ;;  %v2594_v6 = vmax.f32 %v2593_v21, %v6938_v15  ;;  %v2062_v19 = vmax.f32 %v1550_v32, %v1806_v47  ;;  %v1551_v55 = vadd.f32 %v6044_v25, %v752_v5  ;;  %v2612_v31 = vmax.f32 %v2611_v20, %v6930_v4  ;;  %v3890_v5 = vld [vmem:[#allocation2 + $0x18] sm:$0xff] }
 0x186   : > { %v2557_v59 = vmax.f32 %v2556_v57, %v6945_v61  ;;  %v2030_v29 = vmax.f32 %v1518_v37, %v1774_v9  ;;  %v1519_v46 = vadd.f32 %v6038_v22, %v618_v16  ;;  %1008 = vbcast.lane.b32.xlu1 %v6423_v27, 368  ;;  %v2650_v1 = vmax.f32 %v2649_v11, %v6935_v28  ;;  %v3888_v9 = vld [vmem:[#allocation2 + $0x8] sm:$0xff]  ;;  %v11569_v4 = vld [vmem:[#allocation62_spill] sm:$0xff] }
 0x187   : > { %v6956_v33 = vadd.f32 %v11566_v54, %v2061_v10  ;;  %v2595_v38 = vrot.slane %v2594_v6, 4  ;;  %v1807_v21 = vmul.f32 0.2, %v1551_v55  ;;  %874 = vbcast.lane.b32.xlu0 %v6402_v43, 368  ;;  %v2613_v32 = vmax.f32 %v2612_v31, %v6942_v23  ;;  %3967 = vmatprep.mubr.f32.mxu0 %v3888_v9 }
 0x188   : > { %v6961_v20 = vadd.f32 %v11566_v54, %v2029_v45  ;;  %v2558_v57 = vrot.slane %v2557_v59, 4  ;;  %v1775_v37 = vmul.f32 0.2, %v1519_v46  ;;  %v756_v47 = vpop.permute.xlu1 %755  ;;  %v6964_v11 = vadd.f32 %v11569_v4, %v2062_v19  ;;  %v622_v48 = vpop.permute.xlu0 %621  ;;  %4040 = vmatprep.mubr.f32.mxu1 %v3890_v5 }
 0x189   : > { %11567 = vst [vmem:[#allocation129_spill] sm:$0xff] %v6956_v33  ;;  %v2596_v16 = vmax.f32 %v2594_v6, %v2595_v38  ;;  %v2063_v10 = vmax.f32 %v1551_v55, %v1807_v21  ;;  %v1552_v28 = vadd.f32 %v6044_v25, %v756_v47  ;;  %v6968_v31 = vadd.f32 %v11569_v4, %v2030_v29  ;;  %v11572_v38 = vld [vmem:[#allocation65_spill] sm:$0xff] }
 0x18a   : > { %11568 = vst [vmem:[#allocation130_spill] sm:$0xff] %v6961_v20  ;;  %11570 = vst [vmem:[#allocation131_spill] sm:$0xff] %v6964_v11  ;;  %v2559_v8 = vmax.f32 %v2557_v59, %v2558_v57  ;;  %v2031_v45 = vmax.f32 %v1519_v46, %v1775_v37  ;;  %v1520_v23 = vadd.f32 %v6038_v22, %v622_v48  ;;  %811 = vbcast.lane.b32.xlu1 %v6349_v41, 376  ;;  %v11575_v37 = vld [vmem:[#allocation13_spill] sm:$0xff] }
 0x18b   : > { %11571 = vst [vmem:[#allocation132_spill] sm:$0xff] %v6968_v31  ;;  %v2651_v3 = vmax.f32 %v2650_v1, %v6956_v33  ;;  %v2597_v6 = vrot.slane %v2596_v16, 2  ;;  %v6974_v19 = vadd.f32 %v11572_v38, %v2063_v10  ;;  %v1808_v55 = vmul.f32 0.2, %v1552_v28  ;;  %677 = vbcast.lane.b32.xlu0 %v6365_v13, 376  ;;  %v11597_v4 = vld [vmem:[#allocation49_spill] sm:$0xff] }
 0x18c   : > { %v2614_v59 = vmax.f32 %v2613_v32, %v6961_v20  ;;  %v2560_v21 = vrot.slane %v2559_v8, 2  ;;  %v6979_v29 = vadd.f32 %v11572_v38, %v2031_v45  ;;  %v1776_v46 = vmul.f32 0.2, %v1520_v23  ;;  %v823_v48 = vpop.permute.xlu1 %822  ;;  %v819_v9 = vpop.permute.xlu0 %818 }
 0x18d   : > { %11573 = vst [vmem:[#allocation133_spill] sm:$0xff] %v6974_v19  ;;  %v2598_v57 = vmax.f32 %v2596_v16, %v2597_v6  ;;  %v2652_v41 = vmax.f32 %v2651_v3, %v6964_v11  ;;  %v2064_v1 = vmax.f32 %v1552_v28, %v1808_v55  ;;  %v6983_v47 = vadd.f32 %v11575_v37, %v823_v48  ;;  %v11578_v16 = vld [vmem:[#allocation69_spill] sm:$0xff]  ;;  %v11593_v11 = vld [vmem:[#allocation42_spill] sm:$0xff] }
 0x18e   : > { %11574 = vst [vmem:[#allocation134_spill] sm:$0xff] %v6979_v29  ;;  %v2561_v10 = vmax.f32 %v2559_v8, %v2560_v21  ;;  %v2615_v13 = vmax.f32 %v2614_v59, %v6968_v31  ;;  %v2032_v5 = vmax.f32 %v1520_v23, %v1776_v46  ;;  %v6987_v32 = vadd.f32 %v11575_v37, %v819_v9  ;;  %v11589_v46 = vld [vmem:[#allocation34_spill] sm:$0xff] }
 0x18f   : > { %1012 = vbcast.lane.b32.xlu1 %v6423_v27, 376  ;;  %v2599_v45 = vrot.slane %v2598_v57, 1  ;;  %v6991_v20 = vmax.f32 %v2652_v41, %v6974_v19  ;;  %v6994_v3 = vadd.f32 %v11578_v16, %v2064_v1  ;;  %v6997_v28 = vmul.f32 0.2, %v6983_v47  ;;  %878 = vbcast.lane.b32.xlu0 %v6402_v43, 376  ;;  %v11583_v43 = vld [vmem:[#allocation15_spill] sm:$0xff] }
 0x190   : > { %11576 = vst [vmem:[#allocation135_spill] sm:$0xff] %v6987_v32  ;;  %v2562_v8 = vrot.slane %v2561_v10, 1  ;;  %v7001_v23 = vmax.f32 %v2615_v13, %v6979_v29  ;;  %v7004_v6 = vadd.f32 %v11578_v16, %v2032_v5  ;;  %v7007_v27 = vmul.f32 0.2, %v6987_v32  ;;  %v957_v55 = vpop.permute.xlu1 %956  ;;  %v953_v41 = vpop.permute.xlu0 %952  ;;  %v11586_v5 = vld [vmem:[#allocation29_spill] sm:$0xff]  ;;  %v11590_v13 = vld [vmem:[#allocation36_spill] sm:$0xff] }
 0x191   : > { %11577 = vst [vmem:[#allocation136_spill] sm:$0xff] %v6991_v20  ;;  %11579 = vst [vmem:[#allocation137_spill] sm:$0xff] %v6994_v3  ;;  %v7009_v59 = vmax.f32 %v2598_v57, %v2599_v45  ;;  %v7016_v48 = vadd.f32 %v11583_v43, %v957_v55  ;;  %v7025_v57 = vadd.f32 %v11583_v43, %v953_v41  ;;  %v11587_v55 = vld [vmem:[#allocation28_spill] sm:$0xff]  ;;  %v11591_v29 = vld [vmem:[#allocation38_spill] sm:$0xff] }
 0x192   : > { %11580 = vst [vmem:[#allocation138_spill] sm:$0xff] %v7001_v23  ;;  %11581 = vst [vmem:[#allocation139_spill] sm:$0xff] %v7004_v6  ;;  %v7018_v1 = vmax.f32 %v2561_v10, %v2562_v8  ;;  %v11588_v10 = vld [vmem:[#allocation33_spill] sm:$0xff]  ;;  %v11611_v6 = vld [vmem:[#allocation88_spill] sm:$0xff] }
 0x193   : > { %11582 = vst [vmem:[#allocation140_spill] sm:$0xff] %v7007_v27  ;;  %11584 = vst [vmem:[#allocation141_spill] sm:$0xff] %v7016_v48  ;;  %1019 = vbcast.lane.b32.xlu1 %v6844_v53, 256  ;;  %v2855_v45 = vsub.f32 %v11586_v5, %v7009_v59  ;;  %v2856_v21 = vsub.f32 %v11587_v55, %v7009_v59  ;;  %v2857_v8 = vsub.f32 %v11588_v10, %v7009_v59  ;;  %v11592_v19 = vld [vmem:[#allocation41_spill] sm:$0xff]  ;;  %v11595_v10 = vld [vmem:[#allocation43_spill] sm:$0xff] }
 0x194   : > { %11585 = vst [vmem:[#allocation142_spill] sm:$0xff] %v7025_v57  ;;  %v2858_v9 = vsub.f32 %v11589_v46, %v7009_v59  ;;  %885 = vbcast.lane.b32.xlu0 %v6855_v60, 256  ;;  %v2859_v41 = vsub.f32 %v11590_v13, %v7009_v59  ;;  %v2860_v31 = vsub.f32 %v11591_v29, %v7009_v59  ;;  %v7045_v33 = vpop.permute.xlu1 %759  ;;  %v11596_v46 = vld [vmem:[#allocation47_spill] sm:$0xff]  ;;  %v7055_v54 = vpop.permute.xlu0 %625 }
 0x195   : > { %v2861_v5 = vsub.f32 %v11592_v19, %v7009_v59  ;;  %v2862_v55 = vsub.f32 %v11593_v11, %v7009_v59  ;;  %11594 = vst [vmem:[#allocation29_spill] sm:$0xff] %v7045_v33  ;;  %v2863_v16 = vsub.f32 %v11595_v10, %v7009_v59  ;;  %v2864_v38 = vsub.f32 %v11596_v46, %v7009_v59  ;;  %v11600_v19 = vld [vmem:[#allocation55_spill] sm:$0xff] }
 0x196   : > { %v2865_v13 = vsub.f32 %v11597_v4, %v7009_v59  ;;  %v2866_v29 = vsub.f32 %v11598_v34, %v7009_v59  ;;  %11599 = vst [vmem:[#allocation28_spill] sm:$0xff] %v7055_v54  ;;  %v2867_v26 = vsub.f32 %v11600_v19, %v7009_v59  ;;  %v11601_v11 = vld [vmem:[#allocation59_spill] sm:$0xff]  ;;  %v2869_v10 = vsub.f32 %v11602_v30, %v7009_v59  ;;  %v11605_v34 = vld [vmem:[#allocation72_spill] sm:$0xff] }
 0x197   : > { %v2868_v14 = vsub.f32 %v11601_v11, %v7009_v59  ;;  %v2870_v46 = vsub.f32 %v11603_v58, %v7009_v59  ;;  %1023 = vbcast.lane.b32.xlu1 %v6844_v53, 264  ;;  %v11604_v4 = vld [vmem:[#allocation67_spill] sm:$0xff]  ;;  %v2872_v44 = vsub.f32 %v11605_v34, %v7009_v59  ;;  %v2873_v19 = vsub.f32 %v11606_v0, %v7009_v59  ;;  %v11609_v58 = vld [vmem:[#allocation82_spill] sm:$0xff]  ;;  %v11616_v54 = vld [vmem:[#allocation20_spill] sm:$0xff] }
 0x198   : > { %v2871_v24 = vsub.f32 %v11604_v4, %v7009_v59  ;;  %v2874_v11 = vsub.f32 %v11607_v36, %v7009_v59  ;;  %889 = vbcast.lane.b32.xlu0 %v6855_v60, 264  ;;  %v11608_v30 = vld [vmem:[#allocation79_spill] sm:$0xff]  ;;  %v2876_v49 = vsub.f32 %v11609_v58, %v7009_v59  ;;  %v2877_v4 = vsub.f32 %v11610_v18, %v7009_v59  ;;  %v7083_v23 = vpop.permute.xlu1 %960  ;;  %v7093_v20 = vpop.permute.xlu0 %826 }
 0x199   : > { %v2875_v42 = vsub.f32 %v11608_v30, %v7009_v59  ;;  %v2878_v34 = vsub.f32 %v11611_v6, %v7009_v59  ;;  %11612 = vst [vmem:[#allocation33_spill] sm:$0xff] %v7083_v23  ;;  %v11613_v0 = vld [vmem:[#allocation91_spill] sm:$0xff]  ;;  %v2880_v36 = vsub.f32 %v6630_v50, %v7009_v59  ;;  %v2881_v30 = vsub.f32 %v6698_v12, %v7009_v59 }
 0x19a   : > { %v2879_v3 = vsub.f32 %v11613_v0, %v7009_v59  ;;  %v2882_v58 = vsub.f32 %v6748_v40, %v7009_v59  ;;  %11614 = vst [vmem:[#allocation34_spill] sm:$0xff] %v7093_v20  ;;  %v2883_v18 = vsub.f32 %v6794_v63, %v7009_v59  ;;  %v2884_v6 = vsub.f32 %v6850_v2, %v7009_v59  ;;  %v11615_v40 = vld [vmem:[#allocation22_spill] sm:$0xff] }
 0x19b   : > { %v2885_v0 = vsub.f32 %v6897_v56, %v7009_v59  ;;  %v2886_v50 = vsub.f32 %v6938_v15, %v7009_v59  ;;  %1090 = vbcast.lane.b32.xlu1 %v6889_v39, 264  ;;  %v3143_v12 = vmul.f32 1.442695, %v2855_v45  ;;  %v3145_v37 = vmul.f32 1.442695, %v2856_v21 }
 0x19c   : > { %v3147_v43 = vmul.f32 1.442695, %v2857_v8  ;;  %v3149_v23 = vmul.f32 1.442695, %v2858_v9  ;;  %v3151_v22 = vmul.f32 1.442695, %v2859_v41  ;;  %v7108_v25 = vpop.permute.xlu1 %763  ;;  %v7110_v59 = vpop.permute.xlu0 %629 }
 0x19d   : > { %v3153_v63 = vmul.f32 1.442695, %v2860_v31  ;;  %11617 = vst [vmem:[#allocation36_spill] sm:$0xff] %v7108_v25  ;;  %5161 = vpow2.f32 %v3143_v12  ;;  %v3155_v56 = vmul.f32 1.442695, %v2861_v5  ;;  %11618 = vst [vmem:[#allocation38_spill] sm:$0xff] %v7110_v59 }
 0x19e   : > { %v3157_v33 = vmul.f32 1.442695, %v2862_v55  ;;  %v3159_v15 = vmul.f32 1.442695, %v2863_v16  ;;  %5163 = vpow2.f32 %v3145_v37  ;;  %v3161_v21 = vmul.f32 1.442695, %v2864_v38 }
 0x19f   : > { %v3163_v45 = vmul.f32 1.442695, %v2865_v13  ;;  %v3165_v8 = vmul.f32 1.442695, %v2866_v29  ;;  %5165 = vpow2.f32 %v3147_v43  ;;  %v3167_v20 = vmul.f32 1.442695, %v2867_v26 }
 0x1a0   : > { %v3169_v9 = vmul.f32 1.442695, %v2868_v14  ;;  %v3171_v41 = vmul.f32 1.442695, %v2869_v10  ;;  %5167 = vpow2.f32 %v3149_v23  ;;  %v3173_v31 = vmul.f32 1.442695, %v2870_v46  ;;  %v7116_v12 = vpop.permute.xlu1 %964  ;;  %v7124_v37 = vpop.permute.xlu0 %830 }
 0x1a1   : > { %v7112_v57 = vmul.f32 1.442695, %v2871_v24  ;;  %v7114_v2 = vmul.f32 1.442695, %v2872_v44  ;;  %11619 = vst [vmem:[#allocation41_spill] sm:$0xff] %v7116_v12  ;;  %5169 = vpow2.f32 %v3151_v22  ;;  %11620 = vst [vmem:[#allocation42_spill] sm:$0xff] %v7124_v37 }
 0x1a2   : > { %v7118_v16 = vmul.f32 1.442695, %v2873_v19  ;;  %v7120_v5 = vmul.f32 1.442695, %v2874_v11  ;;  %v7122_v38 = vmul.f32 1.442695, %v2875_v42  ;;  %5171 = vpow2.f32 %v3153_v63 }
 0x1a3   : > { %v7126_v14 = vmul.f32 1.442695, %v2876_v49  ;;  %v7128_v26 = vmul.f32 1.442695, %v2877_v4  ;;  %v7130_v24 = vmul.f32 1.442695, %v2878_v34  ;;  %5173 = vpow2.f32 %v3155_v56 }
 0x1a4   : > { %v7132_v44 = vmul.f32 1.442695, %v2879_v3  ;;  %v7134_v23 = vmul.f32 1.442695, %v2880_v36  ;;  %v7136_v22 = vmul.f32 1.442695, %v2881_v30  ;;  %5175 = vpow2.f32 %v3157_v33  ;;  %v7144_v49 = vpop.permute.xlu1 %767  ;;  %v7154_v33 = vpop.permute.xlu0 %633 }
 0x1a5   : > { %v7138_v43 = vmul.f32 1.442695, %v2882_v58  ;;  %v7140_v42 = vmul.f32 1.442695, %v2883_v18  ;;  %v7142_v55 = vmul.f32 1.442695, %v2884_v6  ;;  %5177 = vpow2.f32 %v3159_v15 }
 0x1a6   : > { %11621 = vst [vmem:[#allocation43_spill] sm:$0xff] %v7144_v49  ;;  %v7146_v13 = vmul.f32 1.442695, %v2885_v0  ;;  %v7148_v29 = vmul.f32 1.442695, %v2886_v50  ;;  %v11622_v3 = vld [vmem:[#allocation24_spill] sm:$0xff]  ;;  %5179 = vpow2.f32 %v3161_v21 }
 0x1a7   : > { %1086 = vbcast.lane.b32.xlu0 %v6889_v39, 256  ;;  %1224 = vbcast.lane.b32.xlu1 %v6920_v51, 264  ;;  %11623 = vst [vmem:[#allocation47_spill] sm:$0xff] %v7154_v33  ;;  %v11624_v46 = vld [vmem:[#allocation26_spill] sm:$0xff]  ;;  %v11626_v34 = vld [vmem:[#allocation31_spill] sm:$0xff]  ;;  %5181 = vpow2.f32 %v3163_v45  ;;  %v11627_v30 = vld [vmem:[#allocation37_spill] sm:$0xff] }
 0x1a8   : > { %v2826_v19 = vsub.f32 %v11624_v46, %v7018_v1  ;;  %v11625_v11 = vld [vmem:[#allocation30_spill] sm:$0xff]  ;;  %v11628_v18 = vld [vmem:[#allocation39_spill] sm:$0xff]  ;;  %v11629_v0 = vld [vmem:[#allocation45_spill] sm:$0xff]  ;;  %5183 = vpow2.f32 %v3165_v8  ;;  %v7174_v45 = vpop.permute.xlu1 %968  ;;  %v7184_v21 = vpop.permute.xlu0 %834 }
 0x1a9   : > { %v11630_v63 = vld [vmem:[#allocation48_spill] sm:$0xff]  ;;  %v11631_v15 = vld [vmem:[#allocation51_spill] sm:$0xff]  ;;  %v11632_v46 = vld [vmem:[#allocation54_spill] sm:$0xff]  ;;  %11633 = vst [vmem:[#allocation49_spill] sm:$0xff] %v7174_v45  ;;  %5185 = vpow2.f32 %v3167_v20 }
 0x1aa   : > { %v11634_v58 = vld [vmem:[#allocation57_spill] sm:$0xff]  ;;  %v11635_v6 = vld [vmem:[#allocation60_spill] sm:$0xff]  ;;  %v11636_v8 = vld [vmem:[#allocation63_spill] sm:$0xff]  ;;  %11637 = vst [vmem:[#allocation53_spill] sm:$0xff] %v7184_v21  ;;  %v7186_v56 = vpop.eup %5161  ;;  %5187 = vpow2.f32 %v3169_v9 }
 0x1ab   : > { %1220 = vbcast.lane.b32.xlu0 %v6920_v51, 256  ;;  %1027 = vbcast.lane.b32.xlu1 %v6844_v53, 272  ;;  %11638 = vst [vmem:[#allocation55_spill] sm:$0xff] %v7186_v56  ;;  %v11639_v20 = vld [vmem:[#allocation64_spill] sm:$0xff]  ;;  %v11640_v4 = vld [vmem:[#allocation70_spill] sm:$0xff]  ;;  %v7194_v49 = vpop.eup %5163  ;;  %5189 = vpow2.f32 %v3171_v41  ;;  %v11643_v50 = vld [vmem:[#allocation75_spill] sm:$0xff] }
 0x1ac   : > { %v11641_v10 = vld [vmem:[#allocation74_spill] sm:$0xff]  ;;  %11642 = vst [vmem:[#allocation59_spill] sm:$0xff] %v7194_v49  ;;  %v11645_v9 = vld [vmem:[#allocation80_spill] sm:$0xff]  ;;  %v7202_v25 = vpop.eup %5165  ;;  %5191 = vpow2.f32 %v3173_v31  ;;  %v3628_v45 = vadd.f32 %v7194_v49, %v7186_v56  ;;  %v11647_v33 = vld [vmem:[#allocation83_spill] sm:$0xff]  ;;  %v7210_v27 = vpop.permute.xlu1 %771 }
 0x1ad   : > { %v11644_v21 = vld [vmem:[#allocation78_spill] sm:$0xff]  ;;  %11646 = vst [vmem:[#allocation61_spill] sm:$0xff] %v7202_v25  ;;  %11649 = vst [vmem:[#allocation66_spill] sm:$0xff] %v7210_v27  ;;  %v7212_v37 = vpop.eup %5167  ;;  %5193 = vpow2.f32 %v7112_v57  ;;  %v11651_v59 = vld [vmem:[#allocation89_spill] sm:$0xff]  ;;  %v7223_v48 = vpop.permute.xlu0 %637 }
 0x1ae   : > { %v11648_v41 = vld [vmem:[#allocation86_spill] sm:$0xff]  ;;  %11650 = vst [vmem:[#allocation67_spill] sm:$0xff] %v7212_v37  ;;  %v11652_v31 = vld [vmem:[#allocation92_spill] sm:$0xff]  ;;  %11654 = vst [vmem:[#allocation72_spill] sm:$0xff] %v7223_v48  ;;  %v7225_v36 = vpop.eup %5169  ;;  %5195 = vpow2.f32 %v7114_v2  ;;  %v3629_v57 = vadd.f32 %v7202_v25, %v3628_v45  ;;  %v11661_v2 = vsub.f32 %v11616_v54, %v7018_v1  ;;  %v11665_v54 = vsub.f32 %v11625_v11, %v7018_v1 }
 0x1af   : > { %v11653_v56 = vld [vmem:[#allocation98_spill] sm:$0xff]  ;;  %893 = vbcast.lane.b32.xlu0 %v6855_v60, 272  ;;  %1228 = vbcast.lane.b32.xlu1 %v6920_v51, 272  ;;  %11655 = vst [vmem:[#allocation73_spill] sm:$0xff] %v7225_v36  ;;  %v7233_v27 = vpop.eup %5171  ;;  %5197 = vpow2.f32 %v7118_v16  ;;  %v11658_v16 = vsub.f32 %v11615_v40, %v7018_v1  ;;  %v11669_v11 = vsub.f32 %v11628_v18, %v7018_v1 }
 0x1b0   : > { %11656 = vst [vmem:[#allocation76_spill] sm:$0xff] %v7233_v27  ;;  %v7242_v45 = vpop.eup %5173  ;;  %5199 = vpow2.f32 %v7120_v5  ;;  %v3630_v12 = vadd.f32 %v7212_v37, %v3629_v57  ;;  %v7253_v49 = vpop.permute.xlu1 %972  ;;  %v7261_v5 = vmul.f32 1.442695, %v11661_v2  ;;  %v11662_v57 = vsub.f32 %v11622_v3, %v7018_v1 }
 0x1b1   : > { %11657 = vst [vmem:[#allocation79_spill] sm:$0xff] %v7242_v45  ;;  %v7251_v25 = vmul.f32 1.442695, %v11658_v16  ;;  %11659 = vst [vmem:[#allocation82_spill] sm:$0xff] %v7253_v49  ;;  %v7255_v48 = vpop.eup %5175  ;;  %5201 = vpow2.f32 %v7122_v38  ;;  %v7268_v37 = vmul.f32 1.442695, %v2826_v19  ;;  %v7270_v40 = vpop.permute.xlu0 %838  ;;  %v11666_v3 = vsub.f32 %v11626_v34, %v7018_v1 }
 0x1b2   : > { %11660 = vst [vmem:[#allocation85_spill] sm:$0xff] %v7255_v48  ;;  %v7266_v32 = vmul.f32 1.442695, %v11662_v57  ;;  %11663 = vst [vmem:[#allocation88_spill] sm:$0xff] %v7270_v40  ;;  %v7272_v16 = vpop.eup %5177  ;;  %5203 = vpow2.f32 %v7126_v14  ;;  %v3631_v38 = vadd.f32 %v7225_v36, %v3630_v12  ;;  %v7279_v2 = vmul.f32 1.442695, %v11665_v54 }
 0x1b3   : > { %11664 = vst [vmem:[#allocation91_spill] sm:$0xff] %v7272_v16  ;;  %v7284_v57 = vmul.f32 1.442695, %v11666_v3  ;;  %1094 = vbcast.lane.b32.xlu0 %v6889_v39, 272  ;;  %1031 = vbcast.lane.b32.xlu1 %v6844_v53, 280  ;;  %v7288_v19 = vpop.eup %5179  ;;  %5205 = vpow2.f32 %v7128_v26  ;;  %v11668_v12 = vsub.f32 %v11627_v30, %v7018_v1  ;;  %v11670_v34 = vsub.f32 %v11629_v0, %v7018_v1 }
 0x1b4   : > { %11667 = vst [vmem:[#allocation22_spill] sm:$0xff] %v7288_v19  ;;  %v7299_v54 = vmul.f32 1.442695, %v11669_v11  ;;  %v7306_v36 = vpop.eup %5181  ;;  %5207 = vpow2.f32 %v7130_v24  ;;  %v3632_v26 = vadd.f32 %v7233_v27, %v3631_v38  ;;  %v11671_v30 = vsub.f32 %v11630_v63, %v7018_v1  ;;  %v7320_v40 = vpop.permute.xlu1 %775 }
 0x1b5   : > { %v7294_v14 = vmul.f32 1.442695, %v11668_v12  ;;  %v7304_v3 = vmul.f32 1.442695, %v11670_v34  ;;  %v11672_v18 = vsub.f32 %v11631_v15, %v7018_v1  ;;  %11673 = vst [vmem:[#allocation20_spill] sm:$0xff] %v7320_v40  ;;  %v7322_v0 = vpop.eup %5183  ;;  %5209 = vpow2.f32 %v7132_v44 }
 0x1b6   : > { %v7313_v12 = vmul.f32 1.442695, %v11671_v30  ;;  %v11674_v24 = vsub.f32 %v11632_v46, %v7018_v1  ;;  %v11675_v63 = vsub.f32 %v11634_v58, %v7018_v1  ;;  %v11676_v15 = vsub.f32 %v11635_v6, %v7018_v1  ;;  %v7342_v27 = vpop.eup %5185 }
 0x1b7   : > { %v7318_v11 = vmul.f32 1.442695, %v11672_v18  ;;  %v7340_v18 = vpop.permute.xlu0 %641  ;;  %5211 = vpow2.f32 %v7134_v23  ;;  %v3633_v44 = vadd.f32 %v7242_v45, %v3632_v26  ;;  %v11678_v46 = vsub.f32 %v11636_v8, %v7018_v1  ;;  %897 = vbcast.lane.b32.xlu0 %v6855_v60, 280  ;;  %1232 = vbcast.lane.b32.xlu1 %v6920_v51, 280  ;;  %v7358_v6 = vpop.eup %5187  ;;  %v11711_v45 = vld [vmem:[#allocation19_spill] sm:$0xff] }
 0x1b8   : > { %v7328_v38 = vmul.f32 1.442695, %v11674_v24  ;;  %v7333_v34 = vmul.f32 1.442695, %v11675_v63  ;;  %v7338_v30 = vmul.f32 1.442695, %v11676_v15  ;;  %v11679_v58 = vsub.f32 %v11639_v20, %v7018_v1 }
 0x1b9   : > { %11677 = vst [vmem:[#allocation24_spill] sm:$0xff] %v7340_v18  ;;  %v7349_v24 = vmul.f32 1.442695, %v11678_v46  ;;  %5213 = vpow2.f32 %v7136_v22  ;;  %v11680_v23 = vsub.f32 %v11640_v4, %v7018_v1  ;;  %v11681_v8 = vsub.f32 %v11641_v10, %v7018_v1  ;;  %v7390_v18 = vpop.permute.xlu1 %976 }
 0x1ba   : > { %v7354_v63 = vmul.f32 1.442695, %v11679_v58  ;;  %v11682_v20 = vsub.f32 %v11643_v50, %v7018_v1  ;;  %v7376_v58 = vpop.eup %5189  ;;  %5215 = vpow2.f32 %v7138_v43  ;;  %v3634_v22 = vadd.f32 %v7255_v48, %v3633_v44  ;;  %11685 = vst [vmem:[#allocation26_spill] sm:$0xff] %v7390_v18 }
 0x1bb   : > { %v7364_v26 = vmul.f32 1.442695, %v11680_v23  ;;  %v7369_v15 = vmul.f32 1.442695, %v11681_v8  ;;  %v11683_v4 = vsub.f32 %v11644_v21, %v7018_v1  ;;  %v11684_v10 = vsub.f32 %v11645_v9, %v7018_v1  ;;  %v7392_v50 = vpop.eup %5191  ;;  %1098 = vbcast.lane.b32.xlu0 %v6889_v39, 280  ;;  %1035 = vbcast.lane.b32.xlu1 %v6844_v53, 288 }
 0x1bc   : > { %v7374_v46 = vmul.f32 1.442695, %v11682_v20  ;;  %5217 = vpow2.f32 %v7140_v42  ;;  %v11686_v43 = vsub.f32 %v11647_v33, %v7018_v1  ;;  %v11687_v21 = vsub.f32 %v11648_v41, %v7018_v1  ;;  %v7412_v18 = vpop.eup %5193 }
 0x1bd   : > { %v7383_v23 = vmul.f32 1.442695, %v11683_v4  ;;  %v7388_v8 = vmul.f32 1.442695, %v11684_v10  ;;  %v11688_v9 = vsub.f32 %v11651_v59, %v7018_v1  ;;  %v7410_v10 = vpop.permute.xlu0 %842  ;;  %5219 = vpow2.f32 %v7142_v55  ;;  %v7428_v59 = vpop.eup %5195 }
 0x1be   : > { %v7398_v44 = vmul.f32 1.442695, %v11686_v43  ;;  %v7403_v20 = vmul.f32 1.442695, %v11687_v21  ;;  %11689 = vst [vmem:[#allocation30_spill] sm:$0xff] %v7410_v10  ;;  %v3635_v42 = vadd.f32 %v7272_v16, %v3634_v22  ;;  %v11690_v33 = vsub.f32 %v11652_v31, %v7018_v1  ;;  %v7460_v10 = vpop.permute.xlu1 %779 }
 0x1bf   : > { %v7408_v4 = vmul.f32 1.442695, %v11688_v9  ;;  %v11691_v41 = vsub.f32 %v11653_v56, %v7018_v1  ;;  %5221 = vpow2.f32 %v7146_v13  ;;  %v11692_v55 = vsub.f32 %v6705_v17, %v7018_v1  ;;  %11702 = vst [vmem:[#allocation51_spill] sm:$0xff] %v7460_v10  ;;  %901 = vbcast.lane.b32.xlu0 %v6855_v60, 288  ;;  %1236 = vbcast.lane.b32.xlu1 %v6920_v51, 288 }
 0x1c0   : > { %v7419_v43 = vmul.f32 1.442695, %v11690_v33  ;;  %v11694_v31 = vsub.f32 %v6758_v35, %v7018_v1  ;;  %v11696_v56 = vsub.f32 %v6803_v7, %v7018_v1  ;;  %5223 = vpow2.f32 %v7148_v29 }
 0x1c1   : > { %v7424_v21 = vmul.f32 1.442695, %v11691_v41  ;;  %v7434_v22 = vmul.f32 1.442695, %v11692_v55  ;;  %v7446_v41 = vpop.eup %5197  ;;  %v3636_v13 = vadd.f32 %v7288_v19, %v3635_v42  ;;  %v11698_v17 = vsub.f32 %v6861_v52, %v7018_v1  ;;  %v7482_v49 = vpop.permute.xlu0 %645 }
 0x1c2   : > { %v7439_v9 = vmul.f32 1.442695, %v11694_v31  ;;  %v7444_v33 = vmul.f32 1.442695, %v11696_v56  ;;  %v11700_v35 = vsub.f32 %v6903_v62, %v7018_v1  ;;  %v7462_v7 = vpop.eup %5199  ;;  %5225 = vpow2.f32 %v7251_v25  ;;  %v11706_v56 = vld [vmem:[#allocation18_spill] sm:$0xff]  ;;  %v11708_v62 = vld [vmem:[#allocation135_spill] sm:$0xff] }
 0x1c3   : > { %11693 = vst [vmem:[#allocation31_spill] sm:$0xff] %v7434_v22  ;;  %v7453_v55 = vmul.f32 1.442695, %v11698_v17  ;;  %v11703_v29 = vsub.f32 %v6945_v61, %v7018_v1  ;;  %v11705_v52 = vmax.f32 %v6983_v47, %v6997_v28  ;;  %11713 = vst [vmem:[#allocation63_spill] sm:$0xff] %v7482_v49  ;;  %v7484_v25 = vpop.eup %5201  ;;  %v3637_v61 = vadd.f32 %v7306_v36, %v3636_v13  ;;  %v11714_v1 = vld [vmem:[#allocation141_spill] sm:$0xff]  ;;  %v11715_v47 = vld [vmem:[#allocation142_spill] sm:$0xff] }
 0x1c4   : > { %11695 = vst [vmem:[#allocation37_spill] sm:$0xff] %v7439_v9  ;;  %11697 = vst [vmem:[#allocation39_spill] sm:$0xff] %v7444_v33  ;;  %v7458_v31 = vmul.f32 1.442695, %v11700_v35  ;;  %v11709_v35 = vld [vmem:[#allocation140_spill] sm:$0xff]  ;;  %5227 = vpow2.f32 %v7261_v5  ;;  %v11722_v9 = vld [vmem:[#allocation33_spill] sm:$0xff] }
 0x1c5   : > { %11699 = vst [vmem:[#allocation45_spill] sm:$0xff] %v7453_v55  ;;  %v7468_v42 = vmul.f32 1.442695, %v11703_v29  ;;  %v7474_v17 = vadd.f32 %v11706_v56, %v11705_v52  ;;  %v11710_v40 = vmax.f32 %v11708_v62, %v11709_v35  ;;  %v1856_v29 = vmul.f32 0.2, %v11714_v1  ;;  %v7492_v52 = vpop.eup %5203  ;;  %v11716_v62 = vld [vmem:[#allocation29_spill] sm:$0xff]  ;;  %v7514_v22 = vpop.permute.xlu0 %846 }
 0x1c6   : > { %11701 = vst [vmem:[#allocation48_spill] sm:$0xff] %v7458_v31  ;;  %v1855_v28 = vmul.f32 0.2, %v11715_v47  ;;  %5229 = vpow2.f32 %v7266_v32  ;;  %v11717_v35 = vld [vmem:[#allocation14_spill] sm:$0xff]  ;;  %v11718_v49 = vld [vmem:[#allocation28_spill] sm:$0xff]  ;;  %v7501_v48 = vpop.eup %5205  ;;  %v3638_v31 = vadd.f32 %v7322_v0, %v3637_v61  ;;  %v7507_v32 = vpop.permute.xlu1 %980  ;;  %11724 = vst [vmem:[#allocation74_spill] sm:$0xff] %v7514_v22 }
 0x1c7   : > { %11704 = vst [vmem:[#allocation54_spill] sm:$0xff] %v7468_v42  ;;  %11707 = vst [vmem:[#allocation57_spill] sm:$0xff] %v7474_v17  ;;  %v7480_v10 = vadd.f32 %v11711_v45, %v11710_v40  ;;  %v1553_v13 = vadd.f32 %v11717_v35, %v11716_v62  ;;  %v11719_v5 = vld [vmem:[#allocation12_spill] sm:$0xff]  ;;  %5231 = vpow2.f32 %v7268_v37  ;;  %v2112_v55 = vmax.f32 %v11714_v1, %v1856_v29  ;;  %v7509_v33 = vpop.eup %5207 }
 0x1c8   : > { %v1521_v42 = vadd.f32 %v11719_v5, %v11718_v49  ;;  %v2111_v16 = vmax.f32 %v11715_v47, %v1855_v28  ;;  %11720 = vst [vmem:[#allocation64_spill] sm:$0xff] %v7507_v32  ;;  %11721 = vst [vmem:[#allocation70_spill] sm:$0xff] %v7509_v33  ;;  %5233 = vpow2.f32 %v7279_v2  ;;  %v11723_v49 = vld [vmem:[#allocation15_spill] sm:$0xff]  ;;  %v7516_v61 = vpop.eup %5209  ;;  %v3639_v37 = vadd.f32 %v7342_v27, %v3638_v31 }
 0x1c9   : > { %11712 = vst [vmem:[#allocation60_spill] sm:$0xff] %v7480_v10  ;;  %v1809_v62 = vmul.f32 0.2, %v1553_v13  ;;  %v1601_v19 = vadd.f32 %v11723_v49, %v11722_v9  ;;  %11725 = vst [vmem:[#allocation75_spill] sm:$0xff] %v7516_v61  ;;  %5235 = vpow2.f32 %v7284_v57  ;;  %v7521_v1 = vadd.f32 %v11706_v56, %v2112_v55  ;;  %1102 = vbcast.lane.b32.xlu0 %v6889_v39, 288  ;;  %v7528_v2 = vpop.eup %5211  ;;  %v11729_v55 = vld [vmem:[#allocation34_spill] sm:$0xff] }
 0x1ca   : > { %v1777_v40 = vmul.f32 0.2, %v1521_v42  ;;  %v7524_v29 = vadd.f32 %v11711_v45, %v2111_v16  ;;  %1039 = vbcast.lane.b32.xlu1 %v6844_v53, 296  ;;  %11728 = vst [vmem:[#allocation83_spill] sm:$0xff] %v7528_v2  ;;  %5237 = vpow2.f32 %v7294_v14  ;;  %v7531_v31 = vpop.eup %5213  ;;  %v3640_v57 = vadd.f32 %v7358_v6, %v3639_v37  ;;  %v11730_v45 = vld [vmem:[#allocation13_spill] sm:$0xff]  ;;  %v7539_v22 = vpop.permute.xlu1 %783  ;;  %v11732_v14 = vld [vmem:[#allocation68_spill] sm:$0xff] }
 0x1cb   : > { %11726 = vst [vmem:[#allocation78_spill] sm:$0xff] %v7521_v1  ;;  %v2065_v9 = vmax.f32 %v1553_v13, %v1809_v62  ;;  %v1857_v28 = vmul.f32 0.2, %v1601_v19  ;;  %5239 = vpow2.f32 %v7299_v54  ;;  %v1569_v56 = vadd.f32 %v11730_v45, %v11729_v55  ;;  %11731 = vst [vmem:[#allocation86_spill] sm:$0xff] %v7539_v22  ;;  %v7541_v32 = vpop.eup %5215  ;;  %v7550_v54 = vpop.permute.xlu0 %649 }
 0x1cc   : > { %11727 = vst [vmem:[#allocation80_spill] sm:$0xff] %v7524_v29  ;;  %v2033_v47 = vmax.f32 %v1521_v42, %v1777_v40  ;;  %v2712_v16 = vmax.f32 %v7524_v29, %v7521_v1  ;;  %5241 = vpow2.f32 %v7304_v3  ;;  %11735 = vst [vmem:[#allocation98_spill] sm:$0xff] %v7550_v54  ;;  %v7552_v62 = vpop.eup %5217  ;;  %v3641_v37 = vadd.f32 %v7376_v58, %v3640_v57  ;;  %v11736_v1 = vld [vmem:[#allocation36_spill] sm:$0xff]  ;;  %v11741_v57 = vld [vmem:[#allocation139_spill] sm:$0xff] }
 0x1cd   : > { %v7545_v42 = vadd.f32 %v11732_v14, %v2065_v9  ;;  %v2113_v13 = vmax.f32 %v1601_v19, %v1857_v28  ;;  %5243 = vpow2.f32 %v7313_v12  ;;  %v1825_v55 = vmul.f32 0.2, %v1569_v56  ;;  %905 = vbcast.lane.b32.xlu0 %v6855_v60, 296  ;;  %v7560_v3 = vpop.eup %5219  ;;  %v11737_v19 = vld [vmem:[#allocation136_spill] sm:$0xff]  ;;  %v11738_v9 = vld [vmem:[#allocation137_spill] sm:$0xff]  ;;  %v11740_v12 = vld [vmem:[#allocation138_spill] sm:$0xff] }
 0x1ce   : > { %v7548_v40 = vadd.f32 %v11732_v14, %v2033_v47  ;;  %v1554_v29 = vadd.f32 %v11717_v35, %v11736_v1  ;;  %1240 = vbcast.lane.b32.xlu1 %v6920_v51, 296  ;;  %5245 = vpow2.f32 %v7318_v11  ;;  %v11739_v47 = vmax.f32 %v11737_v19, %v11738_v9  ;;  %v11743_v1 = vld [vmem:[#allocation21_spill] sm:$0xff]  ;;  %v7578_v61 = vpop.eup %5221  ;;  %v7582_v19 = vpop.permute.xlu1 %984 }
 0x1cf   : > { %11733 = vst [vmem:[#allocation89_spill] sm:$0xff] %v7545_v42  ;;  %v11742_v14 = vmax.f32 %v11740_v12, %v11741_v57  ;;  %v7576_v22 = vadd.f32 %v11743_v1, %v2113_v13  ;;  %v3642_v33 = vadd.f32 %v7392_v50, %v3641_v37  ;;  %5247 = vpow2.f32 %v7328_v38  ;;  %v11745_v12 = vld [vmem:[#allocation38_spill] sm:$0xff]  ;;  %v7594_v37 = vpop.permute.xlu0 %850 }
 0x1d0   : > { %11734 = vst [vmem:[#allocation92_spill] sm:$0xff] %v7548_v40  ;;  %v7567_v28 = vmax.f32 %v11739_v47, %v7545_v42  ;;  %v2081_v11 = vmax.f32 %v1569_v56, %v1825_v55  ;;  %v1810_v2 = vmul.f32 0.2, %v1554_v29  ;;  %v7584_v47 = vpop.eup %5223  ;;  %5249 = vpow2.f32 %v7333_v34 }
 0x1d1   : > { %v7573_v54 = vmax.f32 %v11742_v14, %v7548_v40  ;;  %11744 = vst [vmem:[#allocation135_spill] sm:$0xff] %v7576_v22  ;;  %v7588_v14 = vmax.f32 %v2712_v16, %v7576_v22  ;;  %v1522_v13 = vadd.f32 %v11719_v5, %v11745_v12  ;;  %v11746_v40 = vld [vmem:[#allocation41_spill] sm:$0xff]  ;;  %v7596_v38 = vpop.eup %5225  ;;  %v3643_v56 = vadd.f32 %v7412_v18, %v3642_v33  ;;  %v11750_v22 = vld [vmem:[#allocation42_spill] sm:$0xff] }
 0x1d2   : > { %v1602_v57 = vadd.f32 %v11723_v49, %v11746_v40  ;;  %11747 = vst [vmem:[#allocation140_spill] sm:$0xff] %v7596_v38  ;;  %5251 = vpow2.f32 %v7338_v30  ;;  %v7601_v55 = vadd.f32 %v11743_v1, %v2081_v11  ;;  %v2066_v34 = vmax.f32 %v1554_v29, %v1810_v2  ;;  %4846 = vmatprep.subr.mxu1 %v7584_v47  ;;  %v7605_v16 = vpop.eup %5227  ;;  %v11754_v11 = vld [vmem:[#allocation71_spill] sm:$0xff] }
 0x1d3   : > { %1106 = vbcast.lane.b32.xlu0 %v6889_v39, 296  ;;  %11749 = vst [vmem:[#allocation142_spill] sm:$0xff] %v7605_v16  ;;  %5253 = vpow2.f32 %v7349_v24  ;;  %v1778_v40 = vmul.f32 0.2, %v1522_v13  ;;  %v1570_v42 = vadd.f32 %v11730_v45, %v11750_v22  ;;  %4847 = vmatpush3.msra.mxu1 %v7392_v50  ;;  %v7612_v30 = vpop.eup %5229  ;;  %v3644_v33 = vadd.f32 %v7428_v59, %v3643_v56  ;;  %v7625_v50 = vpop.permute.xlu1 %787 }
 0x1d4   : > { %11748 = vst [vmem:[#allocation141_spill] sm:$0xff] %v7601_v55  ;;  %v1858_v12 = vmul.f32 0.2, %v1602_v57  ;;  %1043 = vbcast.lane.b32.xlu1 %v6844_v53, 304  ;;  %11751 = vst [vmem:[#allocation29_spill] sm:$0xff] %v7612_v30  ;;  %5255 = vpow2.f32 %v7354_v63  ;;  %v3591_v29 = vadd.f32 %v7605_v16, %v7596_v38  ;;  %v11752_v24 = vmax.f32 %v7480_v10, %v7474_v17  ;;  %v7627_v22 = vpop.eup %5231  ;;  %v7634_v9 = vpop.permute.xlu0 %653  ;;  %v11771_v38 = vld [vmem:[#allocation53_spill] sm:$0xff] }
 0x1d5   : > { %4848 = vmatprep.subr.mxu1 %v7578_v61  ;;  %11753 = vst [vmem:[#allocation14_spill] sm:$0xff] %v7627_v22  ;;  %5257 = vpow2.f32 %v7364_v26  ;;  %v7631_v56 = vadd.f32 %v11754_v11, %v2066_v34  ;;  %v2034_v63 = vmax.f32 %v1522_v13, %v1778_v40  ;;  %v7636_v17 = vpop.eup %5233  ;;  %v1826_v10 = vmul.f32 0.2, %v1570_v42  ;;  %v11759_v13 = vld [vmem:[#allocation23_spill] sm:$0xff] }
 0x1d6   : > { %v7622_v2 = vmax.f32 %v11752_v24, %v7601_v55  ;;  %v2114_v1 = vmax.f32 %v1602_v57, %v1858_v12  ;;  %4849 = vmatpush3.msra.mxu1 %v7376_v58  ;;  %11756 = vst [vmem:[#allocation12_spill] sm:$0xff] %v7636_v17  ;;  %v3645_v24 = vadd.f32 %v7446_v41, %v3644_v33  ;;  %5259 = vpow2.f32 %v7369_v15  ;;  %v7643_v26 = vpop.eup %5235 }
 0x1d7   : > { %11755 = vst [vmem:[#allocation28_spill] sm:$0xff] %v7631_v56  ;;  %v3592_v55 = vadd.f32 %v7612_v30, %v3591_v29  ;;  %4850 = vmatprep.subr.mxu1 %v7560_v3  ;;  %909 = vbcast.lane.b32.xlu0 %v6855_v60, 304  ;;  %11757 = vst [vmem:[#allocation33_spill] sm:$0xff] %v7643_v26  ;;  %5261 = vpow2.f32 %v7374_v46  ;;  %v7649_v57 = vadd.f32 %v11754_v11, %v2034_v63  ;;  %v7656_v15 = vpop.eup %5237  ;;  %v7662_v33 = vpop.permute.xlu1 %988  ;;  %v11763_v63 = vld [vmem:[#allocation43_spill] sm:$0xff] }
 0x1d8   : > { %v7652_v34 = vadd.f32 %v11759_v13, %v2114_v1  ;;  %4851 = vmatpush3.msra.mxu1 %v7358_v6  ;;  %1244 = vbcast.lane.b32.xlu1 %v6920_v51, 304  ;;  %11761 = vst [vmem:[#allocation136_spill] sm:$0xff] %v7656_v15  ;;  %v3646_v40 = vadd.f32 %v7462_v7, %v3645_v24  ;;  %5263 = vpow2.f32 %v7383_v23  ;;  %v7664_v29 = vpop.eup %5239  ;;  %v11767_v1 = vld [vmem:[#allocation47_spill] sm:$0xff] }
 0x1d9   : > { %11758 = vst [vmem:[#allocation34_spill] sm:$0xff] %v7649_v57  ;;  %v3593_v46 = vadd.f32 %v7627_v22, %v3592_v55  ;;  %v2082_v12 = vmax.f32 %v1570_v42, %v1826_v10  ;;  %4852 = vmatprep.subr.mxu1 %v7552_v62  ;;  %11762 = vst [vmem:[#allocation138_spill] sm:$0xff] %v7664_v29  ;;  %5265 = vpow2.f32 %v7388_v8  ;;  %v7674_v10 = vpop.permute.xlu0 %854  ;;  %v7676_v42 = vpop.eup %5241  ;;  %v11772_v30 = vld [vmem:[#allocation83_spill] sm:$0xff] }
 0x1da   : > { %11760 = vst [vmem:[#allocation36_spill] sm:$0xff] %v7652_v34  ;;  %v1555_v23 = vadd.f32 %v11717_v35, %v11763_v63  ;;  %4853 = vmatpush3.msra.mxu1 %v7342_v27  ;;  %11764 = vst [vmem:[#allocation38_spill] sm:$0xff] %v7676_v42  ;;  %v3647_v55 = vadd.f32 %v7484_v25, %v3646_v40  ;;  %5267 = vpow2.f32 %v7398_v44  ;;  %v7686_v63 = vpop.eup %5243  ;;  %v11768_v40 = vld [vmem:[#allocation49_spill] sm:$0xff] }
 0x1db   : > { %v3594_v8 = vadd.f32 %v7636_v17, %v3593_v46  ;;  %v7682_v24 = vadd.f32 %v11759_v13, %v2082_v12  ;;  %4854 = vmatprep.subr.mxu1 %v7541_v32  ;;  %1110 = vbcast.lane.b32.xlu0 %v6889_v39, 304  ;;  %11766 = vst [vmem:[#allocation42_spill] sm:$0xff] %v7686_v63  ;;  %5269 = vpow2.f32 %v7403_v20  ;;  %v7695_v46 = vpop.eup %5245  ;;  %v11776_v17 = vld [vmem:[#allocation22_spill] sm:$0xff] }
 0x1dc   : > { %v1811_v27 = vmul.f32 0.2, %v1555_v23  ;;  %v1523_v6 = vadd.f32 %v11719_v5, %v11767_v1  ;;  %v1603_v44 = vadd.f32 %v11723_v49, %v11768_v40  ;;  %4855 = vmatpush3.msra.mxu1 %v7322_v0  ;;  %1047 = vbcast.lane.b32.xlu1 %v6844_v53, 312  ;;  %v3648_v12 = vadd.f32 %v7492_v52, %v3647_v55  ;;  %v7703_v1 = vpop.permute.xlu1 %791  ;;  %v7705_v40 = vpop.eup %5247 }
 0x1dd   : > { %11765 = vst [vmem:[#allocation41_spill] sm:$0xff] %v7682_v24  ;;  %5271 = vpow2.f32 %v7408_v4  ;;  %v3595_v58 = vadd.f32 %v7643_v26, %v3594_v8  ;;  %4856 = vmatprep.subr.mxu1 %v7531_v31  ;;  %11769 = vst [vmem:[#allocation43_spill] sm:$0xff] %v7703_v1  ;;  %v7709_v55 = vpop.permute.xlu0 %657  ;;  %v7711_v4 = vpop.eup %5249  ;;  %v1571_v16 = vadd.f32 %v11730_v45, %v11771_v38  ;;  %v11777_v38 = vld [vmem:[#allocation70_spill] sm:$0xff]  ;;  %v11778_v26 = vld [vmem:[#allocation37_spill] sm:$0xff] }
 0x1de   : > { %5273 = vpow2.f32 %v7419_v43  ;;  %v2067_v0 = vmax.f32 %v1555_v23, %v1811_v27  ;;  %v1779_v13 = vmul.f32 0.2, %v1523_v6  ;;  %v1859_v11 = vmul.f32 0.2, %v1603_v44  ;;  %4857 = vmatpush3.msra.mxu1 %v7306_v36  ;;  %11770 = vst [vmem:[#allocation47_spill] sm:$0xff] %v7709_v55  ;;  %v11773_v36 = vld [vmem:[#allocation31_spill] sm:$0xff] }
 0x1df   : > { %v3649_v8 = vadd.f32 %v7501_v48, %v3648_v12  ;;  %5275 = vpow2.f32 %v7424_v21  ;;  %v3596_v20 = vadd.f32 %v7656_v15, %v3595_v58  ;;  %4858 = vmatprep.subr.mxu1 %v11772_v30  ;;  %913 = vbcast.lane.b32.xlu0 %v6855_v60, 312  ;;  %v7720_v43 = vpop.eup %5251  ;;  %v11774_v23 = vld [vmem:[#allocation77_spill] sm:$0xff]  ;;  %v1827_v55 = vmul.f32 0.2, %v1571_v16  ;;  %v11779_v1 = vld [vmem:[#allocation75_spill] sm:$0xff] }
 0x1e0   : > { %5277 = vpow2.f32 %v11773_v36  ;;  %v7724_v27 = vadd.f32 %v11774_v23, %v2067_v0  ;;  %v2035_v22 = vmax.f32 %v1523_v6, %v1779_v13  ;;  %v2115_v12 = vmax.f32 %v1603_v44, %v1859_v11  ;;  %4859 = vmatpush3.msra.mxu1 %v11776_v17  ;;  %1248 = vbcast.lane.b32.xlu1 %v6920_v51, 312  ;;  %v7728_v21 = vpop.eup %5253  ;;  %v7734_v36 = vpop.permute.xlu1 %992  ;;  %v11781_v11 = vld [vmem:[#allocation39_spill] sm:$0xff] }
 0x1e1   : > { %v3650_v58 = vadd.f32 %v11777_v38, %v3649_v8  ;;  %5279 = vpow2.f32 %v11778_v26  ;;  %v3597_v15 = vadd.f32 %v7664_v29, %v3596_v20  ;;  %4860 = vmatprep.subr.mxu1 %v11779_v1  ;;  %11780 = vst [vmem:[#allocation53_spill] sm:$0xff] %v7734_v36  ;;  %v7736_v0 = vpop.eup %5255  ;;  %v11782_v17 = vmax.f32 %v7567_v28, %v7631_v56  ;;  %v11784_v26 = vld [vmem:[#allocation25_spill] sm:$0xff]  ;;  %v11786_v20 = vld [vmem:[#allocation91_spill] sm:$0xff]  ;;  %v7752_v8 = vpop.permute.xlu0 %858 }
 0x1e2   : > { %11775 = vst [vmem:[#allocation49_spill] sm:$0xff] %v7724_v27  ;;  %5281 = vpow2.f32 %v11781_v11  ;;  %v7746_v6 = vadd.f32 %v11774_v23, %v2035_v22  ;;  %v7749_v44 = vadd.f32 %v11784_v26, %v2115_v12  ;;  %4861 = vmatpush3.msra.mxu1 %v11786_v20  ;;  %11787 = vst [vmem:[#allocation22_spill] sm:$0xff] %v7752_v8  ;;  %v7754_v36 = vpop.eup %5257  ;;  %v11789_v29 = vld [vmem:[#allocation45_spill] sm:$0xff]  ;;  %v11790_v12 = vld [vmem:[#allocation48_spill] sm:$0xff] }
 0x1e3   : > { %v7743_v13 = vmax.f32 %v11782_v17, %v7724_v27  ;;  %11788 = vst [vmem:[#allocation70_spill] sm:$0xff] %v7754_v36  ;;  %v3651_v11 = vadd.f32 %v11779_v1, %v3650_v58  ;;  %5283 = vpow2.f32 %v11789_v29  ;;  %v3598_v28 = vadd.f32 %v7676_v42, %v3597_v15  ;;  %4862 = vmatprep.subr.mxu1 %v11777_v38  ;;  %v7761_v22 = vpop.eup %5259 }
 0x1e4   : > { %11783 = vst [vmem:[#allocation83_spill] sm:$0xff] %v7746_v6  ;;  %11785 = vst [vmem:[#allocation31_spill] sm:$0xff] %v7749_v44  ;;  %v2083_v17 = vmax.f32 %v1571_v16, %v1827_v55  ;;  %1114 = vbcast.lane.b32.xlu0 %v6889_v39, 312  ;;  %5285 = vpow2.f32 %v11790_v12  ;;  %v11791_v20 = vmax.f32 %v7573_v54, %v7649_v57  ;;  %v11793_v16 = vld [vmem:[#allocation66_spill] sm:$0xff]  ;;  %v11794_v55 = vld [vmem:[#allocation85_spill] sm:$0xff]  ;;  %1051 = vbcast.lane.b32.xlu1 %v6844_v53, 320  ;;  %v7780_v38 = vpop.eup %5261 }
 0x1e5   : > { %v11792_v29 = vmax.f32 %v7588_v14, %v7652_v34  ;;  %v1556_v1 = vadd.f32 %v11717_v35, %v11793_v16  ;;  %4863 = vmatpush3.msra.mxu1 %v11794_v55  ;;  %v3652_v58 = vadd.f32 %v11772_v30, %v3651_v11  ;;  %v11795_v54 = vld [vmem:[#allocation54_spill] sm:$0xff]  ;;  %v3599_v12 = vadd.f32 %v7686_v63, %v3598_v28  ;;  %v7789_v14 = vpop.permute.xlu1 %795  ;;  %v11798_v55 = vld [vmem:[#allocation72_spill] sm:$0xff]  ;;  %v11801_v28 = vld [vmem:[#allocation79_spill] sm:$0xff] }
 0x1e6   : > { %v7768_v23 = vmax.f32 %v11791_v20, %v7746_v6  ;;  %5287 = vpow2.f32 %v11795_v54  ;;  %v7786_v20 = vadd.f32 %v11784_v26, %v2083_v17  ;;  %4864 = vmatprep.subr.mxu1 %v7501_v48  ;;  %11797 = vst [vmem:[#allocation75_spill] sm:$0xff] %v7789_v14  ;;  %v11799_v34 = vld [vmem:[#allocation82_spill] sm:$0xff]  ;;  %v11800_v11 = vld [vmem:[#allocation88_spill] sm:$0xff]  ;;  %v7800_v17 = vpop.permute.xlu0 %661 }
 0x1e7   : > { %v7774_v15 = vmax.f32 %v11792_v29, %v7749_v44  ;;  %v7791_v29 = vpop.eup %5263  ;;  %v1812_v16 = vmul.f32 0.2, %v1556_v1  ;;  %v1524_v44 = vadd.f32 %v11719_v5, %v11798_v55  ;;  %v1604_v30 = vadd.f32 %v11723_v49, %v11799_v34  ;;  %4865 = vmatpush3.msra.mxu1 %v11801_v28  ;;  %11802 = vst [vmem:[#allocation39_spill] sm:$0xff] %v7800_v17  ;;  %v11804_v34 = vld [vmem:[#allocation20_spill] sm:$0xff] }
 0x1e8   : > { %11796 = vst [vmem:[#allocation37_spill] sm:$0xff] %v7786_v20  ;;  %v1572_v54 = vadd.f32 %v11730_v45, %v11800_v11  ;;  %v7802_v26 = vpop.eup %5265  ;;  %v3653_v48 = vadd.f32 %v7531_v31, %v3652_v58  ;;  %v3600_v6 = vadd.f32 %v7695_v46, %v3599_v12  ;;  %v11803_v55 = vmax.f32 %v7622_v2, %v7682_v24  ;;  %v11805_v31 = vld [vmem:[#allocation76_spill] sm:$0xff] }
 0x1e9   : > { %v1557_v27 = vadd.f32 %v11717_v35, %v11804_v34  ;;  %4866 = vmatprep.subr.mxu1 %v7492_v52  ;;  %v7815_v11 = vpop.eup %5267  ;;  %v2068_v28 = vmax.f32 %v1556_v1, %v1812_v16  ;;  %v1780_v56 = vmul.f32 0.2, %v1524_v44  ;;  %v1860_v17 = vmul.f32 0.2, %v1604_v30  ;;  %917 = vbcast.lane.b32.xlu0 %v6855_v60, 320  ;;  %v7826_v52 = vpop.permute.xlu1 %996  ;;  %v11808_v16 = vld [vmem:[#allocation81_spill] sm:$0xff] }
 0x1ea   : > { %v7810_v57 = vmax.f32 %v11803_v55, %v7786_v20  ;;  %v1828_v14 = vmul.f32 0.2, %v1572_v54  ;;  %4867 = vmatpush3.msra.mxu1 %v11805_v31  ;;  %v7818_v58 = vpop.eup %5269  ;;  %v3654_v12 = vadd.f32 %v7541_v32, %v3653_v48  ;;  %v3601_v2 = vadd.f32 %v7705_v40, %v3600_v6  ;;  %v11806_v20 = vld [vmem:[#allocation24_spill] sm:$0xff]  ;;  %11807 = vst [vmem:[#allocation91_spill] sm:$0xff] %v7826_v52  ;;  %v11810_v48 = vld [vmem:[#allocation73_spill] sm:$0xff]  ;;  %v7834_v6 = vpop.permute.xlu0 %862 }
 0x1eb   : > { %v1813_v55 = vmul.f32 0.2, %v1557_v27  ;;  %v1525_v34 = vadd.f32 %v11719_v5, %v11806_v20  ;;  %4868 = vmatprep.subr.mxu1 %v7484_v25  ;;  %v7828_v1 = vpop.eup %5271  ;;  %v7831_v31 = vadd.f32 %v11808_v16, %v2068_v28  ;;  %v2036_v24 = vmax.f32 %v1524_v44, %v1780_v56  ;;  %1252 = vbcast.lane.b32.xlu1 %v6920_v51, 320 }
 0x1ec   : > { %v2116_v8 = vmax.f32 %v1604_v30, %v1860_v17  ;;  %v2084_v32 = vmax.f32 %v1572_v54, %v1828_v14  ;;  %4869 = vmatpush3.msra.mxu1 %v11810_v48  ;;  %v7836_v42 = vpop.eup %5273  ;;  %v3655_v25 = vadd.f32 %v7552_v62, %v3654_v12  ;;  %v3602_v20 = vadd.f32 %v7711_v4, %v3601_v2  ;;  %v11812_v14 = vld [vmem:[#allocation27_spill] sm:$0xff]  ;;  %v11816_v12 = vld [vmem:[#allocation84_spill] sm:$0xff]  ;;  %v11818_v48 = vld [vmem:[#allocation26_spill] sm:$0xff] }
 0x1ed   : > { %11809 = vst [vmem:[#allocation45_spill] sm:$0xff] %v7831_v31  ;;  %v2069_v63 = vmax.f32 %v1557_v27, %v1813_v55  ;;  %v1781_v52 = vmul.f32 0.2, %v1525_v34  ;;  %4870 = vmatprep.subr.mxu1 %v7462_v7  ;;  %v7842_v28 = vpop.eup %5275  ;;  %v2658_v56 = vmax.f32 %v7743_v13, %v7831_v31  ;;  %v7847_v44 = vadd.f32 %v11808_v16, %v2036_v24  ;;  %v11815_v27 = vld [vmem:[#allocation67_spill] sm:$0xff]  ;;  %v7864_v24 = vpop.permute.xlu1 %799 }
 0x1ee   : > { %v7850_v30 = vadd.f32 %v11812_v14, %v2116_v8  ;;  %v7853_v62 = vadd.f32 %v11812_v14, %v2084_v32  ;;  %4871 = vmatpush3.msra.mxu1 %v11815_v27  ;;  %v7856_v54 = vpop.eup %5277  ;;  %v3656_v7 = vadd.f32 %v7560_v3, %v3655_v25  ;;  %v3603_v17 = vadd.f32 %v7720_v43, %v3602_v20  ;;  %v11819_v25 = vld [vmem:[#allocation61_spill] sm:$0xff]  ;;  %v11827_v14 = vld [vmem:[#allocation64_spill] sm:$0xff] }
 0x1ef   : > { %11811 = vst [vmem:[#allocation48_spill] sm:$0xff] %v7847_v44  ;;  %v7861_v2 = vadd.f32 %v11816_v12, %v2069_v63  ;;  %v2037_v13 = vmax.f32 %v1525_v34, %v1781_v52  ;;  %4872 = vmatprep.subr.mxu1 %v7446_v41  ;;  %v7866_v8 = vpop.eup %5279  ;;  %v2621_v55 = vmax.f32 %v7768_v23, %v7847_v44  ;;  %v7877_v34 = vpop.permute.xlu0 %665 }
 0x1f0   : > { %11813 = vst [vmem:[#allocation66_spill] sm:$0xff] %v7850_v30  ;;  %11814 = vst [vmem:[#allocation85_spill] sm:$0xff] %v7853_v62  ;;  %v2716_v32 = vmax.f32 %v7774_v15, %v7850_v30  ;;  %v2679_v3 = vmax.f32 %v7810_v57, %v7853_v62  ;;  %v1605_v63 = vadd.f32 %v11723_v49, %v11818_v48  ;;  %4873 = vmatpush3.msra.mxu1 %v11819_v25  ;;  %v7879_v41 = vpop.eup %5281  ;;  %v11822_v48 = vld [vmem:[#allocation30_spill] sm:$0xff]  ;;  %v11823_v62 = vld [vmem:[#allocation51_spill] sm:$0xff] }
 0x1f1   : > { %11817 = vst [vmem:[#allocation54_spill] sm:$0xff] %v7861_v2  ;;  %11820 = vst [vmem:[#allocation72_spill] sm:$0xff] %v7877_v34  ;;  %v3657_v52 = vadd.f32 %v7578_v61, %v3656_v7  ;;  %v3604_v20 = vadd.f32 %v7728_v21, %v3603_v17  ;;  %v7884_v23 = vmax.f32 %v2658_v56, %v7861_v2  ;;  %4874 = vmatprep.subr.mxu1 %v7428_v59  ;;  %v7890_v57 = vpop.eup %5283  ;;  %v11824_v61 = vld [vmem:[#allocation63_spill] sm:$0xff]  ;;  %v3889_v56 = vld [vmem:[#allocation2 + $0x10] sm:$0xff] }
 0x1f2   : > { %v7887_v15 = vadd.f32 %v11816_v12, %v2037_v13  ;;  %v1861_v27 = vmul.f32 0.2, %v1605_v63  ;;  %v1573_v25 = vadd.f32 %v11730_v45, %v11822_v48  ;;  %v1558_v30 = vadd.f32 %v11717_v35, %v11823_v62  ;;  %v11825_v17 = vld [vmem:[#allocation59_spill] sm:$0xff]  ;;  %1118 = vbcast.lane.b32.xlu0 %v6889_v39, 320  ;;  %v7900_v13 = vpop.eup %5285  ;;  %1055 = vbcast.lane.b32.xlu1 %v6844_v53, 328 }
 0x1f3   : > { %v1526_v7 = vadd.f32 %v11719_v5, %v11824_v61  ;;  %4875 = vmatpush3.msra.mxu1 %v11825_v17  ;;  %v7903_v59 = vadd.f32 %v7584_v47, %v3657_v52  ;;  %v3605_v12 = vadd.f32 %v7736_v0, %v3604_v20  ;;  %v1606_v62 = vadd.f32 %v11723_v49, %v11827_v14  ;;  %v7912_v61 = vpop.permute.xlu1 %1000  ;;  %v7914_v17 = vpop.eup %5287  ;;  %v11830_v47 = vld [vmem:[#allocation55_spill] sm:$0xff]  ;;  %v11832_v14 = vld [vmem:[#allocation74_spill] sm:$0xff] }
 0x1f4   : > { %11821 = vst [vmem:[#allocation82_spill] sm:$0xff] %v7887_v15  ;;  %v7907_v48 = vmax.f32 %v2621_v55, %v7887_v15  ;;  %4876 = vmatprep.subr.mxu1 %v7412_v18  ;;  %11828 = vst [vmem:[#allocation79_spill] sm:$0xff] %v7912_v61  ;;  %v2117_v16 = vmax.f32 %v1605_v63, %v1861_v27  ;;  %v1829_v44 = vmul.f32 0.2, %v1573_v25  ;;  %v1814_v2 = vmul.f32 0.2, %v1558_v30  ;;  %v7917_v52 = vpop.permute.xlu0 %866 }
 0x1f5   : > { %11826 = vst [vmem:[#allocation88_spill] sm:$0xff] %v7903_v59  ;;  %11829 = vst [vmem:[#allocation20_spill] sm:$0xff] %v7914_v17  ;;  %v1782_v31 = vmul.f32 0.2, %v1526_v7  ;;  %4877 = vmatpush3.msra.mxu1 %v11830_v47  ;;  %v3606_v55 = vadd.f32 %v7754_v36, %v3605_v12  ;;  %4811 = vmatprep.subr.mxu0 %v7914_v17  ;;  %v1862_v20 = vmul.f32 0.2, %v1606_v62 }
 0x1f6   : > { %11831 = vst [vmem:[#allocation76_spill] sm:$0xff] %v7917_v52  ;;  %v1574_v18 = vadd.f32 %v11730_v45, %v11832_v14  ;;  %v11833_v59 = vld [vmem:[#allocation86_spill] sm:$0xff]  ;;  %4041 = vmatmul.mubr.f32.vlgmr.msra.gmra.mxu1 %v3889_v56  ;;  %4812 = vmatpush3.msra.mxu0 %v7736_v0  ;;  %v11834_v63 = vld [vmem:[#allocation32_spill] sm:$0xff]  ;;  %v2085_v47 = vmax.f32 %v1573_v25, %v1829_v44 }
 0x1f7   : > { %v1559_v15 = vadd.f32 %v11717_v35, %v11833_v59  ;;  %v7927_v27 = vadd.f32 %v11834_v63, %v2117_v16  ;;  %v2070_v61 = vmax.f32 %v1558_v30, %v1814_v2  ;;  %v2038_v52 = vmax.f32 %v1526_v7, %v1782_v31  ;;  %4813 = vmatprep.subr.mxu0 %v7900_v13  ;;  %v7932_v14 = vpop.permute.xlu1 %803  ;;  %v11837_v31 = vld [vmem:[#allocation87_spill] sm:$0xff] }
 0x1f8   : > { %v3607_v12 = vadd.f32 %v7761_v22, %v3606_v55  ;;  %v2118_v36 = vmax.f32 %v1606_v62, %v1862_v20  ;;  %v1830_v17 = vmul.f32 0.2, %v1574_v18  ;;  %4814 = vmatpush3.msra.mxu0 %v7728_v21  ;;  %v7939_v16 = vadd.f32 %v11834_v63, %v2085_v47  ;;  %v7947_v2 = vpop.permute.xlu0 %669  ;;  %v11838_v7 = vld [vmem:[#allocation35_spill] sm:$0xff]  ;;  %921 = vbcast.lane.b32.xlu0 %v6855_v60, 328 }
 0x1f9   : > { %11835 = vst [vmem:[#allocation24_spill] sm:$0xff] %v7927_v27  ;;  %v1815_v34 = vmul.f32 0.2, %v1559_v15  ;;  %v7936_v0 = vmax.f32 %v2716_v32, %v7927_v27  ;;  %v7942_v44 = vadd.f32 %v11837_v31, %v2070_v61  ;;  %v7945_v30 = vadd.f32 %v11837_v31, %v2038_v52  ;;  %4815 = vmatprep.subr.mxu0 %v7890_v57  ;;  %v11840_v52 = vld [vmem:[#allocation98_spill] sm:$0xff]  ;;  %v11934_v31 = vld [vmem:[#allocation121_spill] sm:$0xff] }
 0x1fa   : > { %11836 = vst [vmem:[#allocation73_spill] sm:$0xff] %v7939_v16  ;;  %v3608_v25 = vadd.f32 %v7780_v38, %v3607_v12  ;;  %v7952_v21 = vadd.f32 %v11838_v7, %v2118_v36  ;;  %v2086_v32 = vmax.f32 %v1574_v18, %v1830_v17  ;;  %4816 = vmatpush3.msra.mxu0 %v7720_v43 }
 0x1fb   : > { %v2071_v56 = vmax.f32 %v1559_v15, %v1815_v34  ;;  %v2680_v59 = vmax.f32 %v2679_v3, %v7939_v16  ;;  %v2660_v62 = vmax.f32 %v7884_v23, %v7942_v44  ;;  %v2623_v61 = vmax.f32 %v7907_v48, %v7945_v30  ;;  %4817 = vmatprep.subr.mxu0 %v7879_v41  ;;  %v11842_v3 = vld [vmem:[#allocation90_spill] sm:$0xff]  ;;  %v7972_v23 = vpop.permute.xlu1 %1004 }
 0x1fc   : > { %11839 = vst [vmem:[#allocation67_spill] sm:$0xff] %v7952_v21  ;;  %v1527_v55 = vadd.f32 %v11719_v5, %v11840_v52  ;;  %v3609_v20 = vadd.f32 %v7791_v29, %v3608_v25  ;;  %v2718_v36 = vmax.f32 %v7936_v0, %v7952_v21  ;;  %v7967_v43 = vadd.f32 %v11838_v7, %v2086_v32  ;;  %v7982_v47 = vpop.permute.xlu0 %870  ;;  %v11843_v21 = vld [vmem:[#allocation42_spill] sm:$0xff] }
 0x1fd   : > { %v7970_v34 = vadd.f32 %v11842_v3, %v2071_v56  ;;  %4818 = vmatpush3.msra.mxu0 %v7711_v4  ;;  %v1607_v48 = vadd.f32 %v11723_v49, %v7582_v19  ;;  %v1575_v17 = vadd.f32 %v11730_v45, %v7594_v37  ;;  %v1560_v18 = vadd.f32 %v11717_v35, %v7625_v50 }
 0x1fe   : > { %11841 = vst [vmem:[#allocation26_spill] sm:$0xff] %v7967_v43  ;;  %v1783_v15 = vmul.f32 0.2, %v1527_v55  ;;  %v3610_v12 = vadd.f32 %v7802_v26, %v3609_v20  ;;  %4819 = vmatprep.subr.mxu0 %v7866_v8  ;;  %v2681_v4 = vmax.f32 %v2680_v59, %v7967_v43  ;;  %v1528_v19 = vadd.f32 %v11719_v5, %v7634_v9 }
 0x1ff   : > { %v7988_v0 = vmax.f32 %v2660_v62, %v7970_v34  ;;  %4820 = vmatpush3.msra.mxu0 %v7705_v40  ;;  %v1863_v50 = vmul.f32 0.2, %v1607_v48  ;;  %v1831_v25 = vmul.f32 0.2, %v1575_v17  ;;  %v1816_v32 = vmul.f32 0.2, %v1560_v18  ;;  %v8000_v9 = vpop.permute.xlu1 %807 }
 0x200   : > { %v2039_v37 = vmax.f32 %v1527_v55, %v1783_v15  ;;  %v3611_v56 = vadd.f32 %v7815_v11, %v3610_v12  ;;  %4821 = vmatprep.subr.mxu0 %v7856_v54  ;;  %v1784_v52 = vmul.f32 0.2, %v1528_v19  ;;  %v1608_v59 = vadd.f32 %v11723_v49, %v7662_v33  ;;  %1256 = vbcast.lane.b32.xlu1 %v6920_v51, 328  ;;  %v8006_v12 = vpop.permute.xlu0 %673 }
 0x201   : > { %v1576_v62 = vadd.f32 %v11730_v45, %v7674_v10  ;;  %4822 = vmatpush3.msra.mxu0 %v7695_v46  ;;  %v2119_v55 = vmax.f32 %v1607_v48, %v1863_v50  ;;  %v2087_v20 = vmax.f32 %v1575_v17, %v1831_v25  ;;  %v2072_v15 = vmax.f32 %v1560_v18, %v1816_v32  ;;  %v11847_v18 = vld [vmem:[#allocation93_spill] sm:$0xff] }
 0x202   : > { %v8004_v40 = vadd.f32 %v11842_v3, %v2039_v37  ;;  %v3612_v43 = vadd.f32 %v7818_v58, %v3611_v56  ;;  %4823 = vmatprep.subr.mxu0 %v7842_v28  ;;  %v2040_v33 = vmax.f32 %v1528_v19, %v1784_v52  ;;  %v1864_v10 = vmul.f32 0.2, %v1608_v59  ;;  %1122 = vbcast.lane.b32.xlu0 %v6889_v39, 328  ;;  %v11844_v37 = vld [vmem:[#allocation40_spill] sm:$0xff]  ;;  %v11848_v56 = vld [vmem:[#allocation38_spill] sm:$0xff] }
 0x203   : > { %v1832_v16 = vmul.f32 0.2, %v1576_v62  ;;  %4824 = vmatpush3.msra.mxu0 %v11843_v21  ;;  %v8016_v48 = vadd.f32 %v11844_v37, %v2119_v55  ;;  %v8019_v17 = vadd.f32 %v11844_v37, %v2087_v20  ;;  %v8022_v50 = vadd.f32 %v11847_v18, %v2072_v15  ;;  %v11849_v15 = vld [vmem:[#allocation43_spill] sm:$0xff] }
 0x204   : > { %v8013_v46 = vmax.f32 %v2623_v61, %v8004_v40  ;;  %v3613_v19 = vadd.f32 %v7828_v1, %v3612_v43  ;;  %4825 = vmatprep.subr.mxu0 %v7836_v42  ;;  %v8027_v25 = vadd.f32 %v11847_v18, %v2040_v33  ;;  %v2120_v21 = vmax.f32 %v1608_v59, %v1864_v10  ;;  %v8029_v61 = vpop.permute.xlu1 %1008  ;;  %v8038_v27 = vpop.permute.xlu0 %874  ;;  %v11850_v59 = vld [vmem:[#allocation44_spill] sm:$0xff]  ;;  %v11854_v10 = vld [vmem:[#allocation47_spill] sm:$0xff] }
 0x205   : > { %11845 = vst [vmem:[#allocation61_spill] sm:$0xff] %v8016_v48  ;;  %11846 = vst [vmem:[#allocation30_spill] sm:$0xff] %v8019_v17  ;;  %v2088_v32 = vmax.f32 %v1576_v62, %v1832_v16  ;;  %4826 = vmatpush3.msra.mxu0 %v11848_v56  ;;  %v2719_v52 = vmax.f32 %v2718_v36, %v8016_v48  ;;  %v2682_v55 = vmax.f32 %v2681_v4, %v8019_v17  ;;  %v11853_v4 = vld [vmem:[#allocation138_spill] sm:$0xff]  ;;  %v11858_v48 = vld [vmem:[#allocation136_spill] sm:$0xff] }
 0x206   : > { %v2662_v20 = vmax.f32 %v7988_v0, %v8022_v50  ;;  %v1561_v43 = vadd.f32 %v11717_v35, %v11849_v15  ;;  %v3614_v33 = vadd.f32 %v7836_v42, %v3613_v19  ;;  %4827 = vmatprep.subr.mxu0 %v7828_v1  ;;  %v2625_v16 = vmax.f32 %v8013_v46, %v8027_v25  ;;  %v11855_v15 = vld [vmem:[#allocation53_spill] sm:$0xff]  ;;  %v11856_v19 = vld [vmem:[#allocation22_spill] sm:$0xff] }
 0x207   : > { %v8045_v62 = vadd.f32 %v11850_v59, %v2120_v21  ;;  %v8048_v36 = vadd.f32 %v11850_v59, %v2088_v32  ;;  %4828 = vmatpush3.msra.mxu0 %v11853_v4  ;;  %v1529_v56 = vadd.f32 %v11719_v5, %v11854_v10  ;;  %v1609_v42 = vadd.f32 %v11723_v49, %v11855_v15  ;;  %v11857_v4 = vld [vmem:[#allocation75_spill] sm:$0xff] }
 0x208   : > { %v1817_v0 = vmul.f32 0.2, %v1561_v43  ;;  %v1577_v1 = vadd.f32 %v11730_v45, %v11856_v19  ;;  %1059 = vbcast.lane.b32.xlu1 %v6844_v53, 336  ;;  %v3615_v46 = vadd.f32 %v7842_v28, %v3614_v33  ;;  %4829 = vmatprep.subr.mxu0 %v7818_v58  ;;  %v1562_v17 = vadd.f32 %v11717_v35, %v11857_v4  ;;  %v8064_v10 = vpop.permute.xlu1 %811  ;;  %v11859_v28 = vld [vmem:[#allocation39_spill] sm:$0xff]  ;;  %v11861_v4 = vld [vmem:[#allocation33_spill] sm:$0xff] }
 0x209   : > { %11851 = vst [vmem:[#allocation51_spill] sm:$0xff] %v8045_v62  ;;  %11852 = vst [vmem:[#allocation63_spill] sm:$0xff] %v8048_v36  ;;  %v2720_v21 = vmax.f32 %v2719_v52, %v8045_v62  ;;  %v2683_v32 = vmax.f32 %v2682_v55, %v8048_v36  ;;  %4830 = vmatpush3.msra.mxu0 %v11858_v48  ;;  %v1785_v59 = vmul.f32 0.2, %v1529_v56  ;;  %v1865_v19 = vmul.f32 0.2, %v1609_v42 }
 0x20a   : > { %v2073_v15 = vmax.f32 %v1561_v43, %v1817_v0  ;;  %v1833_v18 = vmul.f32 0.2, %v1577_v1  ;;  %v3616_v37 = vadd.f32 %v7856_v54, %v3615_v46  ;;  %4831 = vmatprep.subr.mxu0 %v7815_v11  ;;  %v1818_v58 = vmul.f32 0.2, %v1562_v17  ;;  %v11860_v55 = vld [vmem:[#allocation91_spill] sm:$0xff]  ;;  %925 = vbcast.lane.b32.xlu0 %v6855_v60, 336  ;;  %v8078_v54 = vpop.permute.xlu0 %677 }
 0x20b   : > { %v1530_v52 = vadd.f32 %v11719_v5, %v11859_v28  ;;  %v1610_v33 = vadd.f32 %v11723_v49, %v11860_v55  ;;  %4832 = vmatpush3.msra.mxu0 %v11861_v4  ;;  %v11862_v48 = vld [vmem:[#allocation94_spill] sm:$0xff]  ;;  %v2041_v0 = vmax.f32 %v1529_v56, %v1785_v59  ;;  %v2121_v36 = vmax.f32 %v1609_v42, %v1865_v19  ;;  %v11863_v4 = vld [vmem:[#allocation12_spill] sm:$0xff] }
 0x20c   : > { %v8076_v43 = vadd.f32 %v11862_v48, %v2073_v15  ;;  %v2089_v62 = vmax.f32 %v1577_v1, %v1833_v18  ;;  %v3617_v11 = vadd.f32 %v7866_v8, %v3616_v37  ;;  %4833 = vmatprep.subr.mxu0 %v7802_v26  ;;  %v2074_v46 = vmax.f32 %v1562_v17, %v1818_v58  ;;  %v8083_v55 = vpop.permute.xlu1 %1012  ;;  %v11864_v59 = vld [vmem:[#allocation46_spill] sm:$0xff]  ;;  %v11867_v37 = vld [vmem:[#allocation95_spill] sm:$0xff] }
 0x20d   : > { %v1786_v28 = vmul.f32 0.2, %v1530_v52  ;;  %v1866_v3 = vmul.f32 0.2, %v1610_v33  ;;  %1260 = vbcast.lane.b32.xlu1 %v6920_v51, 336  ;;  %4834 = vmatpush3.msra.mxu0 %v11863_v4  ;;  %v8090_v18 = vadd.f32 %v11862_v48, %v2041_v0  ;;  %v8093_v56 = vadd.f32 %v11864_v59, %v2121_v36  ;;  %v3887_v4 = vld [vmem:[#allocation2] sm:$0xff] }
 0x20e   : > { %v8087_v15 = vmax.f32 %v2662_v20, %v8076_v43  ;;  %v8096_v26 = vadd.f32 %v11864_v59, %v2089_v62  ;;  %v3618_v8 = vadd.f32 %v7879_v41, %v3617_v11  ;;  %4835 = vmatprep.subr.mxu0 %v7791_v29  ;;  %v8101_v17 = vadd.f32 %v11867_v37, %v2074_v46  ;;  %v11868_v20 = vld [vmem:[#allocation14_spill] sm:$0xff]  ;;  %v8127_v11 = vpop.permute.xlu0 %878 }
 0x20f   : > { %11865 = vst [vmem:[#allocation59_spill] sm:$0xff] %v8093_v56  ;;  %v2042_v42 = vmax.f32 %v1530_v52, %v1786_v28  ;;  %v2122_v1 = vmax.f32 %v1610_v33, %v1866_v3  ;;  %4836 = vmatpush3.msra.mxu0 %v11868_v20  ;;  %v2626_v19 = vmax.f32 %v2625_v16, %v8090_v18  ;;  %v11869_v52 = vld [vmem:[#allocation50_spill] sm:$0xff]  ;;  %v11871_v16 = vld [vmem:[#allocation29_spill] sm:$0xff] }
 0x210   : > { %11866 = vst [vmem:[#allocation64_spill] sm:$0xff] %v8096_v26  ;;  %v2721_v58 = vmax.f32 %v2720_v21, %v8093_v56  ;;  %v2684_v36 = vmax.f32 %v2683_v32, %v8096_v26  ;;  %v1578_v62 = vadd.f32 %v11730_v45, %v7834_v6  ;;  %v3619_v41 = vadd.f32 %v7890_v57, %v3618_v8  ;;  %v11872_v6 = vld [vmem:[#allocation72_spill] sm:$0xff]  ;;  %v8129_v46 = vpop.permute.xlu1 %1019 }
 0x211   : > { %4837 = vmatprep.subr.mxu0 %v7780_v38  ;;  %v2664_v29 = vmax.f32 %v8087_v15, %v8101_v17  ;;  %v8114_v3 = vadd.f32 %v11867_v37, %v2042_v42  ;;  %v8117_v33 = vadd.f32 %v11869_v52, %v2122_v1  ;;  %v1563_v32 = vadd.f32 %v11717_v35, %v7864_v24  ;;  %v11873_v38 = vld [vmem:[#allocation79_spill] sm:$0xff]  ;;  %v11874_v8 = vld [vmem:[#allocation76_spill] sm:$0xff]  ;;  %v11875_v1 = vld [vmem:[#allocation142_spill] sm:$0xff] }
 0x212   : > { %4838 = vmatpush3.msra.mxu0 %v11871_v16  ;;  %v1834_v21 = vmul.f32 0.2, %v1578_v62  ;;  %v1531_v57 = vadd.f32 %v11719_v5, %v11872_v6  ;;  %1126 = vbcast.lane.b32.xlu0 %v6889_v39, 336  ;;  %v1611_v0 = vadd.f32 %v11723_v49, %v11873_v38  ;;  %v3620_v28 = vadd.f32 %v7900_v13, %v3619_v41  ;;  %v11876_v26 = vld [vmem:[#allocation20_spill] sm:$0xff]  ;;  %v11878_v13 = vld [vmem:[#allocation70_spill] sm:$0xff] }
 0x213   : > { %11870 = vst [vmem:[#allocation55_spill] sm:$0xff] %v8117_v33  ;;  %4839 = vmatprep.subr.mxu0 %v7761_v22  ;;  %v2627_v15 = vmax.f32 %v2626_v19, %v8114_v3  ;;  %v2722_v24 = vmax.f32 %v2721_v58, %v8117_v33  ;;  %v1579_v42 = vadd.f32 %v11730_v45, %v11874_v8  ;;  %v1819_v16 = vmul.f32 0.2, %v1563_v32  ;;  %v11879_v41 = vld [vmem:[#allocation140_spill] sm:$0xff] }
 0x214   : > { %4840 = vmatpush3.msra.mxu0 %v11875_v1  ;;  %v2090_v20 = vmax.f32 %v1578_v62, %v1834_v21  ;;  %v1787_v6 = vmul.f32 0.2, %v1531_v57  ;;  %v1867_v38 = vmul.f32 0.2, %v1611_v0  ;;  %v8139_v56 = vadd.f32 %v11876_v26, %v3620_v28  ;;  %1063 = vbcast.lane.b32.xlu1 %v6844_v53, 344 }
 0x215   : > { %4841 = vmatprep.subr.mxu0 %v11878_v13  ;;  %v1835_v22 = vmul.f32 0.2, %v1579_v42  ;;  %v1564_v19 = vadd.f32 %v11717_v35, %v7932_v14  ;;  %v1532_v58 = vadd.f32 %v11719_v5, %v7947_v2  ;;  %v2075_v21 = vmax.f32 %v1563_v32, %v1819_v16  ;;  %v11881_v2 = vld [vmem:[#allocation102_spill] sm:$0xff]  ;;  %v11882_v32 = vld [vmem:[#allocation52_spill] sm:$0xff] }
 0x216   : > { %11877 = vst [vmem:[#allocation74_spill] sm:$0xff] %v8139_v56  ;;  %4842 = vmatpush3.msra.mxu0 %v11879_v41  ;;  %v8149_v62 = vadd.f32 %v11869_v52, %v2090_v20  ;;  %v2043_v8 = vmax.f32 %v1531_v57, %v1787_v6  ;;  %v2123_v26 = vmax.f32 %v1611_v0, %v1867_v38  ;;  %v8164_v0 = vpop.permute.xlu0 %885 }
 0x217   : > { %3968 = vmatmul.mubr.f32.vlgmr.msra.gmra.mxu0 %v3887_v4  ;;  %v2091_v28 = vmax.f32 %v1579_v42, %v1835_v22  ;;  %929 = vbcast.lane.b32.xlu0 %v6855_v60, 344  ;;  %v1820_v1 = vmul.f32 0.2, %v1564_v19  ;;  %v1788_v13 = vmul.f32 0.2, %v1532_v58  ;;  %v1612_v14 = vadd.f32 %v11723_v49, %v7972_v23  ;;  %v8166_v4 = vpop.permute.xlu1 %1023 }
 0x218   : > { %11880 = vst [vmem:[#allocation86_spill] sm:$0xff] %v8149_v62  ;;  %v2685_v56 = vmax.f32 %v2684_v36, %v8149_v62  ;;  %v8156_v33 = vadd.f32 %v11881_v2, %v2075_v21  ;;  %v8159_v20 = vadd.f32 %v11881_v2, %v2043_v8  ;;  %v8162_v57 = vadd.f32 %v11882_v32, %v2123_v26  ;;  %v11885_v8 = vld [vmem:[#allocation104_spill] sm:$0xff] }
 0x219   : > { %v8169_v42 = vadd.f32 %v11882_v32, %v2091_v28  ;;  %v2076_v16 = vmax.f32 %v1564_v19, %v1820_v1  ;;  %v2044_v23 = vmax.f32 %v1532_v58, %v1788_v13  ;;  %1264 = vbcast.lane.b32.xlu1 %v6920_v51, 344  ;;  %v1868_v36 = vmul.f32 0.2, %v1612_v14  ;;  %v11886_v1 = vld [vmem:[#allocation56_spill] sm:$0xff] }
 0x21a   : > { %11883 = vst [vmem:[#allocation98_spill] sm:$0xff] %v8162_v57  ;;  %v2665_v6 = vmax.f32 %v2664_v29, %v8156_v33  ;;  %v2628_v38 = vmax.f32 %v2627_v15, %v8159_v20  ;;  %v2723_v22 = vmax.f32 %v2722_v24, %v8162_v57  ;;  %v1580_v41 = vadd.f32 %v11730_v45, %v7982_v47  ;;  %v11897_v2 = vld [vmem:[#allocation16_spill] sm:$0xff] }
 0x21b   : > { %11884 = vst [vmem:[#allocation42_spill] sm:$0xff] %v8169_v42  ;;  %v2686_v21 = vmax.f32 %v2685_v56, %v8169_v42  ;;  %v8179_v26 = vadd.f32 %v11885_v8, %v2076_v16  ;;  %v8182_v19 = vadd.f32 %v11885_v8, %v2044_v23  ;;  %1130 = vbcast.lane.b32.xlu0 %v6889_v39, 344  ;;  %v8199_v42 = vpop.permute.xlu1 %1090 }
 0x21c   : > { %v2124_v58 = vmax.f32 %v1612_v14, %v1868_v36  ;;  %v1836_v28 = vmul.f32 0.2, %v1580_v41  ;;  %v1565_v29 = vadd.f32 %v11717_v35, %v8000_v9  ;;  %v1533_v15 = vadd.f32 %v11719_v5, %v8006_v12  ;;  %v890_v12 = vpop.permute.xlu0 %889 }
 0x21d   : > { %v1613_v47 = vadd.f32 %v11723_v49, %v8029_v61  ;;  %v2666_v56 = vmax.f32 %v2665_v6, %v8179_v26  ;;  %v2629_v24 = vmax.f32 %v2628_v38, %v8182_v19  ;;  %1067 = vbcast.lane.b32.xlu1 %v6844_v53, 352  ;;  %v1581_v14 = vadd.f32 %v11730_v45, %v8038_v27 }
 0x21e   : > { %v8194_v13 = vadd.f32 %v11886_v1, %v2124_v58  ;;  %v2092_v16 = vmax.f32 %v1580_v41, %v1836_v28  ;;  %v1821_v9 = vmul.f32 0.2, %v1565_v29  ;;  %v1789_v23 = vmul.f32 0.2, %v1533_v15 }
 0x21f   : > { %v1869_v36 = vmul.f32 0.2, %v1613_v47  ;;  %933 = vbcast.lane.b32.xlu0 %v6855_v60, 352  ;;  %v1837_v6 = vmul.f32 0.2, %v1581_v14  ;;  %v1566_v38 = vadd.f32 %v11717_v35, %v8064_v10  ;;  %v1534_v58 = vadd.f32 %v11719_v5, %v8078_v54  ;;  %v11889_v35 = vld [vmem:[#allocation105_spill] sm:$0xff] }
 0x220   : > { %11887 = vst [vmem:[#allocation38_spill] sm:$0xff] %v8194_v13  ;;  %v2724_v61 = vmax.f32 %v2723_v22, %v8194_v13  ;;  %v8208_v27 = vadd.f32 %v11886_v1, %v2092_v16  ;;  %v2077_v41 = vmax.f32 %v1565_v29, %v1821_v9  ;;  %v2045_v28 = vmax.f32 %v1533_v15, %v1789_v23  ;;  %v11890_v54 = vld [vmem:[#allocation58_spill] sm:$0xff] }
 0x221   : > { %v2125_v62 = vmax.f32 %v1613_v47, %v1869_v36  ;;  %1268 = vbcast.lane.b32.xlu1 %v6920_v51, 352  ;;  %v2093_v57 = vmax.f32 %v1581_v14, %v1837_v6  ;;  %v1822_v8 = vmul.f32 0.2, %v1566_v38  ;;  %v1790_v22 = vmul.f32 0.2, %v1534_v58  ;;  %v1087_v36 = vpop.permute.xlu0 %1086 }
 0x222   : > { %11888 = vst [vmem:[#allocation43_spill] sm:$0xff] %v8208_v27  ;;  %v1614_v13 = vadd.f32 %v11723_v49, %v8083_v55  ;;  %v2687_v32 = vmax.f32 %v2686_v21, %v8208_v27  ;;  %v8215_v10 = vadd.f32 %v11889_v35, %v2077_v41  ;;  %v8218_v5 = vadd.f32 %v11889_v35, %v2045_v28  ;;  %v11894_v28 = vld [vmem:[#allocation62_spill] sm:$0xff] }
 0x223   : > { %v8221_v29 = vadd.f32 %v11890_v54, %v2125_v62  ;;  %1134 = vbcast.lane.b32.xlu0 %v6889_v39, 352  ;;  %v8225_v15 = vadd.f32 %v11890_v54, %v2093_v57  ;;  %v2078_v47 = vmax.f32 %v1566_v38, %v1822_v8  ;;  %v2046_v14 = vmax.f32 %v1534_v58, %v1790_v22  ;;  %v1225_v62 = vpop.permute.xlu1 %1224  ;;  %v11893_v57 = vld [vmem:[#allocation118_spill] sm:$0xff] }
 0x224   : > { %v1870_v16 = vmul.f32 0.2, %v1614_v13  ;;  %v2667_v55 = vmax.f32 %v2666_v56, %v8215_v10  ;;  %v2630_v21 = vmax.f32 %v2629_v24, %v8218_v5  ;;  %v1582_v23 = vadd.f32 %v11730_v45, %v8127_v11 }
 0x225   : > { %11891 = vst [vmem:[#allocation138_spill] sm:$0xff] %v8221_v29  ;;  %11892 = vst [vmem:[#allocation47_spill] sm:$0xff] %v8225_v15  ;;  %v2725_v9 = vmax.f32 %v2724_v61, %v8221_v29  ;;  %v2688_v6 = vmax.f32 %v2687_v32, %v8225_v15  ;;  %1071 = vbcast.lane.b32.xlu1 %v6844_v53, 360  ;;  %v8235_v41 = vadd.f32 %v11893_v57, %v2078_v47  ;;  %v1221_v15 = vpop.permute.xlu0 %1220 }
 0x226   : > { %v8238_v8 = vadd.f32 %v11893_v57, %v2046_v14  ;;  %v2126_v56 = vmax.f32 %v1614_v13, %v1870_v16  ;;  %v1838_v38 = vmul.f32 0.2, %v1582_v23  ;;  %v1615_v24 = vadd.f32 %v11723_v49, %v8129_v46 }
 0x227   : > { %v1583_v11 = vadd.f32 %v11730_v45, %v8164_v0  ;;  %v1616_v61 = vadd.f32 %v11723_v49, %v8166_v4  ;;  %937 = vbcast.lane.b32.xlu0 %v6855_v60, 360  ;;  %v2668_v32 = vmax.f32 %v2667_v55, %v8235_v41  ;;  %v1584_v13 = vadd.f32 %v11730_v45, %v890_v12  ;;  %v1028_v0 = vpop.permute.xlu1 %1027  ;;  %v3892_v12 = vld [vmem:[#allocation2 + $0x28] sm:$0xff] }
 0x228   : > { %v2631_v58 = vmax.f32 %v2630_v21, %v8238_v8  ;;  %v8250_v22 = vadd.f32 %v11894_v28, %v2126_v56  ;;  %v2094_v47 = vmax.f32 %v1582_v23, %v1838_v38  ;;  %v1871_v14 = vmul.f32 0.2, %v1615_v24  ;;  %v3894_v23 = vld [vmem:[#allocation2 + $0x38] sm:$0xff]  ;;  %4113 = vmatprep.mubr.f32.mxu0 %v3892_v12 }
 0x229   : > { %v1839_v46 = vmul.f32 0.2, %v1583_v11  ;;  %v1872_v16 = vmul.f32 0.2, %v1616_v61  ;;  %v2669_v27 = vrot.slane %v2668_v32, 4  ;;  %1272 = vbcast.lane.b32.xlu1 %v6920_v51, 360  ;;  %v1632_v52 = vadd.f32 %v11897_v2, %v8199_v42  ;;  %4186 = vmatprep.mubr.f32.mxu1 %v3894_v23 }
 0x22a   : > { %11895 = vst [vmem:[#allocation53_spill] sm:$0xff] %v8250_v22  ;;  %v2632_v29 = vrot.slane %v2631_v58, 4  ;;  %v2726_v4 = vmax.f32 %v2725_v9, %v8250_v22  ;;  %v1840_v55 = vmul.f32 0.2, %v1584_v13  ;;  %v8256_v21 = vadd.f32 %v11894_v28, %v2094_v47  ;;  %v11898_v9 = vld [vmem:[#allocation65_spill] sm:$0xff] }
 0x22b   : > { %v2127_v56 = vmax.f32 %v1615_v24, %v1871_v14  ;;  %v2095_v57 = vmax.f32 %v1583_v11, %v1839_v46  ;;  %v2128_v54 = vmax.f32 %v1616_v61, %v1872_v16  ;;  %v2670_v38 = vmax.f32 %v2668_v32, %v2669_v27  ;;  %1138 = vbcast.lane.b32.xlu0 %v6889_v39, 360  ;;  %v11901_v24 = vld [vmem:[#allocation69_spill] sm:$0xff]  ;;  %v894_v61 = vpop.permute.xlu0 %893  ;;  %v1229_v27 = vpop.permute.xlu1 %1228 }
 0x22c   : > { %11896 = vst [vmem:[#allocation22_spill] sm:$0xff] %v8256_v21  ;;  %v2633_v35 = vmax.f32 %v2631_v58, %v2632_v29  ;;  %v2096_v1 = vmax.f32 %v1584_v13, %v1840_v55  ;;  %v2689_v37 = vmax.f32 %v2688_v6, %v8256_v21  ;;  %v1888_v6 = vmul.f32 0.2, %v1632_v52  ;;  %v11906_v13 = vld [vmem:[#allocation17_spill] sm:$0xff] }
 0x22d   : > { %v8263_v22 = vadd.f32 %v11898_v9, %v2127_v56  ;;  %v8266_v47 = vadd.f32 %v11898_v9, %v2095_v57  ;;  %v8269_v11 = vadd.f32 %v11901_v24, %v2128_v54  ;;  %v2671_v29 = vrot.slane %v2670_v38, 2  ;;  %1075 = vbcast.lane.b32.xlu1 %v6844_v53, 368 }
 0x22e   : > { %v2634_v32 = vrot.slane %v2633_v35, 2  ;;  %v8273_v42 = vadd.f32 %v11901_v24, %v2096_v1  ;;  %v1631_v54 = vadd.f32 %v11897_v2, %v1087_v36  ;;  %v1664_v14 = vadd.f32 %v11906_v13, %v1225_v62  ;;  %v11908_v62 = vld [vmem:[#allocation18_spill] sm:$0xff] }
 0x22f   : > { %11899 = vst [vmem:[#allocation75_spill] sm:$0xff] %v8263_v22  ;;  %11900 = vst [vmem:[#allocation136_spill] sm:$0xff] %v8266_v47  ;;  %v8276_v58 = vmax.f32 %v2726_v4, %v8263_v22  ;;  %v8279_v57 = vmax.f32 %v2689_v37, %v8266_v47  ;;  %v2672_v46 = vmax.f32 %v2670_v38, %v2671_v29  ;;  %941 = vbcast.lane.b32.xlu0 %v6855_v60, 368  ;;  %v8300_v38 = vpop.permute.xlu1 %1031  ;;  %v11913_v4 = vld [vmem:[#allocation11_spill] sm:$0xff] }
 0x230   : > { %11902 = vst [vmem:[#allocation39_spill] sm:$0xff] %v8269_v11  ;;  %11903 = vst [vmem:[#allocation91_spill] sm:$0xff] %v8273_v42  ;;  %v2635_v16 = vmax.f32 %v2633_v35, %v2634_v32  ;;  %v2144_v55 = vmax.f32 %v1632_v52, %v1888_v6  ;;  %v8285_v1 = vadd.f32 %v11906_v13, %v1221_v15  ;;  %v1887_v37 = vmul.f32 0.2, %v1631_v54  ;;  %v8298_v15 = vpop.permute.xlu0 %1094  ;;  %v5707_v6 = vld [vmem:[%s10922_s1 + $0x8] sm:$0xff]  ;;  %v11940_v42 = vld [vmem:[#allocation133_spill] sm:$0xff] }
 0x231   : > { %11904 = vst [vmem:[#allocation33_spill] sm:$0xff] %v8276_v58  ;;  %11905 = vst [vmem:[#allocation12_spill] sm:$0xff] %v8279_v57  ;;  %v1920_v12 = vmul.f32 0.2, %v1664_v14  ;;  %v2673_v23 = vrot.slane %v2672_v46, 1  ;;  %1276 = vbcast.lane.b32.xlu1 %v6920_v51, 368 }
 0x232   : > { %11907 = vst [vmem:[#allocation14_spill] sm:$0xff] %v8285_v1  ;;  %v2636_v36 = vrot.slane %v2635_v16, 1  ;;  %v8293_v35 = vadd.f32 %v11908_v62, %v2144_v55  ;;  %v8296_v52 = vmul.f32 0.2, %v8285_v1  ;;  %11911 = vst [vmem:[#allocation79_spill] sm:$0xff] %v8298_v15  ;;  %v2143_v29 = vmax.f32 %v1631_v54, %v1887_v37  ;;  %v11917_v37 = vld [vmem:[#allocation19_spill] sm:$0xff] }
 0x233   : > { %11912 = vst [vmem:[#allocation76_spill] sm:$0xff] %v8300_v38  ;;  %v2176_v32 = vmax.f32 %v1664_v14, %v1920_v12  ;;  %v11914_v56 = vsub.s32 7, %v11913_v4  ;;  %v11915_v55 = vsub.s32 6, %v11913_v4  ;;  %v8313_v22 = vmax.f32 %v2672_v46, %v2673_v23  ;;  %1142 = vbcast.lane.b32.xlu0 %v6889_v39, 368  ;;  %v11941_v57 = vld [vmem:[#allocation137_spill] sm:$0xff]  ;;  %v11949_v15 = vld [vmem:[#allocation100_spill] sm:$0xff] }
 0x234   : > { %11909 = vst [vmem:[#allocation29_spill] sm:$0xff] %v8293_v35  ;;  %11910 = vst [vmem:[#allocation72_spill] sm:$0xff] %v8296_v52  ;;  %v8315_v24 = vmax.f32 %v2635_v16, %v2636_v36  ;;  %v8321_v14 = vadd.f32 %v11723_v49, %v1028_v0  ;;  %v8324_v12 = vadd.f32 %v11917_v37, %v2143_v29  ;;  %v11922_v16 = vld [vmem:[#allocation99_spill] sm:$0xff]  ;;  %v11923_v36 = vld [vmem:[#allocation97_spill] sm:$0xff] }
 0x235   : > { %v8307_v47 = vrot.slane %v5707_v6, %v11914_v56  ;;  %v8311_v21 = vrot.slane %v5707_v6, %v11915_v55  ;;  %v8327_v56 = vadd.f32 %v11908_v62, %v2176_v32  ;;  %v8330_v4 = vadd.f32 %v11730_v45, %v894_v61  ;;  %v11924_v0 = vld [vmem:[#allocation101_spill] sm:$0xff]  ;;  %v11925_v29 = vld [vmem:[#allocation106_spill] sm:$0xff]  ;;  %1079 = vbcast.lane.b32.xlu1 %v6844_v53, 376  ;;  %v8344_v62 = vpop.permute.xlu0 %897  ;;  %v8346_v61 = vpop.permute.xlu1 %1232  ;;  %v11933_v53 = vld [vmem:[#allocation119_spill] sm:$0xff] }
 0x236   : > { %11916 = vst [vmem:[#allocation142_spill] sm:$0xff] %v8321_v14  ;;  %11918 = vst [vmem:[#allocation20_spill] sm:$0xff] %v8324_v12  ;;  %v8333_v46 = vadd.f32 %v11906_v13, %v1229_v27  ;;  %v2919_v23 = vsub.f32 %v11922_v16, %v8313_v22  ;;  %v2920_v6 = vsub.f32 %v11923_v36, %v8313_v22  ;;  %v11928_v27 = vld [vmem:[#allocation108_spill] sm:$0xff]  ;;  %v11929_v16 = vld [vmem:[#allocation110_spill] sm:$0xff] }
 0x237   : > { %11919 = vst [vmem:[#allocation70_spill] sm:$0xff] %v8327_v56  ;;  %11920 = vst [vmem:[#allocation140_spill] sm:$0xff] %v8330_v4  ;;  %v2921_v55 = vsub.f32 %v11924_v0, %v8313_v22  ;;  %v2922_v54 = vsub.f32 %v11925_v29, %v8313_v22  ;;  %v2923_v32 = vsub.f32 %v11928_v27, %v8313_v22  ;;  %v11930_v36 = vld [vmem:[#allocation112_spill] sm:$0xff]  ;;  %v11931_v0 = vld [vmem:[#allocation114_spill] sm:$0xff]  ;;  %945 = vbcast.lane.b32.xlu0 %v6855_v60, 376 }
 0x238   : > { %11921 = vst [vmem:[#allocation18_spill] sm:$0xff] %v8333_v46  ;;  %11926 = vst [vmem:[#allocation11_spill] sm:$0xff] %v8344_v62  ;;  %v2924_v9 = vsub.f32 %v11929_v16, %v8313_v22  ;;  %v2925_v28 = vsub.f32 %v11930_v36, %v8313_v22  ;;  %v2926_v59 = vsub.f32 %v11931_v0, %v8313_v22  ;;  %v11932_v29 = vld [vmem:[#allocation116_spill] sm:$0xff]  ;;  %v11935_v27 = vld [vmem:[#allocation123_spill] sm:$0xff] }
 0x239   : > { %11927 = vst [vmem:[#allocation99_spill] sm:$0xff] %v8346_v61  ;;  %v2927_v48 = vsub.f32 %v11932_v29, %v8313_v22  ;;  %v2928_v7 = vsub.f32 %v11933_v53, %v8313_v22  ;;  %v2929_v63 = vsub.f32 %v11934_v31, %v8313_v22  ;;  %v2930_v13 = vsub.f32 %v11935_v27, %v8313_v22  ;;  %v11936_v16 = vld [vmem:[#allocation125_spill] sm:$0xff]  ;;  %v11937_v61 = vld [vmem:[#allocation127_spill] sm:$0xff] }
 0x23a   : > { %v2931_v36 = vsub.f32 %v11936_v16, %v8313_v22  ;;  %v2932_v0 = vsub.f32 %v11937_v61, %v8313_v22  ;;  %v11938_v45 = vld [vmem:[#allocation129_spill] sm:$0xff]  ;;  %v11939_v62 = vld [vmem:[#allocation131_spill] sm:$0xff]  ;;  %v2935_v31 = vsub.f32 %v11940_v42, %v8313_v22  ;;  %v2936_v27 = vsub.f32 %v11941_v57, %v8313_v22  ;;  %v11943_v16 = vld [vmem:[#allocation28_spill] sm:$0xff]  ;;  %1280 = vbcast.lane.b32.xlu1 %v6920_v51, 376  ;;  %v8382_v61 = vpop.permute.xlu0 %1098 }
 0x23b   : > { %v2933_v29 = vsub.f32 %v11938_v45, %v8313_v22  ;;  %v2934_v53 = vsub.f32 %v11939_v62, %v8313_v22  ;;  %v11942_v60 = vld [vmem:[#allocation89_spill] sm:$0xff]  ;;  %v2938_v58 = vsub.f32 %v11943_v16, %v8313_v22  ;;  %11944 = vst [vmem:[#allocation97_spill] sm:$0xff] %v8382_v61  ;;  %v8384_v45 = vpop.permute.xlu1 %1035  ;;  %v11948_v57 = vld [vmem:[#allocation54_spill] sm:$0xff]  ;;  %v2943_v16 = vsub.f32 %v7970_v34, %v8313_v22 }
 0x23c   : > { %v2937_v11 = vsub.f32 %v11942_v60, %v8313_v22  ;;  %11945 = vst [vmem:[#allocation101_spill] sm:$0xff] %v8384_v45  ;;  %v11946_v62 = vld [vmem:[#allocation49_spill] sm:$0xff]  ;;  %v2941_v2 = vsub.f32 %v11948_v57, %v8313_v22  ;;  %v2942_v60 = vsub.f32 %v7942_v44, %v8313_v22  ;;  %v2944_v51 = vsub.f32 %v8022_v50, %v8313_v22 }
 0x23d   : > { %v2939_v49 = vsub.f32 %v11946_v62, %v8313_v22  ;;  %v11947_v42 = vld [vmem:[#allocation45_spill] sm:$0xff]  ;;  %v2945_v45 = vsub.f32 %v8076_v43, %v8313_v22  ;;  %v2946_v62 = vsub.f32 %v8101_v17, %v8313_v22  ;;  %1146 = vbcast.lane.b32.xlu0 %v6889_v39, 376  ;;  %v2948_v44 = vsub.f32 %v8179_v26, %v8313_v22  ;;  %v11952_v26 = vld [vmem:[#allocation96_spill] sm:$0xff] }
 0x23e   : > { %v2940_v38 = vsub.f32 %v11947_v42, %v8313_v22  ;;  %v2947_v42 = vsub.f32 %v8156_v33, %v8313_v22  ;;  %v2949_v34 = vsub.f32 %v8215_v10, %v8313_v22  ;;  %v2950_v50 = vsub.f32 %v8235_v41, %v8313_v22  ;;  %v8413_v46 = vpop.permute.xlu0 %901  ;;  %1287 = vbcast.lane.b32.xlu1 %v8307_v47, 256 }
 0x23f   : > { %v3271_v57 = vmul.f32 1.442695, %v2919_v23  ;;  %v3273_v61 = vmul.f32 1.442695, %v2920_v6  ;;  %v3275_v43 = vmul.f32 1.442695, %v2921_v55  ;;  %v8415_v39 = vpop.permute.xlu1 %1236 }
 0x240   : > { %11950 = vst [vmem:[#allocation106_spill] sm:$0xff] %v8413_v46  ;;  %11951 = vst [vmem:[#allocation108_spill] sm:$0xff] %v8415_v39  ;;  %v3277_v33 = vmul.f32 1.442695, %v2922_v54  ;;  %v3279_v56 = vmul.f32 1.442695, %v2923_v32 }
 0x241   : > { %v3281_v4 = vmul.f32 1.442695, %v2924_v9  ;;  %5289 = vpow2.f32 %v3271_v57  ;;  %v3283_v10 = vmul.f32 1.442695, %v2925_v28  ;;  %v3285_v37 = vmul.f32 1.442695, %v2926_v59 }
 0x242   : > { %v3287_v41 = vmul.f32 1.442695, %v2927_v48  ;;  %5291 = vpow2.f32 %v3273_v61  ;;  %v3289_v22 = vmul.f32 1.442695, %v2928_v7  ;;  %v3291_v23 = vmul.f32 1.442695, %v2929_v63  ;;  %v8419_v52 = vpop.permute.xlu0 %1102 }
 0x243   : > { %v3293_v6 = vmul.f32 1.442695, %v2930_v13  ;;  %5293 = vpow2.f32 %v3275_v43  ;;  %v3295_v55 = vmul.f32 1.442695, %v2931_v36  ;;  %v3297_v17 = vmul.f32 1.442695, %v2932_v0  ;;  %v8421_v54 = vpop.permute.xlu1 %1039 }
 0x244   : > { %v3299_v46 = vmul.f32 1.442695, %v2933_v29  ;;  %11953 = vst [vmem:[#allocation110_spill] sm:$0xff] %v8419_v52  ;;  %11954 = vst [vmem:[#allocation112_spill] sm:$0xff] %v8421_v54  ;;  %5295 = vpow2.f32 %v3277_v33  ;;  %v3301_v9 = vmul.f32 1.442695, %v2934_v53 }
 0x245   : > { %v3303_v32 = vmul.f32 1.442695, %v2935_v31  ;;  %v8423_v14 = vmul.f32 1.442695, %v2936_v27  ;;  %5297 = vpow2.f32 %v3279_v56  ;;  %v8425_v59 = vmul.f32 1.442695, %v2937_v11 }
 0x246   : > { %v8427_v48 = vmul.f32 1.442695, %v2938_v58  ;;  %v8429_v63 = vmul.f32 1.442695, %v2939_v49  ;;  %5299 = vpow2.f32 %v3281_v4  ;;  %v8431_v7 = vmul.f32 1.442695, %v2940_v38  ;;  %v8443_v11 = vpop.permute.xlu0 %905 }
 0x247   : > { %v8433_v28 = vmul.f32 1.442695, %v2941_v2  ;;  %v8435_v13 = vmul.f32 1.442695, %v2942_v60  ;;  %5301 = vpow2.f32 %v3283_v10  ;;  %v8437_v36 = vmul.f32 1.442695, %v2943_v16  ;;  %v8445_v58 = vpop.permute.xlu1 %1240 }
 0x248   : > { %v8439_v0 = vmul.f32 1.442695, %v2944_v51  ;;  %v8441_v29 = vmul.f32 1.442695, %v2945_v45  ;;  %11955 = vst [vmem:[#allocation114_spill] sm:$0xff] %v8443_v11  ;;  %11956 = vst [vmem:[#allocation116_spill] sm:$0xff] %v8445_v58  ;;  %5303 = vpow2.f32 %v3285_v37  ;;  %v11989_v11 = vsub.f32 %v11949_v15, %v8315_v24 }
 0x249   : > { %v8447_v49 = vmul.f32 1.442695, %v2946_v62  ;;  %v8449_v38 = vmul.f32 1.442695, %v2947_v42  ;;  %v8451_v2 = vmul.f32 1.442695, %v2948_v44  ;;  %5305 = vpow2.f32 %v3287_v41 }
 0x24a   : > { %v8453_v56 = vmul.f32 1.442695, %v2949_v34  ;;  %v8455_v4 = vmul.f32 1.442695, %v2950_v50  ;;  %v11957_v53 = vld [vmem:[#allocation103_spill] sm:$0xff]  ;;  %1153 = vbcast.lane.b32.xlu0 %v8311_v21, 256  ;;  %5307 = vpow2.f32 %v3289_v22  ;;  %v8473_v57 = vpop.permute.xlu0 %1106 }
 0x24b   : > { %v11958_v37 = vld [vmem:[#allocation107_spill] sm:$0xff]  ;;  %v11959_v61 = vld [vmem:[#allocation109_spill] sm:$0xff]  ;;  %5309 = vpow2.f32 %v3291_v23  ;;  %11964 = vst [vmem:[#allocation119_spill] sm:$0xff] %v8473_v57  ;;  %v11965_v43 = vld [vmem:[#allocation120_spill] sm:$0xff]  ;;  %1291 = vbcast.lane.b32.xlu1 %v8307_v47, 264 }
 0x24c   : > { %v2890_v27 = vsub.f32 %v11958_v37, %v8315_v24  ;;  %v11960_v60 = vld [vmem:[#allocation111_spill] sm:$0xff]  ;;  %v11961_v51 = vld [vmem:[#allocation113_spill] sm:$0xff]  ;;  %5311 = vpow2.f32 %v3293_v6  ;;  %v11966_v10 = vld [vmem:[#allocation122_spill] sm:$0xff]  ;;  %v8489_v6 = vpop.permute.xlu1 %1043 }
 0x24d   : > { %v11962_v42 = vld [vmem:[#allocation115_spill] sm:$0xff]  ;;  %v11963_v34 = vld [vmem:[#allocation117_spill] sm:$0xff]  ;;  %v11967_v22 = vld [vmem:[#allocation124_spill] sm:$0xff]  ;;  %5313 = vpow2.f32 %v3295_v55  ;;  %11971 = vst [vmem:[#allocation121_spill] sm:$0xff] %v8489_v6 }
 0x24e   : > { %v11968_v37 = vld [vmem:[#allocation126_spill] sm:$0xff]  ;;  %v11969_v44 = vld [vmem:[#allocation128_spill] sm:$0xff]  ;;  %1157 = vbcast.lane.b32.xlu0 %v8311_v21, 264  ;;  %v8491_v41 = vpop.eup %5289  ;;  %5315 = vpow2.f32 %v3297_v17  ;;  %v11975_v16 = vld [vmem:[#allocation139_spill] sm:$0xff]  ;;  %v8515_v1 = vpop.permute.xlu0 %909 }
 0x24f   : > { %v11970_v50 = vld [vmem:[#allocation130_spill] sm:$0xff]  ;;  %11972 = vst [vmem:[#allocation123_spill] sm:$0xff] %v8491_v41  ;;  %v11973_v55 = vld [vmem:[#allocation132_spill] sm:$0xff]  ;;  %v8499_v57 = vpop.eup %5291  ;;  %5317 = vpow2.f32 %v3299_v46  ;;  %v11979_v17 = vld [vmem:[#allocation83_spill] sm:$0xff]  ;;  %1295 = vbcast.lane.b32.xlu1 %v8307_v47, 272 }
 0x250   : > { %v11974_v62 = vld [vmem:[#allocation134_spill] sm:$0xff]  ;;  %11976 = vst [vmem:[#allocation125_spill] sm:$0xff] %v8499_v57  ;;  %v11977_v45 = vld [vmem:[#allocation92_spill] sm:$0xff]  ;;  %v8507_v52 = vpop.eup %5293  ;;  %5319 = vpow2.f32 %v3301_v9  ;;  %v3702_v33 = vadd.f32 %v8499_v57, %v8491_v41  ;;  %11983 = vst [vmem:[#allocation129_spill] sm:$0xff] %v8515_v1 }
 0x251   : > { %v11978_v6 = vld [vmem:[#allocation34_spill] sm:$0xff]  ;;  %11980 = vst [vmem:[#allocation127_spill] sm:$0xff] %v8507_v52  ;;  %v11981_v31 = vld [vmem:[#allocation48_spill] sm:$0xff]  ;;  %v8517_v58 = vpop.eup %5295  ;;  %5321 = vpow2.f32 %v3303_v32  ;;  %v8555_v32 = vmul.f32 1.442695, %v11989_v11 }
 0x252   : > { %v11982_v46 = vld [vmem:[#allocation82_spill] sm:$0xff]  ;;  %11984 = vst [vmem:[#allocation131_spill] sm:$0xff] %v8517_v58  ;;  %1161 = vbcast.lane.b32.xlu0 %v8311_v21, 272  ;;  %v8527_v23 = vpop.eup %5297  ;;  %5323 = vpow2.f32 %v8423_v14  ;;  %v3703_v39 = vadd.f32 %v8507_v52, %v3702_v33  ;;  %v8544_v33 = vpop.permute.xlu1 %1244  ;;  %v11991_v14 = vsub.f32 %v11952_v26, %v8315_v24  ;;  %v11995_v26 = vsub.f32 %v11960_v60, %v8315_v24 }
 0x253   : > { %11985 = vst [vmem:[#allocation133_spill] sm:$0xff] %v8527_v23  ;;  %v8535_v9 = vpop.eup %5299  ;;  %5325 = vpow2.f32 %v8425_v59  ;;  %11987 = vst [vmem:[#allocation89_spill] sm:$0xff] %v8544_v33  ;;  %v8570_v59 = vmul.f32 1.442695, %v2890_v27  ;;  %1299 = vbcast.lane.b32.xlu1 %v8307_v47, 280 }
 0x254   : > { %11986 = vst [vmem:[#allocation137_spill] sm:$0xff] %v8535_v9  ;;  %v8546_v57 = vpop.eup %5301  ;;  %5327 = vpow2.f32 %v8427_v48  ;;  %v3704_v54 = vadd.f32 %v8517_v58, %v3703_v39  ;;  %v8563_v52 = vmul.f32 1.442695, %v11991_v14  ;;  %v11992_v39 = vsub.f32 %v11957_v53, %v8315_v24  ;;  %v8588_v53 = vpop.permute.xlu0 %1110 }
 0x255   : > { %11988 = vst [vmem:[#allocation28_spill] sm:$0xff] %v8546_v57  ;;  %v8557_v41 = vpop.eup %5303  ;;  %5329 = vpow2.f32 %v8429_v63  ;;  %v11994_v63 = vsub.f32 %v11959_v61, %v8315_v24  ;;  %v8584_v14 = vmul.f32 1.442695, %v11995_v26  ;;  %11996 = vst [vmem:[#allocation54_spill] sm:$0xff] %v8588_v53  ;;  %v11998_v61 = vsub.f32 %v11962_v42, %v8315_v24 }
 0x256   : > { %11990 = vst [vmem:[#allocation49_spill] sm:$0xff] %v8557_v41  ;;  %v8568_v48 = vmul.f32 1.442695, %v11992_v39  ;;  %v8572_v58 = vpop.eup %5305  ;;  %5331 = vpow2.f32 %v8431_v7  ;;  %v3705_v15 = vadd.f32 %v8527_v23, %v3704_v54  ;;  %1165 = vbcast.lane.b32.xlu0 %v8311_v21, 280  ;;  %v11997_v54 = vsub.f32 %v11961_v51, %v8315_v24  ;;  %v12034_v23 = vld [vmem:[#allocation19_spill] sm:$0xff] }
 0x257   : > { %11993 = vst [vmem:[#allocation45_spill] sm:$0xff] %v8572_v58  ;;  %v8579_v11 = vmul.f32 1.442695, %v11994_v63  ;;  %v8590_v27 = vpop.eup %5307  ;;  %5333 = vpow2.f32 %v8433_v28  ;;  %v8601_v60 = vmul.f32 1.442695, %v11998_v61  ;;  %v11999_v39 = vsub.f32 %v11963_v34, %v8315_v24  ;;  %1303 = vbcast.lane.b32.xlu1 %v8307_v47, 288 }
 0x258   : > { %v8596_v7 = vmul.f32 1.442695, %v11997_v54  ;;  %v8608_v26 = vpop.eup %5309  ;;  %5335 = vpow2.f32 %v8435_v13  ;;  %v3706_v28 = vadd.f32 %v8535_v9, %v3705_v15  ;;  %v12000_v51 = vsub.f32 %v11965_v43, %v8315_v24 }
 0x259   : > { %v8606_v63 = vmul.f32 1.442695, %v11999_v39  ;;  %v12001_v42 = vsub.f32 %v11966_v10, %v8315_v24  ;;  %v8622_v53 = vpop.eup %5311  ;;  %5337 = vpow2.f32 %v8437_v36  ;;  %v12002_v34 = vsub.f32 %v11967_v22, %v8315_v24 }
 0x25a   : > { %v8615_v54 = vmul.f32 1.442695, %v12000_v51  ;;  %v12003_v15 = vsub.f32 %v11968_v37, %v8315_v24  ;;  %v12004_v39 = vsub.f32 %v11969_v44, %v8315_v24  ;;  %v8640_v51 = vpop.permute.xlu1 %1047  ;;  %5339 = vpow2.f32 %v8439_v0  ;;  %1169 = vbcast.lane.b32.xlu0 %v8311_v21, 288 }
 0x25b   : > { %v8620_v61 = vmul.f32 1.442695, %v12001_v42  ;;  %v8628_v13 = vmul.f32 1.442695, %v12002_v34  ;;  %12005 = vst [vmem:[#allocation100_spill] sm:$0xff] %v8640_v51  ;;  %v8642_v42 = vpop.eup %5313  ;;  %v3707_v36 = vadd.f32 %v8546_v57, %v3706_v28  ;;  %v12006_v22 = vsub.f32 %v11970_v50, %v8315_v24  ;;  %v8690_v51 = vpop.permute.xlu0 %913  ;;  %1307 = vbcast.lane.b32.xlu1 %v8307_v47, 296 }
 0x25c   : > { %v8633_v43 = vmul.f32 1.442695, %v12003_v15  ;;  %v8638_v10 = vmul.f32 1.442695, %v12004_v39  ;;  %v12007_v37 = vsub.f32 %v11973_v55, %v8315_v24  ;;  %v8658_v44 = vpop.eup %5315  ;;  %5341 = vpow2.f32 %v8441_v29  ;;  %12013 = vst [vmem:[#allocation96_spill] sm:$0xff] %v8690_v51 }
 0x25d   : > { %v8649_v34 = vmul.f32 1.442695, %v12006_v22  ;;  %v12008_v0 = vsub.f32 %v11974_v62, %v8315_v24  ;;  %v12009_v50 = vsub.f32 %v11975_v16, %v8315_v24  ;;  %v12010_v55 = vsub.f32 %v11977_v45, %v8315_v24 }
 0x25e   : > { %v8654_v15 = vmul.f32 1.442695, %v12007_v37  ;;  %v8676_v37 = vpop.eup %5317  ;;  %5343 = vpow2.f32 %v8447_v49  ;;  %v3708_v29 = vadd.f32 %v8557_v41, %v3707_v36  ;;  %v12011_v62 = vsub.f32 %v11978_v6, %v8315_v24  ;;  %1173 = vbcast.lane.b32.xlu0 %v8311_v21, 296 }
 0x25f   : > { %v8664_v28 = vmul.f32 1.442695, %v12008_v0  ;;  %v8669_v39 = vmul.f32 1.442695, %v12009_v50  ;;  %v8674_v22 = vmul.f32 1.442695, %v12010_v55  ;;  %v12012_v16 = vsub.f32 %v11979_v17, %v8315_v24  ;;  %v8692_v45 = vpop.eup %5319 }
 0x260   : > { %v8683_v0 = vmul.f32 1.442695, %v12011_v62  ;;  %5345 = vpow2.f32 %v8449_v38  ;;  %v12014_v49 = vsub.f32 %v11981_v31, %v8315_v24  ;;  %v12015_v6 = vsub.f32 %v11982_v46, %v8315_v24  ;;  %1311 = vbcast.lane.b32.xlu1 %v8307_v47, 304 }
 0x261   : > { %v8688_v50 = vmul.f32 1.442695, %v12012_v16  ;;  %v12016_v17 = vsub.f32 %v7945_v30, %v8315_v24  ;;  %v8710_v16 = vpop.eup %5321  ;;  %5347 = vpow2.f32 %v8451_v2  ;;  %v3709_v38 = vadd.f32 %v8572_v58, %v3708_v29 }
 0x262   : > { %v8698_v36 = vmul.f32 1.442695, %v12014_v49  ;;  %v8703_v55 = vmul.f32 1.442695, %v12015_v6  ;;  %v12017_v31 = vsub.f32 %v8004_v40, %v8315_v24  ;;  %v12018_v46 = vsub.f32 %v8027_v25, %v8315_v24  ;;  %v8726_v30 = vpop.eup %5323  ;;  %1177 = vbcast.lane.b32.xlu0 %v8311_v21, 304 }
 0x263   : > { %v8708_v62 = vmul.f32 1.442695, %v12016_v17  ;;  %5349 = vpow2.f32 %v8453_v56  ;;  %v12019_v2 = vsub.f32 %v8090_v18, %v8315_v24  ;;  %v12020_v40 = vsub.f32 %v8114_v3, %v8315_v24  ;;  %v8746_v51 = vpop.eup %5325 }
 0x264   : > { %v8717_v49 = vmul.f32 1.442695, %v12017_v31  ;;  %v8722_v6 = vmul.f32 1.442695, %v12018_v46  ;;  %v12022_v25 = vsub.f32 %v8159_v20, %v8315_v24  ;;  %v8744_v46 = vpop.permute.xlu1 %1248  ;;  %5351 = vpow2.f32 %v8455_v4  ;;  %v8760_v20 = vpop.eup %5327  ;;  %1315 = vbcast.lane.b32.xlu1 %v8307_v47, 312 }
 0x265   : > { %v8732_v29 = vmul.f32 1.442695, %v12019_v2  ;;  %v8737_v17 = vmul.f32 1.442695, %v12020_v40  ;;  %12024 = vst [vmem:[#allocation109_spill] sm:$0xff] %v8744_v46  ;;  %v3710_v18 = vadd.f32 %v8590_v27, %v3709_v38  ;;  %v12025_v56 = vsub.f32 %v8182_v19, %v8315_v24  ;;  %v12031_v19 = vld [vmem:[#allocation14_spill] sm:$0xff] }
 0x266   : > { %v8742_v31 = vmul.f32 1.442695, %v12022_v25  ;;  %v12027_v3 = vsub.f32 %v8218_v5, %v8315_v24  ;;  %5353 = vpow2.f32 %v8555_v32  ;;  %v12029_v25 = vsub.f32 %v8238_v8, %v8315_v24  ;;  %v8776_v5 = vpop.eup %5329  ;;  %v12036_v32 = vld [vmem:[#allocation142_spill] sm:$0xff]  ;;  %v12037_v8 = vld [vmem:[#allocation140_spill] sm:$0xff]  ;;  %1181 = vbcast.lane.b32.xlu0 %v8311_v21, 312 }
 0x267   : > { %12021 = vst [vmem:[#allocation103_spill] sm:$0xff] %v8737_v17  ;;  %v8753_v2 = vmul.f32 1.442695, %v12025_v56  ;;  %v2749_v38 = vmax.f32 %v8324_v12, %v8293_v35  ;;  %v12032_v56 = vld [vmem:[#allocation72_spill] sm:$0xff]  ;;  %5355 = vpow2.f32 %v8563_v52  ;;  %v1873_v33 = vmul.f32 0.2, %v12036_v32 }
 0x268   : > { %12023 = vst [vmem:[#allocation107_spill] sm:$0xff] %v8742_v31  ;;  %v8758_v40 = vmul.f32 1.442695, %v12027_v3  ;;  %v8766_v4 = vmul.f32 1.442695, %v12029_v25  ;;  %v12033_v46 = vmax.f32 %v12031_v19, %v12032_v56  ;;  %v3711_v3 = vadd.f32 %v8608_v26, %v3710_v18  ;;  %v8784_v25 = vpop.permute.xlu0 %1114  ;;  %v8786_v19 = vpop.eup %5331  ;;  %v12040_v18 = vld [vmem:[#allocation18_spill] sm:$0xff] }
 0x269   : > { %12026 = vst [vmem:[#allocation111_spill] sm:$0xff] %v8753_v2  ;;  %v1841_v24 = vmul.f32 0.2, %v12037_v8  ;;  %12038 = vst [vmem:[#allocation120_spill] sm:$0xff] %v8784_v25  ;;  %5357 = vpow2.f32 %v8568_v48  ;;  %v1921_v56 = vmul.f32 0.2, %v12040_v18  ;;  %v8794_v57 = vpop.eup %5333  ;;  %v2129_v25 = vmax.f32 %v12036_v32, %v1873_v33  ;;  %v8806_v2 = vpop.permute.xlu1 %1051 }
 0x26a   : > { %12028 = vst [vmem:[#allocation113_spill] sm:$0xff] %v8758_v40  ;;  %12030 = vst [vmem:[#allocation115_spill] sm:$0xff] %v8766_v4  ;;  %v8774_v9 = vadd.f32 %v12034_v23, %v12033_v46  ;;  %v12039_v23 = vld [vmem:[#allocation70_spill] sm:$0xff]  ;;  %v12041_v52 = vld [vmem:[#allocation79_spill] sm:$0xff]  ;;  %v3712_v1 = vadd.f32 %v8622_v53, %v3711_v3  ;;  %5359 = vpow2.f32 %v8570_v59  ;;  %v8800_v41 = vpop.eup %5335  ;;  %1319 = vbcast.lane.b32.xlu1 %v8307_v47, 320  ;;  %1185 = vbcast.lane.b32.xlu0 %v8311_v21, 320 }
 0x26b   : > { %v12042_v35 = vld [vmem:[#allocation16_spill] sm:$0xff]  ;;  %v2097_v4 = vmax.f32 %v12037_v8, %v1841_v24  ;;  %12043 = vst [vmem:[#allocation122_spill] sm:$0xff] %v8800_v41  ;;  %5361 = vpow2.f32 %v8579_v11  ;;  %v2177_v48 = vmax.f32 %v12040_v18, %v1921_v56  ;;  %v12045_v40 = vld [vmem:[#allocation15_spill] sm:$0xff]  ;;  %12046 = vst [vmem:[#allocation124_spill] sm:$0xff] %v8806_v2  ;;  %v8808_v58 = vpop.eup %5337 }
 0x26c   : > { %12035 = vst [vmem:[#allocation117_spill] sm:$0xff] %v8774_v9  ;;  %v2786_v46 = vmax.f32 %v8774_v9, %v12039_v23  ;;  %v1633_v12 = vadd.f32 %v12042_v35, %v12041_v52  ;;  %v12044_v9 = vld [vmem:[#allocation76_spill] sm:$0xff]  ;;  %12047 = vst [vmem:[#allocation126_spill] sm:$0xff] %v8808_v58  ;;  %v3713_v59 = vadd.f32 %v8642_v42, %v3712_v1  ;;  %5363 = vpow2.f32 %v8584_v14  ;;  %v8820_v11 = vpop.eup %5339  ;;  %v12054_v18 = vld [vmem:[#allocation39_spill] sm:$0xff] }
 0x26d   : > { %v1618_v52 = vadd.f32 %v12045_v40, %v12044_v9  ;;  %v12048_v33 = vld [vmem:[#allocation68_spill] sm:$0xff]  ;;  %5365 = vpow2.f32 %v8596_v7  ;;  %v12051_v9 = vld [vmem:[#allocation21_spill] sm:$0xff]  ;;  %v8826_v14 = vpop.eup %5341  ;;  %v12057_v7 = vld [vmem:[#allocation91_spill] sm:$0xff] }
 0x26e   : > { %v1889_v23 = vmul.f32 0.2, %v1633_v12  ;;  %v8813_v3 = vadd.f32 %v12048_v33, %v2129_v25  ;;  %v8816_v32 = vadd.f32 %v12048_v33, %v2097_v4  ;;  %v8824_v8 = vadd.f32 %v12051_v9, %v2177_v48  ;;  %v12053_v4 = vld [vmem:[#allocation33_spill] sm:$0xff]  ;;  %v12056_v2 = vld [vmem:[#allocation12_spill] sm:$0xff]  ;;  %1323 = vbcast.lane.b32.xlu1 %v8307_v47, 328  ;;  %1189 = vbcast.lane.b32.xlu0 %v8311_v21, 328 }
 0x26f   : > { %v1874_v24 = vmul.f32 0.2, %v1618_v52  ;;  %v3714_v25 = vadd.f32 %v8658_v44, %v3713_v59  ;;  %5367 = vpow2.f32 %v8601_v60  ;;  %v12055_v56 = vmax.f32 %v12053_v4, %v12054_v18  ;;  %v12064_v18 = vld [vmem:[#allocation17_spill] sm:$0xff] }
 0x270   : > { %12049 = vst [vmem:[#allocation128_spill] sm:$0xff] %v8813_v3  ;;  %12050 = vst [vmem:[#allocation130_spill] sm:$0xff] %v8816_v32  ;;  %v2145_v1 = vmax.f32 %v1633_v12, %v1889_v23  ;;  %v12058_v31 = vmax.f32 %v12056_v2, %v12057_v7  ;;  %v8842_v12 = vpop.permute.xlu0 %917  ;;  %v8844_v23 = vpop.eup %5343  ;;  %5369 = vpow2.f32 %v8606_v63  ;;  %v8848_v60 = vmax.f32 %v2786_v46, %v8824_v8  ;;  %v12062_v2 = vld [vmem:[#allocation13_spill] sm:$0xff]  ;;  %v12063_v7 = vld [vmem:[#allocation99_spill] sm:$0xff] }
 0x271   : > { %12052 = vst [vmem:[#allocation132_spill] sm:$0xff] %v8824_v8  ;;  %v8834_v33 = vmax.f32 %v12055_v56, %v8813_v3  ;;  %12059 = vst [vmem:[#allocation134_spill] sm:$0xff] %v8842_v12  ;;  %v2130_v4 = vmax.f32 %v1618_v52, %v1874_v24  ;;  %v8853_v56 = vpop.eup %5345  ;;  %v3715_v3 = vadd.f32 %v8676_v37, %v3714_v25  ;;  %5371 = vpow2.f32 %v8615_v54  ;;  %v12065_v52 = vld [vmem:[#allocation71_spill] sm:$0xff]  ;;  %v12067_v54 = vld [vmem:[#allocation97_spill] sm:$0xff]  ;;  %v8874_v24 = vpop.permute.xlu1 %1252 }
 0x272   : > { %v8840_v48 = vmax.f32 %v12058_v31, %v8816_v32  ;;  %v8851_v59 = vadd.f32 %v12051_v9, %v2145_v1  ;;  %v12061_v31 = vld [vmem:[#allocation11_spill] sm:$0xff]  ;;  %v1666_v12 = vadd.f32 %v12064_v18, %v12063_v7  ;;  %v8863_v63 = vpop.eup %5347  ;;  %5373 = vpow2.f32 %v8620_v61  ;;  %12068 = vst [vmem:[#allocation34_spill] sm:$0xff] %v8874_v24  ;;  %1327 = vbcast.lane.b32.xlu1 %v8307_v47, 336 }
 0x273   : > { %v1586_v32 = vadd.f32 %v12062_v2, %v12061_v31  ;;  %v8870_v9 = vadd.f32 %v12065_v52, %v2130_v4  ;;  %v1634_v1 = vadd.f32 %v12042_v35, %v12067_v54  ;;  %v8876_v25 = vpop.eup %5349  ;;  %v3716_v7 = vadd.f32 %v8692_v45, %v3715_v3  ;;  %1193 = vbcast.lane.b32.xlu0 %v8311_v21, 336 }
 0x274   : > { %12060 = vst [vmem:[#allocation139_spill] sm:$0xff] %v8851_v59  ;;  %v8867_v46 = vmax.f32 %v2749_v38, %v8851_v59  ;;  %5375 = vpow2.f32 %v8628_v13  ;;  %v1922_v8 = vmul.f32 0.2, %v1666_v12  ;;  %v8880_v61 = vpop.eup %5351  ;;  %v12069_v59 = vld [vmem:[#allocation101_spill] sm:$0xff] }
 0x275   : > { %12066 = vst [vmem:[#allocation92_spill] sm:$0xff] %v8870_v9  ;;  %v1842_v31 = vmul.f32 0.2, %v1586_v32  ;;  %5377 = vpow2.f32 %v8633_v43  ;;  %v2730_v38 = vmax.f32 %v8834_v33, %v8870_v9  ;;  %v1890_v4 = vmul.f32 0.2, %v1634_v1  ;;  %v8887_v24 = vpop.eup %5353  ;;  %4916 = vmatprep.subr.mxu1 %v8880_v61  ;;  %v8893_v43 = vpop.permute.xlu0 %1118  ;;  %v12072_v9 = vld [vmem:[#allocation106_spill] sm:$0xff] }
 0x276   : > { %v1619_v54 = vadd.f32 %v12045_v40, %v12069_v59  ;;  %12070 = vst [vmem:[#allocation83_spill] sm:$0xff] %v8887_v24  ;;  %v3717_v58 = vadd.f32 %v8710_v16, %v3716_v7  ;;  %5379 = vpow2.f32 %v8638_v10  ;;  %v2178_v3 = vmax.f32 %v1666_v12, %v1922_v8  ;;  %v8895_v17 = vpop.eup %5355  ;;  %4917 = vmatpush3.msra.mxu1 %v8692_v45  ;;  %v12076_v45 = vld [vmem:[#allocation23_spill] sm:$0xff] }
 0x277   : > { %v2098_v13 = vmax.f32 %v1586_v32, %v1842_v31  ;;  %12071 = vst [vmem:[#allocation48_spill] sm:$0xff] %v8895_v17  ;;  %5381 = vpow2.f32 %v8649_v34  ;;  %v2146_v33 = vmax.f32 %v1634_v1, %v1890_v4  ;;  %v8900_v41 = vadd.f32 %v12062_v2, %v12072_v9  ;;  %v8904_v10 = vpop.eup %5357  ;;  %4918 = vmatprep.subr.mxu1 %v8876_v25 }
 0x278   : > { %v1875_v59 = vmul.f32 0.2, %v1619_v54  ;;  %12073 = vst [vmem:[#allocation82_spill] sm:$0xff] %v8904_v10  ;;  %v3718_v32 = vadd.f32 %v8726_v30, %v3717_v58  ;;  %5383 = vpow2.f32 %v8654_v15  ;;  %v3665_v8 = vadd.f32 %v8895_v17, %v8887_v24  ;;  %v8914_v12 = vpop.eup %5359  ;;  %4919 = vmatpush3.msra.mxu1 %v8676_v37  ;;  %v8924_v15 = vpop.permute.xlu1 %1055  ;;  %1331 = vbcast.lane.b32.xlu1 %v8307_v47, 344 }
 0x279   : > { %v8911_v34 = vadd.f32 %v12065_v52, %v2098_v13  ;;  %12075 = vst [vmem:[#allocation72_spill] sm:$0xff] %v8914_v12  ;;  %5385 = vpow2.f32 %v8664_v28  ;;  %v8918_v9 = vadd.f32 %v12076_v45, %v2178_v3  ;;  %v8921_v1 = vadd.f32 %v12076_v45, %v2146_v33  ;;  %v8926_v7 = vpop.eup %5361  ;;  %4920 = vmatprep.subr.mxu1 %v8863_v63  ;;  %v12085_v45 = vld [vmem:[#allocation108_spill] sm:$0xff] }
 0x27a   : > { %v2131_v58 = vmax.f32 %v1619_v54, %v1875_v59  ;;  %12079 = vst [vmem:[#allocation140_spill] sm:$0xff] %v8926_v7  ;;  %v3719_v31 = vadd.f32 %v8746_v51, %v3718_v32  ;;  %5387 = vpow2.f32 %v8669_v39  ;;  %v3666_v4 = vadd.f32 %v8904_v10, %v3665_v8  ;;  %v8935_v54 = vpop.eup %5363  ;;  %v12081_v39 = vld [vmem:[#allocation77_spill] sm:$0xff]  ;;  %4921 = vmatpush3.msra.mxu1 %v8658_v44  ;;  %v8954_v32 = vpop.permute.xlu0 %921 }
 0x27b   : > { %12074 = vst [vmem:[#allocation14_spill] sm:$0xff] %v8911_v34  ;;  %12077 = vst [vmem:[#allocation19_spill] sm:$0xff] %v8918_v9  ;;  %v2693_v28 = vmax.f32 %v8840_v48, %v8911_v34  ;;  %5389 = vpow2.f32 %v8674_v22  ;;  %v8947_v48 = vpop.eup %5365  ;;  %v1843_v59 = vmul.f32 0.2, %v8900_v41  ;;  %4922 = vmatprep.subr.mxu1 %v8853_v56  ;;  %1197 = vbcast.lane.b32.xlu0 %v8311_v21, 344 }
 0x27c   : > { %12078 = vst [vmem:[#allocation142_spill] sm:$0xff] %v8921_v1  ;;  %12080 = vst [vmem:[#allocation18_spill] sm:$0xff] %v8935_v54  ;;  %v8943_v3 = vadd.f32 %v12081_v39, %v2131_v58  ;;  %v3720_v33 = vadd.f32 %v8760_v20, %v3719_v31  ;;  %5391 = vpow2.f32 %v8683_v0  ;;  %v3667_v22 = vadd.f32 %v8914_v12, %v3666_v4  ;;  %v8956_v8 = vpop.eup %5367  ;;  %v12086_v31 = vld [vmem:[#allocation110_spill] sm:$0xff]  ;;  %v12109_v12 = vld [vmem:[#allocation129_spill] sm:$0xff] }
 0x27d   : > { %12083 = vst [vmem:[#allocation76_spill] sm:$0xff] %v8947_v48  ;;  %12084 = vst [vmem:[#allocation15_spill] sm:$0xff] %v8956_v8  ;;  %5393 = vpow2.f32 %v8688_v50  ;;  %v1667_v58 = vadd.f32 %v12064_v18, %v12085_v45  ;;  %v1635_v0 = vadd.f32 %v12042_v35, %v12086_v31  ;;  %4923 = vmatpush3.msra.mxu1 %v8642_v42  ;;  %v8967_v4 = vpop.eup %5369  ;;  %v12087_v31 = vld [vmem:[#allocation112_spill] sm:$0xff]  ;;  %1335 = vbcast.lane.b32.xlu1 %v8307_v47, 352 }
 0x27e   : > { %12082 = vst [vmem:[#allocation79_spill] sm:$0xff] %v8943_v3  ;;  %v8960_v44 = vmax.f32 %v2730_v38, %v8943_v3  ;;  %v3721_v13 = vadd.f32 %v8776_v5, %v3720_v33  ;;  %5395 = vpow2.f32 %v8698_v36  ;;  %v3668_v37 = vadd.f32 %v8926_v7, %v3667_v22  ;;  %4924 = vmatprep.subr.mxu1 %v8844_v23  ;;  %v8975_v38 = vpop.eup %5371  ;;  %v8982_v36 = vpop.permute.xlu1 %1256 }
 0x27f   : > { %v2099_v50 = vmax.f32 %v8900_v41, %v1843_v59  ;;  %5397 = vpow2.f32 %v8703_v55  ;;  %v1923_v45 = vmul.f32 0.2, %v1667_v58  ;;  %v1891_v42 = vmul.f32 0.2, %v1635_v0  ;;  %4925 = vmatpush3.msra.mxu1 %v8622_v53  ;;  %v8984_v41 = vpop.eup %5373  ;;  %1201 = vbcast.lane.b32.xlu0 %v8311_v21, 352 }
 0x280   : > { %v1620_v52 = vadd.f32 %v12045_v40, %v12087_v31  ;;  %v3722_v33 = vadd.f32 %v8786_v19, %v3721_v13  ;;  %5399 = vpow2.f32 %v8708_v62  ;;  %v3669_v22 = vadd.f32 %v8935_v54, %v3668_v37  ;;  %4926 = vmatprep.subr.mxu1 %v8826_v14 }
 0x281   : > { %v8990_v55 = vadd.f32 %v12081_v39, %v2099_v50  ;;  %v8993_v59 = vpop.eup %5375  ;;  %5401 = vpow2.f32 %v8717_v49  ;;  %v2179_v53 = vmax.f32 %v1667_v58, %v1923_v45  ;;  %v2147_v31 = vmax.f32 %v1635_v0, %v1891_v42  ;;  %4927 = vmatpush3.msra.mxu1 %v8608_v26  ;;  %v9007_v49 = vpop.permute.xlu0 %1122  ;;  %v12089_v26 = vld [vmem:[#allocation25_spill] sm:$0xff]  ;;  %v12092_v45 = vld [vmem:[#allocation122_spill] sm:$0xff]  ;;  %1339 = vbcast.lane.b32.xlu1 %v8307_v47, 360 }
 0x282   : > { %v1876_v34 = vmul.f32 0.2, %v1620_v52  ;;  %v8997_v3 = vpop.eup %5377  ;;  %v3723_v62 = vadd.f32 %v8794_v57, %v3722_v33  ;;  %5403 = vpow2.f32 %v8722_v6  ;;  %v3670_v37 = vadd.f32 %v8947_v48, %v3669_v22  ;;  %4928 = vmatprep.subr.mxu1 %v8820_v11  ;;  %v12093_v33 = vld [vmem:[#allocation103_spill] sm:$0xff]  ;;  %v12095_v39 = vld [vmem:[#allocation126_spill] sm:$0xff] }
 0x283   : > { %12088 = vst [vmem:[#allocation21_spill] sm:$0xff] %v8990_v55  ;;  %v9003_v13 = vmax.f32 %v2693_v28, %v8990_v55  ;;  %v9009_v58 = vpop.eup %5379  ;;  %5405 = vpow2.f32 %v8732_v29  ;;  %v9013_v0 = vadd.f32 %v12089_v26, %v2179_v53  ;;  %v9016_v6 = vadd.f32 %v12089_v26, %v2147_v31  ;;  %4929 = vmatpush3.msra.mxu1 %v8590_v27  ;;  %v12094_v29 = vld [vmem:[#allocation114_spill] sm:$0xff]  ;;  %v12099_v26 = vld [vmem:[#allocation81_spill] sm:$0xff]  ;;  %v9047_v55 = vpop.permute.xlu1 %1059 }
 0x284   : > { %v2132_v50 = vmax.f32 %v1620_v52, %v1876_v34  ;;  %v9020_v28 = vpop.eup %5381  ;;  %v3724_v42 = vadd.f32 %v12092_v45, %v3723_v62  ;;  %5407 = vpow2.f32 %v12093_v33  ;;  %v3671_v22 = vadd.f32 %v8956_v8, %v3670_v37  ;;  %4930 = vmatprep.subr.mxu1 %v12095_v39  ;;  %v12096_v52 = vld [vmem:[#allocation107_spill] sm:$0xff]  ;;  %1205 = vbcast.lane.b32.xlu0 %v8311_v21, 360  ;;  %v12113_v8 = vld [vmem:[#allocation137_spill] sm:$0xff] }
 0x285   : > { %12090 = vst [vmem:[#allocation33_spill] sm:$0xff] %v9013_v0  ;;  %12091 = vst [vmem:[#allocation12_spill] sm:$0xff] %v9016_v6  ;;  %v1588_v53 = vadd.f32 %v12062_v2, %v12094_v29  ;;  %v9028_v31 = vpop.eup %5383  ;;  %5409 = vpow2.f32 %v12096_v52  ;;  %v12097_v27 = vmax.f32 %v8848_v60, %v8918_v9  ;;  %v12098_v62 = vmax.f32 %v8867_v46, %v8921_v1  ;;  %v12101_v29 = vld [vmem:[#allocation45_spill] sm:$0xff]  ;;  %v12102_v60 = vld [vmem:[#allocation111_spill] sm:$0xff] }
 0x286   : > { %v9044_v33 = vadd.f32 %v12099_v26, %v2132_v50  ;;  %4931 = vmatpush3.msra.mxu1 %v12101_v29  ;;  %v9049_v52 = vpop.eup %5385  ;;  %v3725_v24 = vadd.f32 %v12095_v39, %v3724_v42  ;;  %5411 = vpow2.f32 %v12102_v60  ;;  %v12103_v50 = vld [vmem:[#allocation113_spill] sm:$0xff]  ;;  %v12104_v29 = vld [vmem:[#allocation116_spill] sm:$0xff]  ;;  %v12105_v39 = vld [vmem:[#allocation119_spill] sm:$0xff]  ;;  %v1589_v7 = vadd.f32 %v12062_v2, %v12109_v12  ;;  %1343 = vbcast.lane.b32.xlu1 %v8307_v47, 368 }
 0x287   : > { %v9035_v34 = vmax.f32 %v12097_v27, %v9013_v0  ;;  %v9041_v37 = vmax.f32 %v12098_v62, %v9016_v6  ;;  %v3672_v27 = vadd.f32 %v8967_v4, %v3671_v22  ;;  %v1844_v0 = vmul.f32 0.2, %v1588_v53  ;;  %4932 = vmatprep.subr.mxu1 %v12092_v45  ;;  %v9056_v46 = vpop.eup %5387  ;;  %v12106_v60 = vld [vmem:[#allocation49_spill] sm:$0xff]  ;;  %v12107_v1 = vld [vmem:[#allocation115_spill] sm:$0xff]  ;;  %v9073_v62 = vpop.permute.xlu0 %925 }
 0x288   : > { %12100 = vst [vmem:[#allocation11_spill] sm:$0xff] %v9044_v33  ;;  %5413 = vpow2.f32 %v12103_v50  ;;  %v1668_v6 = vadd.f32 %v12064_v18, %v12104_v29  ;;  %v1636_v42 = vadd.f32 %v12042_v35, %v12105_v39  ;;  %4933 = vmatpush3.msra.mxu1 %v12106_v60  ;;  %v9067_v45 = vpop.eup %5389  ;;  %v3726_v22 = vadd.f32 %v8820_v11, %v3725_v24  ;;  %v12108_v60 = vld [vmem:[#allocation121_spill] sm:$0xff]  ;;  %v12110_v11 = vld [vmem:[#allocation28_spill] sm:$0xff] }
 0x289   : > { %5415 = vpow2.f32 %v12107_v1  ;;  %v3673_v50 = vadd.f32 %v8975_v38, %v3672_v27  ;;  %v2100_v9 = vmax.f32 %v1588_v53, %v1844_v0  ;;  %4934 = vmatprep.subr.mxu1 %v8794_v57  ;;  %v9075_v29 = vpop.eup %5391  ;;  %v1621_v10 = vadd.f32 %v12045_v40, %v12108_v60  ;;  %v12112_v53 = vld [vmem:[#allocation89_spill] sm:$0xff]  ;;  %1209 = vbcast.lane.b32.xlu0 %v8311_v21, 368 }
 0x28a   : > { %v1924_v39 = vmul.f32 0.2, %v1668_v6  ;;  %v1892_v17 = vmul.f32 0.2, %v1636_v42  ;;  %4935 = vmatpush3.msra.mxu1 %v12110_v11  ;;  %v9082_v24 = vpop.eup %5393  ;;  %v3727_v1 = vadd.f32 %v8826_v14, %v3726_v22  ;;  %v1669_v27 = vadd.f32 %v12064_v18, %v12112_v53  ;;  %v9096_v14 = vpop.permute.xlu1 %1260  ;;  %1347 = vbcast.lane.b32.xlu1 %v8307_v47, 376 }
 0x28b   : > { %v3674_v57 = vadd.f32 %v8984_v41, %v3673_v50  ;;  %v9087_v0 = vadd.f32 %v12099_v26, %v2100_v9  ;;  %4936 = vmatprep.subr.mxu1 %v8786_v19  ;;  %v9092_v60 = vpop.eup %5395  ;;  %v1877_v48 = vmul.f32 0.2, %v1621_v10  ;;  %v1845_v11 = vmul.f32 0.2, %v1589_v7  ;;  %12114 = vst [vmem:[#allocation99_spill] sm:$0xff] %v9096_v14 }
 0x28c   : > { %v2180_v54 = vmax.f32 %v1668_v6, %v1924_v39  ;;  %v2148_v12 = vmax.f32 %v1636_v42, %v1892_v17  ;;  %4937 = vmatpush3.msra.mxu1 %v12113_v8  ;;  %v9098_v22 = vpop.eup %5397  ;;  %v3728_v9 = vadd.f32 %v8844_v23, %v3727_v1  ;;  %v1925_v53 = vmul.f32 0.2, %v1669_v27  ;;  %v12115_v8 = vld [vmem:[#allocation27_spill] sm:$0xff]  ;;  %v12118_v1 = vld [vmem:[#allocation133_spill] sm:$0xff] }
 0x28d   : > { %12111 = vst [vmem:[#allocation13_spill] sm:$0xff] %v9087_v0  ;;  %v3675_v50 = vadd.f32 %v8993_v59, %v3674_v57  ;;  %v2695_v19 = vmax.f32 %v9003_v13, %v9087_v0  ;;  %4938 = vmatprep.subr.mxu1 %v8776_v5  ;;  %v9106_v17 = vpop.eup %5399  ;;  %v2133_v39 = vmax.f32 %v1621_v10, %v1877_v48  ;;  %v12119_v0 = vld [vmem:[#allocation54_spill] sm:$0xff]  ;;  %v12120_v48 = vld [vmem:[#allocation84_spill] sm:$0xff] }
 0x28e   : > { %v9109_v6 = vadd.f32 %v12115_v8, %v2180_v54  ;;  %v9112_v42 = vadd.f32 %v12115_v8, %v2148_v12  ;;  %v2101_v23 = vmax.f32 %v1589_v7, %v1845_v11  ;;  %4939 = vmatpush3.msra.mxu1 %v12118_v1  ;;  %v9115_v57 = vpop.eup %5401  ;;  %v3729_v13 = vadd.f32 %v8853_v56, %v3728_v9  ;;  %v9122_v54 = vpop.permute.xlu0 %1126  ;;  %v12123_v11 = vld [vmem:[#allocation131_spill] sm:$0xff]  ;;  %v12128_v1 = vld [vmem:[#allocation96_spill] sm:$0xff] }
 0x28f   : > { %v3676_v5 = vadd.f32 %v8997_v3, %v3675_v50  ;;  %v2181_v26 = vmax.f32 %v1669_v27, %v1925_v53  ;;  %v1637_v14 = vadd.f32 %v12042_v35, %v12119_v0  ;;  %4940 = vmatprep.subr.mxu1 %v8760_v20  ;;  %v9124_v12 = vpop.eup %5403  ;;  %v9131_v56 = vadd.f32 %v12120_v48, %v2133_v39  ;;  %v12124_v50 = vld [vmem:[#allocation32_spill] sm:$0xff]  ;;  %v9162_v47 = vpop.permute.xlu1 %1063 }
 0x290   : > { %12116 = vst [vmem:[#allocation97_spill] sm:$0xff] %v9109_v6  ;;  %12117 = vst [vmem:[#allocation101_spill] sm:$0xff] %v9112_v42  ;;  %v2790_v10 = vmax.f32 %v9035_v34, %v9109_v6  ;;  %v2753_v7 = vmax.f32 %v9041_v37, %v9112_v42  ;;  %v9134_v27 = vadd.f32 %v12120_v48, %v2101_v23  ;;  %4941 = vmatpush3.msra.mxu1 %v12123_v11  ;;  %v9137_v0 = vpop.eup %5405  ;;  %v12127_v23 = vld [vmem:[#allocation100_spill] sm:$0xff]  ;;  %v12130_v6 = vld [vmem:[#allocation109_spill] sm:$0xff] }
 0x291   : > { %12121 = vst [vmem:[#allocation106_spill] sm:$0xff] %v9131_v56  ;;  %v3730_v20 = vadd.f32 %v8863_v63, %v3729_v13  ;;  %v3677_v9 = vadd.f32 %v9009_v58, %v3676_v5  ;;  %v9142_v53 = vadd.f32 %v12124_v50, %v2181_v26  ;;  %v1893_v34 = vmul.f32 0.2, %v1637_v14  ;;  %4942 = vmatprep.subr.mxu1 %v8746_v51  ;;  %v9146_v37 = vpop.eup %5407  ;;  %v12129_v51 = vld [vmem:[#allocation127_spill] sm:$0xff]  ;;  %v12131_v48 = vld [vmem:[#allocation120_spill] sm:$0xff] }
 0x292   : > { %12122 = vst [vmem:[#allocation23_spill] sm:$0xff] %v9134_v27  ;;  %v12126_v8 = vmax.f32 %v8960_v44, %v9044_v33  ;;  %v9155_v63 = vmax.f32 %v2695_v19, %v9134_v27  ;;  %v1622_v26 = vadd.f32 %v12045_v40, %v12127_v23  ;;  %v1590_v13 = vadd.f32 %v12062_v2, %v12128_v1  ;;  %v9164_v5 = vpop.eup %5409 }
 0x293   : > { %12125 = vst [vmem:[#allocation108_spill] sm:$0xff] %v9142_v53  ;;  %4943 = vmatpush3.msra.mxu1 %v12129_v51  ;;  %v3731_v11 = vadd.f32 %v8876_v25, %v3730_v20  ;;  %v3678_v44 = vadd.f32 %v9020_v28, %v3677_v9  ;;  %v2149_v19 = vmax.f32 %v1637_v14, %v1893_v34  ;;  %v9172_v23 = vpop.eup %5411  ;;  %v3893_v25 = vld [vmem:[#allocation2 + $0x30] sm:$0xff] }
 0x294   : > { %v9152_v39 = vmax.f32 %v12126_v8, %v9131_v56  ;;  %v9169_v8 = vmax.f32 %v2790_v10, %v9142_v53  ;;  %4944 = vmatprep.subr.mxu1 %v8726_v30  ;;  %v1878_v42 = vmul.f32 0.2, %v1622_v26  ;;  %v1846_v1 = vmul.f32 0.2, %v1590_v13  ;;  %v12132_v56 = vld [vmem:[#allocation125_spill] sm:$0xff]  ;;  %1213 = vbcast.lane.b32.xlu0 %v8311_v21, 376  ;;  %v9180_v10 = vpop.permute.xlu0 %929 }
 0x295   : > { %v1670_v51 = vadd.f32 %v12064_v18, %v12130_v6  ;;  %v1638_v27 = vadd.f32 %v12042_v35, %v12131_v48  ;;  %4945 = vmatpush3.msra.mxu1 %v12132_v56  ;;  %12133 = vst [vmem:[#allocation110_spill] sm:$0xff] %v9180_v10  ;;  %v9182_v14 = vpop.eup %5413  ;;  %v9185_v30 = vadd.f32 %v8880_v61, %v3731_v11  ;;  %v12136_v6 = vld [vmem:[#allocation124_spill] sm:$0xff]  ;;  %v12137_v10 = vld [vmem:[#allocation123_spill] sm:$0xff]  ;;  %v9197_v61 = vpop.permute.xlu1 %1264 }
 0x296   : > { %v3679_v20 = vadd.f32 %v9028_v31, %v3678_v44  ;;  %v9189_v9 = vadd.f32 %v12124_v50, %v2149_v19  ;;  %4946 = vmatprep.subr.mxu1 %v8710_v16  ;;  %v1623_v48 = vadd.f32 %v12045_v40, %v12136_v6  ;;  %v9194_v56 = vpop.eup %5415  ;;  %v2134_v21 = vmax.f32 %v1622_v26, %v1878_v42  ;;  %v12138_v44 = vld [vmem:[#allocation134_spill] sm:$0xff]  ;;  %v12139_v42 = vld [vmem:[#allocation87_spill] sm:$0xff] }
 0x297   : > { %12134 = vst [vmem:[#allocation112_spill] sm:$0xff] %v9185_v30  ;;  %v2102_v34 = vmax.f32 %v1590_v13, %v1846_v1  ;;  %v1926_v53 = vmul.f32 0.2, %v1670_v51  ;;  %v1894_v33 = vmul.f32 0.2, %v1638_v27  ;;  %4947 = vmatpush3.msra.mxu1 %v12137_v10  ;;  %4881 = vmatprep.subr.mxu0 %v9194_v56  ;;  %v1591_v19 = vadd.f32 %v12062_v2, %v12138_v44  ;;  %v12140_v44 = vld [vmem:[#allocation34_spill] sm:$0xff] }
 0x298   : > { %12135 = vst [vmem:[#allocation25_spill] sm:$0xff] %v9189_v9  ;;  %v3680_v11 = vadd.f32 %v9049_v52, %v3679_v20  ;;  %v9202_v50 = vmax.f32 %v2753_v7, %v9189_v9  ;;  %v1879_v16 = vmul.f32 0.2, %v1623_v48  ;;  %4187 = vmatmul.mubr.f32.vlgmr.msra.gmra.mxu1 %v3893_v25  ;;  %4882 = vmatpush3.msra.mxu0 %v9028_v31  ;;  %v9213_v20 = vpop.permute.xlu0 %1130 }
 0x299   : > { %v9208_v26 = vadd.f32 %v12139_v42, %v2134_v21  ;;  %v9211_v13 = vadd.f32 %v12139_v42, %v2102_v34  ;;  %v2182_v1 = vmax.f32 %v1670_v51, %v1926_v53  ;;  %v2150_v10 = vmax.f32 %v1638_v27, %v1894_v33  ;;  %4883 = vmatprep.subr.mxu0 %v9182_v14  ;;  %v12141_v33 = vld [vmem:[#allocation35_spill] sm:$0xff]  ;;  %v9230_v21 = vpop.permute.xlu1 %1067  ;;  %v12144_v34 = vld [vmem:[#allocation90_spill] sm:$0xff] }
 0x29a   : > { %v3681_v7 = vadd.f32 %v9056_v46, %v3680_v11  ;;  %v2135_v6 = vmax.f32 %v1623_v48, %v1879_v16  ;;  %v1847_v9 = vmul.f32 0.2, %v1591_v19  ;;  %v1671_v25 = vadd.f32 %v12064_v18, %v12140_v44  ;;  %4884 = vmatpush3.msra.mxu0 %v9020_v28 }
 0x29b   : > { %v2734_v31 = vmax.f32 %v9152_v39, %v9208_v26  ;;  %v2697_v53 = vmax.f32 %v9155_v63, %v9211_v13  ;;  %v9225_v27 = vadd.f32 %v12141_v33, %v2182_v1  ;;  %v9228_v51 = vadd.f32 %v12141_v33, %v2150_v10  ;;  %4885 = vmatprep.subr.mxu0 %v9172_v23 }
 0x29c   : > { %v3682_v48 = vadd.f32 %v9067_v45, %v3681_v7  ;;  %v9235_v28 = vadd.f32 %v12144_v34, %v2135_v6  ;;  %v2103_v11 = vmax.f32 %v1591_v19, %v1847_v9  ;;  %v1927_v39 = vmul.f32 0.2, %v1671_v25  ;;  %4886 = vmatpush3.msra.mxu0 %v9009_v58  ;;  %v9246_v7 = vpop.permute.xlu0 %933 }
 0x29d   : > { %12142 = vst [vmem:[#allocation122_spill] sm:$0xff] %v9225_v27  ;;  %12143 = vst [vmem:[#allocation103_spill] sm:$0xff] %v9228_v51  ;;  %v2792_v63 = vmax.f32 %v9169_v8, %v9225_v27  ;;  %v2755_v16 = vmax.f32 %v9202_v50, %v9228_v51  ;;  %v1639_v1 = vadd.f32 %v12042_v35, %v8893_v43  ;;  %4887 = vmatprep.subr.mxu0 %v9164_v5  ;;  %v9261_v44 = vpop.permute.xlu1 %1268 }
 0x29e   : > { %v1624_v10 = vadd.f32 %v12045_v40, %v8924_v15  ;;  %v3683_v6 = vadd.f32 %v9075_v29, %v3682_v48  ;;  %v9251_v58 = vmax.f32 %v2734_v31, %v9235_v28  ;;  %v9254_v8 = vadd.f32 %v12144_v34, %v2103_v11  ;;  %4888 = vmatpush3.msra.mxu0 %v8997_v3 }
 0x29f   : > { %v2183_v9 = vmax.f32 %v1671_v25, %v1927_v39  ;;  %v1895_v50 = vmul.f32 0.2, %v1639_v1  ;;  %v1592_v15 = vadd.f32 %v12062_v2, %v8954_v32  ;;  %v1672_v19 = vadd.f32 %v12064_v18, %v8982_v36  ;;  %4889 = vmatprep.subr.mxu0 %v9146_v37  ;;  %v12145_v25 = vld [vmem:[#allocation40_spill] sm:$0xff] }
 0x2a0   : > { %v1880_v43 = vmul.f32 0.2, %v1624_v10  ;;  %v3684_v33 = vadd.f32 %v9082_v24, %v3683_v6  ;;  %v9266_v31 = vmax.f32 %v2697_v53, %v9254_v8  ;;  %v1640_v3 = vadd.f32 %v12042_v35, %v9007_v49  ;;  %4890 = vmatpush3.msra.mxu0 %v8993_v59  ;;  %v9274_v51 = vpop.permute.xlu0 %1134  ;;  %v12148_v59 = vld [vmem:[#allocation93_spill] sm:$0xff] }
 0x2a1   : > { %v9269_v48 = vadd.f32 %v12145_v25, %v2183_v9  ;;  %v2151_v32 = vmax.f32 %v1639_v1, %v1895_v50  ;;  %v1848_v36 = vmul.f32 0.2, %v1592_v15  ;;  %v1928_v39 = vmul.f32 0.2, %v1672_v19  ;;  %4891 = vmatprep.subr.mxu0 %v9137_v0 }
 0x2a2   : > { %v2136_v11 = vmax.f32 %v1624_v10, %v1880_v43  ;;  %v3685_v6 = vadd.f32 %v9092_v60, %v3684_v33  ;;  %v1896_v9 = vmul.f32 0.2, %v1640_v3  ;;  %4892 = vmatpush3.msra.mxu0 %v8984_v41  ;;  %v9288_v43 = vpop.permute.xlu1 %1071  ;;  %v4488_v41 = vld [vmem:[%s10925_s4 + $0x8] sm:$0xff] }
 0x2a3   : > { %12146 = vst [vmem:[#allocation114_spill] sm:$0xff] %v9269_v48  ;;  %v9279_v53 = vmax.f32 %v2792_v63, %v9269_v48  ;;  %v9283_v49 = vadd.f32 %v12145_v25, %v2151_v32  ;;  %v2104_v10 = vmax.f32 %v1592_v15, %v1848_v36  ;;  %v2184_v50 = vmax.f32 %v1672_v19, %v1928_v39  ;;  %v4487_v36 = vld [vmem:[%s10925_s4] sm:$0xff] }
 0x2a4   : > { %v9286_v1 = vadd.f32 %v12148_v59, %v2136_v11  ;;  %v3686_v33 = vadd.f32 %v9098_v22, %v3685_v6  ;;  %4893 = vmatprep.subr.mxu0 %v9124_v12  ;;  %v2152_v27 = vmax.f32 %v1640_v3, %v1896_v9  ;;  %v5840_v63 = vmov 0   ;;  %v12149_v3 = vld [vmem:[#allocation44_spill] sm:$0xff]  ;;  %v9312_v39 = vpop.permute.xlu0 %937 }
 0x2a5   : > { %12147 = vst [vmem:[#allocation126_spill] sm:$0xff] %v9283_v49  ;;  %5159 = vset.pattern.permute.xlu1 %v5840_v63  ;;  %v1625_v25 = vadd.f32 %v12045_v40, %v9047_v55  ;;  %4894 = vmatpush3.msra.mxu0 %v8975_v38  ;;  %v9299_v15 = vmax.f32 %v2755_v16, %v9283_v49 }
 0x2a6   : > { %v2736_v19 = vmax.f32 %v9251_v58, %v9286_v1  ;;  %v9304_v32 = vadd.f32 %v12148_v59, %v2104_v10  ;;  %v9307_v11 = vadd.f32 %v12149_v3, %v2184_v50  ;;  %v3687_v38 = vadd.f32 %v9106_v17, %v3686_v33  ;;  %4895 = vmatprep.subr.mxu0 %v9115_v57  ;;  %v12152_v10 = vld [vmem:[#allocation99_spill] sm:$0xff]  ;;  %v9328_v33 = vpop.permute.xlu1 %1272 }
 0x2a7   : > { %v9317_v55 = vadd.f32 %v12149_v3, %v2152_v27  ;;  %5158 = vset.pattern.permute.xlu0 %v5840_v63  ;;  %v1881_v16 = vmul.f32 0.2, %v1625_v25  ;;  %v1593_v58 = vadd.f32 %v12062_v2, %v9073_v62  ;;  %4896 = vmatpush3.msra.mxu0 %v8967_v4  ;;  %v1673_v50 = vadd.f32 %v12064_v18, %v12152_v10  ;;  %v12153_v27 = vld [vmem:[#allocation88_spill] sm:$0xff] }
 0x2a8   : > { %12150 = vst [vmem:[#allocation107_spill] sm:$0xff] %v9307_v11  ;;  %v2699_v6 = vmax.f32 %v9266_v31, %v9304_v32  ;;  %v2794_v9 = vmax.f32 %v9279_v53, %v9307_v11  ;;  %4502 = vperm.xlu1 %5159, %v4488_v41   ;;  %v3688_v3 = vadd.f32 %v9115_v57, %v3687_v38  ;;  %v4489_v53 = vld [vmem:[%s10925_s4 + $0x10] sm:$0xff]  ;;  %v12154_v41 = vld [vmem:[#allocation15_spill] sm:$0xff] }
 0x2a9   : > { %12151 = vst [vmem:[#allocation45_spill] sm:$0xff] %v9317_v55  ;;  %4897 = vmatprep.subr.mxu0 %v9106_v17  ;;  %v2757_v4 = vmax.f32 %v9299_v15, %v9317_v55  ;;  %4497 = vperm.xlu0 %5158, %v4487_v36   ;;  %v2137_v62 = vmax.f32 %v1625_v25, %v1881_v16  ;;  %v1849_v31 = vmul.f32 0.2, %v1593_v58  ;;  %v1929_v10 = vmul.f32 0.2, %v1673_v50  ;;  %v12155_v17 = vld [vmem:[#allocation110_spill] sm:$0xff]  ;;  %v9345_v15 = vpop.permute.xlu0 %1138 }
 0x2aa   : > { %4898 = vmatpush3.msra.mxu0 %v12154_v41  ;;  %v1641_v63 = vadd.f32 %v12042_v35, %v9122_v54  ;;  %v1626_v57 = vadd.f32 %v12045_v40, %v9162_v47  ;;  %v1594_v38 = vadd.f32 %v12062_v2, %v12155_v17  ;;  %v4490_v25 = vld [vmem:[%s10925_s4 + $0x18] sm:$0xff]  ;;  %v3689_v36 = vadd.f32 %v9124_v12, %v3688_v3  ;;  %v12157_v55 = vld [vmem:[#allocation76_spill] sm:$0xff] }
 0x2ab   : > { %4899 = vmatprep.subr.mxu0 %v9098_v22  ;;  %v12156_v16 = vld [vmem:[#allocation94_spill] sm:$0xff]  ;;  %v2105_v54 = vmax.f32 %v1593_v58, %v1849_v31  ;;  %v1674_v47 = vadd.f32 %v12064_v18, %v9197_v61  ;;  %v2185_v17 = vmax.f32 %v1673_v50, %v1929_v10 }
 0x2ac   : > { %v9353_v41 = vadd.f32 %v12156_v16, %v2137_v62  ;;  %4900 = vmatpush3.msra.mxu0 %v12157_v55  ;;  %v1897_v49 = vmul.f32 0.2, %v1641_v63  ;;  %v1882_v11 = vmul.f32 0.2, %v1626_v57  ;;  %v1850_v48 = vmul.f32 0.2, %v1594_v38  ;;  %4507 = vperm.xlu1 %5159, %v4489_v53   ;;  %v9370_v53 = vpop.permute.xlu1 %1075 }
 0x2ad   : > { %v3690_v30 = vadd.f32 %v9137_v0, %v3689_v36  ;;  %4901 = vmatprep.subr.mxu0 %v9092_v60  ;;  %v9364_v12 = vadd.f32 %v12156_v16, %v2105_v54  ;;  %v1930_v58 = vmul.f32 0.2, %v1674_v47  ;;  %4512 = vperm.xlu0 %5158, %v4490_v25   ;;  %v12158_v61 = vld [vmem:[#allocation18_spill] sm:$0xff]  ;;  %v9372_v0 = vpop.permute.xlu0 %941  ;;  %v1642_v25 = vadd.f32 %v12042_v35, %v9213_v20  ;;  %v12161_v36 = vld [vmem:[#allocation140_spill] sm:$0xff] }
 0x2ae   : > { %v9361_v22 = vmax.f32 %v2736_v19, %v9353_v41  ;;  %4902 = vmatpush3.msra.mxu0 %v12158_v61  ;;  %v12159_v55 = vld [vmem:[#allocation46_spill] sm:$0xff]  ;;  %v2153_v3 = vmax.f32 %v1641_v63, %v1897_v49  ;;  %v2138_v62 = vmax.f32 %v1626_v57, %v1882_v11  ;;  %v2106_v31 = vmax.f32 %v1594_v38, %v1850_v48  ;;  %v12163_v11 = vld [vmem:[#allocation95_spill] sm:$0xff]  ;;  %v12166_v57 = vld [vmem:[#allocation72_spill] sm:$0xff] }
 0x2af   : > { %v9368_v50 = vadd.f32 %v12159_v55, %v2185_v17  ;;  %v3691_v60 = vadd.f32 %v9146_v37, %v3690_v30  ;;  %4903 = vmatprep.subr.mxu0 %v9082_v24  ;;  %v2700_v19 = vmax.f32 %v2699_v6, %v9364_v12  ;;  %v2186_v10 = vmax.f32 %v1674_v47, %v1930_v58  ;;  %v12164_v30 = vld [vmem:[#allocation50_spill] sm:$0xff] }
 0x2b0   : > { %4904 = vmatpush3.msra.mxu0 %v12161_v36  ;;  %v9384_v48 = vadd.f32 %v12159_v55, %v2153_v3  ;;  %v9387_v63 = vadd.f32 %v12163_v11, %v2138_v62  ;;  %v9390_v37 = vadd.f32 %v12163_v11, %v2106_v31  ;;  %v1898_v6 = vmul.f32 0.2, %v1642_v25  ;;  %v12167_v61 = vld [vmem:[#allocation82_spill] sm:$0xff]  ;;  %v3891_v62 = vld [vmem:[#allocation2 + $0x20] sm:$0xff] }
 0x2b1   : > { %12160 = vst [vmem:[#allocation111_spill] sm:$0xff] %v9368_v50  ;;  %v9381_v49 = vmax.f32 %v2794_v9, %v9368_v50  ;;  %v3692_v24 = vadd.f32 %v9164_v5, %v3691_v60  ;;  %4905 = vmatprep.subr.mxu0 %v9075_v29  ;;  %v9395_v20 = vadd.f32 %v12164_v30, %v2186_v10  ;;  %v1143_v3 = vpop.permute.xlu0 %1142 }
 0x2b2   : > { %12162 = vst [vmem:[#allocation113_spill] sm:$0xff] %v9384_v48  ;;  %v1627_v9 = vadd.f32 %v12045_v40, %v9230_v21  ;;  %4906 = vmatpush3.msra.mxu0 %v12166_v57  ;;  %v2758_v38 = vmax.f32 %v2757_v4, %v9384_v48  ;;  %v2738_v54 = vmax.f32 %v9361_v22, %v9387_v63 }
 0x2b3   : > { %12165 = vst [vmem:[#allocation116_spill] sm:$0xff] %v9395_v20  ;;  %v2701_v47 = vmax.f32 %v2700_v19, %v9390_v37  ;;  %v1595_v5 = vadd.f32 %v12062_v2, %v9246_v7  ;;  %v3693_v29 = vadd.f32 %v9172_v23, %v3692_v24  ;;  %4907 = vmatprep.subr.mxu0 %v9067_v45  ;;  %v1277_v23 = vpop.permute.xlu1 %1276  ;;  %v12169_v19 = vld [vmem:[#allocation48_spill] sm:$0xff] }
 0x2b4   : > { %v2796_v17 = vmax.f32 %v9381_v49, %v9395_v20  ;;  %v2154_v21 = vmax.f32 %v1642_v25, %v1898_v6  ;;  %v1883_v58 = vmul.f32 0.2, %v1627_v9  ;;  %4908 = vmatpush3.msra.mxu0 %v12167_v61  ;;  %v1675_v22 = vadd.f32 %v12064_v18, %v9261_v44 }
 0x2b5   : > { %v1851_v4 = vmul.f32 0.2, %v1595_v5  ;;  %v1643_v55 = vadd.f32 %v12042_v35, %v9274_v51  ;;  %v1628_v7 = vadd.f32 %v12045_v40, %v9288_v43  ;;  %v3694_v45 = vadd.f32 %v9182_v14, %v3693_v29  ;;  %4909 = vmatprep.subr.mxu0 %v9056_v46  ;;  %v12171_v14 = vld [vmem:[#allocation102_spill] sm:$0xff] }
 0x2b6   : > { %v9420_v31 = vadd.f32 %v12164_v30, %v2154_v21  ;;  %v2139_v60 = vmax.f32 %v1627_v9, %v1883_v58  ;;  %v1596_v44 = vadd.f32 %v12062_v2, %v9312_v39  ;;  %4910 = vmatpush3.msra.mxu0 %v12169_v19  ;;  %v1931_v10 = vmul.f32 0.2, %v1675_v22  ;;  %v12172_v30 = vld [vmem:[#allocation83_spill] sm:$0xff]  ;;  %v12173_v21 = vld [vmem:[#allocation52_spill] sm:$0xff] }
 0x2b7   : > { %v2107_v51 = vmax.f32 %v1595_v5, %v1851_v4  ;;  %v1899_v25 = vmul.f32 0.2, %v1643_v55  ;;  %v1884_v43 = vmul.f32 0.2, %v1628_v7  ;;  %v9426_v36 = vadd.f32 %v9194_v56, %v3694_v45  ;;  %4911 = vmatprep.subr.mxu0 %v9049_v52  ;;  %v12176_v4 = vld [vmem:[#allocation104_spill] sm:$0xff] }
 0x2b8   : > { %12168 = vst [vmem:[#allocation119_spill] sm:$0xff] %v9420_v31  ;;  %v2759_v46 = vmax.f32 %v2758_v38, %v9420_v31  ;;  %v9431_v49 = vadd.f32 %v12171_v14, %v2139_v60  ;;  %v1852_v24 = vmul.f32 0.2, %v1596_v44  ;;  %4912 = vmatpush3.msra.mxu0 %v12172_v30  ;;  %v2187_v6 = vmax.f32 %v1675_v22, %v1931_v10 }
 0x2b9   : > { %12170 = vst [vmem:[#allocation49_spill] sm:$0xff] %v9426_v36  ;;  %v9435_v39 = vadd.f32 %v12171_v14, %v2107_v51  ;;  %v2155_v9 = vmax.f32 %v1643_v55, %v1899_v25  ;;  %v2140_v57 = vmax.f32 %v1628_v7, %v1884_v43  ;;  %4114 = vmatmul.mubr.f32.vlgmr.msra.gmra.mxu0 %v3891_v62  ;;  %v1080_v55 = vpop.permute.xlu1 %1079 }
 0x2ba   : > { %v2739_v56 = vmax.f32 %v2738_v54, %v9431_v49  ;;  %v2108_v5 = vmax.f32 %v1596_v44, %v1852_v24  ;;  %v1676_v52 = vadd.f32 %v12064_v18, %v9328_v33  ;;  %v1644_v38 = vadd.f32 %v12042_v35, %v9345_v15  ;;  %v946_v54 = vpop.permute.xlu0 %945 }
 0x2bb   : > { %v2702_v29 = vmax.f32 %v2701_v47, %v9435_v39  ;;  %v9444_v58 = vadd.f32 %v12173_v21, %v2187_v6  ;;  %v9447_v61 = vadd.f32 %v12173_v21, %v2155_v9  ;;  %v9450_v22 = vadd.f32 %v12176_v4, %v2140_v57 }
 0x2bc   : > { %v9453_v7 = vadd.f32 %v12176_v4, %v2108_v5  ;;  %v1932_v33 = vmul.f32 0.2, %v1676_v52  ;;  %v1900_v45 = vmul.f32 0.2, %v1644_v38  ;;  %v1629_v15 = vadd.f32 %v12045_v40, %v9370_v53 }
 0x2bd   : > { %12174 = vst [vmem:[#allocation115_spill] sm:$0xff] %v9444_v58  ;;  %12175 = vst [vmem:[#allocation121_spill] sm:$0xff] %v9447_v61  ;;  %v2797_v47 = vmax.f32 %v2796_v17, %v9444_v58  ;;  %v2760_v62 = vmax.f32 %v2759_v46, %v9447_v61  ;;  %v2740_v60 = vmax.f32 %v2739_v56, %v9450_v22  ;;  %v12177_v17 = vld [vmem:[#allocation56_spill] sm:$0xff] }
 0x2be   : > { %v1597_v44 = vadd.f32 %v12062_v2, %v9372_v0  ;;  %v2703_v19 = vmax.f32 %v2702_v29, %v9453_v7  ;;  %v2188_v51 = vmax.f32 %v1676_v52, %v1932_v33  ;;  %v2156_v10 = vmax.f32 %v1644_v38, %v1900_v45  ;;  %v1281_v38 = vpop.permute.xlu1 %1280  ;;  %v1147_v29 = vpop.permute.xlu0 %1146 }
 0x2bf   : > { %v1885_v25 = vmul.f32 0.2, %v1629_v15  ;;  %v1677_v24 = vadd.f32 %v12064_v18, %v1277_v23  ;;  %v1645_v30 = vadd.f32 %v12042_v35, %v1143_v3  ;;  %v1630_v53 = vadd.f32 %v12045_v40, %v1080_v55  ;;  %v12180_v40 = vld [vmem:[#allocation105_spill] sm:$0xff] }
 0x2c0   : > { %v1853_v43 = vmul.f32 0.2, %v1597_v44  ;;  %v9467_v6 = vadd.f32 %v12177_v17, %v2188_v51  ;;  %v9470_v46 = vadd.f32 %v12177_v17, %v2156_v10  ;;  %v1598_v0 = vadd.f32 %v12062_v2, %v946_v54  ;;  %v12184_v17 = vld [vmem:[#allocation118_spill] sm:$0xff] }
 0x2c1   : > { %v2141_v9 = vmax.f32 %v1629_v15, %v1885_v25  ;;  %v1933_v56 = vmul.f32 0.2, %v1677_v24  ;;  %v1901_v5 = vmul.f32 0.2, %v1645_v30  ;;  %v1886_v52 = vmul.f32 0.2, %v1630_v53 }
 0x2c2   : > { %12178 = vst [vmem:[#allocation129_spill] sm:$0xff] %v9467_v6  ;;  %12179 = vst [vmem:[#allocation28_spill] sm:$0xff] %v9470_v46  ;;  %v2109_v57 = vmax.f32 %v1597_v44, %v1853_v43  ;;  %v2798_v23 = vmax.f32 %v2797_v47, %v9467_v6  ;;  %v2761_v3 = vmax.f32 %v2760_v62, %v9470_v46  ;;  %v1854_v55 = vmul.f32 0.2, %v1598_v0  ;;  %v12181_v62 = vld [vmem:[#allocation58_spill] sm:$0xff] }
 0x2c3   : > { %v9476_v21 = vadd.f32 %v12180_v40, %v2141_v9  ;;  %v2189_v45 = vmax.f32 %v1677_v24, %v1933_v56  ;;  %v2157_v15 = vmax.f32 %v1645_v30, %v1901_v5  ;;  %v2142_v2 = vmax.f32 %v1630_v53, %v1886_v52  ;;  %v1288_v5 = vpop.permute.xlu1 %1287  ;;  %v1154_v52 = vpop.permute.xlu0 %1153 }
 0x2c4   : > { %v9479_v33 = vadd.f32 %v12180_v40, %v2109_v57  ;;  %v2110_v44 = vmax.f32 %v1598_v0, %v1854_v55  ;;  %v1678_v51 = vadd.f32 %v12064_v18, %v1281_v38  ;;  %v1646_v10 = vadd.f32 %v12042_v35, %v1147_v29 }
 0x2c5   : > { %v2741_v54 = vmax.f32 %v2740_v60, %v9476_v21  ;;  %v9486_v25 = vadd.f32 %v12181_v62, %v2189_v45  ;;  %v9489_v43 = vadd.f32 %v12181_v62, %v2157_v15  ;;  %v9492_v9 = vadd.f32 %v12184_v17, %v2142_v2 }
 0x2c6   : > { %v2704_v47 = vmax.f32 %v2703_v19, %v9479_v33  ;;  %v9495_v24 = vadd.f32 %v12184_v17, %v2110_v44  ;;  %v1934_v60 = vmul.f32 0.2, %v1678_v51  ;;  %v1902_v30 = vmul.f32 0.2, %v1646_v10 }
 0x2c7   : > { %12182 = vst [vmem:[#allocation89_spill] sm:$0xff] %v9486_v25  ;;  %12183 = vst [vmem:[#allocation137_spill] sm:$0xff] %v9489_v43  ;;  %v12185_v53 = vrot.slane %v12153_v27, 4  ;;  %v2799_v19 = vmax.f32 %v2798_v23, %v9486_v25  ;;  %v2762_v57 = vmax.f32 %v2761_v3, %v9489_v43  ;;  %v2742_v56 = vmax.f32 %v2741_v54, %v9492_v9  ;;  %v1292_v43 = vpop.permute.xlu1 %1291 }
 0x2c8   : > { %v2705_v38 = vmax.f32 %v2704_v47, %v9495_v24  ;;  %v2190_v29 = vmax.f32 %v1678_v51, %v1934_v60  ;;  %v2158_v55 = vmax.f32 %v1646_v10, %v1902_v30  ;;  %v1679_v45 = vadd.f32 %v12064_v18, %v1288_v5  ;;  %v1158_v47 = vpop.permute.xlu0 %1157 }
 0x2c9   : > { %v3660_v0 = vadd.f32 %v12185_v53, %v12153_v27  ;;  %v2743_v15 = vrot.slane %v2742_v56, 4  ;;  %v1647_v2 = vadd.f32 %v12042_v35, %v1154_v52  ;;  %v12186_v27 = vld [vmem:[#allocation62_spill] sm:$0xff]  ;;  %v1648_v61 = vadd.f32 %v12042_v35, %v1158_v47 }
 0x2ca   : > { %v2706_v62 = vrot.slane %v2705_v38, 4  ;;  %v9507_v53 = vadd.f32 %v12186_v27, %v2190_v29  ;;  %v9510_v23 = vadd.f32 %v12186_v27, %v2158_v55  ;;  %v1935_v3 = vmul.f32 0.2, %v1679_v45  ;;  %v12189_v27 = vld [vmem:[#allocation65_spill] sm:$0xff] }
 0x2cb   : > { %v3661_v44 = vrot.slane %v3660_v0, 2  ;;  %v2744_v54 = vmax.f32 %v2742_v56, %v2743_v15  ;;  %v1903_v48 = vmul.f32 0.2, %v1647_v2  ;;  %v1680_v29 = vadd.f32 %v12064_v18, %v1292_v43 }
 0x2cc   : > { %12187 = vst [vmem:[#allocation27_spill] sm:$0xff] %v9507_v53  ;;  %12188 = vst [vmem:[#allocation133_spill] sm:$0xff] %v9510_v23  ;;  %v2707_v10 = vmax.f32 %v2705_v38, %v2706_v62  ;;  %v2800_v60 = vmax.f32 %v2799_v19, %v9507_v53  ;;  %v2763_v30 = vmax.f32 %v2762_v57, %v9510_v23  ;;  %v1904_v19 = vmul.f32 0.2, %v1648_v61  ;;  %v1162_v57 = vpop.permute.xlu0 %1161 }
 0x2cd   : > { %v3662_v51 = vadd.f32 %v3661_v44, %v3660_v0  ;;  %v2191_v5 = vmax.f32 %v1679_v45, %v1935_v3  ;;  %v2745_v52 = vrot.slane %v2744_v54, 2  ;;  %v2159_v46 = vmax.f32 %v1647_v2, %v1903_v48  ;;  %v1296_v44 = vpop.permute.xlu1 %1295 }
 0x2ce   : > { %v2708_v55 = vrot.slane %v2707_v10, 2  ;;  %v1936_v38 = vmul.f32 0.2, %v1680_v29  ;;  %v9523_v48 = vadd.f32 %v12064_v18, %v1296_v44  ;;  %v9526_v43 = vadd.f32 %v12042_v35, %v1162_v57 }
 0x2cf   : > { %v9517_v31 = vadd.f32 %v12189_v27, %v2191_v5  ;;  %v3663_v56 = vrot.slane %v3662_v51, 1  ;;  %v2746_v15 = vmax.f32 %v2744_v54, %v2745_v52  ;;  %v9520_v0 = vadd.f32 %v12189_v27, %v2159_v46  ;;  %v12195_v27 = vld [vmem:[#allocation69_spill] sm:$0xff] }
 0x2d0   : > { %v2709_v45 = vmax.f32 %v2707_v10, %v2708_v55  ;;  %12192 = vst [vmem:[#allocation32_spill] sm:$0xff] %v9526_v43  ;;  %v2192_v62 = vmax.f32 %v1680_v29, %v1936_v38  ;;  %v2160_v3 = vmax.f32 %v1648_v61, %v1904_v19  ;;  %v9529_v54 = vmul.f32 0.2, %v9523_v48  ;;  %v12200_v19 = vld [vmem:[#allocation135_spill] sm:$0xff] }
 0x2d1   : > { %12190 = vst [vmem:[#allocation54_spill] sm:$0xff] %v9517_v31  ;;  %12191 = vst [vmem:[#allocation131_spill] sm:$0xff] %v9520_v0  ;;  %v2747_v2 = vrot.slane %v2746_v15, 1  ;;  %v9532_v46 = vmul.f32 0.2, %v9526_v43  ;;  %v3664_v5 = vadd.f32 %v3663_v56, %v3662_v51  ;;  %v9537_v10 = vmax.f32 %v2800_v60, %v9517_v31  ;;  %v12198_v60 = vld [vmem:[#allocation80_spill] sm:$0xff] }
 0x2d2   : > { %v2710_v47 = vrot.slane %v2709_v45, 1  ;;  %12193 = vst [vmem:[#allocation100_spill] sm:$0xff] %v9529_v54  ;;  %v9540_v55 = vmax.f32 %v2763_v30, %v9520_v0  ;;  %v9543_v44 = vadd.f32 %v12195_v27, %v2192_v62  ;;  %v9548_v29 = vadd.f32 %v12195_v27, %v2160_v3  ;;  %v12199_v30 = vld [vmem:[#allocation78_spill] sm:$0xff]  ;;  %v12202_v62 = vld [vmem:[#allocation31_spill] sm:$0xff]  ;;  %v12204_v51 = vld [vmem:[#allocation24_spill] sm:$0xff] }
 0x2d3   : > { %12194 = vst [vmem:[#allocation96_spill] sm:$0xff] %v9532_v46  ;;  %v9534_v52 = vmax.f32 %v2746_v15, %v2747_v2  ;;  %5417 = vrcp.f32 %v3664_v5  ;;  %v12207_v5 = vld [vmem:[#allocation51_spill] sm:$0xff]  ;;  %v12250_v46 = vld [vmem:[#allocation13_spill] sm:$0xff] }
 0x2d4   : > { %12196 = vst [vmem:[#allocation127_spill] sm:$0xff] %v9543_v44  ;;  %v9545_v61 = vmax.f32 %v2709_v45, %v2710_v47  ;;  %12197 = vst [vmem:[#allocation109_spill] sm:$0xff] %v9548_v29  ;;  %v12201_v45 = vld [vmem:[#allocation36_spill] sm:$0xff]  ;;  %v12203_v47 = vld [vmem:[#allocation66_spill] sm:$0xff] }
 0x2d5   : > { %v2983_v56 = vsub.f32 %v12198_v60, %v9534_v52  ;;  %v2984_v15 = vsub.f32 %v12199_v30, %v9534_v52  ;;  %v2985_v57 = vsub.f32 %v12200_v19, %v9534_v52  ;;  %v2986_v2 = vsub.f32 %v12201_v45, %v9534_v52  ;;  %v12205_v60 = vld [vmem:[#allocation67_spill] sm:$0xff]  ;;  %v12206_v30 = vld [vmem:[#allocation61_spill] sm:$0xff] }
 0x2d6   : > { %v2987_v3 = vsub.f32 %v12202_v62, %v9534_v52  ;;  %v2988_v27 = vsub.f32 %v12203_v47, %v9534_v52  ;;  %v2989_v38 = vsub.f32 %v12204_v51, %v9534_v52  ;;  %v2990_v0 = vsub.f32 %v12205_v60, %v9534_v52  ;;  %v12208_v45 = vld [vmem:[#allocation55_spill] sm:$0xff]  ;;  %v12209_v62 = vld [vmem:[#allocation98_spill] sm:$0xff]  ;;  %v12212_v60 = vld [vmem:[#allocation53_spill] sm:$0xff] }
 0x2d7   : > { %v2991_v23 = vsub.f32 %v12206_v30, %v9534_v52  ;;  %v2992_v19 = vsub.f32 %v12207_v5, %v9534_v52  ;;  %v2994_v31 = vsub.f32 %v12208_v45, %v9534_v52  ;;  %v2995_v50 = vsub.f32 %v12209_v62, %v9534_v52  ;;  %v12210_v47 = vld [vmem:[#allocation38_spill] sm:$0xff]  ;;  %v12213_v30 = vld [vmem:[#allocation59_spill] sm:$0xff]  ;;  %v12216_v62 = vld [vmem:[#allocation92_spill] sm:$0xff] }
 0x2d8   : > { %v2996_v53 = vsub.f32 %v12210_v47, %v9534_v52  ;;  %v12211_v51 = vld [vmem:[#allocation138_spill] sm:$0xff]  ;;  %v2998_v6 = vsub.f32 %v12212_v60, %v9534_v52  ;;  %v2993_v58 = vsub.f32 %v12213_v30, %v9534_v52  ;;  %v12214_v5 = vld [vmem:[#allocation75_spill] sm:$0xff]  ;;  %v3002_v17 = vsub.f32 %v12216_v62, %v9534_v52 }
 0x2d9   : > { %v2997_v25 = vsub.f32 %v12211_v51, %v9534_v52  ;;  %v2999_v20 = vsub.f32 %v12214_v5, %v9534_v52  ;;  %v12215_v45 = vld [vmem:[#allocation39_spill] sm:$0xff]  ;;  %v12219_v60 = vld [vmem:[#allocation106_spill] sm:$0xff]  ;;  %v3006_v30 = vsub.f32 %v9208_v26, %v9534_v52  ;;  %v3007_v5 = vsub.f32 %v9235_v28, %v9534_v52 }
 0x2da   : > { %v3000_v36 = vsub.f32 %v12215_v45, %v9534_v52  ;;  %v12217_v47 = vld [vmem:[#allocation79_spill] sm:$0xff]  ;;  %v3005_v14 = vsub.f32 %v12219_v60, %v9534_v52  ;;  %v3008_v45 = vsub.f32 %v9286_v1, %v9534_v52  ;;  %v3009_v62 = vsub.f32 %v9353_v41, %v9534_v52  ;;  %v12220_v1 = vld [vmem:[#allocation128_spill] sm:$0xff] }
 0x2db   : > { %v3003_v40 = vsub.f32 %v12217_v47, %v9534_v52  ;;  %v12218_v51 = vld [vmem:[#allocation11_spill] sm:$0xff]  ;;  %v3010_v47 = vsub.f32 %v9387_v63, %v9534_v52  ;;  %v3012_v60 = vsub.f32 %v9450_v22, %v9534_v52  ;;  %v3013_v26 = vsub.f32 %v9476_v21, %v9534_v52  ;;  %v12222_v21 = vld [vmem:[#allocation57_spill] sm:$0xff] }
 0x2dc   : > { %v3004_v4 = vsub.f32 %v12218_v51, %v9534_v52  ;;  %v3011_v51 = vsub.f32 %v9431_v49, %v9534_v52  ;;  %v3014_v28 = vsub.f32 %v9492_v9, %v9534_v52  ;;  %v3001_v11 = vsub.f32 %v12220_v1, %v9534_v52  ;;  %v12221_v49 = vld [vmem:[#allocation60_spill] sm:$0xff] }
 0x2dd   : > { %v3399_v16 = vmul.f32 1.442695, %v2983_v56  ;;  %v3401_v41 = vmul.f32 1.442695, %v2984_v15  ;;  %v3403_v59 = vmul.f32 1.442695, %v2985_v57  ;;  %v9622_v57 = vpop.permute.xlu1 %1299 }
 0x2de   : > { %v3405_v34 = vmul.f32 1.442695, %v2986_v2  ;;  %v3407_v63 = vmul.f32 1.442695, %v2987_v3  ;;  %v3409_v42 = vmul.f32 1.442695, %v2988_v27 }
 0x2df   : > { %5419 = vpow2.f32 %v3399_v16  ;;  %v3411_v22 = vmul.f32 1.442695, %v2989_v38  ;;  %v3413_v18 = vmul.f32 1.442695, %v2990_v0  ;;  %v3415_v9 = vmul.f32 1.442695, %v2991_v23  ;;  %v9626_v0 = vpop.permute.xlu0 %1165 }
 0x2e0   : > { %5421 = vpow2.f32 %v3401_v41  ;;  %v3417_v43 = vmul.f32 1.442695, %v2992_v19  ;;  %v3419_v54 = vmul.f32 1.442695, %v2993_v58  ;;  %v3421_v52 = vmul.f32 1.442695, %v2994_v31  ;;  %v9624_v2 = vpop.eup %5417 }
 0x2e1   : > { %5423 = vpow2.f32 %v3403_v59  ;;  %v3423_v56 = vmul.f32 1.442695, %v2995_v50  ;;  %v3425_v15 = vmul.f32 1.442695, %v2996_v53  ;;  %12223 = vst [vmem:[#allocation120_spill] sm:$0xff] %v9622_v57  ;;  %12224 = vst [vmem:[#allocation125_spill] sm:$0xff] %v9624_v2 }
 0x2e2   : > { %5425 = vpow2.f32 %v3405_v34  ;;  %v3427_v3 = vmul.f32 1.442695, %v2997_v25  ;;  %v3429_v16 = vmul.f32 1.442695, %v2998_v6  ;;  %v3431_v38 = vmul.f32 1.442695, %v2999_v20 }
 0x2e3   : > { %12225 = vst [vmem:[#allocation124_spill] sm:$0xff] %v9626_v0  ;;  %5427 = vpow2.f32 %v3407_v63  ;;  %v3433_v27 = vmul.f32 1.442695, %v3000_v36  ;;  %v9628_v1 = vmul.f32 1.442695, %v3001_v11  ;;  %v12227_v25 = vld [vmem:[#allocation141_spill] sm:$0xff] }
 0x2e4   : > { %v9630_v23 = vmul.f32 1.442695, %v3002_v17  ;;  %5429 = vpow2.f32 %v3409_v42  ;;  %v9632_v59 = vmul.f32 1.442695, %v3003_v40  ;;  %v9634_v50 = vmul.f32 1.442695, %v3004_v4  ;;  %v9656_v40 = vpop.permute.xlu1 %1303 }
 0x2e5   : > { %v9636_v31 = vmul.f32 1.442695, %v3005_v14  ;;  %5431 = vpow2.f32 %v3411_v22  ;;  %v9638_v34 = vmul.f32 1.442695, %v3006_v30  ;;  %v9640_v58 = vmul.f32 1.442695, %v3007_v5  ;;  %v9664_v5 = vpop.permute.xlu0 %1169 }
 0x2e6   : > { %v9642_v20 = vmul.f32 1.442695, %v3008_v45  ;;  %5433 = vpow2.f32 %v3413_v18  ;;  %v9644_v36 = vmul.f32 1.442695, %v3009_v62  ;;  %v9646_v11 = vmul.f32 1.442695, %v3010_v47 }
 0x2e7   : > { %v9648_v6 = vmul.f32 1.442695, %v3011_v51  ;;  %5435 = vpow2.f32 %v3415_v9  ;;  %v9650_v42 = vmul.f32 1.442695, %v3012_v60  ;;  %v9652_v4 = vmul.f32 1.442695, %v3013_v26 }
 0x2e8   : > { %v9654_v14 = vmul.f32 1.442695, %v3014_v28  ;;  %12226 = vst [vmem:[#allocation123_spill] sm:$0xff] %v9656_v40  ;;  %5437 = vpow2.f32 %v3417_v43  ;;  %v2953_v17 = vsub.f32 %v12227_v25, %v9545_v61  ;;  %v12228_v18 = vld [vmem:[#allocation41_spill] sm:$0xff]  ;;  %12230 = vst [vmem:[#allocation134_spill] sm:$0xff] %v9664_v5  ;;  %v12233_v43 = vld [vmem:[#allocation26_spill] sm:$0xff]  ;;  %v9700_v40 = vpop.permute.xlu1 %1307 }
 0x2e9   : > { %v2954_v53 = vsub.f32 %v12228_v18, %v9545_v61  ;;  %v12229_v19 = vld [vmem:[#allocation37_spill] sm:$0xff]  ;;  %5439 = vpow2.f32 %v3419_v54  ;;  %v2958_v60 = vsub.f32 %v12233_v43, %v9545_v61  ;;  %v12234_v26 = vld [vmem:[#allocation30_spill] sm:$0xff]  ;;  %v12235_v41 = vld [vmem:[#allocation63_spill] sm:$0xff]  ;;  %12248 = vst [vmem:[#allocation40_spill] sm:$0xff] %v9700_v40  ;;  %v9710_v57 = vpop.permute.xlu0 %1173 }
 0x2ea   : > { %v2955_v30 = vsub.f32 %v12229_v19, %v9545_v61  ;;  %v12231_v45 = vld [vmem:[#allocation85_spill] sm:$0xff]  ;;  %5441 = vpow2.f32 %v3421_v52  ;;  %v12236_v22 = vld [vmem:[#allocation86_spill] sm:$0xff]  ;;  %v12238_v18 = vld [vmem:[#allocation43_spill] sm:$0xff]  ;;  %12252 = vst [vmem:[#allocation99_spill] sm:$0xff] %v9710_v57 }
 0x2eb   : > { %v2956_v62 = vsub.f32 %v12231_v45, %v9545_v61  ;;  %v12232_v47 = vld [vmem:[#allocation73_spill] sm:$0xff]  ;;  %5443 = vpow2.f32 %v3423_v56  ;;  %v12237_v54 = vld [vmem:[#allocation42_spill] sm:$0xff]  ;;  %v12239_v45 = vld [vmem:[#allocation47_spill] sm:$0xff] }
 0x2ec   : > { %v2957_v51 = vsub.f32 %v12232_v47, %v9545_v61  ;;  %v9684_v52 = vpop.eup %5419  ;;  %5445 = vpow2.f32 %v3425_v15  ;;  %v12241_v43 = vld [vmem:[#allocation64_spill] sm:$0xff]  ;;  %v12242_v63 = vld [vmem:[#allocation22_spill] sm:$0xff]  ;;  %v12245_v19 = vld [vmem:[#allocation91_spill] sm:$0xff] }
 0x2ed   : > { %12240 = vst [vmem:[#allocation34_spill] sm:$0xff] %v9684_v52  ;;  %v2961_v28 = vsub.f32 %v12241_v43, %v9545_v61  ;;  %v12243_v56 = vld [vmem:[#allocation136_spill] sm:$0xff]  ;;  %v9692_v35 = vpop.eup %5421  ;;  %5447 = vpow2.f32 %v3427_v3  ;;  %v12246_v47 = vld [vmem:[#allocation14_spill] sm:$0xff]  ;;  %v12247_v15 = vld [vmem:[#allocation21_spill] sm:$0xff] }
 0x2ee   : > { %12244 = vst [vmem:[#allocation35_spill] sm:$0xff] %v9692_v35  ;;  %v9702_v43 = vpop.eup %5423  ;;  %5449 = vpow2.f32 %v3429_v16  ;;  %v3776_v9 = vadd.f32 %v9692_v35, %v9684_v52  ;;  %v12251_v0 = vld [vmem:[#allocation23_spill] sm:$0xff]  ;;  %v12259_v52 = vsub.f32 %v12221_v49, %v9545_v61  ;;  %v9767_v49 = vmul.f32 1.442695, %v2955_v30 }
 0x2ef   : > { %12249 = vst [vmem:[#allocation44_spill] sm:$0xff] %v9702_v43  ;;  %v9712_v2 = vpop.eup %5425  ;;  %5451 = vpow2.f32 %v3431_v38  ;;  %v12257_v38 = vld [vmem:[#allocation130_spill] sm:$0xff] }
 0x2f0   : > { %12253 = vst [vmem:[#allocation88_spill] sm:$0xff] %v9712_v2  ;;  %v9720_v35 = vpop.eup %5427  ;;  %5453 = vpow2.f32 %v3433_v27  ;;  %v3777_v3 = vadd.f32 %v9702_v43, %v3776_v9  ;;  %v2969_v5 = vsub.f32 %v12257_v38, %v9545_v61  ;;  %v9750_v27 = vmul.f32 1.442695, %v12259_v52  ;;  %v9759_v38 = vpop.permute.xlu1 %1311 }
 0x2f1   : > { %12254 = vst [vmem:[#allocation15_spill] sm:$0xff] %v9720_v35  ;;  %v9727_v57 = vpop.eup %5429  ;;  %5455 = vpow2.f32 %v9628_v1  ;;  %12261 = vst [vmem:[#allocation46_spill] sm:$0xff] %v9759_v38  ;;  %v9765_v1 = vmul.f32 1.442695, %v2954_v53  ;;  %v9769_v52 = vpop.permute.xlu0 %1177  ;;  %v12263_v53 = vsub.f32 %v12234_v26, %v9545_v61  ;;  %v12266_v26 = vsub.f32 %v12237_v54, %v9545_v61 }
 0x2f2   : > { %12255 = vst [vmem:[#allocation110_spill] sm:$0xff] %v9727_v57  ;;  %v9736_v9 = vpop.eup %5431  ;;  %5457 = vpow2.f32 %v9630_v23  ;;  %v3778_v25 = vadd.f32 %v9712_v2, %v3777_v3  ;;  %v12260_v23 = vsub.f32 %v12222_v21, %v9545_v61  ;;  %v9757_v3 = vmul.f32 1.442695, %v2953_v17 }
 0x2f3   : > { %12256 = vst [vmem:[#allocation76_spill] sm:$0xff] %v9736_v9  ;;  %v9744_v43 = vpop.eup %5433  ;;  %5459 = vpow2.f32 %v9632_v59  ;;  %v9774_v21 = vmul.f32 1.442695, %v2956_v62  ;;  %v9776_v17 = vmul.f32 1.442695, %v2957_v51  ;;  %v3896_v51 = vld [vmem:[#allocation2 + $0x48] sm:$0xff] }
 0x2f4   : > { %12258 = vst [vmem:[#allocation18_spill] sm:$0xff] %v9744_v43  ;;  %v9755_v16 = vmul.f32 1.442695, %v12260_v23  ;;  %v9761_v2 = vpop.eup %5435  ;;  %5461 = vpow2.f32 %v9634_v50  ;;  %v3779_v59 = vadd.f32 %v9720_v35, %v3778_v25  ;;  %v9778_v23 = vmul.f32 1.442695, %v2958_v60  ;;  %v3898_v25 = vld [vmem:[#allocation2 + $0x58] sm:$0xff]  ;;  %4259 = vmatprep.mubr.f32.mxu0 %v3896_v51 }
 0x2f5   : > { %12262 = vst [vmem:[#allocation140_spill] sm:$0xff] %v9761_v2  ;;  %v9771_v40 = vpop.eup %5437  ;;  %5463 = vpow2.f32 %v9636_v31  ;;  %v9787_v30 = vmul.f32 1.442695, %v12263_v53  ;;  %v12264_v31 = vsub.f32 %v12235_v41, %v9545_v61  ;;  %v9797_v35 = vmul.f32 1.442695, %v2961_v28  ;;  %4332 = vmatprep.mubr.f32.mxu1 %v3898_v25 }
 0x2f6   : > { %v9780_v38 = vpop.eup %5439  ;;  %5465 = vpow2.f32 %v9638_v34  ;;  %v3780_v50 = vadd.f32 %v9727_v57, %v3779_v59  ;;  %v12265_v34 = vsub.f32 %v12236_v22, %v9545_v61  ;;  %v9807_v53 = vmul.f32 1.442695, %v12266_v26  ;;  %v9841_v26 = vpop.permute.xlu1 %1315 }
 0x2f7   : > { %v9792_v62 = vmul.f32 1.442695, %v12264_v31  ;;  %v9794_v60 = vpop.eup %5441  ;;  %5467 = vpow2.f32 %v9640_v58  ;;  %v12267_v28 = vsub.f32 %v12238_v18, %v9545_v61  ;;  %v12268_v22 = vsub.f32 %v12239_v45, %v9545_v61 }
 0x2f8   : > { %v9802_v59 = vmul.f32 1.442695, %v12265_v34  ;;  %v9809_v41 = vpop.eup %5443  ;;  %5469 = vpow2.f32 %v9642_v20  ;;  %v3781_v58 = vadd.f32 %v9736_v9, %v3780_v50  ;;  %v12269_v51 = vsub.f32 %v12242_v63, %v9545_v61  ;;  %v12295_v9 = vld [vmem:[#allocation96_spill] sm:$0xff] }
 0x2f9   : > { %v9816_v31 = vmul.f32 1.442695, %v12267_v28  ;;  %v9821_v34 = vmul.f32 1.442695, %v12268_v22  ;;  %v9823_v54 = vpop.eup %5445  ;;  %5471 = vpow2.f32 %v9644_v36  ;;  %v12270_v50 = vsub.f32 %v12243_v56, %v9545_v61 }
 0x2fa   : > { %v9829_v20 = vmul.f32 1.442695, %v12269_v51  ;;  %v12271_v25 = vsub.f32 %v12245_v19, %v9545_v61  ;;  %v9843_v28 = vpop.eup %5447  ;;  %5473 = vpow2.f32 %v9646_v11  ;;  %v3782_v36 = vadd.f32 %v9744_v43, %v3781_v58  ;;  %v9854_v51 = vpop.permute.xlu0 %1181  ;;  %v12300_v43 = vld [vmem:[#allocation124_spill] sm:$0xff] }
 0x2fb   : > { %v9834_v18 = vmul.f32 1.442695, %v12270_v50  ;;  %v9847_v63 = vmul.f32 1.442695, %v2969_v5  ;;  %v12272_v56 = vsub.f32 %v12246_v47, %v9545_v61  ;;  %v9856_v19 = vpop.eup %5449  ;;  %5475 = vpow2.f32 %v9648_v6 }
 0x2fc   : > { %v9839_v45 = vmul.f32 1.442695, %v12271_v25  ;;  %v12273_v50 = vsub.f32 %v12247_v15, %v9545_v61  ;;  %v12274_v11 = vsub.f32 %v12250_v46, %v9545_v61  ;;  %v12275_v47 = vsub.f32 %v12251_v0, %v9545_v61 }
 0x2fd   : > { %v9852_v22 = vmul.f32 1.442695, %v12272_v56  ;;  %v9874_v56 = vpop.eup %5451  ;;  %5477 = vpow2.f32 %v9650_v42  ;;  %v3783_v6 = vadd.f32 %v9761_v2, %v3782_v36  ;;  %v12276_v15 = vsub.f32 %v9211_v13, %v9545_v61 }
 0x2fe   : > { %v9862_v25 = vmul.f32 1.442695, %v12273_v50  ;;  %v9867_v5 = vmul.f32 1.442695, %v12274_v11  ;;  %v9872_v58 = vmul.f32 1.442695, %v12275_v47  ;;  %v12277_v46 = vsub.f32 %v9254_v8, %v9545_v61  ;;  %v9888_v57 = vpop.eup %5453 }
 0x2ff   : > { %v9881_v50 = vmul.f32 1.442695, %v12276_v15  ;;  %5479 = vpow2.f32 %v9652_v4  ;;  %v12278_v0 = vsub.f32 %v9304_v32, %v9545_v61  ;;  %v12279_v36 = vsub.f32 %v9364_v12, %v9545_v61  ;;  %v9906_v15 = vpop.eup %5455 }
 0x300   : > { %v9886_v11 = vmul.f32 1.442695, %v12277_v46  ;;  %v12280_v47 = vsub.f32 %v9390_v37, %v9545_v61  ;;  %5481 = vpow2.f32 %v9654_v14  ;;  %v3784_v4 = vadd.f32 %v9771_v40, %v3783_v6 }
 0x301   : > { %v9894_v42 = vmul.f32 1.442695, %v12278_v0  ;;  %v9899_v13 = vmul.f32 1.442695, %v12279_v36  ;;  %v12282_v32 = vsub.f32 %v9435_v39, %v9545_v61  ;;  %v12284_v12 = vsub.f32 %v9453_v7, %v9545_v61  ;;  %v9920_v36 = vpop.eup %5457  ;;  %v9935_v7 = vpop.permute.xlu1 %1319 }
 0x302   : > { %v9904_v8 = vmul.f32 1.442695, %v12280_v47  ;;  %5483 = vpow2.f32 %v9750_v27  ;;  %v12286_v37 = vsub.f32 %v9479_v33, %v9545_v61  ;;  %v12288_v6 = vsub.f32 %v9495_v24, %v9545_v61  ;;  %v12290_v27 = vld [vmem:[#allocation100_spill] sm:$0xff] }
 0x303   : > { %v9913_v46 = vmul.f32 1.442695, %v12282_v32  ;;  %v9918_v0 = vmul.f32 1.442695, %v12284_v12  ;;  %v2802_v47 = vmax.f32 %v9537_v10, %v9543_v44  ;;  %v9937_v32 = vpop.eup %5459  ;;  %v3785_v12 = vadd.f32 %v9780_v38, %v3784_v4  ;;  %v12292_v24 = vld [vmem:[#allocation68_spill] sm:$0xff] }
 0x304   : > { %12281 = vst [vmem:[#allocation50_spill] sm:$0xff] %v9904_v8  ;;  %v9926_v14 = vmul.f32 1.442695, %v12286_v37  ;;  %v9931_v39 = vmul.f32 1.442695, %v12288_v6  ;;  %5485 = vpow2.f32 %v9755_v16  ;;  %v2765_v33 = vmax.f32 %v9540_v55, %v9548_v29  ;;  %v9949_v6 = vpop.permute.xlu0 %1185  ;;  %v9951_v10 = vpop.eup %5461  ;;  %v12294_v44 = vld [vmem:[#allocation32_spill] sm:$0xff] }
 0x305   : > { %12283 = vst [vmem:[#allocation72_spill] sm:$0xff] %v9913_v46  ;;  %12285 = vst [vmem:[#allocation82_spill] sm:$0xff] %v9918_v0  ;;  %v12291_v37 = vmax.f32 %v9523_v48, %v12290_v27  ;;  %5487 = vpow2.f32 %v9757_v3  ;;  %v12296_v4 = vmax.f32 %v12294_v44, %v12295_v9  ;;  %v12299_v55 = vld [vmem:[#allocation17_spill] sm:$0xff]  ;;  %v12301_v48 = vld [vmem:[#allocation16_spill] sm:$0xff] }
 0x306   : > { %12287 = vst [vmem:[#allocation48_spill] sm:$0xff] %v9926_v14  ;;  %12289 = vst [vmem:[#allocation83_spill] sm:$0xff] %v9931_v39  ;;  %v12298_v39 = vld [vmem:[#allocation120_spill] sm:$0xff]  ;;  %v1650_v27 = vadd.f32 %v12301_v48, %v12300_v43  ;;  %v3786_v14 = vadd.f32 %v9794_v60, %v3785_v12  ;;  %5489 = vpow2.f32 %v9765_v1  ;;  %v12302_v0 = vld [vmem:[#allocation123_spill] sm:$0xff] }
 0x307   : > { %v9947_v61 = vadd.f32 %v12292_v24, %v12291_v37  ;;  %v9958_v16 = vadd.f32 %v12292_v24, %v12296_v4  ;;  %v1682_v29 = vadd.f32 %v12299_v55, %v12298_v39  ;;  %v9964_v37 = vpop.eup %5463  ;;  %v1683_v44 = vadd.f32 %v12299_v55, %v12302_v0  ;;  %v12305_v12 = vld [vmem:[#allocation134_spill] sm:$0xff]  ;;  %v12306_v46 = vld [vmem:[#allocation40_spill] sm:$0xff] }
 0x308   : > { %v9971_v9 = vpop.eup %5465  ;;  %5491 = vpow2.f32 %v9767_v49  ;;  %v1906_v4 = vmul.f32 0.2, %v1650_v27  ;;  %v3787_v2 = vadd.f32 %v9809_v41, %v3786_v14 }
 0x309   : > { %12293 = vst [vmem:[#allocation52_spill] sm:$0xff] %v9947_v61  ;;  %12297 = vst [vmem:[#allocation56_spill] sm:$0xff] %v9958_v16  ;;  %v2803_v3 = vmax.f32 %v2802_v47, %v9947_v61  ;;  %v2766_v39 = vmax.f32 %v2765_v33, %v9958_v16  ;;  %v1938_v24 = vmul.f32 0.2, %v1682_v29  ;;  %v9975_v43 = vpop.eup %5467  ;;  %5493 = vpow2.f32 %v9774_v21  ;;  %v9986_v16 = vpop.permute.xlu1 %1323 }
 0x30a   : > { %12303 = vst [vmem:[#allocation58_spill] sm:$0xff] %v9971_v9  ;;  %12304 = vst [vmem:[#allocation62_spill] sm:$0xff] %v9975_v43  ;;  %v1939_v1 = vmul.f32 0.2, %v1683_v44  ;;  %v1651_v47 = vadd.f32 %v12301_v48, %v12305_v12  ;;  %v9981_v61 = vpop.eup %5469  ;;  %5495 = vpow2.f32 %v9776_v17  ;;  %v2162_v49 = vmax.f32 %v1650_v27, %v1906_v4  ;;  %v9992_v12 = vpop.permute.xlu0 %1189 }
 0x30b   : > { %v2194_v0 = vmax.f32 %v1682_v29, %v1938_v24  ;;  %v1684_v33 = vadd.f32 %v12299_v55, %v12306_v46  ;;  %v9988_v43 = vpop.eup %5471  ;;  %v3788_v14 = vadd.f32 %v9823_v54, %v3787_v2  ;;  %5497 = vpow2.f32 %v9778_v23  ;;  %12307 = vst [vmem:[#allocation65_spill] sm:$0xff] %v9992_v12  ;;  %v12308_v29 = vld [vmem:[#allocation71_spill] sm:$0xff]  ;;  %v12310_v23 = vld [vmem:[#allocation77_spill] sm:$0xff] }
 0x30c   : > { %v2195_v21 = vmax.f32 %v1683_v44, %v1939_v1  ;;  %v1907_v8 = vmul.f32 0.2, %v1651_v47  ;;  %v9994_v9 = vpop.eup %5473  ;;  %5499 = vpow2.f32 %v9787_v30  ;;  %v10001_v46 = vadd.f32 %v12308_v29, %v2162_v49 }
 0x30d   : > { %v9998_v17 = vadd.f32 %v12308_v29, %v2194_v0  ;;  %v1940_v27 = vmul.f32 0.2, %v1684_v33  ;;  %v10003_v24 = vpop.eup %5475  ;;  %v3789_v2 = vadd.f32 %v9843_v28, %v3788_v14  ;;  %5501 = vpow2.f32 %v9792_v62  ;;  %v12312_v14 = vld [vmem:[#allocation99_spill] sm:$0xff] }
 0x30e   : > { %12309 = vst [vmem:[#allocation69_spill] sm:$0xff] %v10001_v46  ;;  %v10008_v44 = vadd.f32 %v12310_v23, %v2195_v21  ;;  %v2163_v4 = vmax.f32 %v1651_v47, %v1907_v8  ;;  %v10010_v1 = vpop.eup %5477  ;;  %5503 = vpow2.f32 %v9797_v35  ;;  %v2767_v0 = vmax.f32 %v2766_v39, %v10001_v46 }
 0x30f   : > { %v2804_v30 = vmax.f32 %v2803_v3, %v9998_v17  ;;  %v2196_v49 = vmax.f32 %v1684_v33, %v1940_v27  ;;  %v10015_v29 = vpop.eup %5479  ;;  %v3790_v12 = vadd.f32 %v9856_v19, %v3789_v2  ;;  %5505 = vpow2.f32 %v9802_v59  ;;  %v12313_v3 = vld [vmem:[#allocation81_spill] sm:$0xff]  ;;  %v12315_v33 = vld [vmem:[#allocation46_spill] sm:$0xff]  ;;  %v10033_v27 = vpop.permute.xlu1 %1327 }
 0x310   : > { %v10020_v62 = vadd.f32 %v12310_v23, %v2163_v4  ;;  %v1652_v8 = vadd.f32 %v12301_v48, %v12312_v14  ;;  %v10024_v47 = vpop.eup %5481  ;;  %5507 = vpow2.f32 %v9807_v53  ;;  %v1685_v21 = vadd.f32 %v12299_v55, %v12315_v33  ;;  %v10041_v53 = vpop.permute.xlu0 %1193 }
 0x311   : > { %v2805_v35 = vmax.f32 %v2804_v30, %v10008_v44  ;;  %v10029_v39 = vadd.f32 %v12313_v3, %v2196_v49  ;;  %v10035_v59 = vpop.eup %5483  ;;  %v3791_v2 = vadd.f32 %v9874_v56, %v3790_v12  ;;  %5509 = vpow2.f32 %v9816_v31  ;;  %4986 = vmatprep.subr.mxu1 %v10024_v47 }
 0x312   : > { %12311 = vst [vmem:[#allocation80_spill] sm:$0xff] %v10020_v62  ;;  %12316 = vst [vmem:[#allocation135_spill] sm:$0xff] %v10035_v59  ;;  %v2768_v23 = vmax.f32 %v2767_v0, %v10020_v62  ;;  %v1908_v4 = vmul.f32 0.2, %v1652_v8  ;;  %v10043_v30 = vpop.eup %5485  ;;  %5511 = vpow2.f32 %v9821_v34  ;;  %v1941_v14 = vmul.f32 0.2, %v1685_v21  ;;  %4987 = vmatpush3.msra.mxu1 %v9856_v19 }
 0x313   : > { %12314 = vst [vmem:[#allocation78_spill] sm:$0xff] %v10029_v39  ;;  %12317 = vst [vmem:[#allocation36_spill] sm:$0xff] %v10043_v30  ;;  %v2806_v49 = vmax.f32 %v2805_v35, %v10029_v39  ;;  %v1653_v33 = vadd.f32 %v12301_v48, %v9769_v52  ;;  %v10050_v31 = vpop.eup %5487  ;;  %v3792_v12 = vadd.f32 %v9888_v57, %v3791_v2  ;;  %5513 = vpow2.f32 %v9829_v20 }
 0x314   : > { %v3739_v0 = vadd.f32 %v10043_v30, %v10035_v59  ;;  %v2164_v62 = vmax.f32 %v1652_v8, %v1908_v4  ;;  %4988 = vmatprep.subr.mxu1 %v10015_v29  ;;  %v10057_v34 = vpop.eup %5489  ;;  %5515 = vpow2.f32 %v9834_v18  ;;  %v2197_v35 = vmax.f32 %v1685_v21, %v1941_v14  ;;  %v12331_v59 = vld [vmem:[#allocation140_spill] sm:$0xff]  ;;  %v12341_v30 = vld [vmem:[#allocation110_spill] sm:$0xff] }
 0x315   : > { %v1909_v52 = vmul.f32 0.2, %v1653_v33  ;;  %v1686_v19 = vadd.f32 %v12299_v55, %v9841_v26  ;;  %4989 = vmatpush3.msra.mxu1 %v9843_v28  ;;  %v10063_v2 = vpop.eup %5491  ;;  %v3793_v20 = vadd.f32 %v9906_v15, %v3792_v12  ;;  %5517 = vpow2.f32 %v9839_v45  ;;  %v12319_v26 = vld [vmem:[#allocation84_spill] sm:$0xff]  ;;  %v10079_v12 = vpop.permute.xlu1 %1331 }
 0x316   : > { %v3740_v8 = vadd.f32 %v10050_v31, %v3739_v0  ;;  %v10069_v4 = vadd.f32 %v12313_v3, %v2164_v62  ;;  %4990 = vmatprep.subr.mxu1 %v10010_v1  ;;  %v10072_v18 = vpop.eup %5493  ;;  %5519 = vpow2.f32 %v9847_v63  ;;  %v10076_v21 = vadd.f32 %v12319_v26, %v2197_v35  ;;  %v10088_v63 = vpop.permute.xlu0 %1197 }
 0x317   : > { %v2165_v28 = vmax.f32 %v1653_v33, %v1909_v52  ;;  %v1942_v14 = vmul.f32 0.2, %v1686_v19  ;;  %4991 = vmatpush3.msra.mxu1 %v9823_v54  ;;  %v10081_v45 = vpop.eup %5495  ;;  %v3794_v62 = vadd.f32 %v9920_v36, %v3793_v20  ;;  %5521 = vpow2.f32 %v9852_v22 }
 0x318   : > { %12318 = vst [vmem:[#allocation31_spill] sm:$0xff] %v10069_v4  ;;  %12320 = vst [vmem:[#allocation66_spill] sm:$0xff] %v10076_v21  ;;  %v3741_v3 = vadd.f32 %v10057_v34, %v3740_v8  ;;  %v2769_v0 = vmax.f32 %v2768_v23, %v10069_v4  ;;  %4992 = vmatprep.subr.mxu1 %v10003_v24  ;;  %v10090_v33 = vpop.eup %5497  ;;  %5523 = vpow2.f32 %v9862_v25  ;;  %v12327_v4 = vld [vmem:[#allocation62_spill] sm:$0xff] }
 0x319   : > { %v10094_v54 = vmax.f32 %v2806_v49, %v10076_v21  ;;  %v10097_v35 = vadd.f32 %v12319_v26, %v2165_v28  ;;  %v2198_v52 = vmax.f32 %v1686_v19, %v1942_v14  ;;  %4993 = vmatpush3.msra.mxu1 %v9809_v41  ;;  %v10100_v22 = vpop.eup %5499  ;;  %v3795_v23 = vadd.f32 %v9937_v32, %v3794_v62  ;;  %v12322_v41 = vld [vmem:[#allocation87_spill] sm:$0xff] }
 0x31a   : > { %5525 = vpow2.f32 %v9867_v5  ;;  %v3742_v20 = vadd.f32 %v10063_v2, %v3741_v3  ;;  %v1654_v25 = vadd.f32 %v12301_v48, %v9854_v51  ;;  %4994 = vmatprep.subr.mxu1 %v9994_v9  ;;  %v10108_v49 = vpop.eup %5501  ;;  %v1687_v5 = vadd.f32 %v12299_v55, %v9935_v7  ;;  %v10134_v3 = vpop.permute.xlu1 %1335 }
 0x31b   : > { %12321 = vst [vmem:[#allocation24_spill] sm:$0xff] %v10097_v35  ;;  %5527 = vpow2.f32 %v9872_v58  ;;  %v10112_v19 = vmax.f32 %v2769_v0, %v10097_v35  ;;  %v10115_v8 = vadd.f32 %v12322_v41, %v2198_v52  ;;  %4995 = vmatpush3.msra.mxu1 %v9794_v60  ;;  %v10120_v26 = vpop.eup %5503  ;;  %v3796_v51 = vadd.f32 %v9951_v10, %v3795_v23 }
 0x31c   : > { %5529 = vpow2.f32 %v9881_v50  ;;  %v3743_v28 = vadd.f32 %v10072_v18, %v3742_v20  ;;  %v1910_v58 = vmul.f32 0.2, %v1654_v25  ;;  %4996 = vmatprep.subr.mxu1 %v9988_v43  ;;  %v10126_v14 = vpop.eup %5505  ;;  %v1943_v62 = vmul.f32 0.2, %v1687_v5 }
 0x31d   : > { %12323 = vst [vmem:[#allocation67_spill] sm:$0xff] %v10115_v8  ;;  %5531 = vpow2.f32 %v9886_v11  ;;  %v2808_v7 = vmax.f32 %v10094_v54, %v10115_v8  ;;  %v1655_v60 = vadd.f32 %v12301_v48, %v9949_v6  ;;  %4997 = vmatpush3.msra.mxu1 %v9780_v38  ;;  %v10136_v50 = vpop.eup %5507  ;;  %v3797_v0 = vadd.f32 %v9964_v37, %v3796_v51  ;;  %v10142_v54 = vpop.permute.xlu0 %1201 }
 0x31e   : > { %5533 = vpow2.f32 %v9894_v42  ;;  %v3744_v52 = vadd.f32 %v10081_v45, %v3743_v28  ;;  %v2166_v11 = vmax.f32 %v1654_v25, %v1910_v58  ;;  %4998 = vmatprep.subr.mxu1 %v9981_v61  ;;  %v10144_v23 = vpop.eup %5509  ;;  %v2199_v38 = vmax.f32 %v1687_v5, %v1943_v62  ;;  %v12324_v42 = vld [vmem:[#allocation58_spill] sm:$0xff]  ;;  %v12328_v5 = vld [vmem:[#allocation72_spill] sm:$0xff] }
 0x31f   : > { %5535 = vpow2.f32 %v9899_v13  ;;  %v1911_v6 = vmul.f32 0.2, %v1655_v60  ;;  %v1688_v20 = vadd.f32 %v12299_v55, %v9986_v16  ;;  %4999 = vmatpush3.msra.mxu1 %v9771_v40  ;;  %v10150_v51 = vpop.eup %5511  ;;  %v3798_v28 = vadd.f32 %v12324_v42, %v3797_v0  ;;  %v12325_v25 = vld [vmem:[#allocation50_spill] sm:$0xff] }
 0x320   : > { %5537 = vpow2.f32 %v12325_v25  ;;  %v3745_v58 = vadd.f32 %v10090_v33, %v3744_v52  ;;  %v10156_v35 = vadd.f32 %v12322_v41, %v2166_v11  ;;  %5000 = vmatprep.subr.mxu1 %v12327_v4  ;;  %v10159_v13 = vpop.eup %5513  ;;  %v12329_v16 = vld [vmem:[#allocation90_spill] sm:$0xff] }
 0x321   : > { %5539 = vpow2.f32 %v12328_v5  ;;  %v10163_v62 = vadd.f32 %v12329_v16, %v2199_v38  ;;  %v2167_v40 = vmax.f32 %v1655_v60, %v1911_v6  ;;  %v1944_v46 = vmul.f32 0.2, %v1688_v20  ;;  %5001 = vmatpush3.msra.mxu1 %v12331_v59  ;;  %v10166_v0 = vpop.eup %5515  ;;  %v12332_v25 = vld [vmem:[#allocation82_spill] sm:$0xff]  ;;  %v12333_v38 = vld [vmem:[#allocation48_spill] sm:$0xff] }
 0x322   : > { %12326 = vst [vmem:[#allocation61_spill] sm:$0xff] %v10156_v35  ;;  %v3799_v52 = vadd.f32 %v12327_v4, %v3798_v28  ;;  %5541 = vpow2.f32 %v12332_v25  ;;  %v3746_v41 = vadd.f32 %v10100_v22, %v3745_v58  ;;  %v2771_v11 = vmax.f32 %v10112_v19, %v10156_v35  ;;  %5002 = vmatprep.subr.mxu1 %v12324_v42  ;;  %v10174_v5 = vpop.eup %5517  ;;  %v12335_v6 = vld [vmem:[#allocation18_spill] sm:$0xff]  ;;  %v10184_v28 = vpop.permute.xlu1 %1339  ;;  %v12336_v42 = vld [vmem:[#allocation83_spill] sm:$0xff] }
 0x323   : > { %12330 = vst [vmem:[#allocation51_spill] sm:$0xff] %v10163_v62  ;;  %5543 = vpow2.f32 %v12333_v38  ;;  %v10178_v60 = vmax.f32 %v2808_v7, %v10163_v62  ;;  %v10181_v59 = vadd.f32 %v12329_v16, %v2167_v40  ;;  %v2200_v4 = vmax.f32 %v1688_v20, %v1944_v46  ;;  %5003 = vmatpush3.msra.mxu1 %v12335_v6  ;;  %v10186_v58 = vpop.eup %5519  ;;  %v12337_v38 = vld [vmem:[#allocation65_spill] sm:$0xff]  ;;  %v10194_v16 = vpop.permute.xlu0 %1205 }
 0x324   : > { %v3800_v19 = vadd.f32 %v9981_v61, %v3799_v52  ;;  %5545 = vpow2.f32 %v12336_v42  ;;  %v3747_v25 = vadd.f32 %v10108_v49, %v3746_v41  ;;  %v1656_v7 = vadd.f32 %v12301_v48, %v12337_v38  ;;  %5004 = vmatprep.subr.mxu1 %v9964_v37  ;;  %v10196_v46 = vpop.eup %5521  ;;  %v12338_v40 = vld [vmem:[#allocation93_spill] sm:$0xff]  ;;  %v12340_v41 = vld [vmem:[#allocation76_spill] sm:$0xff] }
 0x325   : > { %12334 = vst [vmem:[#allocation55_spill] sm:$0xff] %v10181_v59  ;;  %v2772_v20 = vmax.f32 %v2771_v11, %v10181_v59  ;;  %v10200_v6 = vadd.f32 %v12338_v40, %v2200_v4  ;;  %v1689_v61 = vadd.f32 %v12299_v55, %v10033_v27  ;;  %v1657_v52 = vadd.f32 %v12301_v48, %v10041_v53  ;;  %v10207_v42 = vpop.eup %5523 }
 0x326   : > { %5005 = vmatpush3.msra.mxu1 %v12340_v41  ;;  %v3801_v37 = vadd.f32 %v9988_v43, %v3800_v19  ;;  %v3748_v38 = vadd.f32 %v10120_v26, %v3747_v25  ;;  %v1912_v35 = vmul.f32 0.2, %v1656_v7  ;;  %v1690_v11 = vadd.f32 %v12299_v55, %v10079_v12  ;;  %v1344_v21 = vpop.permute.xlu1 %1343 }
 0x327   : > { %12339 = vst [vmem:[#allocation98_spill] sm:$0xff] %v10200_v6  ;;  %5006 = vmatprep.subr.mxu1 %v9951_v10  ;;  %v10214_v4 = vpop.eup %5525  ;;  %v2810_v27 = vmax.f32 %v10178_v60, %v10200_v6  ;;  %v1945_v53 = vmul.f32 0.2, %v1689_v61  ;;  %v1913_v59 = vmul.f32 0.2, %v1657_v52  ;;  %v1658_v41 = vadd.f32 %v12301_v48, %v10088_v63 }
 0x328   : > { %5007 = vmatpush3.msra.mxu1 %v12341_v30  ;;  %v10221_v43 = vpop.eup %5527  ;;  %v3802_v19 = vadd.f32 %v9994_v9, %v3801_v37  ;;  %v3749_v12 = vadd.f32 %v10126_v14, %v3748_v38  ;;  %v2168_v25 = vmax.f32 %v1656_v7, %v1912_v35  ;;  %v1946_v10 = vmul.f32 0.2, %v1690_v11  ;;  %v12342_v30 = vld [vmem:[#allocation15_spill] sm:$0xff]  ;;  %v1210_v37 = vpop.permute.xlu0 %1209 }
 0x329   : > { %5008 = vmatprep.subr.mxu1 %v9937_v32  ;;  %v10226_v62 = vpop.eup %5529  ;;  %v2201_v60 = vmax.f32 %v1689_v61, %v1945_v53  ;;  %v2169_v6 = vmax.f32 %v1657_v52, %v1913_v59  ;;  %v1914_v8 = vmul.f32 0.2, %v1658_v41  ;;  %v1691_v63 = vadd.f32 %v12299_v55, %v10134_v3  ;;  %v12343_v61 = vld [vmem:[#allocation94_spill] sm:$0xff] }
 0x32a   : > { %5009 = vmatpush3.msra.mxu1 %v12342_v30  ;;  %v10231_v39 = vpop.eup %5531  ;;  %v3803_v9 = vadd.f32 %v10003_v24, %v3802_v19  ;;  %v3750_v35 = vadd.f32 %v10136_v50, %v3749_v12  ;;  %v10236_v7 = vadd.f32 %v12338_v40, %v2168_v25  ;;  %v2202_v32 = vmax.f32 %v1690_v11, %v1946_v10  ;;  %v12345_v24 = vld [vmem:[#allocation88_spill] sm:$0xff]  ;;  %v12346_v12 = vld [vmem:[#allocation95_spill] sm:$0xff] }
 0x32b   : > { %5010 = vmatprep.subr.mxu1 %v9920_v36  ;;  %v10239_v59 = vpop.eup %5533  ;;  %v10242_v3 = vadd.f32 %v12343_v61, %v2201_v60  ;;  %v10245_v52 = vadd.f32 %v12343_v61, %v2169_v6  ;;  %v2170_v38 = vmax.f32 %v1658_v41, %v1914_v8  ;;  %v1947_v53 = vmul.f32 0.2, %v1691_v63  ;;  %v12347_v60 = vld [vmem:[#allocation44_spill] sm:$0xff] }
 0x32c   : > { %5011 = vmatpush3.msra.mxu1 %v12345_v24  ;;  %v10248_v19 = vpop.eup %5535  ;;  %v3804_v40 = vadd.f32 %v10010_v1, %v3803_v9  ;;  %v3751_v11 = vadd.f32 %v10144_v23, %v3750_v35  ;;  %v2773_v36 = vmax.f32 %v2772_v20, %v10236_v7  ;;  %v10254_v25 = vadd.f32 %v12346_v12, %v2202_v32 }
 0x32d   : > { %12344 = vst [vmem:[#allocation38_spill] sm:$0xff] %v10245_v52  ;;  %5012 = vmatprep.subr.mxu1 %v9906_v15  ;;  %v10257_v10 = vpop.eup %5537  ;;  %v2811_v8 = vmax.f32 %v2810_v27, %v10242_v3  ;;  %v10261_v6 = vadd.f32 %v12346_v12, %v2170_v38  ;;  %v2203_v41 = vmax.f32 %v1691_v63, %v1947_v53  ;;  %v1348_v38 = vpop.permute.xlu1 %1347  ;;  %v12349_v53 = vld [vmem:[#allocation35_spill] sm:$0xff]  ;;  %v3897_v12 = vld [vmem:[#allocation2 + $0x50] sm:$0xff] }
 0x32e   : > { %v1659_v1 = vadd.f32 %v12301_v48, %v10142_v54  ;;  %5013 = vmatpush3.msra.mxu1 %v12347_v60  ;;  %v10266_v30 = vpop.eup %5539  ;;  %v3805_v20 = vadd.f32 %v10015_v29, %v3804_v40  ;;  %v3752_v9 = vadd.f32 %v10150_v51, %v3751_v11  ;;  %v2774_v15 = vmax.f32 %v2773_v36, %v10245_v52  ;;  %v12348_v54 = vld [vmem:[#allocation102_spill] sm:$0xff]  ;;  %v1214_v36 = vpop.permute.xlu0 %1213 }
 0x32f   : > { %v1692_v27 = vadd.f32 %v12299_v55, %v10184_v28  ;;  %5014 = vmatprep.subr.mxu1 %v9888_v57  ;;  %v10274_v35 = vpop.eup %5541  ;;  %v2812_v63 = vmax.f32 %v2811_v8, %v10254_v25  ;;  %v10278_v32 = vadd.f32 %v12348_v54, %v2203_v41  ;;  %v1660_v29 = vadd.f32 %v12301_v48, %v10194_v16  ;;  %v12351_v52 = vld [vmem:[#allocation34_spill] sm:$0xff] }
 0x330   : > { %v1915_v61 = vmul.f32 0.2, %v1659_v1  ;;  %5015 = vmatpush3.msra.mxu1 %v12349_v53  ;;  %v10283_v24 = vpop.eup %5543  ;;  %v10286_v28 = vadd.f32 %v10024_v47, %v3805_v20  ;;  %v3753_v57 = vadd.f32 %v10159_v13, %v3752_v9  ;;  %v2775_v40 = vmax.f32 %v2774_v15, %v10261_v6 }
 0x331   : > { %v1948_v11 = vmul.f32 0.2, %v1692_v27  ;;  %5016 = vmatprep.subr.mxu1 %v9874_v56  ;;  %v10291_v8 = vpop.eup %5545  ;;  %v2813_v16 = vmax.f32 %v2812_v63, %v10278_v32  ;;  %v1916_v60 = vmul.f32 0.2, %v1660_v29  ;;  %v1693_v53 = vadd.f32 %v12299_v55, %v1344_v21 }
 0x332   : > { %12350 = vst [vmem:[#allocation138_spill] sm:$0xff] %v10286_v28  ;;  %v2171_v41 = vmax.f32 %v1659_v1, %v1915_v61  ;;  %5017 = vmatpush3.msra.mxu1 %v12351_v52  ;;  %v3754_v47 = vadd.f32 %v10166_v0, %v3753_v57  ;;  %4951 = vmatprep.subr.mxu0 %v10291_v8  ;;  %v12352_v61 = vld [vmem:[#allocation104_spill] sm:$0xff] }
 0x333   : > { %v2204_v20 = vmax.f32 %v1692_v27, %v1948_v11  ;;  %v1661_v9 = vadd.f32 %v12301_v48, %v1210_v37  ;;  %v1694_v56 = vadd.f32 %v12299_v55, %v1348_v38  ;;  %4952 = vmatpush3.msra.mxu0 %v10159_v13  ;;  %v2172_v1 = vmax.f32 %v1660_v29, %v1916_v60 }
 0x334   : > { %v10302_v15 = vadd.f32 %v12348_v54, %v2171_v41  ;;  %v1949_v63 = vmul.f32 0.2, %v1693_v53  ;;  %v1662_v21 = vadd.f32 %v12301_v48, %v1214_v36  ;;  %4333 = vmatmul.mubr.f32.vlgmr.msra.gmra.mxu1 %v3897_v12  ;;  %v3755_v52 = vadd.f32 %v10174_v5, %v3754_v47  ;;  %4953 = vmatprep.subr.mxu0 %v10283_v24  ;;  %v12354_v47 = vld [vmem:[#allocation118_spill] sm:$0xff] }
 0x335   : > { %v10308_v27 = vadd.f32 %v12352_v61, %v2204_v20  ;;  %v1917_v37 = vmul.f32 0.2, %v1661_v9  ;;  %v1950_v57 = vmul.f32 0.2, %v1694_v56  ;;  %4954 = vmatpush3.msra.mxu0 %v10150_v51  ;;  %v10313_v13 = vadd.f32 %v12352_v61, %v2172_v1  ;;  %v12353_v51 = vld [vmem:[#allocation105_spill] sm:$0xff] }
 0x336   : > { %v2776_v55 = vmax.f32 %v2775_v40, %v10302_v15  ;;  %v2205_v54 = vmax.f32 %v1693_v53, %v1949_v63  ;;  %v1918_v29 = vmul.f32 0.2, %v1662_v21  ;;  %v3756_v48 = vadd.f32 %v10186_v58, %v3755_v52  ;;  %4955 = vmatprep.subr.mxu0 %v10274_v35  ;;  %v12355_v63 = vld [vmem:[#allocation74_spill] sm:$0xff] }
 0x337   : > { %v2814_v38 = vmax.f32 %v2813_v16, %v10308_v27  ;;  %v2173_v11 = vmax.f32 %v1661_v9, %v1917_v37  ;;  %v2206_v36 = vmax.f32 %v1694_v56, %v1950_v57  ;;  %4956 = vmatpush3.msra.mxu0 %v10144_v23  ;;  %v4878_v16 = vpop.f32.mrf.mxu1 }
 0x338   : > { %v2777_v12 = vmax.f32 %v2776_v55, %v10313_v13  ;;  %v10321_v41 = vadd.f32 %v12353_v51, %v2205_v54  ;;  %v2174_v40 = vmax.f32 %v1662_v21, %v1918_v29  ;;  %v3757_v60 = vadd.f32 %v10196_v46, %v3756_v48  ;;  %4957 = vmatprep.subr.mxu0 %v10266_v30  ;;  %v12356_v29 = vld [vmem:[#allocation49_spill] sm:$0xff] }
 0x339   : > { %v10326_v53 = vadd.f32 %v12353_v51, %v2173_v11  ;;  %v10329_v20 = vadd.f32 %v12354_v47, %v2206_v36  ;;  %4958 = vmatpush3.msra.mxu0 %v10136_v50  ;;  %v3622_v21 = vrot.slane %v12355_v63, 4  ;;  %v4879_v37 = vpop.f32.mrf.mxu1  ;;  %v3696_v48 = vrot.slane %v12356_v29, 4 }
 0x33a   : > { %v2815_v23 = vmax.f32 %v2814_v38, %v10321_v41  ;;  %v10334_v9 = vadd.f32 %v12354_v47, %v2174_v40  ;;  %v3758_v56 = vadd.f32 %v10207_v42, %v3757_v60  ;;  %4959 = vmatprep.subr.mxu0 %v10257_v10  ;;  %v12357_v38 = vld [vmem:[#allocation112_spill] sm:$0xff]  ;;  %v4491_v40 = vld [vmem:[%s10925_s4 + $0x20] sm:$0xff] }
 0x33b   : > { %v2778_v1 = vmax.f32 %v2777_v12, %v10326_v53  ;;  %4960 = vmatpush3.msra.mxu0 %v10126_v14  ;;  %v3623_v54 = vadd.f32 %v3622_v21, %v12355_v63  ;;  %v3733_v11 = vrot.slane %v12357_v38, 4  ;;  %v4880_v12 = vadd.f32 %v4879_v37, %v4878_v16  ;;  %4517 = vperm.xlu1 %5159, %v4491_v40   ;;  %v4493_v63 = vld [vmem:[%s10925_s4 + $0x30] sm:$0xff] }
 0x33c   : > { %v2816_v52 = vmax.f32 %v2815_v23, %v10329_v20  ;;  %v3759_v61 = vadd.f32 %v10214_v4, %v3758_v56  ;;  %4961 = vmatprep.subr.mxu0 %v10248_v19  ;;  %v4503_v23 = vpop.permute.xlu1 %4502  ;;  %v3697_v56 = vadd.f32 %v3696_v48, %v12356_v29  ;;  %v12365_v40 = vld [vmem:[#allocation89_spill] sm:$0xff] }
 0x33d   : > { %v2779_v50 = vmax.f32 %v2778_v1, %v10334_v9  ;;  %4962 = vmatpush3.msra.mxu0 %v10120_v26  ;;  %v3902_v26 = vld [vmem:[#allocation2 + $0x78] sm:$0xff]  ;;  %v3624_v47 = vrot.slane %v3623_v54, 2  ;;  %v3734_v1 = vadd.f32 %v3733_v11, %v12357_v38  ;;  %v12362_v11 = vld [vmem:[#allocation129_spill] sm:$0xff] }
 0x33e   : > { %v2817_v57 = vrot.slane %v2816_v52, 4  ;;  %v3760_v55 = vadd.f32 %v10221_v43, %v3759_v61  ;;  %4963 = vmatprep.subr.mxu0 %v10239_v59  ;;  %4478 = vmatprep.mubr.f32.mxu1 %v3902_v26  ;;  %v12364_v26 = vld [vmem:[#allocation132_spill] sm:$0xff] }
 0x33f   : > { %4964 = vmatpush3.msra.mxu0 %v10108_v49  ;;  %v4492_v49 = vld [vmem:[%s10925_s4 + $0x28] sm:$0xff]  ;;  %4527 = vperm.xlu1 %5159, %v4493_v63   ;;  %v12369_v63 = vld [vmem:[#allocation66_spill] sm:$0xff] }
 0x340   : > { %v2818_v14 = vmax.f32 %v2816_v52, %v2817_v57  ;;  %v3761_v36 = vadd.f32 %v10226_v62, %v3760_v55  ;;  %4965 = vmatprep.subr.mxu0 %v10231_v39  ;;  %4522 = vperm.xlu0 %5158, %v4492_v49   ;;  %v3625_v57 = vadd.f32 %v3624_v47, %v3623_v54  ;;  %v3698_v55 = vrot.slane %v3697_v56, 2  ;;  %v12367_v47 = vld [vmem:[#allocation19_spill] sm:$0xff] }
 0x341   : > { %4966 = vmatpush3.msra.mxu0 %v10100_v22  ;;  %v2780_v22 = vrot.slane %v2779_v50, 4 }
 0x342   : > { %v2819_v51 = vrot.slane %v2818_v14, 2  ;;  %v3762_v60 = vadd.f32 %v10231_v39, %v3761_v36  ;;  %4967 = vmatprep.subr.mxu0 %v10226_v62  ;;  %v12358_v62 = vld [vmem:[#allocation125_spill] sm:$0xff]  ;;  %v3699_v48 = vadd.f32 %v3698_v55, %v3697_v56  ;;  %v12368_v56 = vld [vmem:[#allocation78_spill] sm:$0xff] }
 0x343   : > { %4968 = vmatpush3.msra.mxu0 %v10090_v33  ;;  %v4048_v21 = vmul.f32 %v12358_v62, %v4880_v12  ;;  %v4494_v33 = vld [vmem:[%s10925_s4 + $0x38] sm:$0xff]  ;;  %v12371_v62 = vld [vmem:[#allocation51_spill] sm:$0xff] }
 0x344   : > { %v2820_v16 = vmax.f32 %v2818_v14, %v2819_v51  ;;  %v3763_v39 = vadd.f32 %v10239_v59, %v3762_v60  ;;  %4969 = vmatprep.subr.mxu0 %v10221_v43  ;;  %v2781_v59 = vmax.f32 %v2779_v50, %v2780_v22  ;;  %v3735_v14 = vrot.slane %v3734_v1, 2  ;;  %4532 = vperm.xlu0 %5158, %v4494_v33   ;;  %v12372_v33 = vld [vmem:[#allocation36_spill] sm:$0xff] }
 0x345   : > { %4970 = vmatpush3.msra.mxu0 %v10081_v45  ;;  %v10378_v37 = vadd.f32 %v4503_v23, %v4048_v21  ;;  %v12376_v21 = vld [vmem:[#allocation33_spill] sm:$0xff] }
 0x346   : > { %v2821_v52 = vrot.slane %v2820_v16, 1  ;;  %v3764_v61 = vadd.f32 %v10248_v19, %v3763_v39  ;;  %4971 = vmatprep.subr.mxu0 %v10214_v4  ;;  %v3626_v19 = vrot.slane %v3625_v57, 1  ;;  %v2782_v54 = vrot.slane %v2781_v59, 2 }
 0x347   : > { %4972 = vmatpush3.msra.mxu0 %v10072_v18  ;;  %v4552_v4 = vmin.f32 %v10378_v37, 0.0  ;;  %v12359_v18 = vld [vmem:[#allocation117_spill] sm:$0xff]  ;;  %v3736_v38 = vadd.f32 %v3735_v14, %v3734_v1  ;;  %vm4544_vm0 = vcmp.gt.f32.partialorder %v10378_v37, 0.0 }
 0x348   : > { %v10381_v43 = vmax.f32 %v2820_v16, %v2821_v52  ;;  %v3765_v29 = vadd.f32 %v10257_v10, %v3764_v61  ;;  %4973 = vmatprep.subr.mxu0 %v10207_v42  ;;  %v3895_v52 = vld [vmem:[#allocation2 + $0x40] sm:$0xff] }
 0x349   : > { %4974 = vmatpush3.msra.mxu0 %v10063_v2  ;;  %v12360_v2 = vld [vmem:[#allocation116_spill] sm:$0xff] }
 0x34a   : > { %v3766_v45 = vadd.f32 %v10266_v30, %v3765_v29  ;;  %4975 = vmatprep.subr.mxu0 %v10196_v46  ;;  %v3047_v50 = vsub.f32 %v12359_v18, %v10381_v43  ;;  %v3058_v42 = vsub.f32 %v12360_v2, %v10381_v43  ;;  %v12361_v46 = vld [vmem:[#allocation115_spill] sm:$0xff]  ;;  %v3060_v36 = vsub.f32 %v12362_v11, %v10381_v43  ;;  %v12389_v2 = vld [vmem:[#allocation137_spill] sm:$0xff] }
 0x34b   : > { %4976 = vmatpush3.msra.mxu0 %v10057_v34  ;;  %v3059_v30 = vsub.f32 %v12361_v46, %v10381_v43  ;;  %v12363_v34 = vld [vmem:[#allocation70_spill] sm:$0xff]  ;;  %v3049_v51 = vsub.f32 %v12364_v26, %v10381_v43  ;;  %v3050_v16 = vsub.f32 %v12367_v47, %v10381_v43  ;;  %v3066_v22 = vsub.f32 %v9998_v17, %v10381_v43  ;;  %v12375_v26 = vld [vmem:[#allocation135_spill] sm:$0xff]  ;;  %v12391_v11 = vld [vmem:[#allocation133_spill] sm:$0xff] }
 0x34c   : > { %v3767_v10 = vadd.f32 %v10274_v35, %v3766_v45  ;;  %4977 = vmatprep.subr.mxu0 %v10186_v58  ;;  %v3048_v12 = vsub.f32 %v12363_v34, %v10381_v43  ;;  %v3061_v35 = vsub.f32 %v12365_v40, %v10381_v43  ;;  %v12366_v58 = vld [vmem:[#allocation27_spill] sm:$0xff]  ;;  %v3067_v23 = vsub.f32 %v10008_v44, %v10381_v43  ;;  %v3900_v45 = vld [vmem:[#allocation2 + $0x68] sm:$0xff] }
 0x34d   : > { %v3062_v49 = vsub.f32 %v12366_v58, %v10381_v43  ;;  %4978 = vmatpush3.msra.mxu0 %v10050_v31  ;;  %v3068_v1 = vsub.f32 %v12368_v56, %v10381_v43  ;;  %v3069_v39 = vsub.f32 %v12369_v63, %v10381_v43  ;;  %v12370_v31 = vld [vmem:[#allocation67_spill] sm:$0xff]  ;;  %v3051_v55 = vsub.f32 %v12376_v21, %v10381_v43  ;;  %v12380_v21 = vld [vmem:[#allocation114_spill] sm:$0xff] }
 0x34e   : > { %v3768_v60 = vadd.f32 %v10283_v24, %v3767_v10  ;;  %4979 = vmatprep.subr.mxu0 %v10174_v5  ;;  %v12374_v5 = vld [vmem:[#allocation98_spill] sm:$0xff]  ;;  %v3529_v47 = vmul.f32 1.442695, %v3048_v12  ;;  %v3531_v14 = vmul.f32 1.442695, %v3049_v51  ;;  %v2783_v29 = vmax.f32 %v2781_v59, %v2782_v54  ;;  %v12378_v12 = vld [vmem:[#allocation108_spill] sm:$0xff] }
 0x34f   : > { %4980 = vmatpush3.msra.mxu0 %v12372_v33  ;;  %v3627_v33 = vadd.f32 %v3626_v19, %v3625_v57  ;;  %v4561_v18 = vmul.f32 1.442695, %v4552_v4  ;;  %v3737_v10 = vrot.slane %v3736_v38, 1  ;;  %v3533_v34 = vmul.f32 1.442695, %v3050_v16  ;;  %v12379_v59 = vld [vmem:[#allocation122_spill] sm:$0xff] }
 0x350   : > { %v10427_v61 = vadd.f32 %v10291_v8, %v3768_v60  ;;  %4981 = vmatprep.subr.mxu0 %v10166_v0  ;;  %v3527_v60 = vmul.f32 1.442695, %v3047_v50  ;;  %v3700_v0 = vrot.slane %v3699_v48, 1  ;;  %v12377_v8 = vld [vmem:[#allocation97_spill] sm:$0xff]  ;;  %v3053_v57 = vsub.f32 %v12378_v12, %v10381_v43  ;;  %v12381_v16 = vld [vmem:[#allocation107_spill] sm:$0xff] }
 0x351   : > { %4982 = vmatpush3.msra.mxu0 %v12375_v26  ;;  %v3052_v24 = vsub.f32 %v12377_v8, %v10381_v43  ;;  %v3535_v19 = vmul.f32 1.442695, %v3051_v55  ;;  %v3738_v51 = vadd.f32 %v3737_v10, %v3736_v38  ;;  %v3054_v54 = vsub.f32 %v12379_v59, %v10381_v43  ;;  %v12383_v38 = vld [vmem:[#allocation54_spill] sm:$0xff] }
 0x352   : > { %12373 = vst [vmem:[#allocation53_spill] sm:$0xff] %v10427_v61  ;;  %4260 = vmatmul.mubr.f32.vlgmr.msra.gmra.mxu0 %v3895_v52  ;;  %5547 = vpow2.f32 %v3527_v60  ;;  %v3701_v50 = vadd.f32 %v3700_v0, %v3699_v48  ;;  %v2784_v52 = vrot.slane %v2783_v29, 1  ;;  %v3056_v8 = vsub.f32 %v12381_v16, %v10381_v43  ;;  %v12382_v48 = vld [vmem:[#allocation111_spill] sm:$0xff]  ;;  %v12385_v60 = vld [vmem:[#allocation52_spill] sm:$0xff] }
 0x353   : > { %4405 = vmatprep.mubr.f32.mxu0 %v3900_v45  ;;  %5549 = vpow2.f32 %v3529_v47  ;;  %v3537_v4 = vmul.f32 1.442695, %v3052_v24  ;;  %v3055_v45 = vsub.f32 %v12380_v21, %v10381_v43  ;;  %v3057_v26 = vsub.f32 %v12382_v48, %v10381_v43  ;;  %v12384_v24 = vld [vmem:[#allocation127_spill] sm:$0xff] }
 0x354   : > { %5551 = vrcp.f32 %v3627_v33  ;;  %v3539_v55 = vmul.f32 1.442695, %v3053_v57  ;;  %v3064_v10 = vsub.f32 %v12384_v24, %v10381_v43  ;;  %v3065_v47 = vsub.f32 %v12385_v60, %v10381_v43  ;;  %v12386_v57 = vld [vmem:[#allocation119_spill] sm:$0xff] }
 0x355   : > { %5553 = vpow2.f32 %v3531_v14  ;;  %v10459_v14 = vmax.f32 %v2783_v29, %v2784_v52  ;;  %v3543_v33 = vmul.f32 1.442695, %v3055_v45  ;;  %v3545_v0 = vmul.f32 1.442695, %v3056_v8  ;;  %v12393_v8 = vld [vmem:[#allocation69_spill] sm:$0xff] }
 0x356   : > { %5555 = vpow2.f32 %v4561_v18  ;;  %v3063_v18 = vsub.f32 %v12383_v38, %v10381_v43  ;;  %v3547_v12 = vmul.f32 1.442695, %v3057_v26  ;;  %v3549_v29 = vmul.f32 1.442695, %v3058_v42  ;;  %v12394_v26 = vld [vmem:[#allocation80_spill] sm:$0xff] }
 0x357   : > { %5557 = vpow2.f32 %v3533_v34  ;;  %v3541_v34 = vmul.f32 1.442695, %v3054_v54  ;;  %v3553_v52 = vmul.f32 1.442695, %v3060_v36  ;;  %v12388_v54 = vld [vmem:[#allocation28_spill] sm:$0xff]  ;;  %v12400_v36 = vld [vmem:[#allocation38_spill] sm:$0xff]  ;;  %v12402_v44 = vsub.f32 %v12370_v31, %v10381_v43 }
 0x358   : > { %5559 = vrcp.f32 %v3701_v50  ;;  %v3551_v50 = vmul.f32 1.442695, %v3059_v30  ;;  %v3555_v46 = vmul.f32 1.442695, %v3061_v35  ;;  %v3557_v30 = vmul.f32 1.442695, %v3062_v49 }
 0x359   : > { %5561 = vpow2.f32 %v3535_v19  ;;  %v3559_v16 = vmul.f32 1.442695, %v3063_v18  ;;  %v12395_v35 = vld [vmem:[#allocation31_spill] sm:$0xff]  ;;  %v12396_v49 = vld [vmem:[#allocation24_spill] sm:$0xff]  ;;  %v3565_v60 = vmul.f32 1.442695, %v3066_v22  ;;  %v12404_v63 = vsub.f32 %v10321_v41, %v10381_v43 }
 0x35a   : > { %5563 = vrcp.f32 %v3738_v51  ;;  %v12387_v51 = vld [vmem:[#allocation121_spill] sm:$0xff]  ;;  %v3571_v17 = vmul.f32 1.442695, %v3069_v39  ;;  %v12401_v22 = vld [vmem:[#allocation20_spill] sm:$0xff]  ;;  %v12405_v31 = vsub.f32 %v10329_v20, %v10381_v43  ;;  %v12412_v59 = vsub.f32 %v10254_v25, %v10381_v43 }
 0x35b   : > { %5565 = vpow2.f32 %v3537_v4  ;;  %v3587_v39 = vmul.f32 1.442695, %v12404_v63  ;;  %v12413_v19 = vld [vmem:[#allocation25_spill] sm:$0xff]  ;;  %v12414_v25 = vsub.f32 %v10242_v3, %v10381_v43 }
 0x35c   : > { %5567 = vpow2.f32 %v3539_v55 }
 0x35d   : > { %5569 = vpow2.f32 %v3541_v34 }
 0x35e   : > { %5571 = vpow2.f32 %v3543_v33 }
 0x35f   : > { %v10484_v21 = vpop.eup %5547  ;;  %5573 = vpow2.f32 %v3545_v0 }
 0x360   : > { %12390 = vst [vmem:[#allocation59_spill] sm:$0xff] %v10484_v21  ;;  %v10494_v45 = vpop.eup %5549  ;;  %5575 = vpow2.f32 %v3547_v12 }
 0x361   : > { %12392 = vst [vmem:[#allocation75_spill] sm:$0xff] %v10494_v45  ;;  %v10500_v38 = vpop.eup %5551  ;;  %v3850_v40 = vadd.f32 %v10494_v45, %v10484_v21  ;;  %5577 = vpow2.f32 %v3549_v29 }
 0x362   : > { %v10508_v34 = vpop.eup %5553  ;;  %5579 = vpow2.f32 %v3551_v50  ;;  %v3563_v50 = vmul.f32 1.442695, %v3065_v47  ;;  %v3569_v47 = vmul.f32 1.442695, %v3068_v1  ;;  %v12403_v1 = vld [vmem:[#allocation29_spill] sm:$0xff] }
 0x363   : > { %12397 = vst [vmem:[#allocation39_spill] sm:$0xff] %v10508_v34  ;;  %v10516_v48 = vpop.eup %5555  ;;  %v3851_v58 = vadd.f32 %v10508_v34, %v3850_v40  ;;  %5581 = vpow2.f32 %v3553_v52  ;;  %v3561_v40 = vmul.f32 1.442695, %v3064_v10  ;;  %v3567_v10 = vmul.f32 1.442695, %v3067_v23 }
 0x364   : > { %v10523_v42 = vpop.eup %5557  ;;  %5583 = vpow2.f32 %v3555_v46  ;;  %v3573_v23 = vmul.f32 1.442695, %v12402_v44 }
 0x365   : > { %v10531_v0 = vpop.eup %5559  ;;  %v3852_v24 = vadd.f32 %v10523_v42, %v3851_v58  ;;  %5585 = vpow2.f32 %v3557_v30  ;;  %v3016_v58 = vsub.f32 %v12403_v1, %v10459_v14 }
 0x366   : > { %v10536_v4 = vpop.eup %5561  ;;  %5587 = vpow2.f32 %v3559_v16  ;;  %v3015_v16 = vsub.f32 %v12401_v22, %v10459_v14 }
 0x367   : > { %v10538_v55 = vpop.eup %5563  ;;  %v3853_v29 = vadd.f32 %v10536_v4, %v3852_v24  ;;  %5589 = vpow2.f32 %v3561_v40  ;;  %v3465_v63 = vmul.f32 1.442695, %v3016_v58  ;;  %v12410_v58 = vsub.f32 %v10278_v32, %v10381_v43 }
 0x368   : > { %v10544_v52 = vpop.eup %5565  ;;  %5591 = vpow2.f32 %v3563_v50  ;;  %v12406_v50 = vld [vmem:[#allocation139_spill] sm:$0xff]  ;;  %v3581_v32 = vmul.f32 1.442695, %v12412_v59  ;;  %v3579_v59 = vmul.f32 1.442695, %v12414_v25 }
 0x369   : > { %v3854_v46 = vadd.f32 %v10544_v52, %v3853_v29  ;;  %v10553_v30 = vpop.eup %5567  ;;  %5593 = vpow2.f32 %v3565_v60  ;;  %v3589_v60 = vmul.f32 1.442695, %v12405_v31 }
 0x36a   : > { %v10566_v24 = vpop.eup %5569  ;;  %5595 = vpow2.f32 %v3567_v10  ;;  %v3463_v10 = vmul.f32 1.442695, %v3015_v16  ;;  %v12409_v16 = vld [vmem:[#allocation12_spill] sm:$0xff] }
 0x36b   : > { %v3855_v56 = vadd.f32 %v10553_v30, %v3854_v46  ;;  %v10571_v29 = vpop.eup %5571  ;;  %5597 = vpow2.f32 %v3569_v47  ;;  %v3017_v46 = vsub.f32 %v12406_v50, %v10459_v14  ;;  %v12407_v47 = vld [vmem:[#allocation142_spill] sm:$0xff] }
 0x36c   : > { %v10579_v22 = vpop.eup %5573  ;;  %5599 = vpow2.f32 %v3571_v17  ;;  %v3018_v1 = vsub.f32 %v12407_v47, %v10459_v14  ;;  %v3583_v47 = vmul.f32 1.442695, %v12410_v58 }
 0x36d   : > { %v3856_v40 = vadd.f32 %v10566_v24, %v3855_v56  ;;  %v10581_v44 = vpop.eup %5575  ;;  %5601 = vpow2.f32 %v3573_v23  ;;  %v12408_v56 = vsub.f32 %v10308_v27, %v10381_v43  ;;  %v3019_v23 = vsub.f32 %v12409_v16, %v10459_v14 }
 0x36e   : > { %v10587_v20 = vpop.eup %5577  ;;  %5603 = vpow2.f32 %v3587_v39  ;;  %v4721_v27 = vadd.f32 -1.0, %v10516_v48 }
 0x36f   : > { %v3857_v41 = vadd.f32 %v10571_v29, %v3856_v40  ;;  %v3585_v31 = vmul.f32 1.442695, %v12408_v56  ;;  %v10592_v50 = vpop.eup %5579  ;;  %5605 = vpow2.f32 %v3589_v60  ;;  %v3467_v40 = vmul.f32 1.442695, %v3017_v46 }
 0x370   : > { %v10597_v12 = vpop.eup %5581  ;;  %5607 = vpow2.f32 %v3463_v10  ;;  %v3469_v46 = vmul.f32 1.442695, %v3018_v1  ;;  %v4584_v10 = vsel %vm4544_vm0, %v10378_v37, %v4721_v27  ;;  %v3471_v61 = vmul.f32 1.442695, %v3019_v23  ;;  %v4843_v27 = vpop.f32.mrf.mxu0 }
 0x371   : > { %v3858_v17 = vadd.f32 %v10579_v22, %v3857_v41  ;;  %v10604_v39 = vpop.eup %5583  ;;  %v12411_v41 = vld [vmem:[#allocation101_spill] sm:$0xff]  ;;  %5609 = vpow2.f32 %v3465_v63  ;;  %4592 = vst [vmem:[%s10618_s12 + $0x8] sm:$0xff] %v4584_v10  ;;  %v12417_v10 = vld [vmem:[#allocation126_spill] sm:$0xff] }
 0x372   : > { %v3020_v56 = vsub.f32 %v12411_v41, %v10459_v14  ;;  %v5586_v16 = vpop.eup %5585  ;;  %5611 = vpow2.f32 %v3585_v31  ;;  %v12415_v31 = vld [vmem:[#allocation103_spill] sm:$0xff] }
 0x373   : > { %v3859_v60 = vadd.f32 %v10581_v44, %v3858_v17  ;;  %v10613_v58 = vpop.eup %5587  ;;  %v3021_v17 = vsub.f32 %v12413_v19, %v10459_v14  ;;  %5613 = vpow2.f32 %v3467_v40  ;;  %v3022_v19 = vsub.f32 %v12415_v31, %v10459_v14  ;;  %v4948_v31 = vpop.f32.mrf.mxu1 }
 0x374   : > { %v10621_v1 = vpop.eup %5589  ;;  %5615 = vpow2.f32 %v3583_v47  ;;  %v3473_v23 = vmul.f32 1.442695, %v3020_v56  ;;  %v12418_v56 = vsub.f32 %v12371_v62, %v10381_v43 }
 0x375   : > { %v3860_v48 = vadd.f32 %v10587_v20, %v3859_v60  ;;  %v10626_v37 = vpop.eup %5591  ;;  %5617 = vpow2.f32 %v3469_v46  ;;  %v12416_v60 = vsub.f32 %v12374_v5, %v10381_v43  ;;  %v3475_v25 = vmul.f32 1.442695, %v3021_v17  ;;  %v12420_v17 = vld [vmem:[#allocation113_spill] sm:$0xff] }
 0x376   : > { %v10631_v40 = vpop.eup %5593  ;;  %5619 = vpow2.f32 %v3581_v32  ;;  %v3575_v28 = vmul.f32 1.442695, %v12418_v56  ;;  %v3477_v21 = vmul.f32 1.442695, %v3022_v19  ;;  %v3025_v45 = vsub.f32 %v12420_v17, %v10459_v14 }
 0x377   : > { %v3861_v63 = vadd.f32 %v10592_v50, %v3860_v48  ;;  %v3577_v41 = vmul.f32 1.442695, %v12416_v60  ;;  %v10636_v3 = vpop.eup %5595  ;;  %v3023_v48 = vsub.f32 %v12417_v10, %v10459_v14  ;;  %5621 = vpow2.f32 %v3471_v61  ;;  %v12419_v60 = vld [vmem:[#allocation45_spill] sm:$0xff]  ;;  %v4844_v61 = vpop.f32.mrf.mxu0 }
 0x378   : > { %v10641_v46 = vpop.eup %5597  ;;  %5623 = vpow2.f32 %v3579_v59  ;;  %v4949_v59 = vpop.f32.mrf.mxu1  ;;  %v4845_v17 = vadd.f32 %v4844_v61, %v4843_v27  ;;  %v3483_v34 = vmul.f32 1.442695, %v3025_v45  ;;  %v12422_v45 = vsub.f32 %v12386_v57, %v10459_v14  ;;  %v12424_v57 = vld [vmem:[#allocation109_spill] sm:$0xff] }
 0x379   : > { %v3862_v47 = vadd.f32 %v10597_v12, %v3861_v63  ;;  %v10646_v5 = vpop.eup %5599  ;;  %v3024_v63 = vsub.f32 %v12419_v60, %v10459_v14  ;;  %5625 = vpow2.f32 %v3473_v23  ;;  %v3479_v62 = vmul.f32 1.442695, %v3023_v48 }
 0x37a   : > { %v10651_v10 = vpop.eup %5601  ;;  %5627 = vpow2.f32 %v3577_v41  ;;  %v4950_v48 = vadd.f32 %v4949_v59, %v4948_v31 }
 0x37b   : > { %v3863_v32 = vadd.f32 %v10604_v39, %v3862_v47  ;;  %v10655_v33 = vpop.eup %5603  ;;  %5629 = vpow2.f32 %v3475_v25  ;;  %v4913_v47 = vpop.f32.mrf.mxu0  ;;  %v3481_v23 = vmul.f32 1.442695, %v3024_v63 }
 0x37c   : > { %v10657_v56 = vpop.eup %5605  ;;  %5631 = vpow2.f32 %v3575_v28 }
 0x37d   : > { %v3864_v43 = vadd.f32 %v5586_v16, %v3863_v32  ;;  %v10659_v60 = vpop.eup %5607  ;;  %5633 = vpow2.f32 %v3477_v21  ;;  %5056 = vmatprep.subr.mxu1 %v10657_v56  ;;  %v4914_v25 = vpop.f32.mrf.mxu0 }
 0x37e   : > { %12421 = vst [vmem:[#allocation92_spill] sm:$0xff] %v10659_v60  ;;  %v10663_v41 = vpop.eup %5609  ;;  %5057 = vmatpush3.msra.mxu1 %v5586_v16  ;;  %5635 = vpow2.f32 %v3479_v62  ;;  %v4915_v21 = vadd.f32 %v4914_v25, %v4913_v47  ;;  %v3485_v16 = vmul.f32 1.442695, %v12422_v45  ;;  %v12423_v47 = vld [vmem:[#allocation131_spill] sm:$0xff]  ;;  %v3032_v25 = vsub.f32 %v12424_v57, %v10459_v14 }
 0x37f   : > { %v3865_v19 = vadd.f32 %v10613_v58, %v3864_v43  ;;  %v10665_v32 = vpop.eup %5611  ;;  %v3813_v18 = vadd.f32 %v10663_v41, %v10659_v60  ;;  %v4498_v43 = vpop.permute.xlu0 %4497  ;;  %5058 = vmatprep.subr.mxu1 %v10655_v33  ;;  %5637 = vpow2.f32 %v3481_v23  ;;  %v4194_v23 = vmul.f32 %v10538_v55, %v4950_v48 }
 0x380   : > { %v10671_v63 = vpop.eup %5613  ;;  %5059 = vmatpush3.msra.mxu1 %v10604_v39  ;;  %v4121_v62 = vmul.f32 %v10531_v0, %v4915_v21  ;;  %v3975_v39 = vmul.f32 %v10500_v38, %v4845_v17  ;;  %5639 = vpow2.f32 %v3483_v34  ;;  %v12425_v0 = vsub.f32 %v12387_v51, %v10459_v14 }
 0x381   : > { %v3866_v28 = vadd.f32 %v10621_v1, %v3865_v19  ;;  %v10677_v27 = vpop.eup %5615  ;;  %v3814_v61 = vadd.f32 %v10671_v63, %v3813_v18  ;;  %5060 = vmatprep.subr.mxu1 %v10665_v32  ;;  %v3031_v19 = vsub.f32 %v12423_v47, %v10459_v14  ;;  %v12427_v55 = vsub.f32 %v12388_v54, %v10459_v14 }
 0x382   : > { %v10683_v59 = vpop.eup %5617  ;;  %5061 = vmatpush3.msra.mxu1 %v10597_v12  ;;  %v3487_v21 = vmul.f32 1.442695, %v12425_v0  ;;  %v12426_v12 = vld [vmem:[#allocation56_spill] sm:$0xff]  ;;  %v12428_v34 = vsub.f32 %v12389_v2, %v10459_v14  ;;  %v10710_v51 = vadd.f32 %v4498_v43, %v3975_v39  ;;  %5641 = vpow2.f32 %v3485_v16 }
 0x383   : > { %v3867_v31 = vadd.f32 %v10626_v37, %v3866_v28  ;;  %v4508_v28 = vpop.permute.xlu1 %4507  ;;  %v10692_v18 = vpop.eup %5619  ;;  %v3815_v47 = vadd.f32 %v10683_v59, %v3814_v61  ;;  %5062 = vmatprep.subr.mxu1 %v10677_v27  ;;  %v3033_v17 = vsub.f32 %v12426_v12, %v10459_v14  ;;  %v3489_v48 = vmul.f32 1.442695, %v12427_v55 }
 0x384   : > { %v4513_v57 = vpop.permute.xlu0 %4512  ;;  %v10700_v38 = vpop.eup %5621  ;;  %5063 = vmatpush3.msra.mxu1 %v10592_v50  ;;  %v10716_v12 = vadd.f32 %v4508_v28, %v4121_v62  ;;  %v12429_v2 = vsub.f32 %v12391_v11, %v10459_v14  ;;  %5643 = vpow2.f32 %v3487_v21  ;;  %v3495_v16 = vmul.f32 1.442695, %v3031_v19 }
 0x385   : > { %v3868_v45 = vadd.f32 %v10631_v40, %v3867_v31  ;;  %v3491_v31 = vmul.f32 1.442695, %v12428_v34  ;;  %v5624_v61 = vpop.eup %5623  ;;  %v3816_v60 = vadd.f32 %v10700_v38, %v3815_v47  ;;  %5064 = vmatprep.subr.mxu1 %v10692_v18  ;;  %v10724_v43 = vadd.f32 %v4513_v57, %v4194_v23 }
 0x386   : > { %v10718_v54 = vpop.eup %5625  ;;  %v3493_v55 = vmul.f32 1.442695, %v12429_v2  ;;  %5065 = vmatpush3.msra.mxu1 %v10587_v20  ;;  %5645 = vpow2.f32 %v3489_v48  ;;  %v3497_v28 = vmul.f32 1.442695, %v3032_v25  ;;  %v3499_v47 = vmul.f32 1.442695, %v3033_v17 }
 0x387   : > { %v3869_v0 = vadd.f32 %v10636_v3, %v3868_v45  ;;  %v5628_v50 = vpop.eup %5627  ;;  %v3817_v45 = vadd.f32 %v10718_v54, %v3816_v60  ;;  %5066 = vmatprep.subr.mxu1 %v5624_v61  ;;  %v4551_v11 = vmin.f32 %v10710_v51, 0.0  ;;  %5647 = vpow2.f32 %v3491_v31 }
 0x388   : > { %v10728_v62 = vpop.eup %5629  ;;  %5067 = vmatpush3.msra.mxu1 %v10581_v44  ;;  %v4553_v19 = vmin.f32 %v10716_v12, 0.0  ;;  %5649 = vpow2.f32 %v3493_v55  ;;  %v12430_v25 = vsub.f32 %v10326_v53, %v10459_v14  ;;  %v4554_v44 = vmin.f32 %v10724_v43, 0.0 }
 0x389   : > { %v3870_v39 = vadd.f32 %v10641_v46, %v3869_v0  ;;  %v5632_v20 = vpop.eup %5631  ;;  %v3818_v57 = vadd.f32 %v10728_v62, %v3817_v45  ;;  %5068 = vmatprep.subr.mxu1 %v5628_v50  ;;  %5651 = vpow2.f32 %v3495_v16  ;;  %v12431_v48 = vsub.f32 %v10334_v9, %v10459_v14 }
 0x38a   : > { %v10735_v60 = vpop.eup %5633  ;;  %v3523_v21 = vmul.f32 1.442695, %v12430_v25  ;;  %5069 = vmatpush3.msra.mxu1 %v10579_v22  ;;  %5653 = vpow2.f32 %v3497_v28  ;;  %v4559_v2 = vmul.f32 1.442695, %v4551_v11  ;;  %v4563_v55 = vmul.f32 1.442695, %v4553_v19 }
 0x38b   : > { %v3871_v23 = vadd.f32 %v10646_v5, %v3870_v39  ;;  %v3525_v34 = vmul.f32 1.442695, %v12431_v48  ;;  %v3819_v31 = vadd.f32 %v10735_v60, %v3818_v57  ;;  %5070 = vmatprep.subr.mxu1 %v5632_v20  ;;  %v10747_v0 = vpop.eup %5635  ;;  %5655 = vpow2.f32 %v3499_v47 }
 0x38c   : > { %5071 = vmatpush3.msra.mxu1 %v10571_v29  ;;  %v10752_v39 = vpop.eup %5637  ;;  %5657 = vpow2.f32 %v3523_v21  ;;  %v4565_v9 = vmul.f32 1.442695, %v4554_v44  ;;  %v12432_v45 = vsub.f32 %v10313_v13, %v10459_v14  ;;  %vm4543_vm1 = vcmp.gt.f32.partialorder %v10710_v51, 0.0 }
 0x38d   : > { %v3872_v17 = vadd.f32 %v10651_v10, %v3871_v23  ;;  %v3820_v22 = vadd.f32 %v10747_v0, %v3819_v31  ;;  %5072 = vmatprep.subr.mxu1 %v10651_v10  ;;  %5659 = vpow2.f32 %v3525_v34  ;;  %v10760_v47 = vpop.eup %5639  ;;  %v12433_v10 = vsub.f32 %v12393_v8, %v10459_v14  ;;  %v12441_v34 = vld [vmem:[#allocation61_spill] sm:$0xff] }
 0x38e   : > { %5073 = vmatpush3.msra.mxu1 %v10566_v24  ;;  %v3521_v28 = vmul.f32 1.442695, %v12432_v45  ;;  %5661 = vpow2.f32 %v4559_v2  ;;  %v12435_v23 = vsub.f32 %v12394_v26, %v10459_v14  ;;  %v12437_v26 = vsub.f32 %v12395_v35, %v10459_v14  ;;  %v12443_v2 = vld [vmem:[#allocation39_spill] sm:$0xff] }
 0x38f   : > { %v3873_v53 = vadd.f32 %v5632_v20, %v3872_v17  ;;  %v3821_v29 = vadd.f32 %v10752_v39, %v3820_v22  ;;  %5074 = vmatprep.subr.mxu1 %v10646_v5  ;;  %v3501_v11 = vmul.f32 1.442695, %v12433_v10  ;;  %5663 = vpow2.f32 %v4563_v55  ;;  %v10771_v5 = vpop.eup %5641 }
 0x390   : > { %5075 = vmatpush3.msra.mxu1 %v10553_v30  ;;  %v3503_v8 = vmul.f32 1.442695, %v12435_v23  ;;  %5665 = vpow2.f32 %v4565_v9  ;;  %v3505_v19 = vmul.f32 1.442695, %v12437_v26  ;;  %v12439_v35 = vsub.f32 %v12396_v49, %v10459_v14  ;;  %v12446_v9 = vld [vmem:[#allocation75_spill] sm:$0xff] }
 0x391   : > { %v3874_v16 = vadd.f32 %v5628_v50, %v3873_v53  ;;  %v12434_v50 = vsub.f32 %v10302_v15, %v10459_v14  ;;  %v3822_v20 = vadd.f32 %v10760_v47, %v3821_v29  ;;  %5076 = vmatprep.subr.mxu1 %v10641_v46  ;;  %v12436_v15 = vsub.f32 %v10261_v6, %v10459_v14  ;;  %v10783_v46 = vpop.eup %5643  ;;  %v12444_v53 = vld [vmem:[#allocation55_spill] sm:$0xff] }
 0x392   : > { %5077 = vmatpush3.msra.mxu1 %v10544_v52  ;;  %5667 = vpow2.f32 %v3521_v28  ;;  %v12438_v6 = vsub.f32 %v12400_v36, %v10459_v14  ;;  %v3507_v44 = vmul.f32 1.442695, %v12439_v35  ;;  %v12440_v36 = vsub.f32 %v10236_v7, %v10459_v14  ;;  %v12447_v29 = vld [vmem:[#allocation59_spill] sm:$0xff] }
 0x393   : > { %v3875_v24 = vadd.f32 %v5624_v61, %v3874_v16  ;;  %v3519_v13 = vmul.f32 1.442695, %v12434_v50  ;;  %v3517_v61 = vmul.f32 1.442695, %v12436_v15  ;;  %v3823_v57 = vadd.f32 %v10771_v5, %v3822_v20  ;;  %5078 = vmatprep.subr.mxu1 %v10636_v3  ;;  %v5646_v52 = vpop.eup %5645  ;;  %v3901_v16 = vld [vmem:[#allocation2 + $0x70] sm:$0xff] }
 0x394   : > { %5669 = vpow2.f32 %v3501_v11  ;;  %5079 = vmatpush3.msra.mxu1 %v10536_v4  ;;  %v3515_v25 = vmul.f32 1.442695, %v12438_v6  ;;  %v5648_v3 = vpop.eup %5647  ;;  %v3513_v17 = vmul.f32 1.442695, %v12440_v36  ;;  %v12442_v49 = vsub.f32 %v12441_v34, %v10459_v14 }
 0x395   : > { %v3876_v30 = vadd.f32 %v10692_v18, %v3875_v24  ;;  %5671 = vpow2.f32 %v3519_v13  ;;  %v3824_v21 = vadd.f32 %v10783_v46, %v3823_v57  ;;  %5080 = vmatprep.subr.mxu1 %v10631_v40  ;;  %v5650_v4 = vpop.eup %5649  ;;  %v12445_v7 = vsub.f32 %v12444_v53, %v10459_v14 }
 0x396   : > { %5673 = vpow2.f32 %v3503_v8  ;;  %5081 = vmatpush3.msra.mxu1 %v10523_v42  ;;  %v10804_v40 = vpop.eup %5651  ;;  %v3509_v31 = vmul.f32 1.442695, %v12442_v49  ;;  %vm4545_vm2 = vcmp.gt.f32.partialorder %v10716_v12, 0.0  ;;  %vm4546_vm3 = vcmp.gt.f32.partialorder %v10724_v43, 0.0  ;;  %v12450_v49 = vld [vmem:[#allocation53_spill] sm:$0xff] }
 0x397   : > { %v3877_v18 = vadd.f32 %v10677_v27, %v3876_v30  ;;  %5675 = vpow2.f32 %v3517_v61  ;;  %v3825_v48 = vadd.f32 %v5646_v52, %v3824_v21  ;;  %5082 = vmatprep.subr.mxu1 %v10626_v37  ;;  %v10810_v42 = vpop.eup %5653  ;;  %v3511_v22 = vmul.f32 1.442695, %v12445_v7 }
 0x398   : > { %5677 = vpow2.f32 %v3505_v19  ;;  %5083 = vmatpush3.msra.mxu1 %v12443_v2  ;;  %v10817_v37 = vpop.eup %5655 }
 0x399   : > { %v3878_v27 = vadd.f32 %v10665_v32, %v3877_v18  ;;  %5679 = vpow2.f32 %v3515_v25  ;;  %v3826_v55 = vadd.f32 %v5648_v3, %v3825_v48  ;;  %5084 = vmatprep.subr.mxu1 %v10621_v1  ;;  %v10820_v45 = vpop.eup %5657 }
 0x39a   : > { %5681 = vpow2.f32 %v3507_v44  ;;  %5085 = vmatpush3.msra.mxu1 %v12446_v9  ;;  %v10826_v14 = vpop.eup %5659 }
 0x39b   : > { %v3879_v32 = vadd.f32 %v10655_v33, %v3878_v27  ;;  %5683 = vpow2.f32 %v3513_v17  ;;  %v3827_v33 = vadd.f32 %v5650_v4, %v3826_v55  ;;  %5086 = vmatprep.subr.mxu1 %v10613_v58  ;;  %v5662_v1 = vpop.eup %5661  ;;  %5021 = vmatprep.subr.mxu0 %v10826_v14 }
 0x39c   : > { %5685 = vpow2.f32 %v3509_v31  ;;  %5087 = vmatpush3.msra.mxu1 %v12447_v29  ;;  %v5664_v11 = vpop.eup %5663  ;;  %5022 = vmatpush3.msra.mxu0 %v5650_v4  ;;  %v3770_v31 = vrot.slane %v12450_v49, 4 }
 0x39d   : > { %v10823_v28 = vadd.f32 %v10657_v56, %v3879_v32  ;;  %5687 = vpow2.f32 %v3511_v22  ;;  %v3828_v10 = vadd.f32 %v10804_v40, %v3827_v33  ;;  %4479 = vmatmul.mubr.f32.vlgmr.msra.gmra.mxu1 %v3901_v16  ;;  %v4720_v56 = vadd.f32 -1.0, %v5662_v1  ;;  %v5666_v24 = vpop.eup %5665  ;;  %5023 = vmatprep.subr.mxu0 %v10820_v45 }
 0x39e   : > { %v4722_v58 = vadd.f32 -1.0, %v5664_v11  ;;  %5024 = vmatpush3.msra.mxu0 %v5648_v3  ;;  %v4723_v23 = vadd.f32 -1.0, %v5666_v24 }
 0x39f   : > { %v3829_v50 = vadd.f32 %v10810_v42, %v3828_v10  ;;  %v5668_v13 = vpop.eup %5667  ;;  %v4583_v20 = vsel %vm4543_vm1, %v10710_v51, %v4720_v56 }
 0x3a0   : > { %4591 = vst [vmem:[%s10618_s12] sm:$0xff] %v4583_v20  ;;  %5025 = vmatprep.subr.mxu0 %v5668_v13  ;;  %v4585_v15 = vsel %vm4545_vm2, %v10716_v12, %v4722_v58  ;;  %v4586_v57 = vsel %vm4546_vm3, %v10724_v43, %v4723_v23 }
 0x3a1   : > { %v5670_v8 = vpop.eup %5669  ;;  %v3830_v30 = vadd.f32 %v10817_v37, %v3829_v50  ;;  %5026 = vmatpush3.msra.mxu0 %v5646_v52  ;;  %4593 = vst [vmem:[%s10618_s12 + $0x10] sm:$0xff] %v4585_v15  ;;  %4594 = vst [vmem:[%s10618_s12 + $0x18] sm:$0xff] %v4586_v57 }
 0x3a2   : > { %v5672_v61 = vpop.eup %5671 }
 0x3a3   : > { %v5674_v51 = vpop.eup %5673  ;;  %v3831_v26 = vadd.f32 %v5670_v8, %v3830_v30  ;;  %5027 = vmatprep.subr.mxu0 %v5672_v61 }
 0x3a4   : > { %v5676_v19 = vpop.eup %5675  ;;  %5028 = vmatpush3.msra.mxu0 %v10783_v46 }
 0x3a5   : > { %v5678_v18 = vpop.eup %5677  ;;  %v3832_v6 = vadd.f32 %v5674_v51, %v3831_v26  ;;  %5029 = vmatprep.subr.mxu0 %v5676_v19 }
 0x3a6   : > { %v5680_v25 = vpop.eup %5679  ;;  %5030 = vmatpush3.msra.mxu0 %v10771_v5 }
 0x3a7   : > { %v5682_v12 = vpop.eup %5681  ;;  %v3833_v21 = vadd.f32 %v5678_v18, %v3832_v6  ;;  %5031 = vmatprep.subr.mxu0 %v5680_v25 }
 0x3a8   : > { %v5684_v52 = vpop.eup %5683  ;;  %5032 = vmatpush3.msra.mxu0 %v10760_v47 }
 0x3a9   : > { %v5686_v43 = vpop.eup %5685  ;;  %v3834_v3 = vadd.f32 %v5682_v12, %v3833_v21  ;;  %5033 = vmatprep.subr.mxu0 %v5684_v52 }
 0x3aa   : > { %v5688_v35 = vpop.eup %5687  ;;  %5034 = vmatpush3.msra.mxu0 %v10752_v39 }
 0x3ab   : > { %v3835_v44 = vadd.f32 %v5686_v43, %v3834_v3  ;;  %5035 = vmatprep.subr.mxu0 %v5688_v35 }
 0x3ac   : > { %5036 = vmatpush3.msra.mxu0 %v10747_v0 }
 0x3ad   : > { %v3836_v46 = vadd.f32 %v5688_v35, %v3835_v44  ;;  %5037 = vmatprep.subr.mxu0 %v5686_v43 }
 0x3ae   : > { %5038 = vmatpush3.msra.mxu0 %v10735_v60 }
 0x3af   : > { %v3837_v5 = vadd.f32 %v5684_v52, %v3836_v46  ;;  %5039 = vmatprep.subr.mxu0 %v5682_v12 }
 0x3b0   : > { %5040 = vmatpush3.msra.mxu0 %v10728_v62 }
 0x3b1   : > { %v3838_v4 = vadd.f32 %v5680_v25, %v3837_v5  ;;  %5041 = vmatprep.subr.mxu0 %v5678_v18 }
 0x3b2   : > { %5042 = vmatpush3.msra.mxu0 %v10718_v54  ;;  %v3899_v54 = vld [vmem:[#allocation2 + $0x60] sm:$0xff] }
 0x3b3   : > { %v3839_v47 = vadd.f32 %v5676_v19, %v3838_v4  ;;  %5043 = vmatprep.subr.mxu0 %v5674_v51 }
 0x3b4   : > { %5044 = vmatpush3.msra.mxu0 %v10700_v38  ;;  %v12448_v38 = vld [vmem:[#allocation92_spill] sm:$0xff] }
 0x3b5   : > { %v3840_v39 = vadd.f32 %v5672_v61, %v3839_v47  ;;  %5045 = vmatprep.subr.mxu0 %v5670_v8  ;;  %v3881_v61 = vrot.slane %v10823_v28, 4 }
 0x3b6   : > { %5046 = vmatpush3.msra.mxu0 %v10683_v59  ;;  %v12449_v59 = vld [vmem:[#allocation138_spill] sm:$0xff]  ;;  %v4518_v50 = vpop.permute.xlu1 %4517 }
 0x3b7   : > { %v3841_v0 = vadd.f32 %v5668_v13, %v3840_v39  ;;  %5047 = vmatprep.subr.mxu0 %v10817_v37  ;;  %v3807_v27 = vrot.slane %v12449_v59, 4  ;;  %v3882_v57 = vadd.f32 %v3881_v61, %v10823_v28 }
 0x3b8   : > { %5048 = vmatpush3.msra.mxu0 %v10671_v63 }
 0x3b9   : > { %v3842_v60 = vadd.f32 %v10820_v45, %v3841_v0  ;;  %5049 = vmatprep.subr.mxu0 %v10810_v42  ;;  %v3808_v36 = vadd.f32 %v3807_v27, %v12449_v59  ;;  %v3771_v42 = vadd.f32 %v3770_v31, %v12450_v49  ;;  %v3883_v51 = vrot.slane %v3882_v57, 2 }
 0x3ba   : > { %5050 = vmatpush3.msra.mxu0 %v10663_v41 }
 0x3bb   : > { %v3843_v62 = vadd.f32 %v10826_v14, %v3842_v60  ;;  %5051 = vmatprep.subr.mxu0 %v10804_v40  ;;  %v3809_v17 = vrot.slane %v3808_v36, 2  ;;  %v4523_v53 = vpop.permute.xlu0 %4522  ;;  %v3772_v22 = vrot.slane %v3771_v42, 2  ;;  %v3884_v26 = vadd.f32 %v3883_v51, %v3882_v57 }
 0x3bc   : > { %5052 = vmatpush3.msra.mxu0 %v12448_v38 }
 0x3bd   : > { %4406 = vmatmul.mubr.f32.vlgmr.msra.gmra.mxu0 %v3899_v54  ;;  %v3810_v63 = vadd.f32 %v3809_v17, %v3808_v36  ;;  %v3773_v9 = vadd.f32 %v3772_v22, %v3771_v42  ;;  %v3885_v19 = vrot.slane %v3884_v26, 1  ;;  %v3844_v6 = vrot.slane %v3843_v62, 4  ;;  %v4528_v17 = vpop.permute.xlu1 %4527 }
 0x3bf   : > { %v3811_v48 = vrot.slane %v3810_v63, 1  ;;  %v3774_v45 = vrot.slane %v3773_v9, 1  ;;  %v3886_v18 = vadd.f32 %v3885_v19, %v3884_v26  ;;  %v3845_v21 = vadd.f32 %v3844_v6, %v3843_v62  ;;  %v4533_v35 = vpop.permute.xlu0 %4532 }
 0x3c1   : > { %v3812_v34 = vadd.f32 %v3811_v48, %v3810_v63  ;;  %v3775_v33 = vadd.f32 %v3774_v45, %v3773_v9  ;;  %v3846_v44 = vrot.slane %v3845_v21, 2 }
 0x3c3   : > { %5689 = vrcp.f32 %v3812_v34  ;;  %v3847_v4 = vadd.f32 %v3846_v44, %v3845_v21 }
 0x3c5   : > { %v3848_v28 = vrot.slane %v3847_v4, 1 }
 0x3c7   : > { %v3849_v39 = vadd.f32 %v3848_v28, %v3847_v4 }
 0x3d0   : > { %v5690_v40 = vpop.eup %5689 }
 0x3f4   : > { %v5018_v41 = vpop.f32.mrf.mxu1 }
 0x3f6   : > { %v5019_v2 = vpop.f32.mrf.mxu1 }
 0x3f7   : > { %v5020_v32 = vadd.f32 %v5019_v2, %v5018_v41 }
 0x3f9   : > { %v4340_v7 = vmul.f32 %v5690_v40, %v5020_v32 }
 0x3fb   : > { %v4540_v55 = vadd.f32 %v4523_v53, %v4340_v7 }
 0x3fd   : > { %v4556_v37 = vmin.f32 %v4540_v55, 0.0  ;;  %vm4548_vm4 = vcmp.gt.f32.partialorder %v4540_v55, 0.0 }
 0x3ff   : > { %v4569_v16 = vmul.f32 1.442695, %v4556_v37 }
 0x401   : > { %5691 = vpow2.f32 %v4569_v16 }
 0x402   : > { %5693 = vrcp.f32 %v3775_v33 }
 0x40e   : > { %v5692_v14 = vpop.eup %5691 }
 0x40f   : > { %v4725_v29 = vadd.f32 -1.0, %v5692_v14  ;;  %v5694_v24 = vpop.eup %5693 }
 0x411   : > { %v4588_v1 = vsel %vm4548_vm4, %v4540_v55, %v4725_v29 }
 0x412   : > { %4596 = vst [vmem:[%s10618_s12 + $0x28] sm:$0xff] %v4588_v1  ;;  %v4983_v10 = vpop.f32.mrf.mxu0 }
 0x414   : > { %v4984_v11 = vpop.f32.mrf.mxu0 }
 0x415   : > { %v4985_v56 = vadd.f32 %v4984_v11, %v4983_v10 }
 0x417   : > { %v4267_v58 = vmul.f32 %v5694_v24, %v4985_v56 }
 0x419   : > { %v4539_v13 = vadd.f32 %v4518_v50, %v4267_v58 }
 0x41b   : > { %v4555_v20 = vmin.f32 %v4539_v13, 0.0  ;;  %vm4547_vm5 = vcmp.gt.f32.partialorder %v4539_v13, 0.0 }
 0x41d   : > { %v4567_v23 = vmul.f32 1.442695, %v4555_v20 }
 0x41f   : > { %5695 = vpow2.f32 %v4567_v23 }
 0x420   : > { %5697 = vrcp.f32 %v3886_v18 }
 0x42c   : > { %v5696_v8 = vpop.eup %5695 }
 0x42d   : > { %v4724_v30 = vadd.f32 -1.0, %v5696_v8  ;;  %v5698_v43 = vpop.eup %5697 }
 0x42f   : > { %v4587_v15 = vsel %vm4547_vm5, %v4539_v13, %v4724_v30 }
 0x430   : > { %4595 = vst [vmem:[%s10618_s12 + $0x20] sm:$0xff] %v4587_v15 }
 0x45d   : > { %v5088_v25 = vpop.f32.mrf.mxu1 }
 0x45f   : > { %v5089_v12 = vpop.f32.mrf.mxu1 }
 0x460   : > { %v5090_v52 = vadd.f32 %v5089_v12, %v5088_v25 }
 0x462   : > { %v4486_v3 = vmul.f32 %v5698_v43, %v5090_v52 }
 0x464   : > { %v4542_v46 = vadd.f32 %v4533_v35, %v4486_v3 }
 0x466   : > { %v4558_v5 = vmin.f32 %v4542_v46, 0.0  ;;  %vm4550_vm6 = vcmp.gt.f32.partialorder %v4542_v46, 0.0 }
 0x468   : > { %v4573_v47 = vmul.f32 1.442695, %v4558_v5 }
 0x46a   : > { %5699 = vpow2.f32 %v4573_v47 }
 0x46b   : > { %5701 = vrcp.f32 %v3849_v39 }
 0x477   : > { %v5700_v0 = vpop.eup %5699 }
 0x478   : > { %v4727_v60 = vadd.f32 -1.0, %v5700_v0  ;;  %v5702_v27 = vpop.eup %5701 }
 0x47a   : > { %v4590_v54 = vsel %vm4550_vm6, %v4542_v46, %v4727_v60 }
 0x47b   : > { %4598 = vst [vmem:[%s10618_s12 + $0x38] sm:$0xff] %v4590_v54 }
 0x47d   : > { %v5053_v62 = vpop.f32.mrf.mxu0 }
 0x47f   : > { %v5054_v38 = vpop.f32.mrf.mxu0 }
 0x480   : > { %v5055_v59 = vadd.f32 %v5054_v38, %v5053_v62 }
 0x482   : > { %v4413_v36 = vmul.f32 %v5702_v27, %v5055_v59 }
 0x484   : > { %v4541_v63 = vadd.f32 %v4528_v17, %v4413_v36 }
 0x486   : > { %v4557_v48 = vmin.f32 %v4541_v63, 0.0  ;;  %vm4549_vm7 = vcmp.gt.f32.partialorder %v4541_v63, 0.0 }
 0x488   : > { %v4571_v34 = vmul.f32 1.442695, %v4557_v48 }
 0x48a   : > { %5703 = vpow2.f32 %v4571_v34 }
 0x497   : > { %v5704_v49 = vpop.eup %5703 }
 0x498   : > { %v4726_v31 = vadd.f32 -1.0, %v5704_v49 }
 0x49a   : > { %v4589_v41 = vsel %vm4549_vm7, %v4541_v63, %v4726_v31 }
 0x49b   : > { %4597 = vst [vmem:[%s10618_s12 + $0x30] sm:$0xff] %v4589_v41 }
 0x49c   : > { %5775 = shalt.err (!%p5772_p5)
}
 0x49d   : > { %s5776_s25 = scalar_lea.hbm %s10877_s8, 1024  ;;  %s5780_s7 = scalar_lea.hbm %s10926_s5, 2048 }
 0x49e   : > { %p5777_p11 = scmp.ne.s32.totalorder %s10877_s8, %s5776_s25  ;;  %p5781_p13 = scmp.lt.s32.totalorder %s10877_s8, %s10926_s5 }
 0x49f   : > { %p5782_p4 = scmp.lt.s32.totalorder %s5780_s7, %s5776_s25 }
 0x4a0   : > { %p5778_p6 = pnand %p5777_p11, %p12451_p2 }
 0x4a1   : > { %p5783_p0 = por %p5782_p4, %p5781_p13 }
 0x4a2   : > { %p5779_p12 = pneg %p5778_p6 }
 0x4a4   : > { %p5784_p1 = pnand %p5783_p0, %p5779_p12 }
 0x4a6   : > { %5787 = shalt.err (!%p5784_p1)
}
 0x4a7   : > { %s5842_s28 = smov 128   ;;  %s5843_s29 = smov 256  }
 0x4a8   : > { %s5844_s23 = smov 8  }
 0x4a9   : > { %5097 = dma.vmem_to_hbm [thread:$0]  (%p12451_p2), %s10872_s15, 1024, %s10877_s8, %s4600_s10, %s5842_s28, %s5843_s29, %s5844_s23  }
 0x4aa PF: > { %s4627_s9 = sand.u32 1, %s5818_s18   ;;  %p12452_p3 = scmp.ne.s32.totalorder %s11431_s6, 0 }
 0x4ab   : > { %p12453_p7 = scmp.ge.s32.totalorder %s5830_s21, 2  ;;  %s4628_s22 = scalar_lea.sflag [#allocation4], %s4627_s9 }
 0x4ad   : > { %p5108_p8 = pnand %p12453_p7, %p12452_p3 }
 0x4af   : > { %p5109_p9 = pneg %p5108_p8 }
 0x4b1   : > { %5813 = dma.done.wait (%p5109_p9), %s4628_s22, 1024  }
 0x4b2   : > { %5815 = vsyncadd (%p5109_p9), %s4628_s22, 4294966272  ;;  %p19_p10 = scmp.ge.s32.totalorder %s5900_s24, 4   ;;  %s12454_s18 = smov %s5822_s19 }
 0x4b3   : > { %s12455_s19 = smov %s5826_s20  ;;  %s12456_s20 = smov %s5912_s27 }
 0x4b4   : > { %s12457_s21 = smov %s5900_s24  ;;  %21 = sbr.rel (!%p19_p10) target bundleno = 6 (0x6), region = 93 }
 0x4b9   :  { %4633 = vsyncpa [#allocation3], 1 }
 0x4ba   :  { %4635 = vsyncpa [#allocation3 + $0x1], 1 }
 0x4bb   :  { %4636 = vsyncpa [#allocation6], 1 }
 0x4bc   :  { %4638 = vsyncpa [#allocation6 + $0x1], 1 }
 0x4bd   :  { %4639 = vsyncpa [#allocation4], 1 }
 0x4be   :  { %4641 = vsyncpa [#allocation4 + $0x1], 1 }

</bundles_post_ra>
